<compile_context>
chip_gen: v7x
topology: tpu7x:2x2x1
jax: 0.10.0
libtpu: 0.0.40
codegen_flags: <defaults>
</compile_context>

<pallas_src>
import jax
import jax.numpy as jnp
from jax import lax
from jax.experimental import pallas as pl
from jax.experimental.pallas import tpu as pltpu

INPUT_SIZE = 784
HIDDEN_SIZE = 256
NUM_CLASSES = 10
DNI_HIDDEN_SIZE = 1024
CONDITIONED_DNI = False        # as in the reference script
BN_EPS = 1e-5

QUANTIZE_WEIGHTS = True        # int8 storage + per-column f32 scale (MXU stays bf16)

_VMEM = pl.BlockSpec(memory_space=pltpu.MemorySpace.VMEM)
_VMEM_LIMIT = 32 * 1024 * 1024


# ---------------------------------------------------------------------------
# In-kernel helpers
# ---------------------------------------------------------------------------
def _linear(x_bf16, w_ref, sb_ref):
    """x @ dequant(w) + b.  w_ref: (in,out) int8 (or bf16), sb_ref: (2,out) f32
    with row0 = per-column scale, row1 = bias.  MXU runs bf16, f32 accumulate."""
    acc = jnp.dot(x_bf16, w_ref[...].astype(jnp.bfloat16),
                  preferred_element_type=jnp.float32)
    return acc * sb_ref[0:1, :] + sb_ref[1:2, :]


def _bn_relu(z, bn_ref):
    """Train-mode BatchNorm1d (biased batch variance) + ReLU, single pass.
    bn_ref: (2,H) f32 with row0 = gamma, row1 = beta."""
    mean = jnp.mean(z, axis=0, keepdims=True)
    var = jnp.mean(z * z, axis=0, keepdims=True) - mean * mean
    var = jnp.maximum(var, 0.0)                      # guard one-pass cancellation
    scale = bn_ref[0:1, :] * lax.rsqrt(var + BN_EPS)
    shift = bn_ref[1:2, :] - mean * scale
    return jnp.maximum(z * scale + shift, 0.0)


def _dni(h_f32, w1, sb1, bn1, w2, sb2, bn2, w3, sb3):
    """dni_linear forward: Linear->BN->ReLU, Linear->BN->ReLU, Linear."""
    h = h_f32.astype(jnp.bfloat16)
    h1 = _bn_relu(_linear(h, w1, sb1), bn1).astype(jnp.bfloat16)
    h2 = _bn_relu(_linear(h1, w2, sb2), bn2).astype(jnp.bfloat16)
    return _linear(h2, w3, sb3)


# ---------------------------------------------------------------------------
# Kernels
# ---------------------------------------------------------------------------
def _mlp_kernel(x_ref, fc1_w, fc1_sb, fc2_w, fc2_sb, fc1_o, fc2_o):
    x = x_ref[...].astype(jnp.bfloat16)
    fc1 = _linear(x, fc1_w, fc1_sb)                          # (B, 256) f32, pre-ReLU
    fc1_o[...] = fc1
    relu1 = jnp.maximum(fc1, 0.0).astype(jnp.bfloat16)
    fc2_o[...] = _linear(relu1, fc2_w, fc2_sb)               # (B, 10) f32


def _net_train_kernel(x_ref, fc1_w, fc1_sb, fc2_w, fc2_sb,
                      d1_w1, d1_sb1, d1_bn1, d1_w2, d1_sb2, d1_bn2, d1_w3, d1_sb3,
                      d2_w1, d2_sb1, d2_bn1, d2_w2, d2_sb2, d2_bn2, d2_w3, d2_sb3,
                      fc1_o, fc2_o, g1_o, g2_o):
    """Fully fused forward: fc1, fc2, grad_fc1 = dni1(fc1), grad_fc2 = dni2(fc2)."""
    x = x_ref[...].astype(jnp.bfloat16)
    fc1 = _linear(x, fc1_w, fc1_sb)                          # (B, 256) f32, pre-ReLU
    fc1_o[...] = fc1
    relu1 = jnp.maximum(fc1, 0.0).astype(jnp.bfloat16)
    fc2 = _linear(relu1, fc2_w, fc2_sb)                      # (B, 10) f32
    fc2_o[...] = fc2
    # conditioned_DNI is False: y is never concatenated into the DNI inputs.
    g1_o[...] = _dni(fc1, d1_w1, d1_sb1, d1_bn1, d1_w2, d1_sb2, d1_bn2, d1_w3, d1_sb3)
    g2_o[...] = _dni(fc2, d2_w1, d2_sb1, d2_bn1, d2_w2, d2_sb2, d2_bn2, d2_w3, d2_sb3)


# ---------------------------------------------------------------------------
# Parameter construction (deterministic, PyTorch-style uniform init)
# ---------------------------------------------------------------------------
def _linear_params(key, in_f, out_f):
    """nn.Linear default init, pre-transposed to (in_f, out_f).  Returns
    (weight storage [int8 or bf16], (2,out_f) f32 [scale; bias])."""
    kw, kb = jax.random.split(key)
    bound = 1.0 / float(in_f) ** 0.5
    w = jax.random.uniform(kw, (in_f, out_f), jnp.float32, -bound, bound)
    b = jax.random.uniform(kb, (out_f,), jnp.float32, -bound, bound)
    if QUANTIZE_WEIGHTS:
        scale = jnp.maximum(jnp.max(jnp.abs(w), axis=0), 1e-12) / 127.0
        w_store = jnp.clip(jnp.round(w / scale), -127.0, 127.0).astype(jnp.int8)
    else:
        scale = jnp.ones((out_f,), jnp.float32)
        w_store = w.astype(jnp.bfloat16)
    return w_store, jnp.stack([scale, b])


def _bn_params():
    return jnp.stack([jnp.ones((DNI_HIDDEN_SIZE,), jnp.float32),
                      jnp.zeros((DNI_HIDDEN_SIZE,), jnp.float32)])


def _init_dni(key, dims):
    # conditioned_DNI = False -> dni_input_dims == dims
    k1, k2, k3 = jax.random.split(key, 3)
    w1, sb1 = _linear_params(k1, dims, DNI_HIDDEN_SIZE)
    w2, sb2 = _linear_params(k2, DNI_HIDDEN_SIZE, DNI_HIDDEN_SIZE)
    w3, sb3 = _linear_params(k3, DNI_HIDDEN_SIZE, dims)
    return dict(w1=w1, sb1=sb1, bn1=_bn_params(),
                w2=w2, sb2=sb2, bn2=_bn_params(),
                w3=w3, sb3=sb3)


def init_net_params(key):
    k_fc1, k_fc2, k_d1, k_d2 = jax.random.split(key, 4)
    fc1_w, fc1_sb = _linear_params(k_fc1, INPUT_SIZE, HIDDEN_SIZE)
    fc2_w, fc2_sb = _linear_params(k_fc2, HIDDEN_SIZE, NUM_CLASSES)
    return dict(fc1_w=fc1_w, fc1_sb=fc1_sb, fc2_w=fc2_w, fc2_sb=fc2_sb,
                d1=_init_dni(k_d1, HIDDEN_SIZE),
                d2=_init_dni(k_d2, NUM_CLASSES))


# ---------------------------------------------------------------------------
# Pallas wrappers (forward pass, matches Net.forward semantics)
# ---------------------------------------------------------------------------
def _nbytes(*arrays):
    return int(sum(a.size * a.dtype.itemsize for a in arrays))


def _dni_args(d):
    return (d["w1"], d["sb1"], d["bn1"], d["w2"], d["sb2"], d["bn2"], d["w3"], d["sb3"])


def net_forward(params, x, y=None):
    """y is None  -> (fc1, fc2)               [MLP-only kernel]
       y not None -> (fc1, fc2, grad_fc1, grad_fc2) [single fused kernel]."""
    B = x.shape[0]
    H, C, D = HIDDEN_SIZE, NUM_CLASSES, DNI_HIDDEN_SIZE

    if y is None:
        args = (x, params["fc1_w"], params["fc1_sb"], params["fc2_w"], params["fc2_sb"])
        flops = 2 * B * (INPUT_SIZE * H + H * C)
        return pl.pallas_call(
            _mlp_kernel,
            out_shape=(jax.ShapeDtypeStruct((B, H), jnp.float32),
                       jax.ShapeDtypeStruct((B, C), jnp.float32)),
            in_specs=[_VMEM] * len(args),
            out_specs=(_VMEM, _VMEM),
            compiler_params=pltpu.CompilerParams(vmem_limit_bytes=_VMEM_LIMIT),
            cost_estimate=pl.CostEstimate(
                flops=flops, transcendentals=0,
                bytes_accessed=_nbytes(*args) + 4 * B * (H + C)),
        )(*args)

    args = (x, params["fc1_w"], params["fc1_sb"], params["fc2_w"], params["fc2_sb"],
            *_dni_args(params["d1"]), *_dni_args(params["d2"]))
    flops = 2 * B * (INPUT_SIZE * H + H * C
                     + H * D + D * D + D * H        # dni1
                     + C * D + D * D + D * C)       # dni2
    return pl.pallas_call(
        _net_train_kernel,
        out_shape=(jax.ShapeDtypeStruct((B, H), jnp.float32),
                   jax.ShapeDtypeStruct((B, C), jnp.float32),
                   jax.ShapeDtypeStruct((B, H), jnp.float32),
                   jax.ShapeDtypeStruct((B, C), jnp.float32)),
        in_specs=[_VMEM] * len(args),
        out_specs=(_VMEM,) * 4,
        compiler_params=pltpu.CompilerParams(vmem_limit_bytes=_VMEM_LIMIT),
        cost_estimate=pl.CostEstimate(
            flops=flops, transcendentals=4 * D,
            bytes_accessed=_nbytes(*args) + 4 * B * 2 * (H + C)),
    )(*args)


# ---------------------------------------------------------------------------
if __name__ == "__main__":
    key = jax.random.PRNGKey(0)
    k_param, k_x, k_y = jax.random.split(key, 3)

    params = init_net_params(k_param)

    batch = 16   # multiple of 16: fills bf16 sublane packing for the MXU casts
    x = jax.random.normal(k_x, (batch, INPUT_SIZE), jnp.float32)
    y = jax.random.randint(k_y, (batch,), 0, NUM_CLASSES, jnp.int32)

    # Training path (y given): one fused kernel producing all four outputs.
    fc1, fc2, grad_fc1, grad_fc2 = jax.block_until_ready(
        jax.jit(net_forward)(params, x, y))

    assert fc1.shape == (batch, HIDDEN_SIZE)
    assert fc2.shape == (batch, NUM_CLASSES)
    assert grad_fc1.shape == (batch, HIDDEN_SIZE)
    assert grad_fc2.shape == (batch, NUM_CLASSES)
    for a in (fc1, fc2, grad_fc1, grad_fc2):
        assert bool(jnp.all(jnp.isfinite(a)))

    # Inference path (y=None): MLP-only kernel.
    f1, f2 = jax.block_until_ready(net_forward(params, x))
    assert f1.shape == (batch, HIDDEN_SIZE) and f2.shape == (batch, NUM_CLASSES)

    print("KERNEL_OK")
</pallas_src>

<mosaic_0001>
module attributes {stable_mosaic.version = 11 : i64} {
  func.func @_net_train_kernel(%arg0: memref<16x784xf32, #tpu.memory_space<vmem>>, %arg1: memref<784x256xi8, #tpu.memory_space<vmem>>, %arg2: memref<2x256xf32, #tpu.memory_space<vmem>>, %arg3: memref<256x10xi8, #tpu.memory_space<vmem>>, %arg4: memref<2x10xf32, #tpu.memory_space<vmem>>, %arg5: memref<256x1024xi8, #tpu.memory_space<vmem>>, %arg6: memref<2x1024xf32, #tpu.memory_space<vmem>>, %arg7: memref<2x1024xf32, #tpu.memory_space<vmem>>, %arg8: memref<1024x1024xi8, #tpu.memory_space<vmem>>, %arg9: memref<2x1024xf32, #tpu.memory_space<vmem>>, %arg10: memref<2x1024xf32, #tpu.memory_space<vmem>>, %arg11: memref<1024x256xi8, #tpu.memory_space<vmem>>, %arg12: memref<2x256xf32, #tpu.memory_space<vmem>>, %arg13: memref<10x1024xi8, #tpu.memory_space<vmem>>, %arg14: memref<2x1024xf32, #tpu.memory_space<vmem>>, %arg15: memref<2x1024xf32, #tpu.memory_space<vmem>>, %arg16: memref<1024x1024xi8, #tpu.memory_space<vmem>>, %arg17: memref<2x1024xf32, #tpu.memory_space<vmem>>, %arg18: memref<2x1024xf32, #tpu.memory_space<vmem>>, %arg19: memref<1024x10xi8, #tpu.memory_space<vmem>>, %arg20: memref<2x10xf32, #tpu.memory_space<vmem>>, %arg21: memref<16x256xf32, #tpu.memory_space<vmem>>, %arg22: memref<16x10xf32, #tpu.memory_space<vmem>>, %arg23: memref<16x256xf32, #tpu.memory_space<vmem>>, %arg24: memref<16x10xf32, #tpu.memory_space<vmem>>) attributes {dimension_semantics = [], scalar_prefetch = 0 : i64, scratch_operands = 0 : i64, tpu.core_type = #tpu.core_type<tc>} {
    %c0 = arith.constant 0 : index
    %c0_0 = arith.constant 0 : index
    %0 = vector.load %arg0[%c0, %c0_0] : memref<16x784xf32, #tpu.memory_space<vmem>>, vector<16x784xf32>
    %1 = arith.truncf %0 : vector<16x784xf32> to vector<16x784xbf16>
    %c0_1 = arith.constant 0 : index
    %c0_2 = arith.constant 0 : index
    %2 = vector.load %arg1[%c0_1, %c0_2] : memref<784x256xi8, #tpu.memory_space<vmem>>, vector<784x256xi8>
    %3 = arith.sitofp %2 : vector<784x256xi8> to vector<784x256xbf16>
    %cst = arith.constant dense<0.000000e+00> : vector<16x256xf32>
    %4 = tpu.matmul %1, %3, %cst {dimension_numbers = #tpu.dot_dimension_numbers<[1], [0], [0], [1], [0, 0, 1, 1], [], []>} : vector<16x784xbf16>, vector<784x256xbf16>, vector<16x256xf32> -> vector<16x256xf32>
    %c0_3 = arith.constant 0 : index
    %c0_4 = arith.constant 0 : index
    %5 = vector.load %arg2[%c0_3, %c0_4] : memref<2x256xf32, #tpu.memory_space<vmem>>, vector<1x256xf32>
    %6 = vector.broadcast %5 : vector<1x256xf32> to vector<16x256xf32>
    %7 = arith.mulf %4, %6 : vector<16x256xf32>
    %c1 = arith.constant 1 : index
    %c0_5 = arith.constant 0 : index
    %8 = vector.load %arg2[%c1, %c0_5] : memref<2x256xf32, #tpu.memory_space<vmem>>, vector<1x256xf32>
    %9 = vector.broadcast %8 : vector<1x256xf32> to vector<16x256xf32>
    %10 = arith.addf %7, %9 : vector<16x256xf32>
    %c0_6 = arith.constant 0 : index
    %c0_7 = arith.constant 0 : index
    %11 = vector.load %arg21[%c0_6, %c0_7] : memref<16x256xf32, #tpu.memory_space<vmem>>, vector<16x256xf32>
    tpu.vector_store %arg21[%c0_6, %c0_7], %10 {strides = array<i32>} : memref<16x256xf32, #tpu.memory_space<vmem>>, vector<16x256xf32>,
    %cst_8 = arith.constant 0.000000e+00 : f32
    %12 = vector.broadcast %cst_8 : f32 to vector<16x256xf32>
    %13 = arith.maximumf %10, %12 : vector<16x256xf32>
    %14 = arith.truncf %13 : vector<16x256xf32> to vector<16x256xbf16>
    %c0_9 = arith.constant 0 : index
    %c0_10 = arith.constant 0 : index
    %15 = vector.load %arg3[%c0_9, %c0_10] : memref<256x10xi8, #tpu.memory_space<vmem>>, vector<256x10xi8>
    %16 = arith.sitofp %15 : vector<256x10xi8> to vector<256x10xbf16>
    %cst_11 = arith.constant dense<0.000000e+00> : vector<16x10xf32>
    %17 = tpu.matmul %14, %16, %cst_11 {dimension_numbers = #tpu.dot_dimension_numbers<[1], [0], [0], [1], [0, 0, 1, 1], [], []>} : vector<16x256xbf16>, vector<256x10xbf16>, vector<16x10xf32> -> vector<16x10xf32>
    %c0_12 = arith.constant 0 : index
    %c0_13 = arith.constant 0 : index
    %18 = vector.load %arg4[%c0_12, %c0_13] : memref<2x10xf32, #tpu.memory_space<vmem>>, vector<1x10xf32>
    %19 = vector.broadcast %18 : vector<1x10xf32> to vector<16x10xf32>
    %20 = arith.mulf %17, %19 : vector<16x10xf32>
    %c1_14 = arith.constant 1 : index
    %c0_15 = arith.constant 0 : index
    %21 = vector.load %arg4[%c1_14, %c0_15] : memref<2x10xf32, #tpu.memory_space<vmem>>, vector<1x10xf32>
    %22 = vector.broadcast %21 : vector<1x10xf32> to vector<16x10xf32>
    %23 = arith.addf %20, %22 : vector<16x10xf32>
    %c0_16 = arith.constant 0 : index
    %c0_17 = arith.constant 0 : index
    %24 = vector.load %arg22[%c0_16, %c0_17] : memref<16x10xf32, #tpu.memory_space<vmem>>, vector<16x10xf32>
    tpu.vector_store %arg22[%c0_16, %c0_17], %23 {strides = array<i32>} : memref<16x10xf32, #tpu.memory_space<vmem>>, vector<16x10xf32>,
    %25 = arith.truncf %10 : vector<16x256xf32> to vector<16x256xbf16>
    %c0_18 = arith.constant 0 : index
    %c0_19 = arith.constant 0 : index
    %26 = vector.load %arg5[%c0_18, %c0_19] : memref<256x1024xi8, #tpu.memory_space<vmem>>, vector<256x1024xi8>
    %27 = arith.sitofp %26 : vector<256x1024xi8> to vector<256x1024xbf16>
    %cst_20 = arith.constant dense<0.000000e+00> : vector<16x1024xf32>
    %28 = tpu.matmul %25, %27, %cst_20 {dimension_numbers = #tpu.dot_dimension_numbers<[1], [0], [0], [1], [0, 0, 1, 1], [], []>} : vector<16x256xbf16>, vector<256x1024xbf16>, vector<16x1024xf32> -> vector<16x1024xf32>
    %c0_21 = arith.constant 0 : index
    %c0_22 = arith.constant 0 : index
    %29 = vector.load %arg6[%c0_21, %c0_22] : memref<2x1024xf32, #tpu.memory_space<vmem>>, vector<1x1024xf32>
    %30 = vector.broadcast %29 : vector<1x1024xf32> to vector<16x1024xf32>
    %31 = arith.mulf %28, %30 : vector<16x1024xf32>
    %c1_23 = arith.constant 1 : index
    %c0_24 = arith.constant 0 : index
    %32 = vector.load %arg6[%c1_23, %c0_24] : memref<2x1024xf32, #tpu.memory_space<vmem>>, vector<1x1024xf32>
    %33 = vector.broadcast %32 : vector<1x1024xf32> to vector<16x1024xf32>
    %34 = arith.addf %31, %33 : vector<16x1024xf32>
    %cst_25 = arith.constant dense<0.000000e+00> : vector<1024xf32>
    %35 = vector.multi_reduction <add>, %34, %cst_25 [0] : vector<16x1024xf32> to vector<1024xf32>
    %36 = vector.shape_cast %35 : vector<1024xf32> to vector<1x1024xf32>
    %cst_26 = arith.constant 1.600000e+01 : f32
    %37 = vector.broadcast %cst_26 : f32 to vector<1x1024xf32>
    %38 = arith.divf %36, %37 : vector<1x1024xf32>
    %39 = arith.mulf %34, %34 : vector<16x1024xf32>
    %cst_27 = arith.constant dense<0.000000e+00> : vector<1024xf32>
    %40 = vector.multi_reduction <add>, %39, %cst_27 [0] : vector<16x1024xf32> to vector<1024xf32>
    %41 = vector.shape_cast %40 : vector<1024xf32> to vector<1x1024xf32>
    %cst_28 = arith.constant 1.600000e+01 : f32
    %42 = vector.broadcast %cst_28 : f32 to vector<1x1024xf32>
    %43 = arith.divf %41, %42 : vector<1x1024xf32>
    %44 = arith.mulf %38, %38 : vector<1x1024xf32>
    %45 = arith.subf %43, %44 : vector<1x1024xf32>
    %cst_29 = arith.constant 0.000000e+00 : f32
    %46 = vector.broadcast %cst_29 : f32 to vector<1x1024xf32>
    %47 = arith.maximumf %45, %46 : vector<1x1024xf32>
    %c0_30 = arith.constant 0 : index
    %c0_31 = arith.constant 0 : index
    %48 = vector.load %arg7[%c0_30, %c0_31] : memref<2x1024xf32, #tpu.memory_space<vmem>>, vector<1x1024xf32>
    %cst_32 = arith.constant 9.99999974E-6 : f32
    %49 = vector.broadcast %cst_32 : f32 to vector<1x1024xf32>
    %50 = arith.addf %47, %49 : vector<1x1024xf32>
    %51 = math.rsqrt %50 : vector<1x1024xf32>
    %52 = arith.mulf %48, %51 : vector<1x1024xf32>
    %c1_33 = arith.constant 1 : index
    %c0_34 = arith.constant 0 : index
    %53 = vector.load %arg7[%c1_33, %c0_34] : memref<2x1024xf32, #tpu.memory_space<vmem>>, vector<1x1024xf32>
    %54 = arith.mulf %38, %52 : vector<1x1024xf32>
    %55 = arith.subf %53, %54 : vector<1x1024xf32>
    %56 = vector.broadcast %52 : vector<1x1024xf32> to vector<16x1024xf32>
    %57 = arith.mulf %34, %56 : vector<16x1024xf32>
    %58 = vector.broadcast %55 : vector<1x1024xf32> to vector<16x1024xf32>
    %59 = arith.addf %57, %58 : vector<16x1024xf32>
    %cst_35 = arith.constant 0.000000e+00 : f32
    %60 = vector.broadcast %cst_35 : f32 to vector<16x1024xf32>
    %61 = arith.maximumf %59, %60 : vector<16x1024xf32>
    %62 = arith.truncf %61 : vector<16x1024xf32> to vector<16x1024xbf16>
    %c0_36 = arith.constant 0 : index
    %c0_37 = arith.constant 0 : index
    %63 = vector.load %arg8[%c0_36, %c0_37] : memref<1024x1024xi8, #tpu.memory_space<vmem>>, vector<1024x1024xi8>
    %64 = arith.sitofp %63 : vector<1024x1024xi8> to vector<1024x1024xbf16>
    %cst_38 = arith.constant dense<0.000000e+00> : vector<16x1024xf32>
    %65 = tpu.matmul %62, %64, %cst_38 {dimension_numbers = #tpu.dot_dimension_numbers<[1], [0], [0], [1], [0, 0, 1, 1], [], []>} : vector<16x1024xbf16>, vector<1024x1024xbf16>, vector<16x1024xf32> -> vector<16x1024xf32>
    %c0_39 = arith.constant 0 : index
    %c0_40 = arith.constant 0 : index
    %66 = vector.load %arg9[%c0_39, %c0_40] : memref<2x1024xf32, #tpu.memory_space<vmem>>, vector<1x1024xf32>
    %67 = vector.broadcast %66 : vector<1x1024xf32> to vector<16x1024xf32>
    %68 = arith.mulf %65, %67 : vector<16x1024xf32>
    %c1_41 = arith.constant 1 : index
    %c0_42 = arith.constant 0 : index
    %69 = vector.load %arg9[%c1_41, %c0_42] : memref<2x1024xf32, #tpu.memory_space<vmem>>, vector<1x1024xf32>
    %70 = vector.broadcast %69 : vector<1x1024xf32> to vector<16x1024xf32>
    %71 = arith.addf %68, %70 : vector<16x1024xf32>
    %cst_43 = arith.constant dense<0.000000e+00> : vector<1024xf32>
    %72 = vector.multi_reduction <add>, %71, %cst_43 [0] : vector<16x1024xf32> to vector<1024xf32>
    %73 = vector.shape_cast %72 : vector<1024xf32> to vector<1x1024xf32>
    %cst_44 = arith.constant 1.600000e+01 : f32
    %74 = vector.broadcast %cst_44 : f32 to vector<1x1024xf32>
    %75 = arith.divf %73, %74 : vector<1x1024xf32>
    %76 = arith.mulf %71, %71 : vector<16x1024xf32>
    %cst_45 = arith.constant dense<0.000000e+00> : vector<1024xf32>
    %77 = vector.multi_reduction <add>, %76, %cst_45 [0] : vector<16x1024xf32> to vector<1024xf32>
    %78 = vector.shape_cast %77 : vector<1024xf32> to vector<1x1024xf32>
    %cst_46 = arith.constant 1.600000e+01 : f32
    %79 = vector.broadcast %cst_46 : f32 to vector<1x1024xf32>
    %80 = arith.divf %78, %79 : vector<1x1024xf32>
    %81 = arith.mulf %75, %75 : vector<1x1024xf32>
    %82 = arith.subf %80, %81 : vector<1x1024xf32>
    %cst_47 = arith.constant 0.000000e+00 : f32
    %83 = vector.broadcast %cst_47 : f32 to vector<1x1024xf32>
    %84 = arith.maximumf %82, %83 : vector<1x1024xf32>
    %c0_48 = arith.constant 0 : index
    %c0_49 = arith.constant 0 : index
    %85 = vector.load %arg10[%c0_48, %c0_49] : memref<2x1024xf32, #tpu.memory_space<vmem>>, vector<1x1024xf32>
    %cst_50 = arith.constant 9.99999974E-6 : f32
    %86 = vector.broadcast %cst_50 : f32 to vector<1x1024xf32>
    %87 = arith.addf %84, %86 : vector<1x1024xf32>
    %88 = math.rsqrt %87 : vector<1x1024xf32>
    %89 = arith.mulf %85, %88 : vector<1x1024xf32>
    %c1_51 = arith.constant 1 : index
    %c0_52 = arith.constant 0 : index
    %90 = vector.load %arg10[%c1_51, %c0_52] : memref<2x1024xf32, #tpu.memory_space<vmem>>, vector<1x1024xf32>
    %91 = arith.mulf %75, %89 : vector<1x1024xf32>
    %92 = arith.subf %90, %91 : vector<1x1024xf32>
    %93 = vector.broadcast %89 : vector<1x1024xf32> to vector<16x1024xf32>
    %94 = arith.mulf %71, %93 : vector<16x1024xf32>
    %95 = vector.broadcast %92 : vector<1x1024xf32> to vector<16x1024xf32>
    %96 = arith.addf %94, %95 : vector<16x1024xf32>
    %cst_53 = arith.constant 0.000000e+00 : f32
    %97 = vector.broadcast %cst_53 : f32 to vector<16x1024xf32>
    %98 = arith.maximumf %96, %97 : vector<16x1024xf32>
    %99 = arith.truncf %98 : vector<16x1024xf32> to vector<16x1024xbf16>
    %c0_54 = arith.constant 0 : index
    %c0_55 = arith.constant 0 : index
    %100 = vector.load %arg11[%c0_54, %c0_55] : memref<1024x256xi8, #tpu.memory_space<vmem>>, vector<1024x256xi8>
    %101 = arith.sitofp %100 : vector<1024x256xi8> to vector<1024x256xbf16>
    %cst_56 = arith.constant dense<0.000000e+00> : vector<16x256xf32>
    %102 = tpu.matmul %99, %101, %cst_56 {dimension_numbers = #tpu.dot_dimension_numbers<[1], [0], [0], [1], [0, 0, 1, 1], [], []>} : vector<16x1024xbf16>, vector<1024x256xbf16>, vector<16x256xf32> -> vector<16x256xf32>
    %c0_57 = arith.constant 0 : index
    %c0_58 = arith.constant 0 : index
    %103 = vector.load %arg12[%c0_57, %c0_58] : memref<2x256xf32, #tpu.memory_space<vmem>>, vector<1x256xf32>
    %104 = vector.broadcast %103 : vector<1x256xf32> to vector<16x256xf32>
    %105 = arith.mulf %102, %104 : vector<16x256xf32>
    %c1_59 = arith.constant 1 : index
    %c0_60 = arith.constant 0 : index
    %106 = vector.load %arg12[%c1_59, %c0_60] : memref<2x256xf32, #tpu.memory_space<vmem>>, vector<1x256xf32>
    %107 = vector.broadcast %106 : vector<1x256xf32> to vector<16x256xf32>
    %108 = arith.addf %105, %107 : vector<16x256xf32>
    %c0_61 = arith.constant 0 : index
    %c0_62 = arith.constant 0 : index
    %109 = vector.load %arg23[%c0_61, %c0_62] : memref<16x256xf32, #tpu.memory_space<vmem>>, vector<16x256xf32>
    tpu.vector_store %arg23[%c0_61, %c0_62], %108 {strides = array<i32>} : memref<16x256xf32, #tpu.memory_space<vmem>>, vector<16x256xf32>,
    %110 = arith.truncf %23 : vector<16x10xf32> to vector<16x10xbf16>
    %c0_63 = arith.constant 0 : index
    %c0_64 = arith.constant 0 : index
    %111 = vector.load %arg13[%c0_63, %c0_64] : memref<10x1024xi8, #tpu.memory_space<vmem>>, vector<10x1024xi8>
    %112 = arith.sitofp %111 : vector<10x1024xi8> to vector<10x1024xbf16>
    %cst_65 = arith.constant dense<0.000000e+00> : vector<16x1024xf32>
    %113 = tpu.matmul %110, %112, %cst_65 {dimension_numbers = #tpu.dot_dimension_numbers<[1], [0], [0], [1], [0, 0, 1, 1], [], []>} : vector<16x10xbf16>, vector<10x1024xbf16>, vector<16x1024xf32> -> vector<16x1024xf32>
    %c0_66 = arith.constant 0 : index
    %c0_67 = arith.constant 0 : index
    %114 = vector.load %arg14[%c0_66, %c0_67] : memref<2x1024xf32, #tpu.memory_space<vmem>>, vector<1x1024xf32>
    %115 = vector.broadcast %114 : vector<1x1024xf32> to vector<16x1024xf32>
    %116 = arith.mulf %113, %115 : vector<16x1024xf32>
    %c1_68 = arith.constant 1 : index
    %c0_69 = arith.constant 0 : index
    %117 = vector.load %arg14[%c1_68, %c0_69] : memref<2x1024xf32, #tpu.memory_space<vmem>>, vector<1x1024xf32>
    %118 = vector.broadcast %117 : vector<1x1024xf32> to vector<16x1024xf32>
    %119 = arith.addf %116, %118 : vector<16x1024xf32>
    %cst_70 = arith.constant dense<0.000000e+00> : vector<1024xf32>
    %120 = vector.multi_reduction <add>, %119, %cst_70 [0] : vector<16x1024xf32> to vector<1024xf32>
    %121 = vector.shape_cast %120 : vector<1024xf32> to vector<1x1024xf32>
    %cst_71 = arith.constant 1.600000e+01 : f32
    %122 = vector.broadcast %cst_71 : f32 to vector<1x1024xf32>
    %123 = arith.divf %121, %122 : vector<1x1024xf32>
    %124 = arith.mulf %119, %119 : vector<16x1024xf32>
    %cst_72 = arith.constant dense<0.000000e+00> : vector<1024xf32>
    %125 = vector.multi_reduction <add>, %124, %cst_72 [0] : vector<16x1024xf32> to vector<1024xf32>
    %126 = vector.shape_cast %125 : vector<1024xf32> to vector<1x1024xf32>
    %cst_73 = arith.constant 1.600000e+01 : f32
    %127 = vector.broadcast %cst_73 : f32 to vector<1x1024xf32>
    %128 = arith.divf %126, %127 : vector<1x1024xf32>
    %129 = arith.mulf %123, %123 : vector<1x1024xf32>
    %130 = arith.subf %128, %129 : vector<1x1024xf32>
    %cst_74 = arith.constant 0.000000e+00 : f32
    %131 = vector.broadcast %cst_74 : f32 to vector<1x1024xf32>
    %132 = arith.maximumf %130, %131 : vector<1x1024xf32>
    %c0_75 = arith.constant 0 : index
    %c0_76 = arith.constant 0 : index
    %133 = vector.load %arg15[%c0_75, %c0_76] : memref<2x1024xf32, #tpu.memory_space<vmem>>, vector<1x1024xf32>
    %cst_77 = arith.constant 9.99999974E-6 : f32
    %134 = vector.broadcast %cst_77 : f32 to vector<1x1024xf32>
    %135 = arith.addf %132, %134 : vector<1x1024xf32>
    %136 = math.rsqrt %135 : vector<1x1024xf32>
    %137 = arith.mulf %133, %136 : vector<1x1024xf32>
    %c1_78 = arith.constant 1 : index
    %c0_79 = arith.constant 0 : index
    %138 = vector.load %arg15[%c1_78, %c0_79] : memref<2x1024xf32, #tpu.memory_space<vmem>>, vector<1x1024xf32>
    %139 = arith.mulf %123, %137 : vector<1x1024xf32>
    %140 = arith.subf %138, %139 : vector<1x1024xf32>
    %141 = vector.broadcast %137 : vector<1x1024xf32> to vector<16x1024xf32>
    %142 = arith.mulf %119, %141 : vector<16x1024xf32>
    %143 = vector.broadcast %140 : vector<1x1024xf32> to vector<16x1024xf32>
    %144 = arith.addf %142, %143 : vector<16x1024xf32>
    %cst_80 = arith.constant 0.000000e+00 : f32
    %145 = vector.broadcast %cst_80 : f32 to vector<16x1024xf32>
    %146 = arith.maximumf %144, %145 : vector<16x1024xf32>
    %147 = arith.truncf %146 : vector<16x1024xf32> to vector<16x1024xbf16>
    %c0_81 = arith.constant 0 : index
    %c0_82 = arith.constant 0 : index
    %148 = vector.load %arg16[%c0_81, %c0_82] : memref<1024x1024xi8, #tpu.memory_space<vmem>>, vector<1024x1024xi8>
    %149 = arith.sitofp %148 : vector<1024x1024xi8> to vector<1024x1024xbf16>
    %cst_83 = arith.constant dense<0.000000e+00> : vector<16x1024xf32>
    %150 = tpu.matmul %147, %149, %cst_83 {dimension_numbers = #tpu.dot_dimension_numbers<[1], [0], [0], [1], [0, 0, 1, 1], [], []>} : vector<16x1024xbf16>, vector<1024x1024xbf16>, vector<16x1024xf32> -> vector<16x1024xf32>
    %c0_84 = arith.constant 0 : index
    %c0_85 = arith.constant 0 : index
    %151 = vector.load %arg17[%c0_84, %c0_85] : memref<2x1024xf32, #tpu.memory_space<vmem>>, vector<1x1024xf32>
    %152 = vector.broadcast %151 : vector<1x1024xf32> to vector<16x1024xf32>
    %153 = arith.mulf %150, %152 : vector<16x1024xf32>
    %c1_86 = arith.constant 1 : index
    %c0_87 = arith.constant 0 : index
    %154 = vector.load %arg17[%c1_86, %c0_87] : memref<2x1024xf32, #tpu.memory_space<vmem>>, vector<1x1024xf32>
    %155 = vector.broadcast %154 : vector<1x1024xf32> to vector<16x1024xf32>
    %156 = arith.addf %153, %155 : vector<16x1024xf32>
    %cst_88 = arith.constant dense<0.000000e+00> : vector<1024xf32>
    %157 = vector.multi_reduction <add>, %156, %cst_88 [0] : vector<16x1024xf32> to vector<1024xf32>
    %158 = vector.shape_cast %157 : vector<1024xf32> to vector<1x1024xf32>
    %cst_89 = arith.constant 1.600000e+01 : f32
    %159 = vector.broadcast %cst_89 : f32 to vector<1x1024xf32>
    %160 = arith.divf %158, %159 : vector<1x1024xf32>
    %161 = arith.mulf %156, %156 : vector<16x1024xf32>
    %cst_90 = arith.constant dense<0.000000e+00> : vector<1024xf32>
    %162 = vector.multi_reduction <add>, %161, %cst_90 [0] : vector<16x1024xf32> to vector<1024xf32>
    %163 = vector.shape_cast %162 : vector<1024xf32> to vector<1x1024xf32>
    %cst_91 = arith.constant 1.600000e+01 : f32
    %164 = vector.broadcast %cst_91 : f32 to vector<1x1024xf32>
    %165 = arith.divf %163, %164 : vector<1x1024xf32>
    %166 = arith.mulf %160, %160 : vector<1x1024xf32>
    %167 = arith.subf %165, %166 : vector<1x1024xf32>
    %cst_92 = arith.constant 0.000000e+00 : f32
    %168 = vector.broadcast %cst_92 : f32 to vector<1x1024xf32>
    %169 = arith.maximumf %167, %168 : vector<1x1024xf32>
    %c0_93 = arith.constant 0 : index
    %c0_94 = arith.constant 0 : index
    %170 = vector.load %arg18[%c0_93, %c0_94] : memref<2x1024xf32, #tpu.memory_space<vmem>>, vector<1x1024xf32>
    %cst_95 = arith.constant 9.99999974E-6 : f32
    %171 = vector.broadcast %cst_95 : f32 to vector<1x1024xf32>
    %172 = arith.addf %169, %171 : vector<1x1024xf32>
    %173 = math.rsqrt %172 : vector<1x1024xf32>
    %174 = arith.mulf %170, %173 : vector<1x1024xf32>
    %c1_96 = arith.constant 1 : index
    %c0_97 = arith.constant 0 : index
    %175 = vector.load %arg18[%c1_96, %c0_97] : memref<2x1024xf32, #tpu.memory_space<vmem>>, vector<1x1024xf32>
    %176 = arith.mulf %160, %174 : vector<1x1024xf32>
    %177 = arith.subf %175, %176 : vector<1x1024xf32>
    %178 = vector.broadcast %174 : vector<1x1024xf32> to vector<16x1024xf32>
    %179 = arith.mulf %156, %178 : vector<16x1024xf32>
    %180 = vector.broadcast %177 : vector<1x1024xf32> to vector<16x1024xf32>
    %181 = arith.addf %179, %180 : vector<16x1024xf32>
    %cst_98 = arith.constant 0.000000e+00 : f32
    %182 = vector.broadcast %cst_98 : f32 to vector<16x1024xf32>
    %183 = arith.maximumf %181, %182 : vector<16x1024xf32>
    %184 = arith.truncf %183 : vector<16x1024xf32> to vector<16x1024xbf16>
    %c0_99 = arith.constant 0 : index
    %c0_100 = arith.constant 0 : index
    %185 = vector.load %arg19[%c0_99, %c0_100] : memref<1024x10xi8, #tpu.memory_space<vmem>>, vector<1024x10xi8>
    %186 = arith.sitofp %185 : vector<1024x10xi8> to vector<1024x10xbf16>
    %cst_101 = arith.constant dense<0.000000e+00> : vector<16x10xf32>
    %187 = tpu.matmul %184, %186, %cst_101 {dimension_numbers = #tpu.dot_dimension_numbers<[1], [0], [0], [1], [0, 0, 1, 1], [], []>} : vector<16x1024xbf16>, vector<1024x10xbf16>, vector<16x10xf32> -> vector<16x10xf32>
    %c0_102 = arith.constant 0 : index
    %c0_103 = arith.constant 0 : index
    %188 = vector.load %arg20[%c0_102, %c0_103] : memref<2x10xf32, #tpu.memory_space<vmem>>, vector<1x10xf32>
    %189 = vector.broadcast %188 : vector<1x10xf32> to vector<16x10xf32>
    %190 = arith.mulf %187, %189 : vector<16x10xf32>
    %c1_104 = arith.constant 1 : index
    %c0_105 = arith.constant 0 : index
    %191 = vector.load %arg20[%c1_104, %c0_105] : memref<2x10xf32, #tpu.memory_space<vmem>>, vector<1x10xf32>
    %192 = vector.broadcast %191 : vector<1x10xf32> to vector<16x10xf32>
    %193 = arith.addf %190, %192 : vector<16x10xf32>
    %c0_106 = arith.constant 0 : index
    %c0_107 = arith.constant 0 : index
    %194 = vector.load %arg24[%c0_106, %c0_107] : memref<16x10xf32, #tpu.memory_space<vmem>>, vector<16x10xf32>
    tpu.vector_store %arg24[%c0_106, %c0_107], %193 {strides = array<i32>} : memref<16x10xf32, #tpu.memory_space<vmem>>, vector<16x10xf32>,
    return
  }
}

</mosaic_0001>

<bundles_post_ra>
// kernel: net_forward.1
= control target key start
LH: loop header
LB: loop body
LE: loop exit
PB: predicated region body
PF: predicated region fallthrough
CT: control target
= control target key end

     0   :  { %s11911_s0 = inlined_call_operand.hbm [shape: f32[16,784], index: 0, kind: input, shape index: {}]   ;;  %s11912_s1 = inlined_call_operand.vmem [shape: s8[784,256], index: 1, kind: input, shape index: {}]   ;;  %s11913_s2 = inlined_call_operand.hbm [shape: f32[2,256], index: 2, kind: input, shape index: {}]   ;;  %s11914_s3 = inlined_call_operand.vmem [shape: s8[256,10], index: 3, kind: input, shape index: {}]   ;;  %s11915_s4 = inlined_call_operand.vmem [shape: f32[2,10], index: 4, kind: input, shape index: {}]   ;;  %s11916_s5 = inlined_call_operand.hbm [shape: s8[256,1024], index: 5, kind: input, shape index: {}]   ;;  %s11917_s6 = inlined_call_operand.hbm [shape: f32[2,1024], index: 6, kind: input, shape index: {}]   ;;  %s11918_s7 = inlined_call_operand.hbm [shape: f32[2,1024], index: 7, kind: input, shape index: {}]   ;;  %s11919_s8 = inlined_call_operand.hbm [shape: s8[1024,1024], index: 8, kind: input, shape index: {}]   ;;  %s11920_s9 = inlined_call_operand.hbm [shape: f32[2,1024], index: 9, kind: input, shape index: {}]   ;;  %s11921_s10 = inlined_call_operand.hbm [shape: f32[2,1024], index: 10, kind: input, shape index: {}]   ;;  %s11922_s11 = inlined_call_operand.hbm [shape: s8[1024,256], index: 11, kind: input, shape index: {}]   ;;  %s11923_s12 = inlined_call_operand.hbm [shape: f32[2,256], index: 12, kind: input, shape index: {}]   ;;  %s11924_s13 = inlined_call_operand.vmem [shape: s8[10,1024], index: 13, kind: input, shape index: {}]   ;;  %s11925_s14 = inlined_call_operand.hbm [shape: f32[2,1024], index: 14, kind: input, shape index: {}]   ;;  %s11926_s15 = inlined_call_operand.hbm [shape: f32[2,1024], index: 15, kind: input, shape index: {}]   ;;  %s11927_s16 = inlined_call_operand.hbm [shape: s8[1024,1024], index: 16, kind: input, shape index: {}]   ;;  %s11928_s17 = inlined_call_operand.hbm [shape: f32[2,1024], index: 17, kind: input, shape index: {}]   ;;  %s11929_s18 = inlined_call_operand.hbm [shape: f32[2,1024], index: 18, kind: input, shape index: {}]   ;;  %s11930_s19 = inlined_call_operand.vmem [shape: s8[1024,10], index: 19, kind: input, shape index: {}]   ;;  %s11931_s20 = inlined_call_operand.hbm [shape: f32[2,10], index: 20, kind: input, shape index: {}]   ;;  %s11932_s21 = inlined_call_operand.hbm [shape: f32[16,256], index: 21, kind: output, shape index: {0}]   ;;  %s11933_s22 = inlined_call_operand.hbm [shape: f32[16,10], index: 22, kind: output, shape index: {1}]   ;;  %s11934_s23 = inlined_call_operand.hbm [shape: f32[16,256], index: 23, kind: output, shape index: {2}]   ;;  %s11935_s24 = inlined_call_operand.hbm [shape: f32[16,10], index: 24, kind: output, shape index: {3}]  }
   0x1   :  { %11986 = sst [smem:[#allocation74_spill]] %s11911_s0 }
   0x2   :  { %11987 = sst [smem:[#allocation75_spill]] %s11912_s1 }
   0x3   :  { %11988 = sst [smem:[#allocation76_spill]] %s11913_s2 }
   0x4   :  { %11989 = sst [smem:[#allocation77_spill]] %s11914_s3 }
   0x5   :  { %11990 = sst [smem:[#allocation78_spill]] %s11915_s4 }
   0x6   :  { %11991 = sst [smem:[#allocation79_spill]] %s11916_s5 }
   0x7   :  { %11992 = sst [smem:[#allocation80_spill]] %s11917_s6 }
   0x8   :  { %11993 = sst [smem:[#allocation81_spill]] %s11918_s7 }
   0x9   :  { %11994 = sst [smem:[#allocation82_spill]] %s11919_s8 }
   0xa   :  { %11995 = sst [smem:[#allocation83_spill]] %s11935_s24 }
   0xb   :  { %30 = vsyncpa [#allocation3], 0 }
   0xc   :  { %31 = vsyncpa [#allocation6], 0 }
   0xd   :  { %32 = vsyncpa [#allocation9], 0 }
   0xe   :  { %33 = vsyncpa [#allocation12], 0 }
   0xf   :  { %34 = vsyncpa [#allocation15], 0 }
  0x10   :  { %35 = vsyncpa [#allocation18], 0 }
  0x11   :  { %36 = vsyncpa [#allocation21], 0 }
  0x12   :  { %37 = vsyncpa [#allocation24], 0 }
  0x13   :  { %38 = vsyncpa [#allocation27], 0 }
  0x14   :  { %39 = vsyncpa [#allocation4], 0 }
  0x15   :  { %40 = vsyncpa [#allocation30], 0 }
  0x16   :  { %41 = vsyncpa [#allocation33], 0  ;;  %s9493_s5 = smov [#allocation5]   ;;  %s9494_s27 = smov [#allocation8]  }
  0x17   :  { %s62_s26 = sshll.u32 %s9493_s5, 4  ;;  %s88_s28 = sshll.u32 %s9494_s27, 4  ;;  %s63_s26 = int_to_ptr.vmem [resolvable:$true] %s62_s26  ;;  %s89_s28 = int_to_ptr.vmem [resolvable:$true] %s88_s28 }
  0x18   :  { %s11996_s29 = sld [smem:[#allocation76_spill]] }
  0x1e   :  { %s9029_s0 = scalar_lea.hbm %s11996_s29, 64 }
  0x1f   :  { %p9030_p0 = scmp.ne.s32.totalorder %s11996_s29, %s9029_s0  ;;  %p9033_p1 = scmp.lt.u32.totalorder %s9029_s0, %s11996_s29 }
  0x21   :  { %p9035_p2 = pnand %p9033_p1, %p9030_p0 }
  0x23   :  { %9038 = shalt.err (!%p9035_p2)
}
  0x24   :  { %s9039_s8 = scalar_lea.vmem %s63_s26, 64  ;;  %p9044_p4 = scmp.lt.s32.totalorder %s63_s26, %s63_s26 }
  0x25   :  { %p9040_p3 = scmp.ne.s32.totalorder %s63_s26, %s9039_s8  ;;  %p9045_p5 = scmp.lt.s32.totalorder %s9039_s8, %s9039_s8 }
  0x27   :  { %p9046_p6 = por %p9045_p5, %p9044_p4 }
  0x29   :  { %p9047_p7 = pnand %p9046_p6, %p9040_p3 }
  0x2b   :  { %9050 = shalt.err (!%p9047_p7)
}
  0x2c   :  { %65 = dma.hbm_to_vmem [thread:$0]  %s11996_s29, 64, %s63_s26, [#allocation6]  }
  0x2d   :  { %s11997_s6 = sld [smem:[#allocation80_spill]] }
  0x33   :  { %s9051_s2 = scalar_lea.hbm %s11997_s6, 256 }
  0x34   :  { %p9052_p8 = scmp.ne.s32.totalorder %s11997_s6, %s9051_s2  ;;  %p9055_p9 = scmp.lt.u32.totalorder %s9051_s2, %s11997_s6 }
  0x36   :  { %p9057_p10 = pnand %p9055_p9, %p9052_p8 }
  0x38   :  { %9060 = shalt.err (!%p9057_p10)
}
  0x39   :  { %s9061_s25 = scalar_lea.vmem %s89_s28, 256  ;;  %p9066_p12 = scmp.lt.s32.totalorder %s89_s28, %s89_s28 }
  0x3a   :  { %p9062_p11 = scmp.ne.s32.totalorder %s89_s28, %s9061_s25  ;;  %p9067_p13 = scmp.lt.s32.totalorder %s9061_s25, %s9061_s25 }
  0x3c   :  { %p9068_p0 = por %p9067_p13, %p9066_p12 }
  0x3e   :  { %p9069_p1 = pnand %p9068_p0, %p9062_p11 }
  0x40   :  { %9072 = shalt.err (!%p9069_p1)
}
  0x41   :  { %91 = dma.hbm_to_vmem [thread:$0]  %s11997_s6, 256, %s89_s28, [#allocation9]  }
  0x42   :  { %s9495_s8 = smov [#allocation11]   ;;  %s9496_s1 = smov [#allocation14]  }
  0x43   :  { %s107_s4 = sshll.u32 %s9495_s8, 4  ;;  %s130_s5 = sshll.u32 %s9496_s1, 4  ;;  %s108_s4 = int_to_ptr.vmem [resolvable:$true] %s107_s4  ;;  %s131_s5 = int_to_ptr.vmem [resolvable:$true] %s130_s5 }
  0x44   :  { %s11998_s7 = sld [smem:[#allocation82_spill]] }
  0x4a   :  { %s9073_s30 = scalar_lea.hbm %s11998_s7, 32768 }
  0x4b   :  { %p9074_p2 = scmp.ne.s32.totalorder %s11998_s7, %s9073_s30  ;;  %p9077_p3 = scmp.lt.u32.totalorder %s9073_s30, %s11998_s7 }
  0x4d   :  { %p9079_p4 = pnand %p9077_p3, %p9074_p2 }
  0x4f   :  { %9082 = shalt.err (!%p9079_p4)
}
  0x50   :  { %s9083_s28 = scalar_lea.vmem %s108_s4, 32768  ;;  %p9088_p6 = scmp.lt.s32.totalorder %s108_s4, %s108_s4 }
  0x51   :  { %p9084_p5 = scmp.ne.s32.totalorder %s108_s4, %s9083_s28  ;;  %p9089_p7 = scmp.lt.s32.totalorder %s9083_s28, %s9083_s28 }
  0x53   :  { %p9090_p8 = por %p9089_p7, %p9088_p6 }
  0x55   :  { %p9091_p9 = pnand %p9090_p8, %p9084_p5 }
  0x57   :  { %9094 = shalt.err (!%p9091_p9)
}
  0x58   :  { %s9497_s6 = smov 1024   ;;  %s9498_s26 = smov 64  }
  0x59   :  { %113 = dma.hbm_to_vmem [thread:$0]  %s11998_s7, 32768, %s108_s4, [#allocation12], %s9497_s6, %s9497_s6, %s9498_s26  }
  0x5a   :  { %s9095_s27 = scalar_lea.hbm %s11921_s10, 256 }
  0x5b   :  { %p9096_p10 = scmp.ne.s32.totalorder %s11921_s10, %s9095_s27  ;;  %p9099_p11 = scmp.lt.u32.totalorder %s9095_s27, %s11921_s10 }
  0x5d   :  { %p9101_p12 = pnand %p9099_p11, %p9096_p10 }
  0x5f   :  { %9104 = shalt.err (!%p9101_p12)
}
  0x60   :  { %s9105_s25 = scalar_lea.vmem %s131_s5, 256  ;;  %p9110_p0 = scmp.lt.s32.totalorder %s131_s5, %s131_s5 }
  0x61   :  { %p9106_p13 = scmp.ne.s32.totalorder %s131_s5, %s9105_s25  ;;  %p9111_p1 = scmp.lt.s32.totalorder %s9105_s25, %s9105_s25 }
  0x63   :  { %p9112_p2 = por %p9111_p1, %p9110_p0 }
  0x65   :  { %p9113_p3 = pnand %p9112_p2, %p9106_p13 }
  0x67   :  { %9116 = shalt.err (!%p9113_p3)
}
  0x68   :  { %133 = dma.hbm_to_vmem [thread:$0]  %s11921_s10, 256, %s131_s5, [#allocation15]  }
  0x69   :  { %s9499_s28 = smov [#allocation17]   ;;  %s9500_s8 = smov [#allocation20]  }
  0x6a   :  { %s152_s29 = sshll.u32 %s9499_s28, 4  ;;  %s174_s24 = sshll.u32 %s9500_s8, 4  ;;  %s153_s29 = int_to_ptr.vmem [resolvable:$true] %s152_s29  ;;  %s175_s24 = int_to_ptr.vmem [resolvable:$true] %s174_s24 }
  0x6b   :  { %s9117_s2 = scalar_lea.hbm %s11923_s12, 64 }
  0x6c   :  { %p9118_p4 = scmp.ne.s32.totalorder %s11923_s12, %s9117_s2  ;;  %p9121_p5 = scmp.lt.u32.totalorder %s9117_s2, %s11923_s12 }
  0x6e   :  { %p9123_p6 = pnand %p9121_p5, %p9118_p4 }
  0x70   :  { %9126 = shalt.err (!%p9123_p6)
}
  0x71   :  { %s9127_s10 = scalar_lea.vmem %s153_s29, 64  ;;  %p9132_p8 = scmp.lt.s32.totalorder %s153_s29, %s153_s29 }
  0x72   :  { %p9128_p7 = scmp.ne.s32.totalorder %s153_s29, %s9127_s10  ;;  %p9133_p9 = scmp.lt.s32.totalorder %s9127_s10, %s9127_s10 }
  0x74   :  { %p9134_p10 = por %p9133_p9, %p9132_p8 }
  0x76   :  { %p9135_p11 = pnand %p9134_p10, %p9128_p7 }
  0x78   :  { %9138 = shalt.err (!%p9135_p11)
}
  0x79   :  { %155 = dma.hbm_to_vmem [thread:$0]  %s11923_s12, 64, %s153_s29, [#allocation18]  }
  0x7a   :  { %s9139_s8 = scalar_lea.hbm %s11926_s15, 256 }
  0x7b   :  { %p9140_p12 = scmp.ne.s32.totalorder %s11926_s15, %s9139_s8  ;;  %p9143_p13 = scmp.lt.u32.totalorder %s9139_s8, %s11926_s15 }
  0x7d   :  { %p9145_p0 = pnand %p9143_p13, %p9140_p12 }
  0x7f   :  { %9148 = shalt.err (!%p9145_p0)
}
  0x80   :  { %s9149_s0 = scalar_lea.vmem %s175_s24, 256  ;;  %p9154_p2 = scmp.lt.s32.totalorder %s175_s24, %s175_s24 }
  0x81   :  { %p9150_p1 = scmp.ne.s32.totalorder %s175_s24, %s9149_s0  ;;  %p9155_p3 = scmp.lt.s32.totalorder %s9149_s0, %s9149_s0 }
  0x83   :  { %p9156_p4 = por %p9155_p3, %p9154_p2 }
  0x85   :  { %p9157_p5 = pnand %p9156_p4, %p9150_p1 }
  0x87   :  { %9160 = shalt.err (!%p9157_p5)
}
  0x88   :  { %177 = dma.hbm_to_vmem [thread:$0]  %s11926_s15, 256, %s175_s24, [#allocation21]  }
  0x89   :  { %s9501_s3 = smov [#allocation23]   ;;  %s9502_s10 = smov [#allocation2]  }
  0x8a   :  { %s196_s25 = sshll.u32 %s9501_s3, 4  ;;  %s47_s5 = sshll.u32 %s9502_s10, 4  ;;  %s197_s25 = int_to_ptr.vmem [resolvable:$true] %s196_s25  ;;  %s9723_s5 = int_to_ptr.vmem [resolvable:$true] %s47_s5 }
  0x8b   :  { %s9161_s28 = scalar_lea.hbm %s11928_s17, 256 }
  0x8c   :  { %p9162_p6 = scmp.ne.s32.totalorder %s11928_s17, %s9161_s28  ;;  %p9165_p7 = scmp.lt.u32.totalorder %s9161_s28, %s11928_s17 }
  0x8e   :  { %p9167_p8 = pnand %p9165_p7, %p9162_p6 }
  0x90   :  { %9170 = shalt.err (!%p9167_p8)
}
  0x91   :  { %s9171_s15 = scalar_lea.vmem %s197_s25, 256  ;;  %p9176_p10 = scmp.lt.s32.totalorder %s197_s25, %s197_s25 }
  0x92   :  { %p9172_p9 = scmp.ne.s32.totalorder %s197_s25, %s9171_s15  ;;  %p9177_p11 = scmp.lt.s32.totalorder %s9171_s15, %s9171_s15 }
  0x94   :  { %p9178_p12 = por %p9177_p11, %p9176_p10 }
  0x96   :  { %p9179_p13 = pnand %p9178_p12, %p9172_p9 }
  0x98   :  { %9182 = shalt.err (!%p9179_p13)
}
  0x99   :  { %199 = dma.hbm_to_vmem [thread:$0]  %s11928_s17, 256, %s197_s25, [#allocation24]  }
  0x9a   :  { %s11999_s29 = sld [smem:[#allocation74_spill]] }
  0xa0   :  { %s9183_s3 = scalar_lea.hbm %s11999_s29, 1792 }
  0xa1   :  { %p9184_p0 = scmp.ne.s32.totalorder %s11999_s29, %s9183_s3  ;;  %p9187_p1 = scmp.lt.u32.totalorder %s9183_s3, %s11999_s29 }
  0xa3   :  { %p9189_p2 = pnand %p9187_p1, %p9184_p0 }
  0xa5   :  { %9192 = shalt.err (!%p9189_p2)
}
  0xa6   :  { %s9193_s8 = scalar_lea.vmem %s9723_s5, 1792  ;;  %p9198_p4 = scmp.lt.s32.totalorder %s9723_s5, %s9723_s5 }
  0xa7   :  { %p9194_p3 = scmp.ne.s32.totalorder %s9723_s5, %s9193_s8  ;;  %p9199_p5 = scmp.lt.s32.totalorder %s9193_s8, %s9193_s8 }
  0xa9   :  { %p9200_p6 = por %p9199_p5, %p9198_p4 }
  0xab   :  { %p9201_p7 = pnand %p9200_p6, %p9194_p3 }
  0xad   :  { %9204 = shalt.err (!%p9201_p7)
}
  0xae   :  { %s9503_s17 = smov 896   ;;  %s9504_s25 = smov 56  }
  0xaf   :  { %53 = dma.hbm_to_vmem [thread:$0]  %s11999_s29, 1792, %s9723_s5, [#allocation3], %s9503_s17, %s9503_s17, %s9504_s25  }
  0xb0   :  { %s9505_s2 = smov [#allocation7]   ;;  %s9506_s24 = smov [#allocation10]  }
  0xb1   :  { %s75_s15 = sshll.u32 %s9505_s2, 4  ;;  %s98_s30 = sshll.u32 %s9506_s24, 4  ;;  %s76_s15 = int_to_ptr.vmem [resolvable:$true] %s75_s15  ;;  %s99_s30 = int_to_ptr.vmem [resolvable:$true] %s98_s30 }
  0xb2   :  { %s12000_s3 = sld [smem:[#allocation79_spill]] }
  0xb8   :  { %s9205_s10 = scalar_lea.hbm %s12000_s3, 8192 }
  0xb9   :  { %p9206_p8 = scmp.ne.s32.totalorder %s12000_s3, %s9205_s10  ;;  %p9209_p9 = scmp.lt.u32.totalorder %s9205_s10, %s12000_s3 }
  0xbb   :  { %p9211_p10 = pnand %p9209_p9, %p9206_p8 }
  0xbd   :  { %9214 = shalt.err (!%p9211_p10)
}
  0xbe   :  { %s9215_s5 = scalar_lea.vmem %s76_s15, 8192  ;;  %p9220_p12 = scmp.lt.s32.totalorder %s76_s15, %s76_s15 }
  0xbf   :  { %p9216_p11 = scmp.ne.s32.totalorder %s76_s15, %s9215_s5  ;;  %p9221_p13 = scmp.lt.s32.totalorder %s9215_s5, %s9215_s5 }
  0xc1   :  { %p9222_p0 = por %p9221_p13, %p9220_p12 }
  0xc3   :  { %p9223_p1 = pnand %p9222_p0, %p9216_p11 }
  0xc5   :  { %9226 = shalt.err (!%p9223_p1)
}
  0xc6   :  { %81 = dma.hbm_to_vmem [thread:$0]  %s12000_s3, 8192, %s76_s15, [#allocation6], %s9497_s6, %s9497_s6, %s9498_s26  }
  0xc7   :  { %s12001_s27 = sld [smem:[#allocation81_spill]] }
  0xcd   :  { %s9227_s2 = scalar_lea.hbm %s12001_s27, 256 }
  0xce   :  { %p9228_p2 = scmp.ne.s32.totalorder %s12001_s27, %s9227_s2  ;;  %p9231_p3 = scmp.lt.u32.totalorder %s9227_s2, %s12001_s27 }
  0xd0   :  { %p9233_p4 = pnand %p9231_p3, %p9228_p2 }
  0xd2   :  { %9236 = shalt.err (!%p9233_p4)
}
  0xd3   :  { %s9237_s4 = scalar_lea.vmem %s99_s30, 256  ;;  %p9242_p6 = scmp.lt.s32.totalorder %s99_s30, %s99_s30 }
  0xd4   :  { %p9238_p5 = scmp.ne.s32.totalorder %s99_s30, %s9237_s4  ;;  %p9243_p7 = scmp.lt.s32.totalorder %s9237_s4, %s9237_s4 }
  0xd6   :  { %p9244_p8 = por %p9243_p7, %p9242_p6 }
  0xd8   :  { %p9245_p9 = pnand %p9244_p8, %p9238_p5 }
  0xda   :  { %9248 = shalt.err (!%p9245_p9)
}
  0xdb   :  { %101 = dma.hbm_to_vmem [thread:$0]  %s12001_s27, 256, %s99_s30, [#allocation9]  }
  0xdc   :  { %s9507_s7 = smov [#allocation13]   ;;  %s9508_s8 = smov [#allocation16]  }
  0xdd   :  { %s120_s28 = sshll.u32 %s9507_s7, 4  ;;  %s139_s5 = sshll.u32 %s9508_s8, 4  ;;  %s121_s28 = int_to_ptr.vmem [resolvable:$true] %s120_s28  ;;  %s9781_s5 = int_to_ptr.vmem [resolvable:$true] %s139_s5 }
  0xde   :  { %s9249_s25 = scalar_lea.hbm %s11920_s9, 256 }
  0xdf   :  { %p9250_p10 = scmp.ne.s32.totalorder %s11920_s9, %s9249_s25  ;;  %p9253_p11 = scmp.lt.u32.totalorder %s9249_s25, %s11920_s9 }
  0xe1   :  { %p9255_p12 = pnand %p9253_p11, %p9250_p10 }
  0xe3   :  { %9258 = shalt.err (!%p9255_p12)
}
  0xe4   :  { %s9259_s30 = scalar_lea.vmem %s121_s28, 256  ;;  %p9264_p0 = scmp.lt.s32.totalorder %s121_s28, %s121_s28 }
  0xe5   :  { %p9260_p13 = scmp.ne.s32.totalorder %s121_s28, %s9259_s30  ;;  %p9265_p1 = scmp.lt.s32.totalorder %s9259_s30, %s9259_s30 }
  0xe7   :  { %p9266_p2 = por %p9265_p1, %p9264_p0 }
  0xe9   :  { %p9267_p3 = pnand %p9266_p2, %p9260_p13 }
  0xeb   :  { %9270 = shalt.err (!%p9267_p3)
}
  0xec   :  { %123 = dma.hbm_to_vmem [thread:$0]  %s11920_s9, 256, %s121_s28, [#allocation12]  }
  0xed   :  { %s9271_s15 = scalar_lea.hbm %s11922_s11, 8192 }
  0xee   :  { %p9272_p4 = scmp.ne.s32.totalorder %s11922_s11, %s9271_s15  ;;  %p9275_p5 = scmp.lt.u32.totalorder %s9271_s15, %s11922_s11 }
  0xf0   :  { %p9277_p6 = pnand %p9275_p5, %p9272_p4 }
  0xf2   :  { %9280 = shalt.err (!%p9277_p6)
}
  0xf3   :  { %s9281_s17 = scalar_lea.vmem %s9781_s5, 8192  ;;  %p9286_p8 = scmp.lt.s32.totalorder %s9781_s5, %s9781_s5 }
  0xf4   :  { %p9282_p7 = scmp.ne.s32.totalorder %s9781_s5, %s9281_s17  ;;  %p9287_p9 = scmp.lt.s32.totalorder %s9281_s17, %s9281_s17 }
  0xf6   :  { %p9288_p10 = por %p9287_p9, %p9286_p8 }
  0xf8   :  { %p9289_p11 = pnand %p9288_p10, %p9282_p7 }
  0xfa   :  { %9292 = shalt.err (!%p9289_p11)
}
  0xfb   :  { %s9509_s9 = smov 256   ;;  %s9510_s28 = smov 16  }
  0xfc   :  { %145 = dma.hbm_to_vmem [thread:$0]  %s11922_s11, 8192, %s9781_s5, [#allocation15], %s9509_s9, %s9509_s9, %s9510_s28  }
  0xfd   :  { %s9511_s2 = smov [#allocation19]   ;;  %s9512_s0 = smov [#allocation22]  }
  0xfe   :  { %s164_s24 = sshll.u32 %s9511_s2, 4  ;;  %s183_s30 = sshll.u32 %s9512_s0, 4  ;;  %s165_s24 = int_to_ptr.vmem [resolvable:$true] %s164_s24  ;;  %s9815_s30 = int_to_ptr.vmem [resolvable:$true] %s183_s30 }
  0xff   :  { %s9293_s10 = scalar_lea.hbm %s11925_s14, 256 }
 0x100   :  { %p9294_p12 = scmp.ne.s32.totalorder %s11925_s14, %s9293_s10  ;;  %p9297_p13 = scmp.lt.u32.totalorder %s9293_s10, %s11925_s14 }
 0x102   :  { %p9299_p0 = pnand %p9297_p13, %p9294_p12 }
 0x104   :  { %9302 = shalt.err (!%p9299_p0)
}
 0x105   :  { %s9303_s11 = scalar_lea.vmem %s165_s24, 256  ;;  %p9308_p2 = scmp.lt.s32.totalorder %s165_s24, %s165_s24 }
 0x106   :  { %p9304_p1 = scmp.ne.s32.totalorder %s165_s24, %s9303_s11  ;;  %p9309_p3 = scmp.lt.s32.totalorder %s9303_s11, %s9303_s11 }
 0x108   :  { %p9310_p4 = por %p9309_p3, %p9308_p2 }
 0x10a   :  { %p9311_p5 = pnand %p9310_p4, %p9304_p1 }
 0x10c   :  { %9314 = shalt.err (!%p9311_p5)
}
 0x10d   :  { %167 = dma.hbm_to_vmem [thread:$0]  %s11925_s14, 256, %s165_s24, [#allocation18]  }
 0x10e   :  { %s9315_s25 = scalar_lea.hbm %s11927_s16, 32768 }
 0x10f   :  { %p9316_p6 = scmp.ne.s32.totalorder %s11927_s16, %s9315_s25  ;;  %p9319_p7 = scmp.lt.u32.totalorder %s9315_s25, %s11927_s16 }
 0x111   :  { %p9321_p8 = pnand %p9319_p7, %p9316_p6 }
 0x113   :  { %9324 = shalt.err (!%p9321_p8)
}
 0x114   :  { %s9325_s12 = scalar_lea.vmem %s9815_s30, 32768  ;;  %p9330_p10 = scmp.lt.s32.totalorder %s9815_s30, %s9815_s30 }
 0x115   :  { %p9326_p9 = scmp.ne.s32.totalorder %s9815_s30, %s9325_s12  ;;  %p9331_p11 = scmp.lt.s32.totalorder %s9325_s12, %s9325_s12 }
 0x117   :  { %p9332_p12 = por %p9331_p11, %p9330_p10 }
 0x119   :  { %p9333_p13 = pnand %p9332_p12, %p9326_p9 }
 0x11b   :  { %9336 = shalt.err (!%p9333_p13)
}
 0x11c   :  { %189 = dma.hbm_to_vmem [thread:$0]  %s11927_s16, 32768, %s9815_s30, [#allocation21], %s9497_s6, %s9497_s6, %s9498_s26  }
 0x11d   :  { %s9513_s10 = smov [#allocation25]   ;;  %s9514_s15 = smov [#allocation26]  }
 0x11e   :  { %s206_s4 = sshll.u32 %s9513_s10, 4  ;;  %s218_s3 = sshll.u32 %s9514_s15, 4  ;;  %s207_s4 = int_to_ptr.vmem [resolvable:$true] %s206_s4  ;;  %s219_s3 = int_to_ptr.vmem [resolvable:$true] %s218_s3 }
 0x11f   :  { %s9337_s5 = scalar_lea.hbm %s11929_s18, 256 }
 0x120   :  { %p9338_p0 = scmp.ne.s32.totalorder %s11929_s18, %s9337_s5  ;;  %p9341_p1 = scmp.lt.u32.totalorder %s9337_s5, %s11929_s18 }
 0x122   :  { %p9343_p2 = pnand %p9341_p1, %p9338_p0 }
 0x124   :  { %9346 = shalt.err (!%p9343_p2)
}
 0x125   :  { %s9347_s16 = scalar_lea.vmem %s207_s4, 256  ;;  %p9352_p4 = scmp.lt.s32.totalorder %s207_s4, %s207_s4 }
 0x126   :  { %p9348_p3 = scmp.ne.s32.totalorder %s207_s4, %s9347_s16  ;;  %p9353_p5 = scmp.lt.s32.totalorder %s9347_s16, %s9347_s16 }
 0x128   :  { %p9354_p6 = por %p9353_p5, %p9352_p4 }
 0x12a   :  { %p9355_p7 = pnand %p9354_p6, %p9348_p3 }
 0x12c   :  { %9358 = shalt.err (!%p9355_p7)
}
 0x12d   :  { %209 = dma.hbm_to_vmem [thread:$0]  %s11929_s18, 256, %s207_s4, [#allocation24]  }
 0x12e   :  { %s9359_s2 = scalar_lea.hbm %s11931_s20, 32 }
 0x12f   :  { %p9360_p8 = scmp.ne.s32.totalorder %s11931_s20, %s9359_s2  ;;  %p9363_p9 = scmp.lt.u32.totalorder %s9359_s2, %s11931_s20 }
 0x131   :  { %p9365_p10 = pnand %p9363_p9, %p9360_p8 }
 0x133   :  { %9368 = shalt.err (!%p9365_p10)
}
 0x134   :  { %s9369_s24 = scalar_lea.vmem %s219_s3, 32  ;;  %p9374_p12 = scmp.lt.s32.totalorder %s219_s3, %s219_s3 }
 0x135   :  { %p9370_p11 = scmp.ne.s32.totalorder %s219_s3, %s9369_s24  ;;  %p9375_p13 = scmp.lt.s32.totalorder %s9369_s24, %s9369_s24 }
 0x137   :  { %p9376_p0 = por %p9375_p13, %p9374_p12 }
 0x139   :  { %p9377_p1 = pnand %p9376_p0, %p9370_p11 }
 0x13b   :  { %9380 = shalt.err (!%p9377_p1)
}
 0x13c   :  { %221 = dma.hbm_to_vmem [thread:$0]  %s11931_s20, 32, %s219_s3, [#allocation27]  }
 0x13d   :  { %9469 = dma.done.wait [#allocation3], 1792  }
 0x13e   :  { %9470 = vsyncadd [#allocation3], 4294965504 }
 0x13f   :  { %9471 = dma.done.wait [#allocation6], 8256  }
 0x140   :  { %9472 = vsyncadd [#allocation6], 4294959040 }
 0x141   :  { %9473 = dma.done.wait [#allocation9], 512  }
 0x142   :  { %9474 = vsyncadd [#allocation9], 4294966784 }
 0x143   :  { %9475 = dma.done.wait [#allocation12], 33024  }
 0x144   :  { %9476 = vsyncadd [#allocation12], 4294934272 }
 0x145   :  { %9477 = dma.done.wait [#allocation15], 8448  }
 0x146   :  { %9478 = vsyncadd [#allocation15], 4294958848 }
 0x147   :  { %9479 = dma.done.wait [#allocation18], 320  }
 0x148   :  { %9480 = vsyncadd [#allocation18], 4294966976 }
 0x149   :  { %9481 = dma.done.wait [#allocation21], 33024  }
 0x14a   :  { %9482 = vsyncadd [#allocation21], 4294934272 }
 0x14b   :  { %9483 = dma.done.wait [#allocation24], 512  }
 0x14c   :  { %9484 = vsyncadd [#allocation24], 4294966784 }
 0x14d   :  { %9485 = dma.done.wait [#allocation27], 32  }
 0x14e   :  { %9486 = vsyncadd [#allocation27], 4294967264  ;;  %s12002_s15 = sld [smem:[#allocation75_spill]]  ;;  %v272_v24 = vld [vmem:[#allocation2 + $0x8] sm:$0xff]  ;;  %v279_v25 = vld [vmem:[#allocation2 + $0x40] sm:$0xff]  ;;  %vm978_vm0 = vcmask 130048  }
 0x14f   :  { %v286_v30 = vpack.c.bf16 %v279_v25, %v272_v24  ;;  %s12003_s17 = sld [smem:[#allocation77_spill]]  ;;  %s12004_s3 = sld [smem:[#allocation78_spill]]  ;;  %vm1412_vm1 = vcmask 80896   ;;  %vm4823_vm2 = vcmask 1044480  }
 0x150   :  { %s9517_s12 = smov [#allocation29]  }
 0x151   :  { %1014 = vmatprep.mubr.bf16.mxu0 %v286_v30  ;;  %v274_v30 = vld [vmem:[#allocation2 + $0x18] sm:$0xff]  ;;  %s8449_s14 = sshll.u32 %s9517_s12, 4  ;;  %s8450_s14 = int_to_ptr.vmem [resolvable:$true] %s8449_s14 }
 0x152   :  { %s9381_s24 = scalar_lea.vmem %s8450_s14, 256  ;;  %p9386_p3 = scmp.lt.s32.totalorder %s8450_s14, %s8450_s14 }
 0x153   :  { %p9382_p2 = scmp.ne.s32.totalorder %s8450_s14, %s9381_s24  ;;  %p9387_p4 = scmp.lt.s32.totalorder %s9381_s24, %s9381_s24 }
 0x154   :  { %v292_v0 = vld [vmem:[%s12002_s15] sm:$0xff]   ;;  %v294_v1 = vld [vmem:[%s12002_s15 + $0x8] sm:$0xff]   ;;  %v296_v2 = vld [vmem:[%s12002_s15 + $0x10] sm:$0xff]  }
 0x155   :  { %v390_v3 = vunpack.c.l.s8.bf16 %v292_v0  ;;  %v391_v4 = vunpack.c.h.s8.bf16 %v292_v0  ;;  %v392_v5 = vunpack.c.l.s8.bf16 %v294_v1  ;;  %v393_v6 = vunpack.c.h.s8.bf16 %v294_v1  ;;  %v298_v12 = vld [vmem:[%s12002_s15 + $0x18] sm:$0xff]   ;;  %v300_v17 = vld [vmem:[%s12002_s15 + $0x20] sm:$0xff]   ;;  %v302_v22 = vld [vmem:[%s12002_s15 + $0x28] sm:$0xff]   ;;  %p9388_p5 = por %p9387_p4, %p9386_p3 }
 0x156   :  { %v394_v7 = vunpack.c.l.s8.bf16 %v296_v2  ;;  %v395_v11 = vunpack.c.h.s8.bf16 %v296_v2  ;;  %v396_v15 = vunpack.c.l.s8.bf16 %v298_v12  ;;  %v397_v16 = vunpack.c.h.s8.bf16 %v298_v12  ;;  %v304_v29 = vld [vmem:[%s12002_s15 + $0x30] sm:$0xff]   ;;  %v306_v35 = vld [vmem:[%s12002_s15 + $0x38] sm:$0xff]   ;;  %v308_v40 = vld [vmem:[%s12002_s15 + $0x40] sm:$0xff]  }
 0x157   :  { %v8505_v8 = vcombine.high %v390_v3, %v391_v4  ;;  %v8504_v9 = vcombine.low %v390_v3, %v391_v4  ;;  %v8507_v10 = vcombine.high %v392_v5, %v393_v6  ;;  %v8506_v13 = vcombine.low %v392_v5, %v393_v6  ;;  %v310_v45 = vld [vmem:[%s12002_s15 + $0x48] sm:$0xff]   ;;  %v312_v50 = vld [vmem:[%s12002_s15 + $0x50] sm:$0xff]   ;;  %v314_v55 = vld [vmem:[%s12002_s15 + $0x58] sm:$0xff]   ;;  %p9389_p6 = pnand %p9388_p5, %p9382_p2 }
 0x158   :  { %v8509_v14 = vcombine.high %v394_v7, %v395_v11  ;;  %v8508_v18 = vcombine.low %v394_v7, %v395_v11  ;;  %v8511_v19 = vcombine.high %v396_v15, %v397_v16  ;;  %v398_v20 = vunpack.c.l.s8.bf16 %v300_v17  ;;  %v316_v60 = vld [vmem:[%s12002_s15 + $0x60] sm:$0xff]   ;;  %v318_v1 = vld [vmem:[%s12002_s15 + $0x68] sm:$0xff]   ;;  %v320_v6 = vld [vmem:[%s12002_s15 + $0x70] sm:$0xff]  }
 0x159   :  { %982 = vmatprep.subr.bf16.mxu0 %v8505_v8  ;;  %v399_v21 = vunpack.c.h.s8.bf16 %v300_v17  ;;  %v8510_v23 = vcombine.low %v396_v15, %v397_v16  ;;  %v400_v27 = vunpack.c.l.s8.bf16 %v302_v22  ;;  %v401_v28 = vunpack.c.h.s8.bf16 %v302_v22  ;;  %v322_v11 = vld [vmem:[%s12002_s15 + $0x78] sm:$0xff]   ;;  %v324_v16 = vld [vmem:[%s12002_s15 + $0x80] sm:$0xff]   ;;  %v326_v24 = vld [vmem:[%s12002_s15 + $0x88] sm:$0xff]  }
 0x15a   :  { %983 = vmatpush1.bf16.msra.mxu0 %v8504_v9  ;;  %v402_v33 = vunpack.c.l.s8.bf16 %v304_v29  ;;  %v403_v34 = vunpack.c.h.s8.bf16 %v304_v29  ;;  %v404_v38 = vunpack.c.l.s8.bf16 %v306_v35  ;;  %v405_v39 = vunpack.c.h.s8.bf16 %v306_v35  ;;  %v388_v17 = vld [vmem:[%s12002_s15 + $0x180] sm:$0xff]   ;;  %v278_v29 = vld [vmem:[#allocation2 + $0x38] sm:$0xff]  ;;  %v277_v35 = vld [vmem:[#allocation2 + $0x30] sm:$0xff] }
 0x15b   :  { %984 = vmatprep.subr.bf16.mxu0 %v8507_v10  ;;  %v8513_v26 = vcombine.high %v398_v20, %v399_v21  ;;  %v8512_v31 = vcombine.low %v398_v20, %v399_v21  ;;  %v8515_v32 = vcombine.high %v400_v27, %v401_v28  ;;  %v8514_v36 = vcombine.low %v400_v27, %v401_v28  ;;  %v271_v28 = vld [vmem:[#allocation2] sm:$0xff] }
 0x15c   :  { %v8517_v37 = vcombine.high %v402_v33, %v403_v34  ;;  %v8516_v41 = vcombine.low %v402_v33, %v403_v34  ;;  %v8519_v42 = vcombine.high %v404_v38, %v405_v39  ;;  %v406_v43 = vunpack.c.l.s8.bf16 %v308_v40  ;;  %v281_v34 = vld [vmem:[#allocation2 + $0x50] sm:$0xff] }
 0x15d   :  { %v407_v44 = vunpack.c.h.s8.bf16 %v308_v40  ;;  %v8518_v46 = vcombine.low %v404_v38, %v405_v39  ;;  %v408_v48 = vunpack.c.l.s8.bf16 %v310_v45  ;;  %v409_v49 = vunpack.c.h.s8.bf16 %v310_v45 }
 0x15e   :  { %985 = vmatpush1.bf16.msra.mxu0 %v8506_v13  ;;  %v410_v53 = vunpack.c.l.s8.bf16 %v312_v50  ;;  %v411_v54 = vunpack.c.h.s8.bf16 %v312_v50  ;;  %v412_v58 = vunpack.c.l.s8.bf16 %v314_v55  ;;  %v413_v59 = vunpack.c.h.s8.bf16 %v314_v55 }
 0x15f   :  { %986 = vmatprep.subr.bf16.mxu0 %v8509_v14  ;;  %v8521_v47 = vcombine.high %v406_v43, %v407_v44  ;;  %v8520_v51 = vcombine.low %v406_v43, %v407_v44  ;;  %v8523_v52 = vcombine.high %v408_v48, %v409_v49  ;;  %v8522_v56 = vcombine.low %v408_v48, %v409_v49  ;;  %v1417_v48 = vld [vmem:[#allocation7] sm:$0xff] }
 0x160   :  { %v8525_v57 = vcombine.high %v410_v53, %v411_v54  ;;  %v8524_v61 = vcombine.low %v410_v53, %v411_v54  ;;  %v8527_v62 = vcombine.high %v412_v58, %v413_v59  ;;  %v414_v63 = vunpack.c.l.s8.bf16 %v316_v60 }
 0x161   :  { %v415_v0 = vunpack.c.h.s8.bf16 %v316_v60  ;;  %v8526_v2 = vcombine.low %v412_v58, %v413_v59  ;;  %v416_v4 = vunpack.c.l.s8.bf16 %v318_v1  ;;  %v417_v5 = vunpack.c.h.s8.bf16 %v318_v1  ;;  %v334_v1 = vld [vmem:[%s12002_s15 + $0xa8] sm:$0xff]  }
 0x162   :  { %987 = vmatpush1.bf16.msra.mxu0 %v8508_v18  ;;  %v418_v9 = vunpack.c.l.s8.bf16 %v320_v6  ;;  %v419_v10 = vunpack.c.h.s8.bf16 %v320_v6  ;;  %v420_v14 = vunpack.c.l.s8.bf16 %v322_v11  ;;  %v421_v15 = vunpack.c.h.s8.bf16 %v322_v11 }
 0x163   :  { %988 = vmatprep.subr.bf16.mxu0 %v8511_v19  ;;  %v8529_v3 = vcombine.high %v414_v63, %v415_v0  ;;  %v8528_v7 = vcombine.low %v414_v63, %v415_v0  ;;  %v8531_v8 = vcombine.high %v416_v4, %v417_v5  ;;  %v8530_v12 = vcombine.low %v416_v4, %v417_v5 }
 0x164   :  { %v8533_v13 = vcombine.high %v418_v9, %v419_v10  ;;  %v8532_v18 = vcombine.low %v418_v9, %v419_v10  ;;  %v486_v19 = vunpack.c.l.s8.bf16 %v388_v17  ;;  %v487_v20 = vunpack.c.h.s8.bf16 %v388_v17  ;;  %v336_v9 = vld [vmem:[%s12002_s15 + $0xb0] sm:$0xff]   ;;  %v338_v17 = vld [vmem:[%s12002_s15 + $0xb8] sm:$0xff]  }
 0x165   :  { %v8535_v21 = vcombine.high %v420_v14, %v421_v15  ;;  %v422_v22 = vunpack.c.l.s8.bf16 %v324_v16  ;;  %v8534_v27 = vcombine.low %v420_v14, %v421_v15  ;;  %v425_v33 = vunpack.c.h.s8.bf16 %v326_v24 }
 0x166   :  { %989 = vmatpush1.bf16.msra.mxu0 %v8510_v23  ;;  %v423_v23 = vunpack.c.h.s8.bf16 %v324_v16  ;;  %v8601_v25 = vcombine.high %v486_v19, %v487_v20  ;;  %v11946_v38 = vmov 0   ;;  %v285_v40 = vpack.c.bf16 %v278_v29, %v271_v28  ;;  %v1441_v29 = vld [vmem:[#allocation7 + $0xc0] sm:$0xff] }
 0x167   :  { %990 = vmatprep.subr.bf16.mxu0 %v8513_v26  ;;  %v8600_v26 = vcombine.low %v486_v19, %v487_v20  ;;  %1143 = vmatprep.mubr.bf16.mxu1 %v11946_v38  ;;  %v1489_v58 = vunpack.c.h.s8.bf16 %v1417_v48  ;;  %v432_v6 = vunpack.c.l.s8.bf16 %v334_v1  ;;  %v434_v15 = vunpack.c.l.s8.bf16 %v336_v9 }
 0x168   :  { %1111 = vmatprep.subr.bf16.mxu1 %v8601_v25  ;;  %v435_v16 = vunpack.c.h.s8.bf16 %v336_v9  ;;  %v340_v25 = vld [vmem:[%s12002_s15 + $0xc0] sm:$0xff]  }
 0x169   :  { %1112 = vmatpush1.bf16.msra.mxu1 %v8600_v26  ;;  %v9967_v9 = vld [vmem:[#allocation7 + $0x188] sm:$0xff] }
 0x16a   :  { %991 = vmatpush1.bf16.msra.mxu0 %v8512_v31  ;;  %v8537_v31 = vcombine.high %v422_v22, %v423_v23 }
 0x16b   :  { %992 = vmatprep.subr.bf16.mxu0 %v8515_v32  ;;  %v424_v32 = vunpack.c.l.s8.bf16 %v326_v24  ;;  %v1442_v24 = vld [vmem:[#allocation7 + $0xc8] sm:$0xff] }
 0x16c   :  { %v1530_v28 = vunpack.c.l.s8.bf16 %v1442_v24 }
 0x16d   :  { %v8539_v43 = vcombine.high %v424_v32, %v425_v33  ;;  %v8538_v49 = vcombine.low %v424_v32, %v425_v33  ;;  %v439_v32 = vunpack.c.h.s8.bf16 %v340_v25  ;;  %v342_v33 = vld [vmem:[%s12002_s15 + $0xc8] sm:$0xff]  }
 0x16e   :  { %993 = vmatpush1.bf16.msra.mxu0 %v8514_v36  ;;  %v284_v36 = vld [vmem:[#allocation2 + $0x68] sm:$0xff] }
 0x16f   :  { %994 = vmatprep.subr.bf16.mxu0 %v8517_v37  ;;  %v328_v37 = vld [vmem:[%s12002_s15 + $0x90] sm:$0xff]   ;;  %v291_v39 = vpack.c.bf16 %v284_v36, %v277_v35  ;;  %v1538_v36 = vunpack.c.h.s8.bf16 %v1442_v24 }
 0x170   :  { %v426_v44 = vunpack.c.l.s8.bf16 %v328_v37  ;;  %v427_v45 = vunpack.c.h.s8.bf16 %v328_v37 }
 0x171   :  { %8602 = vmatmul.mubr.msk.bf16.vlgmr.msra.gmra.mrb[0].mxu1 %vm978_vm0, %v291_v39  ;;  %v440_v39 = vunpack.c.l.s8.bf16 %v342_v33 }
 0x172   :  { %995 = vmatpush1.bf16.msra.mxu0 %v8516_v41  ;;  %v8536_v41 = vcombine.low %v422_v22, %v423_v23  ;;  %v8541_v53 = vcombine.high %v426_v44, %v427_v45  ;;  %v8540_v59 = vcombine.low %v426_v44, %v427_v45  ;;  %v436_v22 = vunpack.c.l.s8.bf16 %v338_v17 }
 0x173   :  { %996 = vmatprep.subr.bf16.mxu0 %v8519_v42  ;;  %v288_v42 = vpack.c.bf16 %v281_v34, %v274_v30  ;;  %v437_v23 = vunpack.c.h.s8.bf16 %v338_v17  ;;  %v1529_v34 = vunpack.c.l.s8.bf16 %v1441_v29  ;;  %v354_v17 = vld [vmem:[%s12002_s15 + $0xf8] sm:$0xff]  }
 0x175   :  { %v8551_v30 = vcombine.high %v436_v22, %v437_v23  ;;  %v8550_v35 = vcombine.low %v436_v22, %v437_v23  ;;  %v356_v22 = vld [vmem:[%s12002_s15 + $0x100] sm:$0xff]  }
 0x176   :  { %997 = vmatpush1.bf16.msra.mxu0 %v8518_v46  ;;  %v330_v46 = vld [vmem:[%s12002_s15 + $0x98] sm:$0xff]  }
 0x177   :  { %998 = vmatprep.subr.bf16.mxu0 %v8521_v47  ;;  %v1418_v47 = vld [vmem:[#allocation7 + $0x8] sm:$0xff]  ;;  %v428_v54 = vunpack.c.l.s8.bf16 %v330_v46  ;;  %v429_v55 = vunpack.c.h.s8.bf16 %v330_v46  ;;  %v1449_v46 = vld [vmem:[#allocation7 + $0x100] sm:$0xff] }
 0x178   :  { %v1482_v50 = vunpack.c.l.s8.bf16 %v1418_v47 }
 0x17a   :  { %999 = vmatpush1.bf16.msra.mxu0 %v8520_v51  ;;  %v1481_v51 = vunpack.c.l.s8.bf16 %v1417_v48  ;;  %1609 = vmatprep.subr.bf16.mxu1 %v1482_v50  ;;  %v346_v50 = vld [vmem:[%s12002_s15 + $0xd8] sm:$0xff]  }
 0x17b   :  { %1000 = vmatprep.subr.bf16.mxu0 %v8523_v52  ;;  %v1490_v52 = vunpack.c.h.s8.bf16 %v1418_v47 }
 0x17c   :  { %1610 = vmatpush1.bf16.msra.mxu1 %v1481_v51  ;;  %v1545_v51 = vunpack.c.l.s8.bf16 %v1449_v46 }
 0x17d   :  { %1611 = vmatprep.subr.bf16.mxu1 %v1490_v52 }
 0x17e   :  { %1001 = vmatpush1.bf16.msra.mxu0 %v8522_v56  ;;  %v1426_v56 = vld [vmem:[#allocation7 + $0x48] sm:$0xff] }
 0x17f   :  { %1002 = vmatprep.subr.bf16.mxu0 %v8525_v57  ;;  %v332_v57 = vld [vmem:[%s12002_s15 + $0xa0] sm:$0xff]   ;;  %v1498_v60 = vunpack.c.l.s8.bf16 %v1426_v56  ;;  %v1506_v4 = vunpack.c.h.s8.bf16 %v1426_v56  ;;  %v445_v56 = vunpack.c.h.s8.bf16 %v346_v50 }
 0x180   :  { %v430_v63 = vunpack.c.l.s8.bf16 %v332_v57  ;;  %v431_v0 = vunpack.c.h.s8.bf16 %v332_v57  ;;  %1612 = vmatpush1.bf16.msra.mxu1 %v1489_v58  ;;  %v1458_v57 = vld [vmem:[#allocation7 + $0x148] sm:$0xff] }
 0x181   :  { %1613 = vmatprep.subr.bf16.mxu1 %v1498_v60  ;;  %v348_v58 = vld [vmem:[%s12002_s15 + $0xe0] sm:$0xff]  }
 0x182   :  { %1003 = vmatpush1.bf16.msra.mxu0 %v8524_v61  ;;  %v1425_v61 = vld [vmem:[#allocation7 + $0x40] sm:$0xff]  ;;  %v8545_v5 = vcombine.high %v430_v63, %v431_v0  ;;  %v8544_v11 = vcombine.low %v430_v63, %v431_v0  ;;  %v446_v0 = vunpack.c.l.s8.bf16 %v348_v58 }
 0x183   :  { %1004 = vmatprep.subr.bf16.mxu0 %v8527_v62  ;;  %v8543_v62 = vcombine.high %v428_v54, %v429_v55  ;;  %v1505_v10 = vunpack.c.h.s8.bf16 %v1425_v61 }
 0x186   :  { %1005 = vmatpush1.bf16.msra.mxu0 %v8526_v2  ;;  %v1497_v2 = vunpack.c.l.s8.bf16 %v1425_v61  ;;  %v1562_v61 = vunpack.c.l.s8.bf16 %v1458_v57 }
 0x187   :  { %1006 = vmatprep.subr.bf16.mxu0 %v8529_v3  ;;  %v8542_v3 = vcombine.low %v428_v54, %v429_v55  ;;  %v444_v55 = vunpack.c.l.s8.bf16 %v346_v50 }
 0x188   :  { %1614 = vmatpush1.bf16.msra.mxu1 %v1497_v2  ;;  %v350_v2 = vld [vmem:[%s12002_s15 + $0xe8] sm:$0xff]  }
 0x189   :  { %1615 = vmatprep.subr.bf16.mxu1 %v1506_v4  ;;  %v8559_v63 = vcombine.high %v444_v55, %v445_v56  ;;  %v8558_v4 = vcombine.low %v444_v55, %v445_v56 }
 0x18a   :  { %1007 = vmatpush1.bf16.msra.mxu0 %v8528_v7  ;;  %v433_v7 = vunpack.c.h.s8.bf16 %v334_v1  ;;  %v447_v1 = vunpack.c.h.s8.bf16 %v348_v58 }
 0x18b   :  { %1008 = vmatprep.subr.bf16.mxu0 %v8531_v8  ;;  %v1434_v8 = vld [vmem:[#allocation7 + $0x88] sm:$0xff] }
 0x18c   :  { %v8547_v14 = vcombine.high %v432_v6, %v433_v7  ;;  %1616 = vmatpush1.bf16.msra.mxu1 %v1505_v10  ;;  %v8546_v19 = vcombine.low %v432_v6, %v433_v7  ;;  %v1522_v20 = vunpack.c.h.s8.bf16 %v1434_v8  ;;  %v8561_v6 = vcombine.high %v446_v0, %v447_v1  ;;  %v352_v10 = vld [vmem:[%s12002_s15 + $0xf0] sm:$0xff]  }
 0x18d   :  { %v448_v7 = vunpack.c.l.s8.bf16 %v350_v2 }
 0x18e   :  { %1009 = vmatpush1.bf16.msra.mxu0 %v8530_v12  ;;  %v1514_v12 = vunpack.c.l.s8.bf16 %v1434_v8  ;;  %v449_v8 = vunpack.c.h.s8.bf16 %v350_v2 }
 0x18f   :  { %1010 = vmatprep.subr.bf16.mxu0 %v8533_v13  ;;  %v1433_v13 = vld [vmem:[#allocation7 + $0x80] sm:$0xff] }
 0x190   :  { %1617 = vmatprep.subr.bf16.mxu1 %v1514_v12  ;;  %v1521_v26 = vunpack.c.h.s8.bf16 %v1433_v13  ;;  %v8560_v12 = vcombine.low %v446_v0, %v447_v1  ;;  %v370_v0 = vld [vmem:[%s12002_s15 + $0x138] sm:$0xff]  }
 0x191   :  { %v10000_v1 = vld [vmem:[#allocation7 + $0x180] sm:$0xff] }
 0x192   :  { %1011 = vmatpush1.bf16.msra.mxu0 %v8532_v18  ;;  %v1513_v18 = vunpack.c.l.s8.bf16 %v1433_v13  ;;  %v1578_v13 = vunpack.c.l.s8.bf16 %v9967_v9 }
 0x193   :  { %1012 = vmatprep.subr.bf16.mxu0 %v8535_v21  ;;  %v8549_v21 = vcombine.high %v434_v15, %v435_v16 }
 0x194   :  { %1618 = vmatpush1.bf16.msra.mxu1 %v1513_v18  ;;  %v8562_v18 = vcombine.low %v448_v7, %v449_v8 }
 0x195   :  { %1619 = vmatprep.subr.bf16.mxu1 %v1522_v20  ;;  %v452_v20 = vunpack.c.l.s8.bf16 %v354_v17 }
 0x196   :  { %1013 = vmatpush1.bf16.msra.mxu0 %v8534_v27  ;;  %v8548_v27 = vcombine.low %v434_v15, %v435_v16  ;;  %v450_v15 = vunpack.c.l.s8.bf16 %v352_v10  ;;  %v451_v16 = vunpack.c.h.s8.bf16 %v352_v10 }
 0x197   :  { %1025 = vmatprep.subr.bf16.mxu0 %v8537_v31  ;;  %v438_v31 = vunpack.c.l.s8.bf16 %v340_v25  ;;  %v454_v25 = vunpack.c.l.s8.bf16 %v356_v22 }
 0x198   :  { %1620 = vmatpush1.bf16.msra.mxu1 %v1521_v26  ;;  %v8564_v23 = vcombine.low %v450_v15, %v451_v16  ;;  %v455_v26 = vunpack.c.h.s8.bf16 %v356_v22 }
 0x199   :  { %1015 = vmatmul.mubr.bf16.vlgmr.msra.gmra.mrb[0].mxu0 %v285_v40  ;;  %1621 = vmatprep.subr.bf16.mxu1 %v1530_v28  ;;  %v8553_v37 = vcombine.high %v438_v31, %v439_v32  ;;  %v441_v40 = vunpack.c.h.s8.bf16 %v342_v33  ;;  %v8552_v44 = vcombine.low %v438_v31, %v439_v32 }
 0x19a   :  { %1026 = vmatpush1.bf16.msra.mxu0 %v8536_v41  ;;  %1057 = vmatprep.mubr.bf16.mxu0 %v288_v42  ;;  %v1450_v41 = vld [vmem:[#allocation7 + $0x108] sm:$0xff]  ;;  %v344_v42 = vld [vmem:[%s12002_s15 + $0xd0] sm:$0xff]   ;;  %v8569_v31 = vcombine.high %v454_v25, %v455_v26 }
 0x19b   :  { %1027 = vmatprep.subr.bf16.mxu0 %v8539_v43  ;;  %v1537_v43 = vunpack.c.h.s8.bf16 %v1441_v29  ;;  %v1546_v45 = vunpack.c.l.s8.bf16 %v1450_v41  ;;  %v8555_v47 = vcombine.high %v440_v39, %v441_v40  ;;  %v442_v48 = vunpack.c.l.s8.bf16 %v344_v42  ;;  %v273_v29 = vld [vmem:[#allocation2 + $0x10] sm:$0xff] }
 0x19c   :  { %1622 = vmatpush1.bf16.msra.mxu1 %v1529_v34  ;;  %v8554_v52 = vcombine.low %v440_v39, %v441_v40  ;;  %v276_v34 = vld [vmem:[#allocation2 + $0x28] sm:$0xff]  ;;  %v8568_v39 = vcombine.low %v454_v25, %v455_v26 }
 0x19d   :  { %1623 = vmatprep.subr.bf16.mxu1 %v1538_v36  ;;  %v360_v36 = vld [vmem:[%s12002_s15 + $0x110] sm:$0xff]  }
 0x19e   :  { %1028 = vmatpush1.bf16.msra.mxu0 %v8538_v49  ;;  %v443_v49 = vunpack.c.h.s8.bf16 %v344_v42  ;;  %v458_v42 = vunpack.c.l.s8.bf16 %v360_v36 }
 0x19f   :  { %1029 = vmatprep.subr.bf16.mxu0 %v8541_v53  ;;  %v1554_v53 = vunpack.c.h.s8.bf16 %v1450_v41 }
 0x1a0   :  { %1624 = vmatpush1.bf16.msra.mxu1 %v1537_v43  ;;  %v8557_v54 = vcombine.high %v442_v48, %v443_v49  ;;  %v8556_v60 = vcombine.low %v442_v48, %v443_v49  ;;  %v459_v43 = vunpack.c.h.s8.bf16 %v360_v36  ;;  %v364_v49 = vld [vmem:[%s12002_s15 + $0x120] sm:$0xff]  }
 0x1a1   :  { %1625 = vmatprep.subr.bf16.mxu1 %v1546_v45 }
 0x1a2   :  { %1030 = vmatpush1.bf16.msra.mxu0 %v8540_v59  ;;  %v1553_v59 = vunpack.c.h.s8.bf16 %v1449_v46  ;;  %v8573_v46 = vcombine.high %v458_v42, %v459_v43  ;;  %v8572_v50 = vcombine.low %v458_v42, %v459_v43 }
 0x1a3   :  { %1031 = vmatprep.subr.bf16.mxu0 %v8543_v62  ;;  %v1457_v62 = vld [vmem:[#allocation7 + $0x140] sm:$0xff] }
 0x1a4   :  { %1626 = vmatpush1.bf16.msra.mxu1 %v1545_v51 }
 0x1a5   :  { %1627 = vmatprep.subr.bf16.mxu1 %v1554_v53  ;;  %v463_v53 = vunpack.c.h.s8.bf16 %v364_v49 }
 0x1a6   :  { %1032 = vmatpush1.bf16.msra.mxu0 %v8542_v3  ;;  %v1561_v3 = vunpack.c.l.s8.bf16 %v1457_v62 }
 0x1a7   :  { %1033 = vmatprep.subr.bf16.mxu0 %v8545_v5  ;;  %v1570_v5 = vunpack.c.h.s8.bf16 %v1458_v57 }
 0x1a8   :  { %1628 = vmatpush1.bf16.msra.mxu1 %v1553_v59  ;;  %v368_v59 = vld [vmem:[%s12002_s15 + $0x130] sm:$0xff]  }
 0x1a9   :  { %1629 = vmatprep.subr.bf16.mxu1 %v1562_v61 }
 0x1aa   :  { %1034 = vmatpush1.bf16.msra.mxu0 %v8544_v11  ;;  %v1569_v11 = vunpack.c.h.s8.bf16 %v1457_v62  ;;  %v466_v62 = vunpack.c.l.s8.bf16 %v368_v59 }
 0x1ab   :  { %1035 = vmatprep.subr.bf16.mxu0 %v8547_v14  ;;  %v8563_v14 = vcombine.high %v448_v7, %v449_v8  ;;  %v372_v7 = vld [vmem:[%s12002_s15 + $0x140] sm:$0xff]  }
 0x1ac   :  { %1630 = vmatpush1.bf16.msra.mxu1 %v1561_v3  ;;  %v1577_v3 = vunpack.c.l.s8.bf16 %v10000_v1 }
 0x1ad   :  { %1631 = vmatprep.subr.bf16.mxu1 %v1570_v5  ;;  %v468_v5 = vunpack.c.l.s8.bf16 %v370_v0 }
 0x1ae   :  { %1036 = vmatpush1.bf16.msra.mxu0 %v8546_v19  ;;  %v8565_v19 = vcombine.high %v450_v15, %v451_v16 }
 0x1af   :  { %1037 = vmatprep.subr.bf16.mxu0 %v8549_v21  ;;  %v453_v21 = vunpack.c.h.s8.bf16 %v354_v17 }
 0x1b0   :  { %1632 = vmatpush1.bf16.msra.mxu1 %v1569_v11  ;;  %v470_v11 = vunpack.c.l.s8.bf16 %v372_v7 }
 0x1b1   :  { %1633 = vmatprep.subr.bf16.mxu1 %v1578_v13  ;;  %v8567_v24 = vcombine.high %v452_v20, %v453_v21  ;;  %v8566_v28 = vcombine.low %v452_v20, %v453_v21  ;;  %v374_v13 = vld [vmem:[%s12002_s15 + $0x148] sm:$0xff]  }
 0x1b2   :  { %1038 = vmatpush1.bf16.msra.mxu0 %v8548_v27  ;;  %v358_v27 = vld [vmem:[%s12002_s15 + $0x108] sm:$0xff]   ;;  %v472_v16 = vunpack.c.l.s8.bf16 %v374_v13  ;;  %v473_v17 = vunpack.c.h.s8.bf16 %v374_v13 }
 0x1b3   :  { %1039 = vmatprep.subr.bf16.mxu0 %v8551_v30  ;;  %v280_v30 = vld [vmem:[#allocation2 + $0x48] sm:$0xff]  ;;  %v456_v32 = vunpack.c.l.s8.bf16 %v358_v27  ;;  %v457_v33 = vunpack.c.h.s8.bf16 %v358_v27 }
 0x1b4   :  { %1634 = vmatpush1.bf16.msra.mxu1 %v1577_v3  ;;  %v8587_v20 = vcombine.high %v472_v16, %v473_v17 }
 0x1b5   :  { %v8571_v41 = vcombine.high %v456_v32, %v457_v33  ;;  %v8570_v45 = vcombine.low %v456_v32, %v457_v33  ;;  %v382_v33 = vld [vmem:[%s12002_s15 + $0x168] sm:$0xff]  }
 0x1b6   :  { %1040 = vmatpush1.bf16.msra.mxu0 %v8550_v35  ;;  %v283_v35 = vld [vmem:[#allocation2 + $0x60] sm:$0xff]  ;;  %v480_v36 = vunpack.c.l.s8.bf16 %v382_v33 }
 0x1b7   :  { %1041 = vmatprep.subr.bf16.mxu0 %v8553_v37  ;;  %v287_v37 = vpack.c.bf16 %v280_v30, %v273_v29  ;;  %v290_v40 = vpack.c.bf16 %v283_v35, %v276_v34 }
 0x1ba   :  { %1042 = vmatpush1.bf16.msra.mxu0 %v8552_v44  ;;  %v362_v44 = vld [vmem:[%s12002_s15 + $0x118] sm:$0xff]  }
 0x1bb   :  { %1043 = vmatprep.subr.bf16.mxu0 %v8555_v47  ;;  %v460_v47 = vunpack.c.l.s8.bf16 %v362_v44  ;;  %v461_v48 = vunpack.c.h.s8.bf16 %v362_v44  ;;  %v386_v44 = vld [vmem:[%s12002_s15 + $0x178] sm:$0xff]  }
 0x1bd   :  { %v8575_v51 = vcombine.high %v460_v47, %v461_v48  ;;  %v8574_v55 = vcombine.low %v460_v47, %v461_v48  ;;  %v484_v47 = vunpack.c.l.s8.bf16 %v386_v44  ;;  %v485_v48 = vunpack.c.h.s8.bf16 %v386_v44 }
 0x1be   :  { %1044 = vmatpush1.bf16.msra.mxu0 %v8554_v52  ;;  %v462_v52 = vunpack.c.l.s8.bf16 %v364_v49  ;;  %v1213_v49 = vld [vmem:[%s12003_s17 + $0x20] sm:$0x3] }
 0x1bf   :  { %1045 = vmatprep.subr.bf16.mxu0 %v8557_v54  ;;  %v366_v54 = vld [vmem:[%s12002_s15 + $0x128] sm:$0xff]  }
 0x1c0   :  { %v8577_v56 = vcombine.high %v462_v52, %v463_v53  ;;  %v464_v57 = vunpack.c.l.s8.bf16 %v366_v54  ;;  %v465_v58 = vunpack.c.h.s8.bf16 %v366_v54 }
 0x1c2   :  { %1046 = vmatpush1.bf16.msra.mxu0 %v8556_v60  ;;  %v8576_v60 = vcombine.low %v462_v52, %v463_v53  ;;  %v8579_v61 = vcombine.high %v464_v57, %v465_v58  ;;  %v8578_v2 = vcombine.low %v464_v57, %v465_v58  ;;  %v8599_v52 = vcombine.high %v484_v47, %v485_v48  ;;  %v1215_v57 = vld [vmem:[%s12003_s17 + $0x24] sm:$0x3]  ;;  %v1216_v58 = vld [vmem:[%s12003_s17 + $0x26] sm:$0x3] }
 0x1c3   :  { %1047 = vmatprep.subr.bf16.mxu0 %v8559_v63  ;;  %v467_v63 = vunpack.c.h.s8.bf16 %v368_v59  ;;  %v1245_v53 = vunpack.c.l.s8.bf16 %v1213_v49  ;;  %v8598_v59 = vcombine.low %v484_v47, %v485_v48  ;;  %v1248_v3 = vunpack.c.l.s8.bf16 %v1216_v58 }
 0x1c4   :  { %v1586_v48 = vunpack.c.h.s8.bf16 %v9967_v9 }
 0x1c5   :  { %v8580_v8 = vcombine.low %v466_v62, %v467_v63 }
 0x1c6   :  { %1048 = vmatpush1.bf16.msra.mxu0 %v8558_v4  ;;  %v8581_v4 = vcombine.high %v466_v62, %v467_v63  ;;  %1635 = vmatprep.subr.bf16.mxu1 %v1586_v48 }
 0x1c7   :  { %1049 = vmatprep.subr.bf16.mxu0 %v8561_v6  ;;  %v469_v6 = vunpack.c.h.s8.bf16 %v370_v0 }
 0x1c9   :  { %v8583_v10 = vcombine.high %v468_v5, %v469_v6 }
 0x1ca   :  { %1050 = vmatpush1.bf16.msra.mxu0 %v8560_v12  ;;  %v471_v12 = vunpack.c.h.s8.bf16 %v372_v7  ;;  %v1218_v7 = vld [vmem:[%s12003_s17 + $0x2a] sm:$0x3] }
 0x1cb   :  { %1051 = vmatprep.subr.bf16.mxu0 %v8563_v14  ;;  %v8582_v14 = vcombine.low %v468_v5, %v469_v6  ;;  %v1200_v5 = vld [vmem:[%s12003_s17 + $0x6] sm:$0x3]  ;;  %v1217_v6 = vld [vmem:[%s12003_s17 + $0x28] sm:$0x3] }
 0x1cc   :  { %v8585_v15 = vcombine.high %v470_v11, %v471_v12 }
 0x1ce   :  { %1052 = vmatpush1.bf16.msra.mxu0 %v8562_v18  ;;  %v376_v18 = vld [vmem:[%s12002_s15 + $0x150] sm:$0xff]  }
 0x1cf   :  { %1053 = vmatprep.subr.bf16.mxu0 %v8565_v19  ;;  %v8584_v19 = vcombine.low %v470_v11, %v471_v12  ;;  %v474_v21 = vunpack.c.l.s8.bf16 %v376_v18  ;;  %v475_v22 = vunpack.c.h.s8.bf16 %v376_v18  ;;  %v1232_v12 = vunpack.c.l.s8.bf16 %v1200_v5  ;;  %v1219_v18 = vld [vmem:[%s12003_s17 + $0x2c] sm:$0x3] }
 0x1d1   :  { %v8589_v25 = vcombine.high %v474_v21, %v475_v22  ;;  %v8588_v29 = vcombine.low %v474_v21, %v475_v22 }
 0x1d2   :  { %1054 = vmatpush1.bf16.msra.mxu0 %v8564_v23  ;;  %v378_v23 = vld [vmem:[%s12002_s15 + $0x158] sm:$0xff]  }
 0x1d3   :  { %1055 = vmatprep.subr.bf16.mxu0 %v8567_v24  ;;  %v8586_v24 = vcombine.low %v472_v16, %v473_v17  ;;  %v476_v26 = vunpack.c.l.s8.bf16 %v378_v23  ;;  %v477_v27 = vunpack.c.h.s8.bf16 %v378_v23  ;;  %v1201_v16 = vld [vmem:[%s12003_s17 + $0x8] sm:$0x3]  ;;  %v1202_v17 = vld [vmem:[%s12003_s17 + $0xa] sm:$0x3] }
 0x1d4   :  { %v1233_v21 = vunpack.c.l.s8.bf16 %v1201_v16  ;;  %v1234_v22 = vunpack.c.l.s8.bf16 %v1202_v17  ;;  %v1212_v16 = vld [vmem:[%s12003_s17 + $0x1e] sm:$0x3] }
 0x1d5   :  { %v8591_v30 = vcombine.high %v476_v26, %v477_v27  ;;  %v8590_v34 = vcombine.low %v476_v26, %v477_v27  ;;  %v1203_v26 = vld [vmem:[%s12003_s17 + $0xc] sm:$0x3]  ;;  %v1204_v27 = vld [vmem:[%s12003_s17 + $0xe] sm:$0x3] }
 0x1d6   :  { %1056 = vmatpush1.bf16.msra.mxu0 %v8566_v28  ;;  %v380_v28 = vld [vmem:[%s12002_s15 + $0x160] sm:$0xff]  }
 0x1d7   :  { %1068 = vmatprep.subr.bf16.mxu0 %v8569_v31  ;;  %v478_v31 = vunpack.c.l.s8.bf16 %v380_v28  ;;  %v479_v32 = vunpack.c.h.s8.bf16 %v380_v28  ;;  %v1221_v28 = vld [vmem:[%s12003_s17 + $0x30] sm:$0x3] }
 0x1d9   :  { %1058 = vmatmul.mubr.bf16.vlgmr.msra.gmra.mrb[0].mxu0 %v287_v37  ;;  %v8593_v35 = vcombine.high %v478_v31, %v479_v32  ;;  %v481_v37 = vunpack.c.h.s8.bf16 %v382_v33 }
 0x1da   :  { %1069 = vmatpush1.bf16.msra.mxu0 %v8568_v39  ;;  %1100 = vmatprep.mubr.bf16.mxu0 %v290_v40  ;;  %v384_v39 = vld [vmem:[%s12002_s15 + $0x170] sm:$0xff]   ;;  %v8592_v40 = vcombine.low %v478_v31, %v479_v32  ;;  %v1235_v31 = vunpack.c.l.s8.bf16 %v1203_v26  ;;  %v1236_v32 = vunpack.c.l.s8.bf16 %v1204_v27  ;;  %v1156_v26 = vlaneseq }
 0x1db   :  { %1070 = vmatprep.subr.bf16.mxu0 %v8571_v41  ;;  %v8595_v41 = vcombine.high %v480_v36, %v481_v37  ;;  %v482_v42 = vunpack.c.l.s8.bf16 %v384_v39  ;;  %v483_v43 = vunpack.c.h.s8.bf16 %v384_v39 }
 0x1dc   :  { %v8606_v39 = vcombine.low %v1235_v31, %v1236_v32  ;;  %v10136_v27 = vshrl.u32 %v1156_v26, 7  ;;  %v1171_v31 = vld [vmem:[#allocation5 + $0x1] ss:$2 sm:$0x3] }
 0x1dd   :  { %v1444_v26 = vld [vmem:[#allocation7 + $0xd8] sm:$0xff] }
 0x1de   :  { %1071 = vmatpush1.bf16.msra.mxu0 %v8570_v45  ;;  %v8594_v45 = vcombine.low %v480_v36, %v481_v37  ;;  %v1205_v36 = vld [vmem:[%s12003_s17 + $0x10] sm:$0x3]  ;;  %v1206_v37 = vld [vmem:[%s12003_s17 + $0x12] sm:$0x3] }
 0x1df   :  { %1072 = vmatprep.subr.bf16.mxu0 %v8573_v46  ;;  %v8597_v46 = vcombine.high %v482_v42, %v483_v43 }
 0x1e2   :  { %1073 = vmatpush1.bf16.msra.mxu0 %v8572_v50  ;;  %v1214_v50 = vld [vmem:[%s12003_s17 + $0x22] sm:$0x3] }
 0x1e3   :  { %1074 = vmatprep.subr.bf16.mxu0 %v8575_v51  ;;  %v8596_v51 = vcombine.low %v482_v42, %v483_v43  ;;  %v1246_v54 = vunpack.c.l.s8.bf16 %v1214_v50 }
 0x1e5   :  { %v8611_v0 = vcombine.low %v1245_v53, %v1246_v54  ;;  %v1585_v54 = vunpack.c.h.s8.bf16 %v10000_v1  ;;  %v1473_v1 = vld [vmem:[#allocation7 + $0x1c0] sm:$0xff] }
 0x1e6   :  { %1075 = vmatpush1.bf16.msra.mxu0 %v8574_v55  ;;  %v1197_v55 = vld [vmem:[%s12003_s17] sm:$0x3]  ;;  %v1601_v17 = vunpack.c.h.s8.bf16 %v1473_v1 }
 0x1e7   :  { %1076 = vmatprep.subr.bf16.mxu0 %v8577_v56  ;;  %v1198_v56 = vld [vmem:[%s12003_s17 + $0x2] sm:$0x3]  ;;  %v1229_v62 = vunpack.c.l.s8.bf16 %v1197_v55  ;;  %1636 = vmatpush1.bf16.msra.mxu1 %v1585_v54  ;;  %v1419_v54 = vld [vmem:[#allocation7 + $0x10] sm:$0xff] }
 0x1e8   :  { %v1230_v63 = vunpack.c.l.s8.bf16 %v1198_v56 }
 0x1ea   :  { %1077 = vmatpush1.bf16.msra.mxu0 %v8576_v60  ;;  %v275_v60 = vld [vmem:[#allocation2 + $0x20] sm:$0xff] }
 0x1eb   :  { %1078 = vmatprep.subr.bf16.mxu0 %v8579_v61  ;;  %v282_v61 = vld [vmem:[#allocation2 + $0x58] sm:$0xff] }
 0x1ee   :  { %1079 = vmatpush1.bf16.msra.mxu0 %v8578_v2  ;;  %v1247_v2 = vunpack.c.l.s8.bf16 %v1215_v57 }
 0x1ef   :  { %1080 = vmatprep.subr.bf16.mxu0 %v8581_v4  ;;  %v1199_v4 = vld [vmem:[%s12003_s17 + $0x4] sm:$0x3] }
 0x1f0   :  { %v1231_v11 = vunpack.c.l.s8.bf16 %v1199_v4  ;;  %v8612_v13 = vcombine.low %v1247_v2, %v1248_v3  ;;  %v1209_v2 = vld [vmem:[%s12003_s17 + $0x18] sm:$0x3]  ;;  %v1593_v3 = vunpack.c.l.s8.bf16 %v1473_v1  ;;  %v1210_v4 = vld [vmem:[%s12003_s17 + $0x1a] sm:$0x3] }
 0x1f1   :  { %v1241_v5 = vunpack.c.l.s8.bf16 %v1209_v2 }
 0x1f2   :  { %1081 = vmatpush1.bf16.msra.mxu0 %v8580_v8  ;;  %v289_v8 = vpack.c.bf16 %v282_v61, %v275_v60  ;;  %v1225_v60 = vld [vmem:[%s12003_s17 + $0x38] sm:$0x3]  ;;  %v1226_v61 = vld [vmem:[%s12003_s17 + $0x3a] sm:$0x3] }
 0x1f3   :  { %1082 = vmatprep.subr.bf16.mxu0 %v8583_v10  ;;  %v8603_v10 = vcombine.low %v1229_v62, %v1230_v63  ;;  %v1257_v63 = vunpack.c.l.s8.bf16 %v1225_v60 }
 0x1f6   :  { %1083 = vmatpush1.bf16.msra.mxu0 %v8582_v14  ;;  %v1249_v14 = vunpack.c.l.s8.bf16 %v1217_v6 }
 0x1f7   :  { %1084 = vmatprep.subr.bf16.mxu0 %v8585_v15  ;;  %v1250_v15 = vunpack.c.l.s8.bf16 %v1218_v7  ;;  %v1242_v7 = vunpack.c.l.s8.bf16 %v1210_v4  ;;  %v1432_v4 = vld [vmem:[#allocation7 + $0x78] sm:$0xff] }
 0x1f9   :  { %v8613_v23 = vcombine.low %v1249_v14, %v1250_v15  ;;  %v1211_v15 = vld [vmem:[%s12003_s17 + $0x1c] sm:$0x3] }
 0x1fa   :  { %1085 = vmatpush1.bf16.msra.mxu0 %v8584_v19  ;;  %v1220_v19 = vld [vmem:[%s12003_s17 + $0x2e] sm:$0x3] }
 0x1fb   :  { %1086 = vmatprep.subr.bf16.mxu0 %v8587_v20  ;;  %v8604_v20 = vcombine.low %v1231_v11, %v1232_v12  ;;  %v8609_v11 = vcombine.low %v1241_v5, %v1242_v7 }
 0x1fe   :  { %1087 = vmatpush1.bf16.msra.mxu0 %v8586_v24  ;;  %v1251_v24 = vunpack.c.l.s8.bf16 %v1219_v18  ;;  %v1243_v18 = vunpack.c.l.s8.bf16 %v1211_v15  ;;  %v1512_v15 = vunpack.c.h.s8.bf16 %v1432_v4 }
 0x1ff   :  { %1088 = vmatprep.subr.bf16.mxu0 %v8589_v25  ;;  %v1252_v25 = vunpack.c.l.s8.bf16 %v1220_v19  ;;  %v1244_v19 = vunpack.c.l.s8.bf16 %v1212_v16 }
 0x201   :  { %v8614_v33 = vcombine.low %v1251_v24, %v1252_v25  ;;  %v1424_v24 = vld [vmem:[#allocation7 + $0x38] sm:$0xff] }
 0x202   :  { %1089 = vmatpush1.bf16.msra.mxu0 %v8588_v29  ;;  %v1222_v29 = vld [vmem:[%s12003_s17 + $0x32] sm:$0x3]  ;;  %v1488_v25 = vunpack.c.l.s8.bf16 %v1424_v24  ;;  %v1496_v2 = vunpack.c.h.s8.bf16 %v1424_v24 }
 0x203   :  { %1090 = vmatprep.subr.bf16.mxu0 %v8591_v30  ;;  %v8605_v30 = vcombine.low %v1233_v21, %v1234_v22  ;;  %v8610_v21 = vcombine.low %v1243_v18, %v1244_v19  ;;  %v10133_v22 = vld [vmem:[#allocation7 + $0x18] sm:$0xff]  ;;  %v1435_v19 = vld [vmem:[#allocation7 + $0x90] sm:$0xff] }
 0x206   :  { %1091 = vmatpush1.bf16.msra.mxu0 %v8590_v34  ;;  %v1253_v34 = vunpack.c.l.s8.bf16 %v1221_v28  ;;  %v10139_v28 = vsub.s32 0, %v10136_v27 }
 0x207   :  { %1092 = vmatprep.subr.bf16.mxu0 %v8593_v35  ;;  %v1254_v35 = vunpack.c.l.s8.bf16 %v1222_v29  ;;  %v1154_v29 = vld [vmem:[#allocation5] ss:$2 sm:$0x3] }
 0x208   :  { %v1159_v32 = vrot.slane %v1154_v29, %v10139_v28 }
 0x209   :  { %v8615_v42 = vcombine.low %v1253_v34, %v1254_v35 }
 0x20a   :  { %1093 = vmatpush1.bf16.msra.mxu0 %v8592_v40  ;;  %v1237_v40 = vunpack.c.l.s8.bf16 %v1205_v36  ;;  %v1176_v36 = vrot.slane %v1171_v31, %v10139_v28 }
 0x20b   :  { %1094 = vmatprep.subr.bf16.mxu0 %v8595_v41  ;;  %v1238_v41 = vunpack.c.l.s8.bf16 %v1206_v37 }
 0x20d   :  { %v8607_v43 = vcombine.low %v1237_v40, %v1238_v41 }
 0x20e   :  { %1095 = vmatpush1.bf16.msra.mxu0 %v8594_v45  ;;  %v1223_v45 = vld [vmem:[%s12003_s17 + $0x34] sm:$0x3] }
 0x20f   :  { %1096 = vmatprep.subr.bf16.mxu0 %v8597_v46  ;;  %v1224_v46 = vld [vmem:[%s12003_s17 + $0x36] sm:$0x3]  ;;  %v1255_v49 = vunpack.c.l.s8.bf16 %v1223_v45 }
 0x210   :  { %v1256_v50 = vunpack.c.l.s8.bf16 %v1224_v46 }
 0x212   :  { %1097 = vmatpush1.bf16.msra.mxu0 %v8596_v51  ;;  %v1207_v51 = vld [vmem:[%s12003_s17 + $0x14] sm:$0x3]  ;;  %v8616_v9 = vcombine.low %v1255_v49, %v1256_v50 }
 0x213   :  { %1098 = vmatprep.subr.bf16.mxu0 %v8599_v52  ;;  %v1208_v52 = vld [vmem:[%s12003_s17 + $0x16] sm:$0x3]  ;;  %v1239_v55 = vunpack.c.l.s8.bf16 %v1207_v51 }
 0x214   :  { %v1240_v56 = vunpack.c.l.s8.bf16 %v1208_v52 }
 0x216   :  { %1099 = vmatpush1.bf16.msra.mxu0 %v8598_v59  ;;  %v8608_v58 = vcombine.low %v1239_v55, %v1240_v56  ;;  %v1474_v59 = vld [vmem:[#allocation7 + $0x1c8] sm:$0xff] }
 0x217   :  { %8703 = vmatprep.subr.bf16.mxu0 %v8611_v0  ;;  %v1594_v62 = vunpack.c.l.s8.bf16 %v1474_v59  ;;  %v1258_v0 = vunpack.c.l.s8.bf16 %v1226_v61  ;;  %v1602_v12 = vunpack.c.h.s8.bf16 %v1474_v59  ;;  %v1483_v59 = vunpack.c.l.s8.bf16 %v1419_v54 }
 0x219   :  { %1101 = vmatmul.mubr.bf16.vlgmr.msra.gmra.mrb[0].mxu0 %v289_v8  ;;  %1637 = vmatprep.subr.bf16.mxu1 %v1594_v62  ;;  %v8617_v6 = vcombine.low %v1257_v63, %v1258_v0  ;;  %v1227_v8 = vld [vmem:[%s12003_s17 + $0x3c] sm:$0x3]  ;;  %v1492_v63 = vunpack.c.h.s8.bf16 %v10133_v22  ;;  %v1428_v0 = vld [vmem:[#allocation7 + $0x58] sm:$0xff] }
 0x21a   :  { %8704 = vmatpush3.bf16.msra.mxu0 %v8603_v10  ;;  %1638 = vmatpush1.bf16.msra.mxu1 %v1593_v3  ;;  %v1228_v10 = vld [vmem:[%s12003_s17 + $0x3e] sm:$0x3]  ;;  %v1491_v3 = vunpack.c.h.s8.bf16 %v1419_v54  ;;  %v1500_v5 = vunpack.c.l.s8.bf16 %v1428_v0 }
 0x21b   :  { %8705 = vmatprep.subr.bf16.mxu0 %v8612_v13  ;;  %v1259_v13 = vunpack.c.l.s8.bf16 %v1227_v8  ;;  %v1260_v14 = vunpack.c.l.s8.bf16 %v1228_v10  ;;  %1639 = vmatprep.subr.bf16.mxu1 %v1602_v12  ;;  %v1504_v8 = vunpack.c.l.s8.bf16 %v1432_v4  ;;  %v1431_v10 = vld [vmem:[#allocation7 + $0x70] sm:$0xff]  ;;  %v1508_v12 = vunpack.c.h.s8.bf16 %v1428_v0 }
 0x21e   :  { %8706 = vmatpush3.bf16.msra.mxu0 %v8604_v20  ;;  %v8618_v20 = vcombine.low %v1259_v13, %v1260_v14  ;;  %1640 = vmatpush1.bf16.msra.mxu1 %v1601_v17  ;;  %v1503_v13 = vunpack.c.l.s8.bf16 %v1431_v10  ;;  %v1436_v14 = vld [vmem:[#allocation7 + $0x98] sm:$0xff] }
 0x21f   :  { %8707 = vmatprep.subr.bf16.mxu0 %v8613_v23  ;;  %v1484_v23 = vunpack.c.l.s8.bf16 %v10133_v22  ;;  %v1440_v17 = vld [vmem:[#allocation7 + $0xb8] sm:$0xff]  ;;  %v1516_v18 = vunpack.c.l.s8.bf16 %v1436_v14  ;;  %v1439_v22 = vld [vmem:[#allocation7 + $0xb0] sm:$0xff]  ;;  %v1524_v24 = vunpack.c.h.s8.bf16 %v1436_v14 }
 0x221   :  { %1652 = vmatprep.subr.bf16.mxu1 %v1484_v23  ;;  %v1515_v23 = vunpack.c.l.s8.bf16 %v1435_v19 }
 0x222   :  { %8708 = vmatpush3.bf16.msra.mxu0 %v8605_v30  ;;  %v10142_v30 = vsub.s32 1, %v10136_v27 }
 0x223   :  { %8709 = vmatprep.subr.bf16.mxu0 %v8614_v33 }
 0x224   :  { %v1163_v34 = vrot.slane %v1154_v29, %v10142_v30  ;;  %v1180_v40 = vrot.slane %v1171_v31, %v10142_v30  ;;  %v1528_v29 = vunpack.c.h.s8.bf16 %v1440_v17  ;;  %v1523_v31 = vunpack.c.h.s8.bf16 %v1435_v19  ;;  %v1480_v19 = vld [vmem:[#allocation7 + $0x1f8] sm:$0xff] }
 0x226   :  { %8710 = vmatpush3.bf16.msra.mxu0 %v8606_v39 }
 0x227   :  { %8711 = vmatprep.subr.bf16.mxu0 %v8615_v42 }
 0x22a   :  { %8712 = vmatpush3.bf16.msra.mxu0 %v8607_v43 }
 0x22b   :  { %8713 = vmatprep.subr.bf16.mxu0 %v8616_v9 }
 0x22e   :  { %8714 = vmatpush3.bf16.msra.mxu0 %v8608_v58  ;;  %v1423_v58 = vld [vmem:[#allocation7 + $0x30] sm:$0xff] }
 0x22f   :  { %8715 = vmatprep.subr.bf16.mxu0 %v8617_v6  ;;  %v1487_v1 = vunpack.c.l.s8.bf16 %v1423_v58  ;;  %v1427_v6 = vld [vmem:[#allocation7 + $0x50] sm:$0xff]  ;;  %v1495_v7 = vunpack.c.h.s8.bf16 %v1423_v58 }
 0x230   :  { %v1507_v16 = vunpack.c.h.s8.bf16 %v1427_v6 }
 0x232   :  { %8716 = vmatpush3.bf16.msra.mxu0 %v8609_v11  ;;  %v1499_v11 = vunpack.c.l.s8.bf16 %v1427_v6  ;;  %v1472_v6 = vld [vmem:[#allocation7 + $0x1b8] sm:$0xff] }
 0x233   :  { %8717 = vmatprep.subr.bf16.mxu0 %v8618_v20  ;;  %v1511_v20 = vunpack.c.h.s8.bf16 %v1431_v10 }
 0x236   :  { %8718 = vmatpush3.bf16.msra.mxu0 %v8610_v21  ;;  %v1520_v21 = vunpack.c.l.s8.bf16 %v1440_v17  ;;  %v1592_v17 = vunpack.c.h.s8.bf16 %v1472_v6 }
 0x237   :  { %1738 = vmatprep.subr.bf16.mxu0 %v1488_v25  ;;  %v1519_v25 = vunpack.c.l.s8.bf16 %v1439_v22 }
 0x244   :  { %v10087_v44 = vpop.f32.mrb[0].mxu1 }
 0x245   :  { %v10095_v47 = vpop.f32.mrb[1].mxu1 }
 0x246   :  { %v10104_v53 = vpop.f32.mrb[2].mxu1 }
 0x247   :  { %v10107_v57 = vpop.f32.mrb[3].mxu1 }
 0x2ec   :  { %v1102_v33 = vpop.f32.mrb[0].mxu0 }
 0x2ed   :  { %v8813_v35 = vadd.f32 %v10087_v44, %v1102_v33  ;;  %v1104_v37 = vpop.f32.mrb[1].mxu0  ;;  %v1532_v33 = vunpack.c.l.s8.bf16 %v1444_v26 }
 0x2ee   :  { %v8814_v39 = vadd.f32 %v10095_v47, %v1104_v37  ;;  %v1106_v41 = vpop.f32.mrb[2].mxu0  ;;  %v1447_v37 = vld [vmem:[#allocation7 + $0xf0] sm:$0xff] }
 0x2ef   :  { %v1166_v42 = vmul.f32 %v8813_v35, %v1159_v32  ;;  %v8815_v43 = vadd.f32 %v10104_v53, %v1106_v41  ;;  %v1108_v45 = vpop.f32.mrb[3].mxu0  ;;  %v1527_v35 = vunpack.c.h.s8.bf16 %v1439_v22  ;;  %v1535_v41 = vunpack.c.l.s8.bf16 %v1447_v37 }
 0x2f0   :  { %v1167_v46 = vmul.f32 %v8814_v39, %v1163_v34  ;;  %v8816_v48 = vadd.f32 %v10107_v57, %v1108_v45 }
 0x2f1   :  { %v1183_v49 = vadd.f32 %v1176_v36, %v1166_v42  ;;  %v1168_v50 = vmul.f32 %v8815_v43, %v1159_v32  ;;  %v1448_v32 = vld [vmem:[#allocation7 + $0xf8] sm:$0xff] }
 0x2f2   :  { %v1184_v51 = vadd.f32 %v1180_v40, %v1167_v46  ;;  %v1169_v52 = vmul.f32 %v8816_v48, %v1163_v34  ;;  %v1443_v34 = vld [vmem:[#allocation7 + $0xd0] sm:$0xff]  ;;  %v1452_v42 = vld [vmem:[#allocation7 + $0x118] sm:$0xff]  ;;  %v1544_v43 = vunpack.c.h.s8.bf16 %v1448_v32 }
 0x2f3   :  { %1187 = vst [vmem:[#allocation28] sm:$0xff] %v1183_v49  ;;  %v1185_v44 = vadd.f32 %v1176_v36, %v1168_v50  ;;  %v1191_v47 = vmax.f32 %v1183_v49, 0.0  ;;  %v1536_v36 = vunpack.c.l.s8.bf16 %v1448_v32  ;;  %v1531_v39 = vunpack.c.l.s8.bf16 %v1443_v34  ;;  %v1456_v46 = vld [vmem:[#allocation7 + $0x138] sm:$0xff] }
 0x2f4   :  { %1188 = vst [vmem:[#allocation28 + $0x8] sm:$0xff] %v1184_v51  ;;  %v1186_v55 = vadd.f32 %v1180_v40, %v1169_v52  ;;  %v1192_v57 = vmax.f32 %v1184_v51, 0.0  ;;  %v1540_v40 = vunpack.c.h.s8.bf16 %v1444_v26  ;;  %v1539_v45 = vunpack.c.h.s8.bf16 %v1443_v34  ;;  %v1455_v52 = vld [vmem:[#allocation7 + $0x130] sm:$0xff] }
 0x2f5   :  { %v1193_v56 = vmax.f32 %v1185_v44, 0.0  ;;  %1189 = vst [vmem:[#allocation28 + $0x10] sm:$0xff] %v1185_v44  ;;  %v10152_v9 = vpack.c.bf16 %v1185_v44, %v1183_v49  ;;  %v1548_v48 = vunpack.c.l.s8.bf16 %v1452_v42  ;;  %v1451_v49 = vld [vmem:[#allocation7 + $0x110] sm:$0xff]  ;;  %v1543_v50 = vunpack.c.h.s8.bf16 %v1447_v37 }
 0x2f6   :  { %1190 = vst [vmem:[#allocation28 + $0x18] sm:$0xff] %v1186_v55  ;;  %v10154_v53 = vpack.c.bf16 %v1186_v55, %v1184_v51  ;;  %v1194_v60 = vmax.f32 %v1186_v55, 0.0  ;;  %v1552_v51 = vunpack.c.l.s8.bf16 %v1456_v46  ;;  %v1547_v44 = vunpack.c.l.s8.bf16 %v1451_v49 }
 0x2f7   :  { %v1195_v61 = vpack.c.bf16 %v1193_v56, %v1191_v47  ;;  %v1556_v54 = vunpack.c.h.s8.bf16 %v1452_v42  ;;  %v1551_v55 = vunpack.c.l.s8.bf16 %v1455_v52  ;;  %v1460_v47 = vld [vmem:[#allocation7 + $0x158] sm:$0xff]  ;;  %v1560_v56 = vunpack.c.h.s8.bf16 %v1456_v46 }
 0x2f8   :  { %1641 = vmatprep.mubr.bf16.mxu1 %v10154_v53  ;;  %v1196_v62 = vpack.c.bf16 %v1194_v60, %v1192_v57  ;;  %v1555_v58 = vunpack.c.h.s8.bf16 %v1451_v49  ;;  %v1564_v57 = vunpack.c.l.s8.bf16 %v1460_v47  ;;  %v1459_v60 = vld [vmem:[#allocation7 + $0x150] sm:$0xff]  ;;  %v1572_v0 = vunpack.c.h.s8.bf16 %v1460_v47  ;;  %v1445_v47 = vld [vmem:[#allocation7 + $0xe0] sm:$0xff] }
 0x2f9   :  { %1642 = vmatmul.mubr.bf16.vlgmr.msra.gmra.mrb[4].mxu1 %v10152_v9  ;;  %v1608_v32 = vunpack.c.h.s8.bf16 %v1480_v19 }
 0x2fa   :  { %1653 = vmatpush1.bf16.msra.mxu1 %v1483_v59  ;;  %1389 = vmatprep.mubr.bf16.mxu0 %v1196_v62  ;;  %v1464_v59 = vld [vmem:[#allocation7 + $0x178] sm:$0xff] }
 0x2fb   :  { %1684 = vmatprep.mubr.bf16.mxu1 %v10154_v53  ;;  %1390 = vmatmul.mubr.bf16.vlgmr.msra.gmra.mrb[4].mxu0 %v1195_v61  ;;  %v1559_v61 = vunpack.c.h.s8.bf16 %v1455_v52  ;;  %v1568_v62 = vunpack.c.l.s8.bf16 %v1464_v59  ;;  %v1576_v4 = vunpack.c.h.s8.bf16 %v1464_v59  ;;  %v1454_v59 = vld [vmem:[#allocation7 + $0x128] sm:$0xff] }
 0x2fc   :  { %1739 = vmatpush1.bf16.msra.mxu0 %v1487_v1  ;;  %1654 = vmatprep.subr.bf16.mxu1 %v1492_v63  ;;  %v1463_v1 = vld [vmem:[#allocation7 + $0x170] sm:$0xff]  ;;  %v1563_v63 = vunpack.c.l.s8.bf16 %v1459_v60 }
 0x2fd   :  { %1770 = vmatprep.mubr.bf16.mxu0 %v10154_v53  ;;  %1740 = vmatprep.subr.bf16.mxu0 %v1496_v2  ;;  %v1567_v2 = vunpack.c.l.s8.bf16 %v1463_v1  ;;  %v1575_v10 = vunpack.c.h.s8.bf16 %v1463_v1  ;;  %v1558_v1 = vunpack.c.h.s8.bf16 %v1454_v59 }
 0x2fe   :  { %1655 = vmatpush1.bf16.msra.mxu1 %v1491_v3  ;;  %v1468_v3 = vld [vmem:[#allocation7 + $0x198] sm:$0xff] }
 0x2ff   :  { %1656 = vmatprep.subr.bf16.mxu1 %v1500_v5  ;;  %v1571_v5 = vunpack.c.h.s8.bf16 %v1459_v60  ;;  %v1588_v14 = vunpack.c.h.s8.bf16 %v1468_v3  ;;  %v1550_v60 = vunpack.c.l.s8.bf16 %v1454_v59 }
 0x300   :  { %1741 = vmatpush1.bf16.msra.mxu0 %v1495_v7  ;;  %v1580_v7 = vunpack.c.l.s8.bf16 %v1468_v3  ;;  %v1461_v3 = vld [vmem:[#allocation7 + $0x160] sm:$0xff] }
 0x301   :  { %1742 = vmatprep.subr.bf16.mxu0 %v1504_v8  ;;  %v1467_v8 = vld [vmem:[#allocation7 + $0x190] sm:$0xff] }
 0x302   :  { %1657 = vmatpush1.bf16.msra.mxu1 %v1499_v11  ;;  %v1584_v11 = vunpack.c.l.s8.bf16 %v1472_v6  ;;  %v1470_v6 = vld [vmem:[#allocation7 + $0x1a8] sm:$0xff] }
 0x303   :  { %1658 = vmatprep.subr.bf16.mxu1 %v1508_v12  ;;  %v1471_v12 = vld [vmem:[#allocation7 + $0x1b0] sm:$0xff] }
 0x304   :  { %1743 = vmatpush1.bf16.msra.mxu0 %v1503_v13  ;;  %v1579_v13 = vunpack.c.l.s8.bf16 %v1467_v8  ;;  %v1591_v22 = vunpack.c.h.s8.bf16 %v1471_v12 }
 0x305   :  { %1744 = vmatprep.subr.bf16.mxu0 %v1512_v15  ;;  %v1583_v15 = vunpack.c.l.s8.bf16 %v1471_v12  ;;  %v1590_v12 = vunpack.c.h.s8.bf16 %v1470_v6 }
 0x306   :  { %1659 = vmatpush1.bf16.msra.mxu1 %v1507_v16  ;;  %v1476_v16 = vld [vmem:[#allocation7 + $0x1d8] sm:$0xff] }
 0x307   :  { %1660 = vmatprep.subr.bf16.mxu1 %v1516_v18  ;;  %v1587_v18 = vunpack.c.h.s8.bf16 %v1467_v8  ;;  %v1604_v26 = vunpack.c.h.s8.bf16 %v1476_v16  ;;  %v1582_v8 = vunpack.c.l.s8.bf16 %v1470_v6 }
 0x308   :  { %1745 = vmatpush1.bf16.msra.mxu0 %v1511_v20  ;;  %v1596_v20 = vunpack.c.l.s8.bf16 %v1476_v16  ;;  %v1477_v16 = vld [vmem:[#allocation7 + $0x1e0] sm:$0xff] }
 0x309   :  { %1746 = vmatprep.subr.bf16.mxu0 %v1520_v21  ;;  %v1475_v21 = vld [vmem:[#allocation7 + $0x1d0] sm:$0xff] }
 0x30a   :  { %1661 = vmatpush1.bf16.msra.mxu1 %v1515_v23  ;;  %v1600_v23 = vunpack.c.l.s8.bf16 %v1480_v19  ;;  %v1605_v19 = vunpack.c.h.s8.bf16 %v1477_v16 }
 0x30b   :  { %1662 = vmatprep.subr.bf16.mxu1 %v1524_v24  ;;  %v1479_v24 = vld [vmem:[#allocation7 + $0x1f0] sm:$0xff] }
 0x30c   :  { %1747 = vmatpush1.bf16.msra.mxu0 %v1519_v25  ;;  %v1595_v25 = vunpack.c.l.s8.bf16 %v1475_v21 }
 0x30d   :  { %1748 = vmatprep.subr.bf16.mxu0 %v1528_v29  ;;  %v1599_v29 = vunpack.c.l.s8.bf16 %v1479_v24 }
 0x30e   :  { %1663 = vmatpush1.bf16.msra.mxu1 %v1523_v31  ;;  %v1422_v31 = vld [vmem:[#allocation7 + $0x28] sm:$0xff] }
 0x30f   :  { %1664 = vmatprep.subr.bf16.mxu1 %v1532_v33  ;;  %v1603_v33 = vunpack.c.h.s8.bf16 %v1475_v21  ;;  %v1486_v34 = vunpack.c.l.s8.bf16 %v1422_v31  ;;  %v10167_v21 = vld [vmem:[#allocation8 + $0x1] ss:$2 sm:$0xff] }
 0x310   :  { %1749 = vmatpush1.bf16.msra.mxu0 %v1527_v35  ;;  %v1421_v35 = vld [vmem:[#allocation7 + $0x20] sm:$0xff] }
 0x311   :  { %1750 = vmatprep.subr.bf16.mxu0 %v1536_v36  ;;  %v1607_v36 = vunpack.c.h.s8.bf16 %v1479_v24  ;;  %v1485_v37 = vunpack.c.l.s8.bf16 %v1421_v35  ;;  %v1845_v24 = vrot.slane %v10167_v21, %v10139_v28 }
 0x312   :  { %1665 = vmatpush1.bf16.msra.mxu1 %v1531_v39  ;;  %v1494_v39 = vunpack.c.h.s8.bf16 %v1422_v31 }
 0x313   :  { %1666 = vmatprep.subr.bf16.mxu1 %v1540_v40  ;;  %v1430_v40 = vld [vmem:[#allocation7 + $0x68] sm:$0xff] }
 0x314   :  { %1751 = vmatpush1.bf16.msra.mxu0 %v1535_v41  ;;  %v1493_v41 = vunpack.c.h.s8.bf16 %v1421_v35  ;;  %v1502_v42 = vunpack.c.l.s8.bf16 %v1430_v40  ;;  %v1510_v46 = vunpack.c.h.s8.bf16 %v1430_v40 }
 0x315   :  { %1752 = vmatprep.subr.bf16.mxu0 %v1544_v43  ;;  %v1429_v43 = vld [vmem:[#allocation7 + $0x60] sm:$0xff] }
 0x316   :  { %1667 = vmatpush1.bf16.msra.mxu1 %v1539_v45  ;;  %v1501_v45 = vunpack.c.l.s8.bf16 %v1429_v43  ;;  %v1509_v49 = vunpack.c.h.s8.bf16 %v1429_v43 }
 0x317   :  { %1668 = vmatprep.subr.bf16.mxu1 %v1548_v48  ;;  %v1438_v48 = vld [vmem:[#allocation7 + $0xa8] sm:$0xff] }
 0x318   :  { %1753 = vmatpush1.bf16.msra.mxu0 %v1543_v50  ;;  %v1518_v50 = vunpack.c.l.s8.bf16 %v1438_v48 }
 0x319   :  { %1754 = vmatprep.subr.bf16.mxu0 %v1552_v51  ;;  %v1437_v51 = vld [vmem:[#allocation7 + $0xa0] sm:$0xff] }
 0x31a   :  { %1669 = vmatpush1.bf16.msra.mxu1 %v1547_v44  ;;  %v1517_v52 = vunpack.c.l.s8.bf16 %v1437_v51  ;;  %v1446_v44 = vld [vmem:[#allocation7 + $0xe8] sm:$0xff] }
 0x31b   :  { %1670 = vmatprep.subr.bf16.mxu1 %v1556_v54  ;;  %v1525_v54 = vunpack.c.h.s8.bf16 %v1437_v51 }
 0x31c   :  { %1755 = vmatpush1.bf16.msra.mxu0 %v1551_v55  ;;  %v1534_v55 = vunpack.c.l.s8.bf16 %v1446_v44 }
 0x31d   :  { %1756 = vmatprep.subr.bf16.mxu0 %v1560_v56  ;;  %v1533_v56 = vunpack.c.l.s8.bf16 %v1445_v47 }
 0x31e   :  { %1671 = vmatpush1.bf16.msra.mxu1 %v1555_v58  ;;  %v1542_v58 = vunpack.c.h.s8.bf16 %v1446_v44 }
 0x31f   :  { %1672 = vmatprep.subr.bf16.mxu1 %v1564_v57  ;;  %v1541_v57 = vunpack.c.h.s8.bf16 %v1445_v47 }
 0x320   :  { %1757 = vmatpush1.bf16.msra.mxu0 %v1559_v61  ;;  %v1453_v61 = vld [vmem:[#allocation7 + $0x120] sm:$0xff] }
 0x321   :  { %1758 = vmatprep.subr.bf16.mxu0 %v1568_v62  ;;  %v1549_v62 = vunpack.c.l.s8.bf16 %v1453_v61 }
 0x322   :  { %1673 = vmatpush1.bf16.msra.mxu1 %v1563_v63  ;;  %v1462_v63 = vld [vmem:[#allocation7 + $0x168] sm:$0xff] }
 0x323   :  { %1674 = vmatprep.subr.bf16.mxu1 %v1572_v0  ;;  %v1557_v0 = vunpack.c.h.s8.bf16 %v1453_v61 }
 0x324   :  { %1759 = vmatpush1.bf16.msra.mxu0 %v1567_v2  ;;  %v1566_v2 = vunpack.c.l.s8.bf16 %v1462_v63 }
 0x325   :  { %1760 = vmatprep.subr.bf16.mxu0 %v1576_v4  ;;  %v1565_v4 = vunpack.c.l.s8.bf16 %v1461_v3 }
 0x326   :  { %1675 = vmatpush1.bf16.msra.mxu1 %v1571_v5  ;;  %v1574_v5 = vunpack.c.h.s8.bf16 %v1462_v63 }
 0x327   :  { %1676 = vmatprep.subr.bf16.mxu1 %v1580_v7  ;;  %v1573_v7 = vunpack.c.h.s8.bf16 %v1461_v3 }
 0x328   :  { %1761 = vmatpush1.bf16.msra.mxu0 %v1575_v10  ;;  %v1469_v10 = vld [vmem:[#allocation7 + $0x1a0] sm:$0xff] }
 0x329   :  { %1762 = vmatprep.subr.bf16.mxu0 %v1584_v11  ;;  %v1581_v11 = vunpack.c.l.s8.bf16 %v1469_v10 }
 0x32a   :  { %1677 = vmatpush1.bf16.msra.mxu1 %v1579_v13  ;;  %v1478_v13 = vld [vmem:[#allocation7 + $0x1e8] sm:$0xff] }
 0x32b   :  { %1678 = vmatprep.subr.bf16.mxu1 %v1588_v14  ;;  %v1589_v14 = vunpack.c.h.s8.bf16 %v1469_v10  ;;  %v2353_v10 = vld [vmem:[#allocation11 + $0x18] sm:$0xff] }
 0x32c   :  { %1763 = vmatpush1.bf16.msra.mxu0 %v1583_v15  ;;  %v1598_v15 = vunpack.c.l.s8.bf16 %v1478_v13 }
 0x32d   :  { %1764 = vmatprep.subr.bf16.mxu0 %v1592_v17  ;;  %v1597_v17 = vunpack.c.l.s8.bf16 %v1477_v16  ;;  %v2352_v16 = vld [vmem:[#allocation11 + $0x10] sm:$0xff] }
 0x32e   :  { %1679 = vmatpush1.bf16.msra.mxu1 %v1587_v18  ;;  %v1606_v18 = vunpack.c.h.s8.bf16 %v1478_v13 }
 0x32f   :  { %1680 = vmatprep.subr.bf16.mxu1 %v1596_v20  ;;  %v10165_v20 = vld [vmem:[#allocation8] ss:$2 sm:$0xff] }
 0x330   :  { %1765 = vmatpush1.bf16.msra.mxu0 %v1591_v22  ;;  %v1786_v22 = vrot.slane %v10165_v20, %v10139_v28 }
 0x331   :  { %1766 = vmatprep.subr.bf16.mxu0 %v1600_v23  ;;  %v1790_v23 = vrot.slane %v10165_v20, %v10142_v30 }
 0x332   :  { %1681 = vmatpush1.bf16.msra.mxu1 %v1595_v25 }
 0x333   :  { %1682 = vmatprep.subr.bf16.mxu1 %v1604_v26  ;;  %v1849_v26 = vrot.slane %v10167_v21, %v10142_v30 }
 0x334   :  { %1767 = vmatpush1.bf16.msra.mxu0 %v1599_v29 }
 0x335   :  { %1768 = vmatprep.subr.bf16.mxu0 %v1608_v32 }
 0x336   :  { %1683 = vmatpush1.bf16.msra.mxu1 %v1603_v33 }
 0x337   :  { %1695 = vmatprep.subr.bf16.mxu1 %v1486_v34 }
 0x338   :  { %1769 = vmatpush1.bf16.msra.mxu0 %v1607_v36 }
 0x339   :  { %1685 = vmatmul.mubr.bf16.vlgmr.msra.gmra.mrb[8].mxu1 %v10152_v9 }
 0x33a   :  { %1696 = vmatpush1.bf16.msra.mxu1 %v1485_v37  ;;  %1727 = vmatprep.mubr.bf16.mxu1 %v10154_v53  ;;  %v1526_v53 = vunpack.c.h.s8.bf16 %v1438_v48  ;;  %v8619_v37 = vld [vmem:[%s12004_s3] ss:$0 sm:$0xff] }
 0x33b   :  { %1771 = vmatmul.mubr.bf16.vlgmr.msra.gmra.mrb[8].mxu0 %v10152_v9  ;;  %1697 = vmatprep.subr.bf16.mxu1 %v1494_v39 }
 0x33e   :  { %1698 = vmatpush1.bf16.msra.mxu1 %v1493_v41 }
 0x33f   :  { %1699 = vmatprep.subr.bf16.mxu1 %v1502_v42 }
 0x342   :  { %1700 = vmatpush1.bf16.msra.mxu1 %v1501_v45 }
 0x343   :  { %1701 = vmatprep.subr.bf16.mxu1 %v1510_v46  ;;  %v8620_v46 = vld [vmem:[%s12004_s3 + $0x1] ss:$0 sm:$0xff] }
 0x346   :  { %1702 = vmatpush1.bf16.msra.mxu1 %v1509_v49 }
 0x347   :  { %1703 = vmatprep.subr.bf16.mxu1 %v1518_v50 }
 0x34a   :  { %1704 = vmatpush1.bf16.msra.mxu1 %v1517_v52 }
 0x34b   :  { %1705 = vmatprep.subr.bf16.mxu1 %v1526_v53 }
 0x34e   :  { %1706 = vmatpush1.bf16.msra.mxu1 %v1525_v54 }
 0x34f   :  { %1707 = vmatprep.subr.bf16.mxu1 %v1534_v55 }
 0x352   :  { %1708 = vmatpush1.bf16.msra.mxu1 %v1533_v56 }
 0x353   :  { %1709 = vmatprep.subr.bf16.mxu1 %v1542_v58 }
 0x356   :  { %1710 = vmatpush1.bf16.msra.mxu1 %v1541_v57 }
 0x357   :  { %1711 = vmatprep.subr.bf16.mxu1 %v1550_v60 }
 0x35a   :  { %1712 = vmatpush1.bf16.msra.mxu1 %v1549_v62 }
 0x35b   :  { %1713 = vmatprep.subr.bf16.mxu1 %v1558_v1 }
 0x35e   :  { %1714 = vmatpush1.bf16.msra.mxu1 %v1557_v0 }
 0x35f   :  { %1715 = vmatprep.subr.bf16.mxu1 %v1566_v2 }
 0x362   :  { %1716 = vmatpush1.bf16.msra.mxu1 %v1565_v4 }
 0x363   :  { %1717 = vmatprep.subr.bf16.mxu1 %v1574_v5 }
 0x366   :  { %1718 = vmatpush1.bf16.msra.mxu1 %v1573_v7 }
 0x367   :  { %1719 = vmatprep.subr.bf16.mxu1 %v1582_v8  ;;  %v2351_v8 = vld [vmem:[#allocation11 + $0x8] sm:$0xff] }
 0x368   :  { %v2607_v13 = vunpack.c.l.s8.bf16 %v2351_v8 }
 0x36a   :  { %1720 = vmatpush1.bf16.msra.mxu1 %v1581_v11 }
 0x36b   :  { %1721 = vmatprep.subr.bf16.mxu1 %v1590_v12 }
 0x36e   :  { %1722 = vmatpush1.bf16.msra.mxu1 %v1589_v14  ;;  %v2609_v14 = vunpack.c.l.s8.bf16 %v2353_v10 }
 0x36f   :  { %1723 = vmatprep.subr.bf16.mxu1 %v1598_v15  ;;  %v2350_v15 = vld [vmem:[#allocation11] sm:$0xff] }
 0x370   :  { %3290 = vmatprep.subr.bf16.mxu0 %v2609_v14 }
 0x372   :  { %1724 = vmatpush1.bf16.msra.mxu1 %v1597_v17 }
 0x373   :  { %1725 = vmatprep.subr.bf16.mxu1 %v1606_v18 }
 0x376   :  { %1726 = vmatpush1.bf16.msra.mxu1 %v1605_v19  ;;  %v2606_v19 = vunpack.c.l.s8.bf16 %v2350_v15 }
 0x377   :  { %3118 = vmatprep.subr.bf16.mxu1 %v2607_v13 }
 0x379   :  { %1728 = vmatmul.mubr.bf16.vlgmr.msra.gmra.mrb[12].mxu1 %v10152_v9 }
 0x37a   :  { %3119 = vmatpush1.bf16.msra.mxu1 %v2606_v19  ;;  %v2377_v19 = vld [vmem:[#allocation11 + $0xd8] sm:$0xff] }
 0x3cc   :  { %v1643_v25 = vpop.f32.mrb[4].mxu1 }
 0x3cd   :  { %v1823_v29 = vmul.f32 %v1786_v22, %v1643_v25  ;;  %v1645_v31 = vpop.f32.mrb[5].mxu1 }
 0x3ce   :  { %v1824_v9 = vmul.f32 %v1790_v23, %v1645_v31  ;;  %v8719_v32 = vpop.f32.mrb[4].mxu0  ;;  %v1647_v33 = vpop.f32.mrb[6].mxu1 }
 0x3cf   :  { %v10177_v34 = vadd.f32 %v1845_v24, %v1823_v29  ;;  %v1831_v35 = vmul.f32 %v1786_v22, %v1647_v33  ;;  %v8720_v36 = vpop.f32.mrb[5].mxu0  ;;  %v1649_v39 = vpop.f32.mrb[7].mxu1  ;;  %v2608_v22 = vunpack.c.l.s8.bf16 %v2352_v16 }
 0x3d0   :  { %v10182_v40 = vadd.f32 %v1849_v26, %v1824_v9  ;;  %v8721_v41 = vadd.f32 %v8720_v36, %v8719_v32  ;;  %v1832_v42 = vmul.f32 %v1790_v23, %v1649_v39  ;;  %v8722_v43 = vpop.f32.mrb[6].mxu0  ;;  %v2615_v9 = vunpack.c.h.s8.bf16 %v2351_v8 }
 0x3d1   :  { %v10184_v45 = vadd.f32 %v1845_v24, %v1831_v35  ;;  %v8723_v48 = vpop.f32.mrb[7].mxu0  ;;  %v1963_v52 = vmul.f32 %v10177_v34, %v10177_v34  ;;  %3291 = vmatpush1.bf16.msra.mxu0 %v2608_v22  ;;  %v2617_v32 = vunpack.c.h.s8.bf16 %v2353_v10  ;;  %v2614_v36 = vunpack.c.h.s8.bf16 %v2350_v15  ;;  %v2366_v10 = vld [vmem:[#allocation11 + $0x80] sm:$0xff] }
 0x3d2   :  { %v1403_v49 = vmul.f32 %v8721_v41, %v8619_v37  ;;  %v10189_v50 = vadd.f32 %v1849_v26, %v1832_v42  ;;  %v8724_v51 = vadd.f32 %v8723_v48, %v8722_v43  ;;  %v1964_v53 = vmul.f32 %v10182_v40, %v10182_v40  ;;  %3120 = vmatprep.subr.bf16.mxu1 %v2615_v9  ;;  %v2361_v48 = vld [vmem:[#allocation11 + $0x58] sm:$0xff] }
 0x3d3   :  { %v1898_v44 = vadd.f32 %v10184_v45, %v10177_v34  ;;  %v1971_v54 = vmul.f32 %v10184_v45, %v10184_v45  ;;  %3292 = vmatprep.subr.bf16.mxu0 %v2617_v32  ;;  %3121 = vmatpush1.bf16.msra.mxu1 %v2614_v36 }
 0x3d4   :  { %v1410_v55 = vadd.f32 %v8620_v46, %v1403_v49  ;;  %v1905_v47 = vadd.f32 %v10189_v50, %v10182_v40  ;;  %v1972_v56 = vmul.f32 %v10189_v50, %v10189_v50  ;;  %v1404_v58 = vmul.f32 %v8724_v51, %v8619_v37 }
 0x3d5   :  { %v1899_v59 = vrot.slane %v1898_v44, 4  ;;  %v1979_v57 = vadd.f32 %v1971_v54, %v1963_v52  ;;  %v2616_v37 = vunpack.c.h.s8.bf16 %v2352_v16  ;;  %v2360_v54 = vld [vmem:[#allocation11 + $0x50] sm:$0xff]  ;;  %v2646_v16 = vunpack.c.h.s8.bf16 %v2366_v10 }
 0x3d6   :  { %v1906_v60 = vrot.slane %v1905_v47, 4  ;;  %v1986_v61 = vadd.f32 %v1972_v56, %v1964_v53  ;;  %v1411_v62 = vadd.f32 %v8620_v46, %v1404_v58  ;;  %1413 = vst.msk [vmem:[#allocation29] sm:$0xff] %vm1412_vm1, %v1410_v55  ;;  %v2359_v46 = vld [vmem:[#allocation11 + $0x48] sm:$0xff]  ;;  %v2625_v53 = vunpack.c.l.s8.bf16 %v2361_v48 }
 0x3d7   :  { %v1900_v1 = vadd.f32 %v1899_v59, %v1898_v44  ;;  %v1980_v63 = vrot.slane %v1979_v57, 4  ;;  %3293 = vmatpush1.bf16.msra.mxu0 %v2616_v37  ;;  %v2623_v52 = vunpack.c.l.s8.bf16 %v2359_v46  ;;  %v2358_v44 = vld [vmem:[#allocation11 + $0x40] sm:$0xff]  ;;  %v2624_v58 = vunpack.c.l.s8.bf16 %v2360_v54 }
 0x3d8   :  { %v1907_v0 = vadd.f32 %v1906_v60, %v1905_v47  ;;  %v1987_v2 = vrot.slane %v1986_v61, 4  ;;  %v10204_v3 = vpack.c.bf16 %v1411_v62, %v1410_v55  ;;  %1414 = vst.msk [vmem:[#allocation29 + $0x8] sm:$0xff] %vm1412_vm1, %v1411_v62  ;;  %v2622_v56 = vunpack.c.l.s8.bf16 %v2358_v44  ;;  %3294 = vmatprep.subr.bf16.mxu0 %v2625_v53 }
 0x3d9   :  { %v1901_v4 = vrot.slane %v1900_v1, 2  ;;  %v1981_v5 = vadd.f32 %v1980_v63, %v1979_v57  ;;  %3122 = vmatprep.subr.bf16.mxu1 %v2623_v52  ;;  %v2633_v62 = vunpack.c.h.s8.bf16 %v2361_v48  ;;  %v2630_v63 = vunpack.c.h.s8.bf16 %v2358_v44 }
 0x3da   :  { %12005 = vst [vmem:[#allocation46_spill] sm:$0xff] %v10204_v3  ;;  %v1908_v6 = vrot.slane %v1907_v0, 2  ;;  %v1988_v7 = vadd.f32 %v1987_v2, %v1986_v61  ;;  %3123 = vmatpush1.bf16.msra.mxu1 %v2622_v56  ;;  %v2631_v61 = vunpack.c.h.s8.bf16 %v2359_v46  ;;  %v2391_v56 = vld [vmem:[#allocation11 + $0x148] sm:$0xff] }
 0x3db   :  { %v1902_v11 = vadd.f32 %v1901_v4, %v1900_v1  ;;  %v1982_v12 = vrot.slane %v1981_v5, 2  ;;  %3295 = vmatpush1.bf16.msra.mxu0 %v2624_v58  ;;  %v2393_v58 = vld [vmem:[#allocation11 + $0x158] sm:$0xff] }
 0x3dc   :  { %v1909_v17 = vadd.f32 %v1908_v6, %v1907_v0  ;;  %v1989_v18 = vrot.slane %v1988_v7, 2  ;;  %v2632_v0 = vunpack.c.h.s8.bf16 %v2360_v54  ;;  %3124 = vmatprep.subr.bf16.mxu1 %v2631_v61  ;;  %3296 = vmatprep.subr.bf16.mxu0 %v2633_v62  ;;  %v2369_v6 = vld [vmem:[#allocation11 + $0x98] sm:$0xff]  ;;  %v2392_v61 = vld [vmem:[#allocation11 + $0x150] sm:$0xff] }
 0x3dd   :  { %v1903_v23 = vrot.slane %v1902_v11, 1  ;;  %v1983_v24 = vadd.f32 %v1982_v12, %v1981_v5  ;;  %v2367_v5 = vld [vmem:[#allocation11 + $0x88] sm:$0xff]  ;;  %v2641_v8 = vunpack.c.l.s8.bf16 %v2369_v6  ;;  %v2638_v12 = vunpack.c.l.s8.bf16 %v2366_v10  ;;  %v2398_v10 = vld [vmem:[#allocation11 + $0x180] sm:$0xff] }
 0x3de   :  { %v1910_v25 = vrot.slane %v1909_v17, 1  ;;  %v1990_v26 = vadd.f32 %v1989_v18, %v1988_v7  ;;  %3125 = vmatpush1.bf16.msra.mxu1 %v2630_v63  ;;  %v2639_v7 = vunpack.c.l.s8.bf16 %v2367_v5  ;;  %v2647_v14 = vunpack.c.h.s8.bf16 %v2367_v5  ;;  %v2375_v18 = vld [vmem:[#allocation11 + $0xc8] sm:$0xff] }
 0x3df   :  { %v1904_v29 = vadd.f32 %v1903_v23, %v1902_v11  ;;  %v1984_v31 = vrot.slane %v1983_v24, 1  ;;  %3297 = vmatpush1.bf16.msra.mxu0 %v2632_v0  ;;  %v2368_v11 = vld [vmem:[#allocation11 + $0x90] sm:$0xff]  ;;  %v2649_v15 = vunpack.c.h.s8.bf16 %v2369_v6  ;;  %v2655_v22 = vunpack.c.l.s8.bf16 %v2375_v18  ;;  %v2399_v5 = vld [vmem:[#allocation11 + $0x188] sm:$0xff]  ;;  %v2401_v6 = vld [vmem:[#allocation11 + $0x198] sm:$0xff] }
 0x3e0   :  { %v1911_v33 = vadd.f32 %v1910_v25, %v1909_v17  ;;  %v1991_v35 = vrot.slane %v1990_v26, 1  ;;  %v2640_v13 = vunpack.c.l.s8.bf16 %v2368_v11  ;;  %3126 = vmatprep.subr.bf16.mxu1 %v2639_v7  ;;  %3298 = vmatprep.subr.bf16.mxu0 %v2641_v8  ;;  %v2648_v17 = vunpack.c.h.s8.bf16 %v2368_v11  ;;  %v2376_v25 = vld [vmem:[#allocation11 + $0xd0] sm:$0xff] }
 0x3e1   :  { %v10207_v39 = vmul.f32 0.0625, %v1904_v29  ;;  %v1985_v41 = vadd.f32 %v1984_v31, %v1983_v24  ;;  %v2657_v23 = vunpack.c.l.s8.bf16 %v2377_v19  ;;  %v2374_v24 = vld [vmem:[#allocation11 + $0xc0] sm:$0xff]  ;;  %v2656_v29 = vunpack.c.l.s8.bf16 %v2376_v25  ;;  %v2400_v11 = vld [vmem:[#allocation11 + $0x190] sm:$0xff] }
 0x3e2   :  { %v10209_v42 = vmul.f32 0.0625, %v1911_v33  ;;  %v1992_v43 = vadd.f32 %v1991_v35, %v1990_v26  ;;  %3127 = vmatpush1.bf16.msra.mxu1 %v2638_v12  ;;  %v2654_v26 = vunpack.c.l.s8.bf16 %v2374_v24  ;;  %v2663_v33 = vunpack.c.h.s8.bf16 %v2375_v18 }
 0x3e3   :  { %v2035_v49 = vmul.f32 0.0625, %v1985_v41  ;;  %v2043_v51 = vmul.f32 %v10207_v39, %v10207_v39  ;;  %3299 = vmatpush1.bf16.msra.mxu0 %v2640_v13  ;;  %3128 = vmatprep.subr.bf16.mxu1 %v2647_v14  ;;  %v2665_v35 = vunpack.c.h.s8.bf16 %v2377_v19  ;;  %v2662_v36 = vunpack.c.h.s8.bf16 %v2374_v24  ;;  %v2383_v41 = vld [vmem:[#allocation11 + $0x108] sm:$0xff] }
 0x3e4   :  { %v2036_v55 = vmul.f32 0.0625, %v1992_v43  ;;  %v2044_v47 = vmul.f32 %v10209_v42, %v10209_v42  ;;  %3300 = vmatprep.subr.bf16.mxu0 %v2649_v15  ;;  %v2664_v37 = vunpack.c.h.s8.bf16 %v2376_v25  ;;  %v2385_v43 = vld [vmem:[#allocation11 + $0x118] sm:$0xff]  ;;  %v2671_v46 = vunpack.c.l.s8.bf16 %v2383_v41 }
 0x3e5   :  { %v2051_v59 = vsub.f32 %v2035_v49, %v2043_v51  ;;  %v2673_v48 = vunpack.c.l.s8.bf16 %v2385_v43  ;;  %v2382_v49 = vld [vmem:[#allocation11 + $0x100] sm:$0xff]  ;;  %v2384_v51 = vld [vmem:[#allocation11 + $0x110] sm:$0xff]  ;;  %v2679_v44 = vunpack.c.h.s8.bf16 %v2383_v41  ;;  %v2681_v54 = vunpack.c.h.s8.bf16 %v2385_v43 }
 0x3e6   :  { %v2052_v57 = vsub.f32 %v2036_v55, %v2044_v47  ;;  %3129 = vmatpush1.bf16.msra.mxu1 %v2646_v16  ;;  %v2670_v52 = vunpack.c.l.s8.bf16 %v2382_v49  ;;  %v2672_v53 = vunpack.c.l.s8.bf16 %v2384_v51  ;;  %v2678_v55 = vunpack.c.h.s8.bf16 %v2382_v49  ;;  %v2408_v41 = vld [vmem:[#allocation11 + $0x1d0] sm:$0xff] }
 0x3e7   :  { %v2059_v60 = vmax.f32 %v2051_v59, 0.0  ;;  %3301 = vmatpush1.bf16.msra.mxu0 %v2648_v17  ;;  %3130 = vmatprep.subr.bf16.mxu1 %v2655_v22  ;;  %v2680_v47 = vunpack.c.h.s8.bf16 %v2384_v51  ;;  %v2687_v59 = vunpack.c.l.s8.bf16 %v2391_v56  ;;  %v2695_v63 = vunpack.c.h.s8.bf16 %v2391_v56 }
 0x3e8   :  { %v2060_v1 = vmax.f32 %v2052_v57, 0.0  ;;  %3302 = vmatprep.subr.bf16.mxu0 %v2657_v23  ;;  %v2689_v57 = vunpack.c.l.s8.bf16 %v2393_v58  ;;  %v2697_v0 = vunpack.c.h.s8.bf16 %v2393_v58  ;;  %v2703_v7 = vunpack.c.l.s8.bf16 %v2399_v5  ;;  %v10237_v58 = vld [vmem:[#allocation11 + $0x208] sm:$0xff] }
 0x3e9   :  { %v2068_v2 = vadd.f32 1e-05, %v2059_v60  ;;  %v2390_v60 = vld [vmem:[#allocation11 + $0x140] sm:$0xff]  ;;  %v2705_v8 = vunpack.c.l.s8.bf16 %v2401_v6  ;;  %v2702_v13 = vunpack.c.l.s8.bf16 %v2398_v10  ;;  %v2704_v14 = vunpack.c.l.s8.bf16 %v2400_v11 }
 0x3ea   :  { %v2069_v4 = vadd.f32 1e-05, %v2060_v1  ;;  %3131 = vmatpush1.bf16.msra.mxu1 %v2654_v26  ;;  %v2686_v62 = vunpack.c.l.s8.bf16 %v2390_v60  ;;  %v2688_v1 = vunpack.c.l.s8.bf16 %v2392_v61  ;;  %v2711_v22 = vunpack.c.h.s8.bf16 %v2399_v5 }
 0x3eb   :  { %8963 = vrsqrt.f32 %v2068_v2  ;;  %3303 = vmatpush1.bf16.msra.mxu0 %v2656_v29  ;;  %3132 = vmatprep.subr.bf16.mxu1 %v2663_v33  ;;  %v2694_v2 = vunpack.c.h.s8.bf16 %v2390_v60  ;;  %v2713_v24 = vunpack.c.h.s8.bf16 %v2401_v6  ;;  %v10222_v26 = vsub.s32 2, %v10136_v27  ;;  %v2407_v33 = vld [vmem:[#allocation11 + $0x1c8] sm:$0xff] }
 0x3ec   :  { %8965 = vrsqrt.f32 %v2069_v4  ;;  %3304 = vmatprep.subr.bf16.mxu0 %v2665_v35  ;;  %v2696_v4 = vunpack.c.h.s8.bf16 %v2392_v61  ;;  %v10225_v29 = vsub.s32 3, %v10136_v27  ;;  %v2409_v35 = vld [vmem:[#allocation11 + $0x1d8] sm:$0xff]  ;;  %v2712_v43 = vunpack.c.h.s8.bf16 %v2400_v11 }
 0x3ed   :  { %v2719_v49 = vunpack.c.l.s8.bf16 %v2407_v33  ;;  %v2721_v51 = vunpack.c.l.s8.bf16 %v2409_v35  ;;  %v2729_v56 = vunpack.c.h.s8.bf16 %v2409_v35  ;;  %v1853_v61 = vrot.slane %v10167_v21, %v10222_v26 }
 0x3ee   :  { %3133 = vmatpush1.bf16.msra.mxu1 %v2662_v36  ;;  %v2710_v36 = vunpack.c.h.s8.bf16 %v2398_v10 }
 0x3ef   :  { %3305 = vmatpush1.bf16.msra.mxu0 %v2664_v37  ;;  %3134 = vmatprep.subr.bf16.mxu1 %v2671_v46  ;;  %v2406_v37 = vld [vmem:[#allocation11 + $0x1c0] sm:$0xff]  ;;  %v1794_v46 = vrot.slane %v10165_v20, %v10222_v26 }
 0x3f0   :  { %3306 = vmatprep.subr.bf16.mxu0 %v2673_v48  ;;  %v10230_v48 = vsub.s32 6, %v10136_v27 }
 0x3f2   :  { %3135 = vmatpush1.bf16.msra.mxu1 %v2670_v52  ;;  %v1798_v52 = vrot.slane %v10165_v20, %v10225_v29 }
 0x3f3   :  { %3307 = vmatpush1.bf16.msra.mxu0 %v2672_v53  ;;  %3136 = vmatprep.subr.bf16.mxu1 %v2679_v44  ;;  %v2718_v53 = vunpack.c.l.s8.bf16 %v2406_v37  ;;  %v2720_v44 = vunpack.c.l.s8.bf16 %v2408_v41 }
 0x3f4   :  { %3308 = vmatprep.subr.bf16.mxu0 %v2681_v54 }
 0x3f5   :  { %v10215_v31 = vpop.eup %8963 }
 0x3f6   :  { %v10217_v9 = vpop.eup %8965  ;;  %3137 = vmatpush1.bf16.msra.mxu1 %v2678_v55  ;;  %v10235_v55 = vsub.s32 7, %v10136_v27 }
 0x3f7   :  { %3309 = vmatpush1.bf16.msra.mxu0 %v2680_v47  ;;  %3138 = vmatprep.subr.bf16.mxu1 %v2687_v59  ;;  %v2727_v47 = vunpack.c.h.s8.bf16 %v2407_v33 }
 0x3f8   :  { %3310 = vmatprep.subr.bf16.mxu0 %v2689_v57  ;;  %v10239_v57 = vld [vmem:[#allocation11 + $0x218] sm:$0xff]  ;;  %v1814_v6 = vrot.slane %v10165_v20, %v10235_v55 }
 0x3fa   :  { %3139 = vmatpush1.bf16.msra.mxu1 %v2686_v62  ;;  %v1810_v62 = vrot.slane %v10165_v20, %v10230_v48 }
 0x3fb   :  { %3311 = vmatpush1.bf16.msra.mxu0 %v2688_v1  ;;  %3140 = vmatprep.subr.bf16.mxu1 %v2695_v63  ;;  %v2726_v1 = vunpack.c.h.s8.bf16 %v2406_v37 }
 0x3fc   :  { %3312 = vmatprep.subr.bf16.mxu0 %v2697_v0  ;;  %v1857_v0 = vrot.slane %v10167_v21, %v10225_v29 }
 0x3fe   :  { %3141 = vmatpush1.bf16.msra.mxu1 %v2694_v2  ;;  %v2728_v2 = vunpack.c.h.s8.bf16 %v2408_v41 }
 0x3ff   :  { %3313 = vmatpush1.bf16.msra.mxu0 %v2696_v4  ;;  %3142 = vmatprep.subr.bf16.mxu1 %v2703_v7  ;;  %v2735_v4 = vunpack.c.l.s8.bf16 %v10237_v58 }
 0x400   :  { %3314 = vmatprep.subr.bf16.mxu0 %v2705_v8  ;;  %v2737_v8 = vunpack.c.l.s8.bf16 %v10239_v57 }
 0x402   :  { %3143 = vmatpush1.bf16.msra.mxu1 %v2702_v13  ;;  %v1869_v13 = vrot.slane %v10167_v21, %v10230_v48 }
 0x403   :  { %3315 = vmatpush1.bf16.msra.mxu0 %v2704_v14  ;;  %3144 = vmatprep.subr.bf16.mxu1 %v2711_v22 }
 0x404   :  { %3316 = vmatprep.subr.bf16.mxu0 %v2713_v24 }
 0x406   :  { %3145 = vmatpush1.bf16.msra.mxu1 %v2710_v36 }
 0x407   :  { %3317 = vmatpush1.bf16.msra.mxu0 %v2712_v43  ;;  %3146 = vmatprep.subr.bf16.mxu1 %v2719_v49 }
 0x408   :  { %3318 = vmatprep.subr.bf16.mxu0 %v2721_v51 }
 0x40a   :  { %3147 = vmatpush1.bf16.msra.mxu1 %v2718_v53 }
 0x40b   :  { %3319 = vmatpush1.bf16.msra.mxu0 %v2720_v44  ;;  %3148 = vmatprep.subr.bf16.mxu1 %v2727_v47 }
 0x40c   :  { %v1686_v12 = vpop.f32.mrb[8].mxu1  ;;  %3320 = vmatprep.subr.bf16.mxu0 %v2729_v56 }
 0x40d   :  { %v1688_v15 = vpop.f32.mrb[9].mxu1  ;;  %v1825_v60 = vmul.f32 %v1794_v46, %v1686_v12 }
 0x40e   :  { %v1690_v16 = vpop.f32.mrb[10].mxu1  ;;  %v1772_v17 = vpop.f32.mrb[8].mxu0  ;;  %v1826_v63 = vmul.f32 %v1798_v52, %v1688_v15  ;;  %3149 = vmatpush1.bf16.msra.mxu1 %v2726_v1 }
 0x40f   :  { %v1692_v18 = vpop.f32.mrb[11].mxu1  ;;  %v1774_v19 = vpop.f32.mrb[9].mxu0  ;;  %v1833_v54 = vmul.f32 %v1794_v46, %v1690_v16  ;;  %v10255_v11 = vadd.f32 %v1853_v61, %v1825_v60  ;;  %v1829_v12 = vmul.f32 %v1810_v62, %v1772_v17  ;;  %v1873_v16 = vrot.slane %v10167_v21, %v10235_v55  ;;  %3321 = vmatpush1.bf16.msra.mxu0 %v2728_v2 }
 0x410   :  { %v1776_v23 = vpop.f32.mrb[10].mxu0  ;;  %v1834_v59 = vmul.f32 %v1798_v52, %v1692_v18  ;;  %v10259_v15 = vadd.f32 %v1857_v0, %v1826_v63  ;;  %3161 = vmatprep.subr.bf16.mxu1 %v2735_v4  ;;  %3333 = vmatprep.subr.bf16.mxu0 %v2737_v8 }
 0x411   :  { %v1778_v25 = vpop.f32.mrb[11].mxu0  ;;  %v10248_v5 = vadd.f32 %v1853_v61, %v1833_v54  ;;  %v1837_v7 = vmul.f32 %v1810_v62, %v1776_v23  ;;  %v1830_v23 = vmul.f32 %v1814_v6, %v1774_v19  ;;  %v1965_v33 = vmul.f32 %v10255_v11, %v10255_v11 }
 0x412   :  { %v10253_v10 = vadd.f32 %v1857_v0, %v1834_v59  ;;  %v1838_v14 = vmul.f32 %v1814_v6, %v1778_v25  ;;  %v10275_v35 = vadd.f32 %v1869_v13, %v1829_v12  ;;  %v1966_v37 = vmul.f32 %v10259_v15, %v10259_v15 }
 0x413   :  { %v1912_v18 = vadd.f32 %v10248_v5, %v10255_v11  ;;  %v1973_v22 = vmul.f32 %v10248_v5, %v10248_v5  ;;  %v10267_v17 = vadd.f32 %v1869_v13, %v1837_v7  ;;  %v10281_v43 = vadd.f32 %v1873_v16, %v1830_v23 }
 0x414   :  { %v1919_v24 = vadd.f32 %v10253_v10, %v10259_v15  ;;  %v1974_v25 = vmul.f32 %v10253_v10, %v10253_v10  ;;  %12007 = vst [vmem:[#allocation48_spill] sm:$0xff] %v10275_v35  ;;  %v10277_v36 = vadd.f32 %v1873_v16, %v1838_v14  ;;  %v1969_v44 = vmul.f32 %v10275_v35, %v10275_v35 }
 0x415   :  { %12006 = vst [vmem:[#allocation47_spill] sm:$0xff] %v10267_v17  ;;  %v1913_v19 = vrot.slane %v1912_v18, 4  ;;  %v1993_v41 = vadd.f32 %v1973_v22, %v1965_v33  ;;  %12009 = vst [vmem:[#allocation50_spill] sm:$0xff] %v10281_v43  ;;  %v1940_v46 = vadd.f32 %v10267_v17, %v10275_v35  ;;  %v1977_v52 = vmul.f32 %v10267_v17, %v10267_v17 }
 0x416   :  { %12008 = vst [vmem:[#allocation49_spill] sm:$0xff] %v10277_v36  ;;  %v1920_v49 = vrot.slane %v1919_v24, 4  ;;  %v2000_v51 = vadd.f32 %v1974_v25, %v1966_v37  ;;  %v1947_v53 = vadd.f32 %v10277_v36, %v10281_v43  ;;  %v1978_v54 = vmul.f32 %v10277_v36, %v10277_v36 }
 0x417   :  { %v1914_v47 = vadd.f32 %v1913_v19, %v1912_v18  ;;  %v1994_v56 = vrot.slane %v1993_v41, 4  ;;  %v1941_v59 = vrot.slane %v1940_v46, 4  ;;  %v1970_v62 = vmul.f32 %v10281_v43, %v10281_v43 }
 0x418   :  { %v1921_v60 = vadd.f32 %v1920_v49, %v1919_v24  ;;  %v2001_v61 = vrot.slane %v2000_v51, 4  ;;  %v2021_v1 = vadd.f32 %v1977_v52, %v1969_v44  ;;  %v1948_v63 = vrot.slane %v1947_v53, 4 }
 0x419   :  { %v2028_v0 = vadd.f32 %v1978_v54, %v1970_v62  ;;  %v1915_v2 = vrot.slane %v1914_v47, 2  ;;  %v1995_v4 = vadd.f32 %v1994_v56, %v1993_v41  ;;  %v1942_v6 = vadd.f32 %v1941_v59, %v1940_v46 }
 0x41a   :  { %v1922_v7 = vrot.slane %v1921_v60, 2  ;;  %v2002_v8 = vadd.f32 %v2001_v61, %v2000_v51  ;;  %v2022_v12 = vrot.slane %v2021_v1, 4  ;;  %v1949_v13 = vadd.f32 %v1948_v63, %v1947_v53 }
 0x41b   :  { %v2029_v14 = vrot.slane %v2028_v0, 4  ;;  %v1916_v16 = vadd.f32 %v1915_v2, %v1914_v47  ;;  %v1996_v18 = vrot.slane %v1995_v4, 2  ;;  %v1943_v22 = vrot.slane %v1942_v6, 2 }
 0x41c   :  { %v1923_v23 = vadd.f32 %v1922_v7, %v1921_v60  ;;  %v2003_v24 = vrot.slane %v2002_v8, 2  ;;  %v2023_v25 = vadd.f32 %v2022_v12, %v2021_v1  ;;  %v1950_v33 = vrot.slane %v1949_v13, 2 }
 0x41d   :  { %v2030_v37 = vadd.f32 %v2029_v14, %v2028_v0  ;;  %v1917_v19 = vrot.slane %v1916_v16, 1  ;;  %v1997_v49 = vadd.f32 %v1996_v18, %v1995_v4  ;;  %v1944_v52 = vadd.f32 %v1943_v22, %v1942_v6 }
 0x41e   :  { %v10296_v44 = vsub.s32 4, %v10136_v27  ;;  %v1924_v41 = vrot.slane %v1923_v23, 1  ;;  %v2004_v46 = vadd.f32 %v2003_v24, %v2002_v8  ;;  %v2024_v51 = vrot.slane %v2023_v25, 2 }
 0x41f   :  { %v10299_v53 = vsub.s32 5, %v10136_v27  ;;  %v1951_v54 = vadd.f32 %v1950_v33, %v1949_v13  ;;  %v2031_v47 = vrot.slane %v2030_v37, 2  ;;  %v1918_v56 = vadd.f32 %v1917_v19, %v1916_v16 }
 0x420   :  { %v1998_v59 = vrot.slane %v1997_v49, 1  ;;  %v1945_v60 = vrot.slane %v1944_v52, 1  ;;  %v1802_v61 = vrot.slane %v10165_v20, %v10296_v44  ;;  %v1925_v62 = vadd.f32 %v1924_v41, %v1923_v23 }
 0x421   :  { %v2005_v1 = vrot.slane %v2004_v46, 1  ;;  %v2025_v63 = vadd.f32 %v2024_v51, %v2023_v25  ;;  %v1806_v0 = vrot.slane %v10165_v20, %v10299_v53  ;;  %v1952_v2 = vrot.slane %v1951_v54, 1 }
 0x422   :  { %v1861_v4 = vrot.slane %v10167_v21, %v10296_v44  ;;  %v2032_v6 = vadd.f32 %v2031_v47, %v2030_v37  ;;  %v1865_v8 = vrot.slane %v10167_v21, %v10299_v53  ;;  %v10309_v12 = vmul.f32 0.0625, %v1918_v56 }
 0x423   :  { %v1999_v13 = vadd.f32 %v1998_v59, %v1997_v49  ;;  %v1946_v14 = vadd.f32 %v1945_v60, %v1944_v52  ;;  %v10311_v22 = vmul.f32 0.0625, %v1925_v62  ;;  %v2006_v23 = vadd.f32 %v2005_v1, %v2004_v46 }
 0x424   :  { %v2026_v24 = vrot.slane %v2025_v63, 1  ;;  %v1953_v33 = vadd.f32 %v1952_v2, %v1951_v54  ;;  %v2033_v51 = vrot.slane %v2032_v6, 1  ;;  %v2045_v49 = vmul.f32 %v10309_v12, %v10309_v12 }
 0x425   :  { %v2037_v56 = vmul.f32 0.0625, %v1999_v13  ;;  %v10319_v52 = vmul.f32 0.0625, %v1946_v14  ;;  %v2038_v46 = vmul.f32 0.0625, %v2006_v23  ;;  %v2046_v54 = vmul.f32 %v10311_v22, %v10311_v22 }
 0x426   :  { %v2027_v60 = vadd.f32 %v2026_v24, %v2025_v63 }
 0x44c   :  { %v1729_v7 = vpop.f32.mrb[12].mxu1 }
 0x44d   :  { %v1827_v16 = vmul.f32 %v1802_v61, %v1729_v7  ;;  %v1731_v18 = vpop.f32.mrb[13].mxu1 }
 0x44e   :  { %v1828_v20 = vmul.f32 %v1806_v0, %v1731_v18  ;;  %v1733_v25 = vpop.f32.mrb[14].mxu1  ;;  %v2041_v18 = vmul.f32 0.0625, %v2027_v60 }
 0x44f   :  { %v10313_v19 = vadd.f32 %v1861_v4, %v1827_v16  ;;  %v1835_v37 = vmul.f32 %v1802_v61, %v1733_v25  ;;  %v1735_v41 = vpop.f32.mrb[15].mxu1  ;;  %v10327_v61 = vmul.f32 0.0625, %v1953_v33  ;;  %v2053_v16 = vsub.f32 %v2037_v56, %v2045_v49 }
 0x450   :  { %v10315_v47 = vadd.f32 %v1865_v8, %v1828_v20  ;;  %v1836_v21 = vmul.f32 %v1806_v0, %v1735_v41  ;;  %v2054_v20 = vsub.f32 %v2038_v46, %v2046_v54  ;;  %v2049_v25 = vmul.f32 %v10319_v52, %v10319_v52 }
 0x451   :  { %v10321_v59 = vadd.f32 %v1861_v4, %v1835_v37  ;;  %v1967_v1 = vmul.f32 %v10313_v19, %v10313_v19  ;;  %v2034_v4 = vadd.f32 %v2033_v51, %v2032_v6  ;;  %v2050_v41 = vmul.f32 %v10327_v61, %v10327_v61 }
 0x452   :  { %v10325_v62 = vadd.f32 %v1865_v8, %v1836_v21  ;;  %v1968_v7 = vmul.f32 %v10315_v47, %v10315_v47  ;;  %v2061_v56 = vmax.f32 %v2053_v16, 0.0  ;;  %v2057_v49 = vsub.f32 %v2041_v18, %v2049_v25 }
 0x453   :  { %v1926_v0 = vadd.f32 %v10321_v59, %v10313_v19  ;;  %v1975_v2 = vmul.f32 %v10321_v59, %v10321_v59  ;;  %v2042_v37 = vmul.f32 0.0625, %v2034_v4  ;;  %v2062_v46 = vmax.f32 %v2054_v20, 0.0 }
 0x454   :  { %v1933_v63 = vadd.f32 %v10325_v62, %v10315_v47  ;;  %v1976_v8 = vmul.f32 %v10325_v62, %v10325_v62  ;;  %v2070_v35 = vadd.f32 1e-05, %v2061_v56  ;;  %v2065_v36 = vmax.f32 %v2057_v49, 0.0 }
 0x455   :  { %v1927_v13 = vrot.slane %v1926_v0, 4  ;;  %v2007_v14 = vadd.f32 %v1975_v2, %v1967_v1  ;;  %v2058_v54 = vsub.f32 %v2042_v37, %v2050_v41  ;;  %v2071_v43 = vadd.f32 1e-05, %v2062_v46 }
 0x456   :  { %v1934_v23 = vrot.slane %v1933_v63, 4  ;;  %v2014_v24 = vadd.f32 %v1976_v8, %v1968_v7  ;;  %8967 = vrsqrt.f32 %v2070_v35  ;;  %v2074_v20 = vadd.f32 1e-05, %v2065_v36 }
 0x457   :  { %v1928_v6 = vadd.f32 %v1927_v13, %v1926_v0  ;;  %v2008_v33 = vrot.slane %v2007_v14, 4  ;;  %8969 = vrsqrt.f32 %v2071_v43 }
 0x458   :  { %v1935_v51 = vadd.f32 %v1934_v23, %v1933_v63  ;;  %v2015_v21 = vrot.slane %v2014_v24, 4  ;;  %8971 = vrsqrt.f32 %v2074_v20 }
 0x459   :  { %v1929_v38 = vrot.slane %v1928_v6, 2  ;;  %v2009_v32 = vadd.f32 %v2008_v33, %v2007_v14  ;;  %v2066_v14 = vmax.f32 %v2058_v54, 0.0 }
 0x45a   :  { %v1936_v3 = vrot.slane %v1935_v51, 2  ;;  %v2016_v1 = vadd.f32 %v2015_v21, %v2014_v24 }
 0x45b   :  { %v1930_v60 = vadd.f32 %v1929_v38, %v1928_v6  ;;  %v2010_v2 = vrot.slane %v2009_v32, 2 }
 0x45c   :  { %v1937_v7 = vadd.f32 %v1936_v3, %v1935_v51  ;;  %v2017_v8 = vrot.slane %v2016_v1, 2 }
 0x45d   :  { %v1931_v0 = vrot.slane %v1930_v60, 1  ;;  %v2011_v13 = vadd.f32 %v2010_v2, %v2009_v32  ;;  %v2075_v32 = vadd.f32 1e-05, %v2066_v14  ;;  %v9516_v2 = vmov 1966171168  }
 0x45e   :  { %v1938_v4 = vrot.slane %v1937_v7, 1  ;;  %v2018_v17 = vadd.f32 %v2017_v8, %v2016_v1  ;;  %v2097_v46 = vunpack.c.l.s4 %v9516_v2 }
 0x45f   :  { %v1932_v63 = vadd.f32 %v1931_v0, %v1930_v60  ;;  %v2012_v23 = vrot.slane %v2011_v13, 1  ;;  %8973 = vrsqrt.f32 %v2075_v32 }
 0x460   :  { %v1939_v33 = vadd.f32 %v1938_v4, %v1937_v7  ;;  %v2019_v24 = vrot.slane %v2018_v17, 1  ;;  %v2098_v36 = vunpack.c.0.s8 %v2097_v46 }
 0x461   :  { %v1959_v16 = vmul.f32 0.0625, %v1932_v63  ;;  %v2013_v18 = vadd.f32 %v2012_v23, %v2011_v13  ;;  %v12010_v23 = vcombine.low %v10215_v31, %v10217_v9 }
 0x462   :  { %v1960_v38 = vmul.f32 0.0625, %v1939_v33  ;;  %v2020_v25 = vadd.f32 %v2019_v24, %v2018_v17  ;;  %v8968_v17 = vpop.eup %8967  ;;  %v10346_v8 = vsub.s32 %v2098_v36, %v10136_v27 }
 0x463   :  { %v2039_v3 = vmul.f32 0.0625, %v2013_v18  ;;  %v2047_v6 = vmul.f32 %v1959_v16, %v1959_v16  ;;  %v8970_v35 = vpop.eup %8969 }
 0x464   :  { %v2040_v37 = vmul.f32 0.0625, %v2020_v25  ;;  %v2048_v41 = vmul.f32 %v1960_v38, %v1960_v38  ;;  %v8972_v54 = vpop.eup %8971  ;;  %v2093_v43 = vcombine.low %v8968_v17, %v8970_v35  ;;  %v2102_v14 = vrot.slane %v12010_v23, %v10346_v8 }
 0x465   :  { %v2055_v51 = vsub.f32 %v2039_v3, %v2047_v6  ;;  %v2067_v6 = vld [vmem:[#allocation10] ss:$2 sm:$0xff] }
 0x466   :  { %v2056_v21 = vsub.f32 %v2040_v37, %v2048_v41  ;;  %v2109_v13 = vrot.slane %v2093_v43, %v10346_v8 }
 0x467   :  { %v2063_v1 = vmax.f32 %v2055_v51, 0.0 }
 0x468   :  { %v2064_v56 = vmax.f32 %v2056_v21, 0.0  ;;  %v2124_v24 = vcombine.low %v2102_v14, %v2109_v13 }
 0x469   :  { %v2072_v49 = vadd.f32 1e-05, %v2063_v1  ;;  %v8974_v7 = vpop.eup %8973 }
 0x46a   :  { %v2073_v60 = vadd.f32 1e-05, %v2064_v56  ;;  %v2095_v4 = vcombine.low %v8972_v54, %v8974_v7  ;;  %v2132_v27 = vrot.slane %v2124_v24, %v10346_v8  ;;  %v10389_v24 = vld [vmem:[#allocation11 + $0x200] sm:$0xff] }
 0x46b   :  { %8975 = vrsqrt.f32 %v2072_v49 }
 0x46c   :  { %8977 = vrsqrt.f32 %v2073_v60  ;;  %v2123_v18 = vrot.slane %v2095_v4, %v10346_v8 }
 0x475   :  { %v8976_v0 = vpop.eup %8975 }
 0x476   :  { %v8978_v63 = vpop.eup %8977 }
 0x477   :  { %v2094_v33 = vcombine.low %v8976_v0, %v8978_v63 }
 0x479   :  { %v2116_v25 = vrot.slane %v2094_v33, %v10346_v8  ;;  %v2144_v33 = vld [vmem:[#allocation10 + $0x1] ss:$2 sm:$0xff] }
 0x47b   :  { %v2125_v20 = vcombine.low %v2116_v25, %v2123_v18  ;;  %v10391_v18 = vld [vmem:[#allocation11 + $0x210] sm:$0xff] }
 0x47d   :  { %v2139_v3 = vrot.slane %v2125_v20, %v10346_v8 }
 0x47f   :  { %v2140_v32 = vcombine.low %v2132_v27, %v2139_v3  ;;  %v2734_v27 = vunpack.c.l.s8.bf16 %v10389_v24 }
 0x481   :  { %v2142_v37 = vmul.f32 %v2140_v32, %v2067_v6 }
 0x483   :  { %v2149_v41 = vrot.slane %v2142_v37, %v10139_v28  ;;  %v2153_v51 = vrot.slane %v2142_v37, %v10142_v30  ;;  %v2157_v31 = vrot.slane %v2142_v37, %v10222_v26  ;;  %v2161_v9 = vrot.slane %v2142_v37, %v10225_v29 }
 0x484   :  { %v2165_v21 = vrot.slane %v2142_v37, %v10296_v44  ;;  %v2169_v1 = vrot.slane %v2142_v37, %v10299_v53  ;;  %v10364_v56 = vrot.slane %v2142_v37, %v10230_v48  ;;  %v10367_v49 = vrot.slane %v2142_v37, %v10235_v55 }
 0x485   :  { %v2186_v60 = vmul.f32 %v2149_v41, %v10207_v39  ;;  %v2187_v2 = vmul.f32 %v2153_v51, %v10209_v42  ;;  %v2188_v46 = vmul.f32 %v2157_v31, %v10309_v12  ;;  %v2189_v17 = vmul.f32 %v2161_v9, %v10311_v22 }
 0x486   :  { %v2190_v35 = vmul.f32 %v2165_v21, %v1959_v16  ;;  %v2191_v36 = vmul.f32 %v2169_v1, %v1960_v38  ;;  %v2192_v54 = vmul.f32 %v10364_v56, %v10319_v52  ;;  %v2193_v43 = vmul.f32 %v10367_v49, %v10327_v61 }
 0x487   :  { %v2202_v7 = vcombine.low %v2186_v60, %v2187_v2  ;;  %v2203_v0 = vcombine.low %v2188_v46, %v2189_v17  ;;  %v2266_v13 = vmul.f32 %v2169_v1, %v10325_v62  ;;  %v2254_v39 = vmul.f32 %v2153_v51, %v10182_v40 }
 0x488   :  { %v2204_v4 = vcombine.low %v2190_v35, %v2191_v36  ;;  %v2205_v42 = vcombine.low %v2192_v54, %v2193_v43  ;;  %v2262_v12 = vmul.f32 %v2153_v51, %v10189_v50  ;;  %v2253_v22 = vmul.f32 %v2149_v41, %v10177_v34 }
 0x489   :  { %v2212_v16 = vrot.slane %v2202_v7, %v10346_v8  ;;  %v2219_v38 = vrot.slane %v2203_v0, %v10346_v8  ;;  %v2261_v52 = vmul.f32 %v2149_v41, %v10184_v45  ;;  %v2258_v62 = vmul.f32 %v2169_v1, %v10315_v47 }
 0x48a   :  { %v2226_v61 = vrot.slane %v2204_v4, %v10346_v8  ;;  %v2233_v63 = vrot.slane %v2205_v42, %v10346_v8  ;;  %v2257_v45 = vmul.f32 %v2165_v21, %v10313_v19  ;;  %v2265_v25 = vmul.f32 %v2165_v21, %v10321_v59 }
 0x48b   :  { %v2234_v23 = vcombine.low %v2212_v16, %v2219_v38  ;;  %v2736_v47 = vunpack.c.l.s8.bf16 %v10391_v18  ;;  %v2256_v3 = vmul.f32 %v2161_v9, %v10259_v15  ;;  %v2264_v51 = vmul.f32 %v2161_v9, %v10253_v10  ;;  %v2423_v38 = vld [vmem:[#allocation11 + $0x248] sm:$0xff] }
 0x48c   :  { %v2235_v40 = vcombine.low %v2226_v61, %v2233_v63  ;;  %v2255_v19 = vmul.f32 %v2157_v31, %v10255_v11  ;;  %v2263_v59 = vmul.f32 %v2157_v31, %v10248_v5  ;;  %v2745_v16 = vunpack.c.h.s8.bf16 %v10239_v57 }
 0x48d   :  { %v2242_v14 = vrot.slane %v2234_v23, %v10346_v8  ;;  %v2742_v23 = vunpack.c.h.s8.bf16 %v10389_v24  ;;  %v2744_v57 = vunpack.c.h.s8.bf16 %v10391_v18  ;;  %v2751_v24 = vunpack.c.l.s8.bf16 %v2423_v38 }
 0x48e   :  { %v2249_v50 = vrot.slane %v2235_v40, %v10346_v8  ;;  %v12011_v40 = vld [vmem:[#allocation50_spill] sm:$0xff] }
 0x490   :  { %v2250_v34 = vcombine.low %v2242_v14, %v2249_v50  ;;  %v2260_v14 = vmul.f32 %v10367_v49, %v12011_v40  ;;  %v2422_v50 = vld [vmem:[#allocation11 + $0x240] sm:$0xff] }
 0x492   :  { %v2252_v20 = vsub.f32 %v2144_v33, %v2250_v34  ;;  %v12012_v34 = vld [vmem:[#allocation49_spill] sm:$0xff] }
 0x494   :  { %v2293_v6 = vrot.slane %v2252_v20, %v10299_v53  ;;  %v2277_v32 = vrot.slane %v2252_v20, %v10142_v30  ;;  %v2273_v37 = vrot.slane %v2252_v20, %v10139_v28  ;;  %v2285_v41 = vrot.slane %v2252_v20, %v10225_v29 }
 0x495   :  { %v2281_v21 = vrot.slane %v2252_v20, %v10222_v26 }
 0x496   :  { %v2323_v1 = vadd.f32 %v2293_v6, %v2266_v13  ;;  %v2311_v60 = vadd.f32 %v2277_v32, %v2254_v39  ;;  %v2319_v2 = vadd.f32 %v2277_v32, %v2262_v12  ;;  %v2310_v15 = vadd.f32 %v2273_v37, %v2253_v22 }
 0x497   :  { %v2318_v46 = vadd.f32 %v2273_v37, %v2261_v52  ;;  %v2313_v17 = vadd.f32 %v2285_v41, %v2256_v3  ;;  %v2321_v35 = vadd.f32 %v2285_v41, %v2264_v51  ;;  %v2312_v36 = vadd.f32 %v2281_v21, %v2255_v19  ;;  %v2425_v52 = vld [vmem:[#allocation11 + $0x258] sm:$0xff]  ;;  %v2424_v37 = vld [vmem:[#allocation11 + $0x250] sm:$0xff] }
 0x498   :  { %v2327_v54 = vmax.f32 %v2311_v60, 0.0  ;;  %v2335_v43 = vmax.f32 %v2319_v2, 0.0  ;;  %v2326_v7 = vmax.f32 %v2310_v15, 0.0  ;;  %v2320_v0 = vadd.f32 %v2281_v21, %v2263_v59  ;;  %v12013_v51 = vld [vmem:[#allocation48_spill] sm:$0xff] }
 0x499   :  { %v2334_v4 = vmax.f32 %v2318_v46, 0.0  ;;  %v2329_v10 = vmax.f32 %v2313_v17, 0.0  ;;  %v2337_v9 = vmax.f32 %v2321_v35, 0.0  ;;  %v2328_v11 = vmax.f32 %v2312_v36, 0.0  ;;  %v2431_v36 = vld [vmem:[#allocation11 + $0x288] sm:$0xff] }
 0x49a   :  { %v10406_v42 = vpack.c.bf16 %v2335_v43, %v2327_v54  ;;  %v2336_v5 = vmax.f32 %v2320_v0, 0.0  ;;  %v2315_v31 = vadd.f32 %v2293_v6, %v2258_v62  ;;  %v2339_v13 = vmax.f32 %v2323_v1, 0.0  ;;  %v2433_v54 = vld [vmem:[#allocation11 + $0x298] sm:$0xff] }
 0x49b   :  { %v10408_v39 = vpack.c.bf16 %v2334_v4, %v2326_v7  ;;  %v10410_v12 = vpack.c.bf16 %v2337_v9, %v2329_v10  ;;  %v2743_v22 = vunpack.c.h.s8.bf16 %v10237_v58  ;;  %v2289_v62 = vrot.slane %v2252_v20, %v10296_v44 }
 0x49c   :  { %3150 = vmatprep.mubr.bf16.mxu1 %v10406_v42  ;;  %3322 = vmatprep.mubr.bf16.mxu0 %v10406_v42  ;;  %v10416_v61 = vpack.c.bf16 %v2336_v5, %v2328_v11  ;;  %v2331_v63 = vmax.f32 %v2315_v31, 0.0  ;;  %v2301_v58 = vrot.slane %v2252_v20, %v10235_v55  ;;  %v2268_v3 = vmul.f32 %v10367_v49, %v12012_v34  ;;  %v2430_v11 = vld [vmem:[#allocation11 + $0x280] sm:$0xff]  ;;  %v2432_v5 = vld [vmem:[#allocation11 + $0x290] sm:$0xff] }
 0x49d   :  { %3151 = vmatmul.mubr.bf16.vlgmr.msra.gmra.mrb[16].mxu1 %v10408_v39  ;;  %3323 = vmatmul.mubr.bf16.vlgmr.msra.gmra.mrb[12].mxu0 %v10408_v39  ;;  %v2297_v6 = vrot.slane %v2252_v20, %v10230_v48  ;;  %v2753_v32 = vunpack.c.l.s8.bf16 %v2425_v52  ;;  %v2314_v41 = vadd.f32 %v2289_v62, %v2257_v45  ;;  %v2259_v19 = vmul.f32 %v10364_v56, %v12013_v51  ;;  %v12014_v20 = vld [vmem:[#allocation47_spill] sm:$0xff] }
 0x49e   :  { %3162 = vmatpush1.bf16.msra.mxu1 %v2734_v27  ;;  %3334 = vmatpush1.bf16.msra.mxu0 %v2736_v47  ;;  %v10426_v33 = vpack.c.bf16 %v2339_v13, %v2331_v63  ;;  %v2322_v27 = vadd.f32 %v2289_v62, %v2265_v25  ;;  %v2317_v18 = vadd.f32 %v2301_v58, %v2260_v14  ;;  %v2750_v59 = vunpack.c.l.s8.bf16 %v2422_v50  ;;  %v2441_v63 = vld [vmem:[#allocation11 + $0x2d8] sm:$0xff]  ;;  %v2448_v51 = vld [vmem:[#allocation11 + $0x310] sm:$0xff] }
 0x49f   :  { %3193 = vmatprep.mubr.bf16.mxu1 %v10410_v12  ;;  %3365 = vmatprep.mubr.bf16.mxu0 %v10410_v12  ;;  %v2325_v47 = vadd.f32 %v2301_v58, %v2268_v3  ;;  %v2330_v49 = vmax.f32 %v2314_v41, 0.0  ;;  %v2267_v1 = vmul.f32 %v10364_v56, %v12014_v20  ;;  %v2752_v60 = vunpack.c.l.s8.bf16 %v2424_v37  ;;  %v2438_v58 = vld [vmem:[#allocation11 + $0x2c0] sm:$0xff]  ;;  %v2455_v20 = vld [vmem:[#allocation11 + $0x348] sm:$0xff] }
 0x4a0   :  { %3163 = vmatprep.subr.bf16.mxu1 %v2743_v22  ;;  %3335 = vmatprep.subr.bf16.mxu0 %v2745_v16  ;;  %v2338_v21 = vmax.f32 %v2322_v27, 0.0  ;;  %v2333_v2 = vmax.f32 %v2317_v18, 0.0  ;;  %v2316_v45 = vadd.f32 %v2297_v6, %v2259_v19  ;;  %v2759_v25 = vunpack.c.h.s8.bf16 %v2423_v38 }
 0x4a1   :  { %v2341_v15 = vmax.f32 %v2325_v47, 0.0  ;;  %v2761_v46 = vunpack.c.h.s8.bf16 %v2425_v52  ;;  %v2324_v35 = vadd.f32 %v2297_v6, %v2267_v1  ;;  %v2758_v56 = vunpack.c.h.s8.bf16 %v2422_v50  ;;  %v2439_v52 = vld [vmem:[#allocation11 + $0x2c8] sm:$0xff]  ;;  %v2446_v47 = vld [vmem:[#allocation11 + $0x300] sm:$0xff]  ;;  %v2457_v1 = vld [vmem:[#allocation11 + $0x358] sm:$0xff] }
 0x4a2   :  { %3164 = vmatpush1.bf16.msra.mxu1 %v2742_v23  ;;  %3336 = vmatpush1.bf16.msra.mxu0 %v2744_v57  ;;  %v10437_v17 = vpack.c.bf16 %v2338_v21, %v2330_v49  ;;  %v2332_v7 = vmax.f32 %v2316_v45, 0.0  ;;  %v2760_v4 = vunpack.c.h.s8.bf16 %v2424_v37  ;;  %v2767_v10 = vunpack.c.l.s8.bf16 %v2431_v36  ;;  %v2440_v57 = vld [vmem:[#allocation11 + $0x2d0] sm:$0xff] }
 0x4a3   :  { %3165 = vmatprep.subr.bf16.mxu1 %v2751_v24  ;;  %3337 = vmatprep.subr.bf16.mxu0 %v2753_v32  ;;  %v10439_v43 = vpack.c.bf16 %v2341_v15, %v2333_v2  ;;  %v2340_v0 = vmax.f32 %v2324_v35, 0.0  ;;  %v2769_v9 = vunpack.c.l.s8.bf16 %v2433_v54  ;;  %v2766_v13 = vunpack.c.l.s8.bf16 %v2430_v11  ;;  %v2447_v24 = vld [vmem:[#allocation11 + $0x308] sm:$0xff]  ;;  %v2449_v32 = vld [vmem:[#allocation11 + $0x318] sm:$0xff] }
 0x4a4   :  { %v2768_v22 = vunpack.c.l.s8.bf16 %v2432_v5  ;;  %v2775_v16 = vunpack.c.h.s8.bf16 %v2431_v36  ;;  %v2777_v38 = vunpack.c.h.s8.bf16 %v2433_v54  ;;  %v2774_v23 = vunpack.c.h.s8.bf16 %v2430_v11 }
 0x4a5   :  { %v10441_v31 = vpack.c.bf16 %v2340_v0, %v2332_v7  ;;  %v2776_v62 = vunpack.c.h.s8.bf16 %v2432_v5  ;;  %v2783_v40 = vunpack.c.l.s8.bf16 %v2439_v52  ;;  %v2785_v14 = vunpack.c.l.s8.bf16 %v2441_v63  ;;  %v2463_v0 = vld [vmem:[#allocation11 + $0x388] sm:$0xff]  ;;  %v2462_v5 = vld [vmem:[#allocation11 + $0x380] sm:$0xff] }
 0x4a6   :  { %3166 = vmatpush1.bf16.msra.mxu1 %v2750_v59  ;;  %3338 = vmatpush1.bf16.msra.mxu0 %v2752_v60  ;;  %v2782_v50 = vunpack.c.l.s8.bf16 %v2438_v58  ;;  %v2784_v34 = vunpack.c.l.s8.bf16 %v2440_v57  ;;  %v2791_v3 = vunpack.c.h.s8.bf16 %v2439_v52  ;;  %v2793_v6 = vunpack.c.h.s8.bf16 %v2441_v63  ;;  %v2471_v63 = vld [vmem:[#allocation11 + $0x3c8] sm:$0xff] }
 0x4a7   :  { %3167 = vmatprep.subr.bf16.mxu1 %v2759_v25  ;;  %3339 = vmatprep.subr.bf16.mxu0 %v2761_v46  ;;  %v2790_v37 = vunpack.c.h.s8.bf16 %v2438_v58  ;;  %v2792_v41 = vunpack.c.h.s8.bf16 %v2440_v57  ;;  %v2799_v27 = vunpack.c.l.s8.bf16 %v2447_v24  ;;  %v2801_v18 = vunpack.c.l.s8.bf16 %v2449_v32  ;;  %v2454_v25 = vld [vmem:[#allocation11 + $0x340] sm:$0xff]  ;;  %v2456_v46 = vld [vmem:[#allocation11 + $0x350] sm:$0xff] }
 0x4a8   :  { %v2798_v19 = vunpack.c.l.s8.bf16 %v2446_v47  ;;  %v2800_v59 = vunpack.c.l.s8.bf16 %v2448_v51  ;;  %v2807_v49 = vunpack.c.h.s8.bf16 %v2447_v24  ;;  %v2809_v21 = vunpack.c.h.s8.bf16 %v2449_v32  ;;  %v2470_v57 = vld [vmem:[#allocation11 + $0x3c0] sm:$0xff]  ;;  %v2479_v32 = vld [vmem:[#allocation11 + $0x408] sm:$0xff] }
 0x4a9   :  { %v2806_v60 = vunpack.c.h.s8.bf16 %v2446_v47  ;;  %v2808_v2 = vunpack.c.h.s8.bf16 %v2448_v51  ;;  %v2815_v15 = vunpack.c.l.s8.bf16 %v2455_v20  ;;  %v2817_v45 = vunpack.c.l.s8.bf16 %v2457_v1  ;;  %v2478_v51 = vld [vmem:[#allocation11 + $0x400] sm:$0xff] }
 0x4aa   :  { %3168 = vmatpush1.bf16.msra.mxu1 %v2758_v56  ;;  %3340 = vmatpush1.bf16.msra.mxu0 %v2760_v4  ;;  %v2814_v35 = vunpack.c.l.s8.bf16 %v2454_v25  ;;  %v2816_v36 = vunpack.c.l.s8.bf16 %v2456_v46  ;;  %v2823_v54 = vunpack.c.h.s8.bf16 %v2455_v20  ;;  %v2825_v7 = vunpack.c.h.s8.bf16 %v2457_v1  ;;  %v2465_v56 = vld [vmem:[#allocation11 + $0x398] sm:$0xff]  ;;  %v2487_v1 = vld [vmem:[#allocation11 + $0x448] sm:$0xff] }
 0x4ab   :  { %3169 = vmatprep.subr.bf16.mxu1 %v2767_v10  ;;  %3341 = vmatprep.subr.bf16.mxu0 %v2769_v9  ;;  %v2822_v4 = vunpack.c.h.s8.bf16 %v2454_v25  ;;  %v2824_v10 = vunpack.c.h.s8.bf16 %v2456_v46  ;;  %v2831_v9 = vunpack.c.l.s8.bf16 %v2463_v0  ;;  %v2833_v11 = vunpack.c.l.s8.bf16 %v2465_v56  ;;  %v2486_v25 = vld [vmem:[#allocation11 + $0x440] sm:$0xff] }
 0x4ac   :  { %v2841_v52 = vunpack.c.h.s8.bf16 %v2465_v56  ;;  %v2495_v56 = vld [vmem:[#allocation11 + $0x488] sm:$0xff] }
 0x4ae   :  { %3170 = vmatpush1.bf16.msra.mxu1 %v2766_v13  ;;  %3342 = vmatpush1.bf16.msra.mxu0 %v2768_v22  ;;  %v2464_v13 = vld [vmem:[#allocation11 + $0x390] sm:$0xff]  ;;  %v2830_v22 = vunpack.c.l.s8.bf16 %v2462_v5 }
 0x4af   :  { %3171 = vmatprep.subr.bf16.mxu1 %v2775_v16  ;;  %3343 = vmatprep.subr.bf16.mxu0 %v2777_v38  ;;  %v2832_v16 = vunpack.c.l.s8.bf16 %v2464_v13  ;;  %v2839_v38 = vunpack.c.h.s8.bf16 %v2463_v0 }
 0x4b2   :  { %3172 = vmatpush1.bf16.msra.mxu1 %v2774_v23  ;;  %3344 = vmatpush1.bf16.msra.mxu0 %v2776_v62  ;;  %v2473_v23 = vld [vmem:[#allocation11 + $0x3d8] sm:$0xff]  ;;  %v2838_v62 = vunpack.c.h.s8.bf16 %v2462_v5  ;;  %v2494_v5 = vld [vmem:[#allocation11 + $0x480] sm:$0xff] }
 0x4b3   :  { %3173 = vmatprep.subr.bf16.mxu1 %v2783_v40  ;;  %3345 = vmatprep.subr.bf16.mxu0 %v2785_v14  ;;  %v2840_v40 = vunpack.c.h.s8.bf16 %v2464_v13  ;;  %v2847_v14 = vunpack.c.l.s8.bf16 %v2471_v63  ;;  %v2849_v58 = vunpack.c.l.s8.bf16 %v2473_v23  ;;  %v2857_v24 = vunpack.c.h.s8.bf16 %v2473_v23  ;;  %v2503_v23 = vld [vmem:[#allocation11 + $0x4c8] sm:$0xff] }
 0x4b6   :  { %3174 = vmatpush1.bf16.msra.mxu1 %v2782_v50  ;;  %3346 = vmatpush1.bf16.msra.mxu0 %v2784_v34  ;;  %v2472_v50 = vld [vmem:[#allocation11 + $0x3d0] sm:$0xff]  ;;  %v2846_v34 = vunpack.c.l.s8.bf16 %v2470_v57 }
 0x4b7   :  { %3175 = vmatprep.subr.bf16.mxu1 %v2791_v3  ;;  %3347 = vmatprep.subr.bf16.mxu0 %v2793_v6  ;;  %v2848_v3 = vunpack.c.l.s8.bf16 %v2472_v50  ;;  %v2855_v6 = vunpack.c.h.s8.bf16 %v2471_v63 }
 0x4ba   :  { %3176 = vmatpush1.bf16.msra.mxu1 %v2790_v37  ;;  %3348 = vmatpush1.bf16.msra.mxu0 %v2792_v41  ;;  %v2481_v37 = vld [vmem:[#allocation11 + $0x418] sm:$0xff]  ;;  %v2854_v41 = vunpack.c.h.s8.bf16 %v2470_v57  ;;  %v2502_v57 = vld [vmem:[#allocation11 + $0x4c0] sm:$0xff] }
 0x4bb   :  { %3177 = vmatprep.subr.bf16.mxu1 %v2799_v27  ;;  %3349 = vmatprep.subr.bf16.mxu0 %v2801_v18  ;;  %v2856_v27 = vunpack.c.h.s8.bf16 %v2472_v50  ;;  %v2863_v18 = vunpack.c.l.s8.bf16 %v2479_v32  ;;  %v2865_v47 = vunpack.c.l.s8.bf16 %v2481_v37  ;;  %v2873_v20 = vunpack.c.h.s8.bf16 %v2481_v37  ;;  %v2511_v37 = vld [vmem:[#allocation11 + $0x508] sm:$0xff] }
 0x4be   :  { %3178 = vmatpush1.bf16.msra.mxu1 %v2798_v19  ;;  %3350 = vmatpush1.bf16.msra.mxu0 %v2800_v59  ;;  %v2480_v19 = vld [vmem:[#allocation11 + $0x410] sm:$0xff]  ;;  %v2862_v59 = vunpack.c.l.s8.bf16 %v2478_v51 }
 0x4bf   :  { %3179 = vmatprep.subr.bf16.mxu1 %v2807_v49  ;;  %3351 = vmatprep.subr.bf16.mxu0 %v2809_v21  ;;  %v2864_v49 = vunpack.c.l.s8.bf16 %v2480_v19  ;;  %v2871_v21 = vunpack.c.h.s8.bf16 %v2479_v32 }
 0x4c2   :  { %3180 = vmatpush1.bf16.msra.mxu1 %v2806_v60  ;;  %3352 = vmatpush1.bf16.msra.mxu0 %v2808_v2  ;;  %v2489_v60 = vld [vmem:[#allocation11 + $0x458] sm:$0xff]  ;;  %v2870_v2 = vunpack.c.h.s8.bf16 %v2478_v51  ;;  %v2510_v51 = vld [vmem:[#allocation11 + $0x500] sm:$0xff] }
 0x4c3   :  { %3181 = vmatprep.subr.bf16.mxu1 %v2815_v15  ;;  %3353 = vmatprep.subr.bf16.mxu0 %v2817_v45  ;;  %v2872_v15 = vunpack.c.h.s8.bf16 %v2480_v19  ;;  %v2879_v45 = vunpack.c.l.s8.bf16 %v2487_v1  ;;  %v2881_v46 = vunpack.c.l.s8.bf16 %v2489_v60  ;;  %v2889_v0 = vunpack.c.h.s8.bf16 %v2489_v60  ;;  %v2519_v60 = vld [vmem:[#allocation11 + $0x548] sm:$0xff] }
 0x4c6   :  { %3182 = vmatpush1.bf16.msra.mxu1 %v2814_v35  ;;  %3354 = vmatpush1.bf16.msra.mxu0 %v2816_v36  ;;  %v2488_v35 = vld [vmem:[#allocation11 + $0x450] sm:$0xff]  ;;  %v2878_v36 = vunpack.c.l.s8.bf16 %v2486_v25 }
 0x4c7   :  { %3183 = vmatprep.subr.bf16.mxu1 %v2823_v54  ;;  %3355 = vmatprep.subr.bf16.mxu0 %v2825_v7  ;;  %v2880_v54 = vunpack.c.l.s8.bf16 %v2488_v35  ;;  %v2887_v7 = vunpack.c.h.s8.bf16 %v2487_v1 }
 0x4ca   :  { %3184 = vmatpush1.bf16.msra.mxu1 %v2822_v4  ;;  %3356 = vmatpush1.bf16.msra.mxu0 %v2824_v10  ;;  %v2497_v4 = vld [vmem:[#allocation11 + $0x498] sm:$0xff]  ;;  %v2886_v10 = vunpack.c.h.s8.bf16 %v2486_v25  ;;  %v2943_v25 = vunpack.c.l.s8.bf16 %v2519_v60 }
 0x4cb   :  { %3185 = vmatprep.subr.bf16.mxu1 %v2831_v9  ;;  %3357 = vmatprep.subr.bf16.mxu0 %v2833_v11  ;;  %v2888_v9 = vunpack.c.h.s8.bf16 %v2488_v35  ;;  %v2895_v11 = vunpack.c.l.s8.bf16 %v2495_v56  ;;  %v2897_v13 = vunpack.c.l.s8.bf16 %v2497_v4  ;;  %v2905_v63 = vunpack.c.h.s8.bf16 %v2497_v4  ;;  %v2527_v4 = vld [vmem:[#allocation11 + $0x588] sm:$0xff] }
 0x4ce   :  { %3186 = vmatpush1.bf16.msra.mxu1 %v2830_v22  ;;  %3358 = vmatpush1.bf16.msra.mxu0 %v2832_v16  ;;  %v2496_v22 = vld [vmem:[#allocation11 + $0x490] sm:$0xff]  ;;  %v2894_v16 = vunpack.c.l.s8.bf16 %v2494_v5 }
 0x4cf   :  { %3187 = vmatprep.subr.bf16.mxu1 %v2839_v38  ;;  %3359 = vmatprep.subr.bf16.mxu0 %v2841_v52  ;;  %v2896_v38 = vunpack.c.l.s8.bf16 %v2496_v22  ;;  %v2903_v52 = vunpack.c.h.s8.bf16 %v2495_v56 }
 0x4d2   :  { %3188 = vmatpush1.bf16.msra.mxu1 %v2838_v62  ;;  %3360 = vmatpush1.bf16.msra.mxu0 %v2840_v40  ;;  %v2505_v62 = vld [vmem:[#allocation11 + $0x4d8] sm:$0xff]  ;;  %v2902_v40 = vunpack.c.h.s8.bf16 %v2494_v5  ;;  %v2959_v5 = vunpack.c.l.s8.bf16 %v2527_v4 }
 0x4d3   :  { %3189 = vmatprep.subr.bf16.mxu1 %v2847_v14  ;;  %3361 = vmatprep.subr.bf16.mxu0 %v2849_v58  ;;  %v2904_v14 = vunpack.c.h.s8.bf16 %v2496_v22  ;;  %v2911_v58 = vunpack.c.l.s8.bf16 %v2503_v23  ;;  %v2913_v50 = vunpack.c.l.s8.bf16 %v2505_v62  ;;  %v2921_v32 = vunpack.c.h.s8.bf16 %v2505_v62  ;;  %v2535_v62 = vld [vmem:[#allocation11 + $0x5c8] sm:$0xff] }
 0x4d6   :  { %3190 = vmatpush1.bf16.msra.mxu1 %v2846_v34  ;;  %3362 = vmatpush1.bf16.msra.mxu0 %v2848_v3  ;;  %v2504_v34 = vld [vmem:[#allocation11 + $0x4d0] sm:$0xff]  ;;  %v2910_v3 = vunpack.c.l.s8.bf16 %v2502_v57 }
 0x4d7   :  { %3191 = vmatprep.subr.bf16.mxu1 %v2855_v6  ;;  %3363 = vmatprep.subr.bf16.mxu0 %v2857_v24  ;;  %v2912_v6 = vunpack.c.l.s8.bf16 %v2504_v34  ;;  %v2919_v24 = vunpack.c.h.s8.bf16 %v2503_v23 }
 0x4da   :  { %3192 = vmatpush1.bf16.msra.mxu1 %v2854_v41  ;;  %3364 = vmatpush1.bf16.msra.mxu0 %v2856_v27  ;;  %v2513_v41 = vld [vmem:[#allocation11 + $0x518] sm:$0xff]  ;;  %v2918_v27 = vunpack.c.h.s8.bf16 %v2502_v57  ;;  %v2975_v57 = vunpack.c.l.s8.bf16 %v2535_v62 }
 0x4db   :  { %3204 = vmatprep.subr.bf16.mxu1 %v2863_v18  ;;  %3376 = vmatprep.subr.bf16.mxu0 %v2865_v47  ;;  %v2920_v18 = vunpack.c.h.s8.bf16 %v2504_v34  ;;  %v2927_v47 = vunpack.c.l.s8.bf16 %v2511_v37  ;;  %v2929_v19 = vunpack.c.l.s8.bf16 %v2513_v41  ;;  %v2937_v1 = vunpack.c.h.s8.bf16 %v2513_v41  ;;  %v2543_v41 = vld [vmem:[#allocation11 + $0x608] sm:$0xff] }
 0x4dd   :  { %3194 = vmatmul.mubr.bf16.vlgmr.msra.gmra.mrb[16].mxu1 %v10416_v61  ;;  %3366 = vmatmul.mubr.bf16.vlgmr.msra.gmra.mrb[12].mxu0 %v10416_v61 }
 0x4de   :  { %3205 = vmatpush1.bf16.msra.mxu1 %v2862_v59  ;;  %3236 = vmatprep.mubr.bf16.mxu1 %v10426_v33  ;;  %v2512_v59 = vld [vmem:[#allocation11 + $0x510] sm:$0xff] }
 0x4df   :  { %3377 = vmatpush1.bf16.msra.mxu0 %v2864_v49  ;;  %3408 = vmatprep.mubr.bf16.mxu0 %v10426_v33  ;;  %v2926_v49 = vunpack.c.l.s8.bf16 %v2510_v51 }
 0x4e0   :  { %3206 = vmatprep.subr.bf16.mxu1 %v2871_v21  ;;  %3378 = vmatprep.subr.bf16.mxu0 %v2873_v20  ;;  %v2928_v21 = vunpack.c.l.s8.bf16 %v2512_v59  ;;  %v2935_v20 = vunpack.c.h.s8.bf16 %v2511_v37 }
 0x4e2   :  { %3207 = vmatpush1.bf16.msra.mxu1 %v2870_v2  ;;  %v2521_v2 = vld [vmem:[#allocation11 + $0x558] sm:$0xff] }
 0x4e3   :  { %3379 = vmatpush1.bf16.msra.mxu0 %v2872_v15  ;;  %3208 = vmatprep.subr.bf16.mxu1 %v2879_v45  ;;  %v2934_v15 = vunpack.c.h.s8.bf16 %v2510_v51  ;;  %v2936_v45 = vunpack.c.h.s8.bf16 %v2512_v59  ;;  %v2945_v35 = vunpack.c.l.s8.bf16 %v2521_v2  ;;  %v2953_v56 = vunpack.c.h.s8.bf16 %v2521_v2 }
 0x4e4   :  { %3380 = vmatprep.subr.bf16.mxu0 %v2881_v46  ;;  %v2518_v46 = vld [vmem:[#allocation11 + $0x540] sm:$0xff]  ;;  %v2991_v51 = vunpack.c.l.s8.bf16 %v2543_v41 }
 0x4e6   :  { %3209 = vmatpush1.bf16.msra.mxu1 %v2878_v36  ;;  %v2520_v36 = vld [vmem:[#allocation11 + $0x550] sm:$0xff] }
 0x4e7   :  { %3381 = vmatpush1.bf16.msra.mxu0 %v2880_v54  ;;  %3210 = vmatprep.subr.bf16.mxu1 %v2887_v7  ;;  %v2942_v54 = vunpack.c.l.s8.bf16 %v2518_v46  ;;  %v2944_v7 = vunpack.c.l.s8.bf16 %v2520_v36 }
 0x4e8   :  { %3382 = vmatprep.subr.bf16.mxu0 %v2889_v0  ;;  %v2951_v0 = vunpack.c.h.s8.bf16 %v2519_v60  ;;  %v2551_v60 = vld [vmem:[#allocation11 + $0x648] sm:$0xff] }
 0x4ea   :  { %3211 = vmatpush1.bf16.msra.mxu1 %v2886_v10  ;;  %v2529_v10 = vld [vmem:[#allocation11 + $0x598] sm:$0xff] }
 0x4eb   :  { %3383 = vmatpush1.bf16.msra.mxu0 %v2888_v9  ;;  %3212 = vmatprep.subr.bf16.mxu1 %v2895_v11  ;;  %v2950_v9 = vunpack.c.h.s8.bf16 %v2518_v46  ;;  %v2952_v11 = vunpack.c.h.s8.bf16 %v2520_v36  ;;  %v2961_v22 = vunpack.c.l.s8.bf16 %v2529_v10  ;;  %v2969_v23 = vunpack.c.h.s8.bf16 %v2529_v10  ;;  %v2559_v10 = vld [vmem:[#allocation11 + $0x688] sm:$0xff] }
 0x4ec   :  { %3384 = vmatprep.subr.bf16.mxu0 %v2897_v13  ;;  %v2526_v13 = vld [vmem:[#allocation11 + $0x580] sm:$0xff]  ;;  %v3007_v46 = vunpack.c.l.s8.bf16 %v2551_v60 }
 0x4ee   :  { %3213 = vmatpush1.bf16.msra.mxu1 %v2894_v16  ;;  %v2528_v16 = vld [vmem:[#allocation11 + $0x590] sm:$0xff] }
 0x4ef   :  { %3385 = vmatpush1.bf16.msra.mxu0 %v2896_v38  ;;  %3214 = vmatprep.subr.bf16.mxu1 %v2903_v52  ;;  %v2958_v38 = vunpack.c.l.s8.bf16 %v2526_v13  ;;  %v2960_v52 = vunpack.c.l.s8.bf16 %v2528_v16 }
 0x4f0   :  { %3386 = vmatprep.subr.bf16.mxu0 %v2905_v63  ;;  %v2967_v63 = vunpack.c.h.s8.bf16 %v2527_v4 }
 0x4f2   :  { %3215 = vmatpush1.bf16.msra.mxu1 %v2902_v40  ;;  %v2537_v40 = vld [vmem:[#allocation11 + $0x5d8] sm:$0xff] }
 0x4f3   :  { %3387 = vmatpush1.bf16.msra.mxu0 %v2904_v14  ;;  %3216 = vmatprep.subr.bf16.mxu1 %v2911_v58  ;;  %v2966_v14 = vunpack.c.h.s8.bf16 %v2526_v13  ;;  %v2968_v58 = vunpack.c.h.s8.bf16 %v2528_v16  ;;  %v2977_v34 = vunpack.c.l.s8.bf16 %v2537_v40  ;;  %v2985_v37 = vunpack.c.h.s8.bf16 %v2537_v40  ;;  %v2567_v40 = vld [vmem:[#allocation11 + $0x6c8] sm:$0xff] }
 0x4f4   :  { %3388 = vmatprep.subr.bf16.mxu0 %v2913_v50  ;;  %v2534_v50 = vld [vmem:[#allocation11 + $0x5c0] sm:$0xff]  ;;  %v3023_v13 = vunpack.c.l.s8.bf16 %v2559_v10 }
 0x4f6   :  { %3217 = vmatpush1.bf16.msra.mxu1 %v2910_v3  ;;  %v2536_v3 = vld [vmem:[#allocation11 + $0x5d0] sm:$0xff] }
 0x4f7   :  { %3389 = vmatpush1.bf16.msra.mxu0 %v2912_v6  ;;  %3218 = vmatprep.subr.bf16.mxu1 %v2919_v24  ;;  %v2974_v6 = vunpack.c.l.s8.bf16 %v2534_v50  ;;  %v2976_v24 = vunpack.c.l.s8.bf16 %v2536_v3 }
 0x4f8   :  { %3390 = vmatprep.subr.bf16.mxu0 %v2921_v32  ;;  %v2983_v32 = vunpack.c.h.s8.bf16 %v2535_v62 }
 0x4fa   :  { %3219 = vmatpush1.bf16.msra.mxu1 %v2918_v27  ;;  %v2545_v27 = vld [vmem:[#allocation11 + $0x618] sm:$0xff] }
 0x4fb   :  { %3391 = vmatpush1.bf16.msra.mxu0 %v2920_v18  ;;  %3220 = vmatprep.subr.bf16.mxu1 %v2927_v47  ;;  %v2982_v18 = vunpack.c.h.s8.bf16 %v2534_v50  ;;  %v2984_v47 = vunpack.c.h.s8.bf16 %v2536_v3  ;;  %v2993_v59 = vunpack.c.l.s8.bf16 %v2545_v27  ;;  %v3001_v2 = vunpack.c.h.s8.bf16 %v2545_v27  ;;  %v2575_v27 = vld [vmem:[#allocation11 + $0x708] sm:$0xff] }
 0x4fc   :  { %3392 = vmatprep.subr.bf16.mxu0 %v2929_v19  ;;  %v2542_v19 = vld [vmem:[#allocation11 + $0x600] sm:$0xff]  ;;  %v3039_v50 = vunpack.c.l.s8.bf16 %v2567_v40 }
 0x4fe   :  { %3221 = vmatpush1.bf16.msra.mxu1 %v2926_v49  ;;  %v2544_v49 = vld [vmem:[#allocation11 + $0x610] sm:$0xff] }
 0x4ff   :  { %3393 = vmatpush1.bf16.msra.mxu0 %v2928_v21  ;;  %3222 = vmatprep.subr.bf16.mxu1 %v2935_v20  ;;  %v2990_v21 = vunpack.c.l.s8.bf16 %v2542_v19  ;;  %v2992_v20 = vunpack.c.l.s8.bf16 %v2544_v49 }
 0x500   :  { %3394 = vmatprep.subr.bf16.mxu0 %v2937_v1  ;;  %v2999_v1 = vunpack.c.h.s8.bf16 %v2543_v41 }
 0x502   :  { %3223 = vmatpush1.bf16.msra.mxu1 %v2934_v15  ;;  %v2553_v15 = vld [vmem:[#allocation11 + $0x658] sm:$0xff] }
 0x503   :  { %3395 = vmatpush1.bf16.msra.mxu0 %v2936_v45  ;;  %3224 = vmatprep.subr.bf16.mxu1 %v2943_v25  ;;  %v2998_v45 = vunpack.c.h.s8.bf16 %v2542_v19  ;;  %v3000_v25 = vunpack.c.h.s8.bf16 %v2544_v49  ;;  %v3009_v36 = vunpack.c.l.s8.bf16 %v2553_v15  ;;  %v3017_v4 = vunpack.c.h.s8.bf16 %v2553_v15  ;;  %v2583_v15 = vld [vmem:[#allocation11 + $0x748] sm:$0xff] }
 0x504   :  { %3396 = vmatprep.subr.bf16.mxu0 %v2945_v35  ;;  %v2550_v35 = vld [vmem:[#allocation11 + $0x640] sm:$0xff]  ;;  %v3055_v19 = vunpack.c.l.s8.bf16 %v2575_v27 }
 0x506   :  { %3225 = vmatpush1.bf16.msra.mxu1 %v2942_v54  ;;  %v2552_v54 = vld [vmem:[#allocation11 + $0x650] sm:$0xff] }
 0x507   :  { %3397 = vmatpush1.bf16.msra.mxu0 %v2944_v7  ;;  %3226 = vmatprep.subr.bf16.mxu1 %v2951_v0  ;;  %v3006_v7 = vunpack.c.l.s8.bf16 %v2550_v35  ;;  %v3008_v0 = vunpack.c.l.s8.bf16 %v2552_v54 }
 0x508   :  { %3398 = vmatprep.subr.bf16.mxu0 %v2953_v56  ;;  %v3015_v56 = vunpack.c.h.s8.bf16 %v2551_v60  ;;  %v3063_v60 = vunpack.c.h.s8.bf16 %v2575_v27 }
 0x50a   :  { %3227 = vmatpush1.bf16.msra.mxu1 %v2950_v9  ;;  %v2561_v9 = vld [vmem:[#allocation11 + $0x698] sm:$0xff] }
 0x50b   :  { %3399 = vmatpush1.bf16.msra.mxu0 %v2952_v11  ;;  %3228 = vmatprep.subr.bf16.mxu1 %v2959_v5  ;;  %v3014_v11 = vunpack.c.h.s8.bf16 %v2550_v35  ;;  %v3016_v5 = vunpack.c.h.s8.bf16 %v2552_v54  ;;  %v3025_v16 = vunpack.c.l.s8.bf16 %v2561_v9  ;;  %v3033_v62 = vunpack.c.h.s8.bf16 %v2561_v9  ;;  %v2591_v9 = vld [vmem:[#allocation11 + $0x788] sm:$0xff] }
 0x50c   :  { %3400 = vmatprep.subr.bf16.mxu0 %v2961_v22  ;;  %v2558_v22 = vld [vmem:[#allocation11 + $0x680] sm:$0xff]  ;;  %v3071_v35 = vunpack.c.l.s8.bf16 %v2583_v15 }
 0x50e   :  { %3229 = vmatpush1.bf16.msra.mxu1 %v2958_v38  ;;  %v2560_v38 = vld [vmem:[#allocation11 + $0x690] sm:$0xff] }
 0x50f   :  { %3401 = vmatpush1.bf16.msra.mxu0 %v2960_v52  ;;  %3230 = vmatprep.subr.bf16.mxu1 %v2967_v63  ;;  %v3022_v52 = vunpack.c.l.s8.bf16 %v2558_v22  ;;  %v3024_v63 = vunpack.c.l.s8.bf16 %v2560_v38 }
 0x510   :  { %3402 = vmatprep.subr.bf16.mxu0 %v2969_v23  ;;  %v3031_v23 = vunpack.c.h.s8.bf16 %v2559_v10 }
 0x512   :  { %3231 = vmatpush1.bf16.msra.mxu1 %v2966_v14  ;;  %v2569_v14 = vld [vmem:[#allocation11 + $0x6d8] sm:$0xff] }
 0x513   :  { %3403 = vmatpush1.bf16.msra.mxu0 %v2968_v58  ;;  %3232 = vmatprep.subr.bf16.mxu1 %v2975_v57  ;;  %v3030_v58 = vunpack.c.h.s8.bf16 %v2558_v22  ;;  %v3032_v57 = vunpack.c.h.s8.bf16 %v2560_v38  ;;  %v3041_v3 = vunpack.c.l.s8.bf16 %v2569_v14  ;;  %v3049_v41 = vunpack.c.h.s8.bf16 %v2569_v14  ;;  %v2599_v14 = vld [vmem:[#allocation11 + $0x7c8] sm:$0xff] }
 0x514   :  { %3404 = vmatprep.subr.bf16.mxu0 %v2977_v34  ;;  %v2566_v34 = vld [vmem:[#allocation11 + $0x6c0] sm:$0xff]  ;;  %v3087_v22 = vunpack.c.l.s8.bf16 %v2591_v9 }
 0x516   :  { %3233 = vmatpush1.bf16.msra.mxu1 %v2974_v6  ;;  %v2568_v6 = vld [vmem:[#allocation11 + $0x6d0] sm:$0xff] }
 0x517   :  { %3405 = vmatpush1.bf16.msra.mxu0 %v2976_v24  ;;  %3234 = vmatprep.subr.bf16.mxu1 %v2983_v32  ;;  %v3038_v24 = vunpack.c.l.s8.bf16 %v2566_v34  ;;  %v3040_v32 = vunpack.c.l.s8.bf16 %v2568_v6 }
 0x518   :  { %3406 = vmatprep.subr.bf16.mxu0 %v2985_v37  ;;  %v3047_v37 = vunpack.c.h.s8.bf16 %v2567_v40 }
 0x51a   :  { %3235 = vmatpush1.bf16.msra.mxu1 %v2982_v18  ;;  %v2577_v18 = vld [vmem:[#allocation11 + $0x718] sm:$0xff] }
 0x51b   :  { %3407 = vmatpush1.bf16.msra.mxu0 %v2984_v47  ;;  %3247 = vmatprep.subr.bf16.mxu1 %v2991_v51  ;;  %v3046_v47 = vunpack.c.h.s8.bf16 %v2566_v34  ;;  %v3048_v51 = vunpack.c.h.s8.bf16 %v2568_v6  ;;  %v3057_v49 = vunpack.c.l.s8.bf16 %v2577_v18  ;;  %v3103_v34 = vunpack.c.l.s8.bf16 %v2599_v14 }
 0x51c   :  { %3419 = vmatprep.subr.bf16.mxu0 %v2993_v59  ;;  %v2574_v59 = vld [vmem:[#allocation11 + $0x700] sm:$0xff] }
 0x51d   :  { %3237 = vmatmul.mubr.bf16.vlgmr.msra.gmra.mrb[16].mxu1 %v10437_v17 }
 0x51e   :  { %3409 = vmatmul.mubr.bf16.vlgmr.msra.gmra.mrb[12].mxu0 %v10437_v17  ;;  %3248 = vmatpush1.bf16.msra.mxu1 %v2990_v21  ;;  %v2576_v21 = vld [vmem:[#allocation11 + $0x710] sm:$0xff] }
 0x51f   :  { %3279 = vmatprep.mubr.bf16.mxu1 %v10439_v43  ;;  %3420 = vmatpush1.bf16.msra.mxu0 %v2992_v20  ;;  %v3054_v20 = vunpack.c.l.s8.bf16 %v2574_v59 }
 0x520   :  { %3451 = vmatprep.mubr.bf16.mxu0 %v10439_v43  ;;  %3249 = vmatprep.subr.bf16.mxu1 %v2999_v1  ;;  %v3056_v1 = vunpack.c.l.s8.bf16 %v2576_v21 }
 0x521   :  { %3421 = vmatprep.subr.bf16.mxu0 %v3001_v2  ;;  %v3065_v2 = vunpack.c.h.s8.bf16 %v2577_v18  ;;  %v2355_v18 = vld [vmem:[#allocation11 + $0x28] sm:$0xff] }
 0x522   :  { %3250 = vmatpush1.bf16.msra.mxu1 %v2998_v45  ;;  %v2585_v45 = vld [vmem:[#allocation11 + $0x758] sm:$0xff] }
 0x523   :  { %3422 = vmatpush1.bf16.msra.mxu0 %v3000_v25  ;;  %3251 = vmatprep.subr.bf16.mxu1 %v3007_v46  ;;  %v3062_v25 = vunpack.c.h.s8.bf16 %v2574_v59  ;;  %v3064_v46 = vunpack.c.h.s8.bf16 %v2576_v21  ;;  %v3073_v54 = vunpack.c.l.s8.bf16 %v2585_v45  ;;  %v3081_v10 = vunpack.c.h.s8.bf16 %v2585_v45 }
 0x524   :  { %3423 = vmatprep.subr.bf16.mxu0 %v3009_v36  ;;  %v2582_v36 = vld [vmem:[#allocation11 + $0x740] sm:$0xff]  ;;  %v2611_v59 = vunpack.c.l.s8.bf16 %v2355_v18 }
 0x526   :  { %3252 = vmatpush1.bf16.msra.mxu1 %v3006_v7  ;;  %v2584_v7 = vld [vmem:[#allocation11 + $0x750] sm:$0xff] }
 0x527   :  { %3424 = vmatpush1.bf16.msra.mxu0 %v3008_v0  ;;  %3253 = vmatprep.subr.bf16.mxu1 %v3015_v56  ;;  %v3070_v0 = vunpack.c.l.s8.bf16 %v2582_v36  ;;  %v3072_v56 = vunpack.c.l.s8.bf16 %v2584_v7 }
 0x528   :  { %3425 = vmatprep.subr.bf16.mxu0 %v3017_v4  ;;  %v3079_v4 = vunpack.c.h.s8.bf16 %v2583_v15  ;;  %v2363_v15 = vld [vmem:[#allocation11 + $0x68] sm:$0xff] }
 0x52a   :  { %3254 = vmatpush1.bf16.msra.mxu1 %v3014_v11  ;;  %v2593_v11 = vld [vmem:[#allocation11 + $0x798] sm:$0xff] }
 0x52b   :  { %3426 = vmatpush1.bf16.msra.mxu0 %v3016_v5  ;;  %3255 = vmatprep.subr.bf16.mxu1 %v3023_v13  ;;  %v3078_v5 = vunpack.c.h.s8.bf16 %v2582_v36  ;;  %v3080_v13 = vunpack.c.h.s8.bf16 %v2584_v7  ;;  %v3089_v38 = vunpack.c.l.s8.bf16 %v2593_v11  ;;  %v3097_v40 = vunpack.c.h.s8.bf16 %v2593_v11  ;;  %v2371_v11 = vld [vmem:[#allocation11 + $0xa8] sm:$0xff] }
 0x52c   :  { %3427 = vmatprep.subr.bf16.mxu0 %v3025_v16  ;;  %v2590_v16 = vld [vmem:[#allocation11 + $0x780] sm:$0xff]  ;;  %v2627_v36 = vunpack.c.l.s8.bf16 %v2363_v15 }
 0x52e   :  { %3256 = vmatpush1.bf16.msra.mxu1 %v3022_v52  ;;  %v2592_v52 = vld [vmem:[#allocation11 + $0x790] sm:$0xff] }
 0x52f   :  { %3428 = vmatpush1.bf16.msra.mxu0 %v3024_v63  ;;  %3257 = vmatprep.subr.bf16.mxu1 %v3031_v23  ;;  %v3086_v63 = vunpack.c.l.s8.bf16 %v2590_v16  ;;  %v3088_v23 = vunpack.c.l.s8.bf16 %v2592_v52 }
 0x530   :  { %3429 = vmatprep.subr.bf16.mxu0 %v3033_v62  ;;  %v3095_v62 = vunpack.c.h.s8.bf16 %v2591_v9 }
 0x532   :  { %3258 = vmatpush1.bf16.msra.mxu1 %v3030_v58  ;;  %v2601_v58 = vld [vmem:[#allocation11 + $0x7d8] sm:$0xff] }
 0x533   :  { %3430 = vmatpush1.bf16.msra.mxu0 %v3032_v57  ;;  %3259 = vmatprep.subr.bf16.mxu1 %v3039_v50  ;;  %v3094_v57 = vunpack.c.h.s8.bf16 %v2590_v16  ;;  %v3096_v50 = vunpack.c.h.s8.bf16 %v2592_v52  ;;  %v3105_v6 = vunpack.c.l.s8.bf16 %v2601_v58  ;;  %v3113_v27 = vunpack.c.h.s8.bf16 %v2601_v58  ;;  %v2370_v16 = vld [vmem:[#allocation11 + $0xa0] sm:$0xff]  ;;  %v2372_v52 = vld [vmem:[#allocation11 + $0xb0] sm:$0xff]  ;;  %v2381_v58 = vld [vmem:[#allocation11 + $0xf8] sm:$0xff] }
 0x534   :  { %3431 = vmatprep.subr.bf16.mxu0 %v3041_v3  ;;  %v2598_v3 = vld [vmem:[#allocation11 + $0x7c0] sm:$0xff] }
 0x536   :  { %3260 = vmatpush1.bf16.msra.mxu1 %v3038_v24  ;;  %v2600_v24 = vld [vmem:[#allocation11 + $0x7d0] sm:$0xff] }
 0x537   :  { %3432 = vmatpush1.bf16.msra.mxu0 %v3040_v32  ;;  %3261 = vmatprep.subr.bf16.mxu1 %v3047_v37  ;;  %v3102_v32 = vunpack.c.l.s8.bf16 %v2598_v3  ;;  %v3104_v37 = vunpack.c.l.s8.bf16 %v2600_v24 }
 0x538   :  { %3433 = vmatprep.subr.bf16.mxu0 %v3049_v41  ;;  %v3111_v41 = vunpack.c.h.s8.bf16 %v2599_v14  ;;  %v2379_v14 = vld [vmem:[#allocation11 + $0xe8] sm:$0xff] }
 0x53a   :  { %3262 = vmatpush1.bf16.msra.mxu1 %v3046_v47  ;;  %v2357_v47 = vld [vmem:[#allocation11 + $0x38] sm:$0xff] }
 0x53b   :  { %3434 = vmatpush1.bf16.msra.mxu0 %v3048_v51  ;;  %3263 = vmatprep.subr.bf16.mxu1 %v3055_v19  ;;  %v3110_v51 = vunpack.c.h.s8.bf16 %v2598_v3  ;;  %v3112_v19 = vunpack.c.h.s8.bf16 %v2600_v24  ;;  %v2613_v21 = vunpack.c.l.s8.bf16 %v2357_v47  ;;  %v2621_v45 = vunpack.c.h.s8.bf16 %v2357_v47  ;;  %v2378_v3 = vld [vmem:[#allocation11 + $0xe0] sm:$0xff]  ;;  %v2380_v24 = vld [vmem:[#allocation11 + $0xf0] sm:$0xff]  ;;  %v2389_v47 = vld [vmem:[#allocation11 + $0x138] sm:$0xff] }
 0x53c   :  { %3435 = vmatprep.subr.bf16.mxu0 %v3057_v49  ;;  %v2354_v49 = vld [vmem:[#allocation11 + $0x20] sm:$0xff] }
 0x53e   :  { %3264 = vmatpush1.bf16.msra.mxu1 %v3054_v20  ;;  %v2356_v20 = vld [vmem:[#allocation11 + $0x30] sm:$0xff] }
 0x53f   :  { %3436 = vmatpush1.bf16.msra.mxu0 %v3056_v1  ;;  %3265 = vmatprep.subr.bf16.mxu1 %v3063_v60  ;;  %v2610_v1 = vunpack.c.l.s8.bf16 %v2354_v49  ;;  %v2612_v60 = vunpack.c.l.s8.bf16 %v2356_v20 }
 0x540   :  { %3437 = vmatprep.subr.bf16.mxu0 %v3065_v2  ;;  %v2619_v2 = vunpack.c.h.s8.bf16 %v2355_v18  ;;  %v2387_v18 = vld [vmem:[#allocation11 + $0x128] sm:$0xff] }
 0x542   :  { %3266 = vmatpush1.bf16.msra.mxu1 %v3062_v25  ;;  %v2365_v25 = vld [vmem:[#allocation11 + $0x78] sm:$0xff] }
 0x543   :  { %3438 = vmatpush1.bf16.msra.mxu0 %v3064_v46  ;;  %3267 = vmatprep.subr.bf16.mxu1 %v3071_v35  ;;  %v2618_v46 = vunpack.c.h.s8.bf16 %v2354_v49  ;;  %v2620_v35 = vunpack.c.h.s8.bf16 %v2356_v20  ;;  %v2629_v7 = vunpack.c.l.s8.bf16 %v2365_v25  ;;  %v2637_v9 = vunpack.c.h.s8.bf16 %v2365_v25  ;;  %v2386_v49 = vld [vmem:[#allocation11 + $0x120] sm:$0xff]  ;;  %v2388_v20 = vld [vmem:[#allocation11 + $0x130] sm:$0xff]  ;;  %v2397_v25 = vld [vmem:[#allocation11 + $0x178] sm:$0xff] }
 0x544   :  { %3439 = vmatprep.subr.bf16.mxu0 %v3073_v54  ;;  %v2362_v54 = vld [vmem:[#allocation11 + $0x60] sm:$0xff] }
 0x546   :  { %3268 = vmatpush1.bf16.msra.mxu1 %v3070_v0  ;;  %v2364_v0 = vld [vmem:[#allocation11 + $0x70] sm:$0xff] }
 0x547   :  { %3440 = vmatpush1.bf16.msra.mxu0 %v3072_v56  ;;  %3269 = vmatprep.subr.bf16.mxu1 %v3079_v4  ;;  %v2626_v56 = vunpack.c.l.s8.bf16 %v2362_v54  ;;  %v2628_v4 = vunpack.c.l.s8.bf16 %v2364_v0 }
 0x548   :  { %3441 = vmatprep.subr.bf16.mxu0 %v3081_v10  ;;  %v2635_v10 = vunpack.c.h.s8.bf16 %v2363_v15  ;;  %v2685_v15 = vunpack.c.h.s8.bf16 %v2389_v47 }
 0x54a   :  { %3270 = vmatpush1.bf16.msra.mxu1 %v3078_v5  ;;  %v2373_v5 = vld [vmem:[#allocation11 + $0xb8] sm:$0xff] }
 0x54b   :  { %3442 = vmatpush1.bf16.msra.mxu0 %v3080_v13  ;;  %3271 = vmatprep.subr.bf16.mxu1 %v3087_v22  ;;  %v2634_v13 = vunpack.c.h.s8.bf16 %v2362_v54  ;;  %v2636_v22 = vunpack.c.h.s8.bf16 %v2364_v0  ;;  %v2394_v54 = vld [vmem:[#allocation11 + $0x160] sm:$0xff]  ;;  %v2396_v0 = vld [vmem:[#allocation11 + $0x170] sm:$0xff] }
 0x54c   :  { %3443 = vmatprep.subr.bf16.mxu0 %v3089_v38  ;;  %v2645_v38 = vunpack.c.l.s8.bf16 %v2373_v5 }
 0x54e   :  { %3272 = vmatpush1.bf16.msra.mxu1 %v3086_v63  ;;  %v2642_v63 = vunpack.c.l.s8.bf16 %v2370_v16 }
 0x54f   :  { %3444 = vmatpush1.bf16.msra.mxu0 %v3088_v23  ;;  %3273 = vmatprep.subr.bf16.mxu1 %v3095_v62  ;;  %v2644_v23 = vunpack.c.l.s8.bf16 %v2372_v52  ;;  %v2651_v62 = vunpack.c.h.s8.bf16 %v2371_v11 }
 0x550   :  { %3445 = vmatprep.subr.bf16.mxu0 %v3097_v40  ;;  %v2653_v40 = vunpack.c.h.s8.bf16 %v2373_v5  ;;  %v2405_v5 = vld [vmem:[#allocation11 + $0x1b8] sm:$0xff] }
 0x552   :  { %3274 = vmatpush1.bf16.msra.mxu1 %v3094_v57  ;;  %v2650_v57 = vunpack.c.h.s8.bf16 %v2370_v16  ;;  %v2402_v16 = vld [vmem:[#allocation11 + $0x1a0] sm:$0xff] }
 0x553   :  { %3446 = vmatpush1.bf16.msra.mxu0 %v3096_v50  ;;  %3275 = vmatprep.subr.bf16.mxu1 %v3103_v34  ;;  %v2652_v50 = vunpack.c.h.s8.bf16 %v2372_v52  ;;  %v2659_v34 = vunpack.c.l.s8.bf16 %v2379_v14  ;;  %v2404_v52 = vld [vmem:[#allocation11 + $0x1b0] sm:$0xff] }
 0x554   :  { %3447 = vmatprep.subr.bf16.mxu0 %v3105_v6  ;;  %v2661_v6 = vunpack.c.l.s8.bf16 %v2381_v58 }
 0x556   :  { %3276 = vmatpush1.bf16.msra.mxu1 %v3102_v32  ;;  %v2658_v32 = vunpack.c.l.s8.bf16 %v2378_v3 }
 0x557   :  { %3448 = vmatpush1.bf16.msra.mxu0 %v3104_v37  ;;  %3277 = vmatprep.subr.bf16.mxu1 %v3111_v41  ;;  %v2660_v37 = vunpack.c.l.s8.bf16 %v2380_v24  ;;  %v2667_v41 = vunpack.c.h.s8.bf16 %v2379_v14  ;;  %v2411_v14 = vld [vmem:[#allocation11 + $0x1e8] sm:$0xff] }
 0x558   :  { %3449 = vmatprep.subr.bf16.mxu0 %v3113_v27  ;;  %v2669_v27 = vunpack.c.h.s8.bf16 %v2381_v58  ;;  %v2413_v58 = vld [vmem:[#allocation11 + $0x1f8] sm:$0xff] }
 0x55a   :  { %3278 = vmatpush1.bf16.msra.mxu1 %v3110_v51  ;;  %v2666_v51 = vunpack.c.h.s8.bf16 %v2378_v3  ;;  %v2410_v3 = vld [vmem:[#allocation11 + $0x1e0] sm:$0xff] }
 0x55b   :  { %3450 = vmatpush1.bf16.msra.mxu0 %v3112_v19  ;;  %3462 = vmatprep.subr.bf16.mxu1 %v2611_v59  ;;  %v2668_v19 = vunpack.c.h.s8.bf16 %v2380_v24  ;;  %v2675_v59 = vunpack.c.l.s8.bf16 %v2387_v18  ;;  %v2412_v24 = vld [vmem:[#allocation11 + $0x1f0] sm:$0xff] }
 0x55c   :  { %3634 = vmatprep.subr.bf16.mxu0 %v2613_v21  ;;  %v2677_v21 = vunpack.c.l.s8.bf16 %v2389_v47  ;;  %v2421_v47 = vld [vmem:[#allocation11 + $0x238] sm:$0xff] }
 0x55d   :  { %3280 = vmatmul.mubr.bf16.vlgmr.msra.gmra.mrb[16].mxu1 %v10441_v31 }
 0x55e   :  { %3452 = vmatmul.mubr.bf16.vlgmr.msra.gmra.mrb[12].mxu0 %v10441_v31  ;;  %3463 = vmatpush1.bf16.msra.mxu1 %v2610_v1  ;;  %v2674_v1 = vunpack.c.l.s8.bf16 %v2386_v49 }
 0x55f   :  { %3494 = vmatprep.mubr.bf16.mxu1 %v10406_v42  ;;  %3635 = vmatpush1.bf16.msra.mxu0 %v2612_v60  ;;  %v2676_v60 = vunpack.c.l.s8.bf16 %v2388_v20 }
 0x560   :  { %3666 = vmatprep.mubr.bf16.mxu0 %v10406_v42  ;;  %3464 = vmatprep.subr.bf16.mxu1 %v2619_v2  ;;  %v2643_v42 = vunpack.c.l.s8.bf16 %v2371_v11  ;;  %v2683_v2 = vunpack.c.h.s8.bf16 %v2387_v18  ;;  %v2403_v11 = vld [vmem:[#allocation11 + $0x1a8] sm:$0xff] }
 0x561   :  { %3636 = vmatprep.subr.bf16.mxu0 %v2621_v45  ;;  %v2395_v45 = vld [vmem:[#allocation11 + $0x168] sm:$0xff] }
 0x562   :  { %3465 = vmatpush1.bf16.msra.mxu1 %v2618_v46  ;;  %v2682_v46 = vunpack.c.h.s8.bf16 %v2386_v49  ;;  %v2419_v18 = vld [vmem:[#allocation11 + $0x228] sm:$0xff]  ;;  %v2418_v49 = vld [vmem:[#allocation11 + $0x220] sm:$0xff] }
 0x563   :  { %3637 = vmatpush1.bf16.msra.mxu0 %v2620_v35  ;;  %3466 = vmatprep.subr.bf16.mxu1 %v2627_v36  ;;  %v2684_v35 = vunpack.c.h.s8.bf16 %v2388_v20  ;;  %v2691_v36 = vunpack.c.l.s8.bf16 %v2395_v45  ;;  %v2420_v20 = vld [vmem:[#allocation11 + $0x230] sm:$0xff] }
 0x564   :  { %3638 = vmatprep.subr.bf16.mxu0 %v2629_v7  ;;  %v2693_v7 = vunpack.c.l.s8.bf16 %v2397_v25 }
 0x566   :  { %3467 = vmatpush1.bf16.msra.mxu1 %v2626_v56  ;;  %v2690_v56 = vunpack.c.l.s8.bf16 %v2394_v54 }
 0x567   :  { %3639 = vmatpush1.bf16.msra.mxu0 %v2628_v4  ;;  %3468 = vmatprep.subr.bf16.mxu1 %v2635_v10  ;;  %v2692_v4 = vunpack.c.l.s8.bf16 %v2396_v0  ;;  %v2699_v10 = vunpack.c.h.s8.bf16 %v2395_v45  ;;  %v2749_v45 = vunpack.c.h.s8.bf16 %v2421_v47 }
 0x568   :  { %3640 = vmatprep.subr.bf16.mxu0 %v2637_v9  ;;  %v2701_v9 = vunpack.c.h.s8.bf16 %v2397_v25  ;;  %v2429_v25 = vld [vmem:[#allocation11 + $0x278] sm:$0xff] }
 0x56a   :  { %3469 = vmatpush1.bf16.msra.mxu1 %v2634_v13  ;;  %v2698_v13 = vunpack.c.h.s8.bf16 %v2394_v54  ;;  %v2426_v54 = vld [vmem:[#allocation11 + $0x260] sm:$0xff] }
 0x56b   :  { %3641 = vmatpush1.bf16.msra.mxu0 %v2636_v22  ;;  %3470 = vmatprep.subr.bf16.mxu1 %v2643_v42  ;;  %v2700_v22 = vunpack.c.h.s8.bf16 %v2396_v0  ;;  %v2707_v42 = vunpack.c.l.s8.bf16 %v2403_v11  ;;  %v2428_v0 = vld [vmem:[#allocation11 + $0x270] sm:$0xff] }
 0x56c   :  { %3642 = vmatprep.subr.bf16.mxu0 %v2645_v38  ;;  %v2709_v38 = vunpack.c.l.s8.bf16 %v2405_v5 }
 0x56e   :  { %3471 = vmatpush1.bf16.msra.mxu1 %v2642_v63  ;;  %v2706_v63 = vunpack.c.l.s8.bf16 %v2402_v16 }
 0x56f   :  { %3643 = vmatpush1.bf16.msra.mxu0 %v2644_v23  ;;  %3472 = vmatprep.subr.bf16.mxu1 %v2651_v62  ;;  %v2708_v23 = vunpack.c.l.s8.bf16 %v2404_v52  ;;  %v2715_v62 = vunpack.c.h.s8.bf16 %v2403_v11  ;;  %v2437_v11 = vld [vmem:[#allocation11 + $0x2b8] sm:$0xff] }
 0x570   :  { %3644 = vmatprep.subr.bf16.mxu0 %v2653_v40  ;;  %v2717_v40 = vunpack.c.h.s8.bf16 %v2405_v5  ;;  %v2762_v5 = vunpack.c.h.s8.bf16 %v2426_v54 }
 0x572   :  { %3473 = vmatpush1.bf16.msra.mxu1 %v2650_v57  ;;  %v2714_v57 = vunpack.c.h.s8.bf16 %v2402_v16  ;;  %v2436_v16 = vld [vmem:[#allocation11 + $0x2b0] sm:$0xff] }
 0x573   :  { %3645 = vmatpush1.bf16.msra.mxu0 %v2652_v50  ;;  %3474 = vmatprep.subr.bf16.mxu1 %v2659_v34  ;;  %v2716_v50 = vunpack.c.h.s8.bf16 %v2404_v52  ;;  %v2723_v34 = vunpack.c.l.s8.bf16 %v2411_v14  ;;  %v2772_v52 = vunpack.c.l.s8.bf16 %v2436_v16 }
 0x574   :  { %3646 = vmatprep.subr.bf16.mxu0 %v2661_v6  ;;  %v2725_v6 = vunpack.c.l.s8.bf16 %v2413_v58 }
 0x576   :  { %3475 = vmatpush1.bf16.msra.mxu1 %v2658_v32  ;;  %v2722_v32 = vunpack.c.l.s8.bf16 %v2410_v3 }
 0x577   :  { %3647 = vmatpush1.bf16.msra.mxu0 %v2660_v37  ;;  %3476 = vmatprep.subr.bf16.mxu1 %v2667_v41  ;;  %v2724_v37 = vunpack.c.l.s8.bf16 %v2412_v24  ;;  %v2731_v41 = vunpack.c.h.s8.bf16 %v2411_v14 }
 0x578   :  { %3648 = vmatprep.subr.bf16.mxu0 %v2669_v27  ;;  %v2733_v27 = vunpack.c.h.s8.bf16 %v2413_v58  ;;  %v2780_v58 = vunpack.c.h.s8.bf16 %v2436_v16 }
 0x57a   :  { %3477 = vmatpush1.bf16.msra.mxu1 %v2666_v51  ;;  %v2730_v51 = vunpack.c.h.s8.bf16 %v2410_v3  ;;  %v2444_v3 = vld [vmem:[#allocation11 + $0x2f0] sm:$0xff] }
 0x57b   :  { %3649 = vmatpush1.bf16.msra.mxu0 %v2668_v19  ;;  %3478 = vmatprep.subr.bf16.mxu1 %v2675_v59  ;;  %v2732_v19 = vunpack.c.h.s8.bf16 %v2412_v24  ;;  %v2739_v59 = vunpack.c.l.s8.bf16 %v2419_v18  ;;  %v2788_v24 = vunpack.c.l.s8.bf16 %v2444_v3 }
 0x57c   :  { %3650 = vmatprep.subr.bf16.mxu0 %v2677_v21  ;;  %v2741_v21 = vunpack.c.l.s8.bf16 %v2421_v47  ;;  %v2796_v47 = vunpack.c.h.s8.bf16 %v2444_v3 }
 0x57e   :  { %3479 = vmatpush1.bf16.msra.mxu1 %v2674_v1  ;;  %v2738_v1 = vunpack.c.l.s8.bf16 %v2418_v49 }
 0x57f   :  { %3651 = vmatpush1.bf16.msra.mxu0 %v2676_v60  ;;  %3480 = vmatprep.subr.bf16.mxu1 %v2683_v2  ;;  %v2740_v60 = vunpack.c.l.s8.bf16 %v2420_v20  ;;  %v2747_v2 = vunpack.c.h.s8.bf16 %v2419_v18 }
 0x580   :  { %3652 = vmatprep.subr.bf16.mxu0 %v2685_v15  ;;  %v2427_v15 = vld [vmem:[#allocation11 + $0x268] sm:$0xff] }
 0x582   :  { %3481 = vmatpush1.bf16.msra.mxu1 %v2682_v46  ;;  %v2746_v46 = vunpack.c.h.s8.bf16 %v2418_v49  ;;  %v2452_v49 = vld [vmem:[#allocation11 + $0x330] sm:$0xff] }
 0x583   :  { %3653 = vmatpush1.bf16.msra.mxu0 %v2684_v35  ;;  %3482 = vmatprep.subr.bf16.mxu1 %v2691_v36  ;;  %v2748_v35 = vunpack.c.h.s8.bf16 %v2420_v20  ;;  %v2755_v36 = vunpack.c.l.s8.bf16 %v2427_v15  ;;  %v2804_v20 = vunpack.c.l.s8.bf16 %v2452_v49 }
 0x584   :  { %3654 = vmatprep.subr.bf16.mxu0 %v2693_v7  ;;  %v2757_v7 = vunpack.c.l.s8.bf16 %v2429_v25 }
 0x586   :  { %3483 = vmatpush1.bf16.msra.mxu1 %v2690_v56  ;;  %v2754_v56 = vunpack.c.l.s8.bf16 %v2426_v54  ;;  %v2460_v54 = vld [vmem:[#allocation11 + $0x370] sm:$0xff] }
 0x587   :  { %3655 = vmatpush1.bf16.msra.mxu0 %v2692_v4  ;;  %3484 = vmatprep.subr.bf16.mxu1 %v2699_v10  ;;  %v2756_v4 = vunpack.c.l.s8.bf16 %v2428_v0  ;;  %v2765_v10 = vunpack.c.h.s8.bf16 %v2429_v25  ;;  %v2812_v25 = vunpack.c.h.s8.bf16 %v2452_v49 }
 0x588   :  { %3656 = vmatprep.subr.bf16.mxu0 %v2701_v9  ;;  %v2435_v9 = vld [vmem:[#allocation11 + $0x2a8] sm:$0xff] }
 0x58a   :  { %3485 = vmatpush1.bf16.msra.mxu1 %v2698_v13  ;;  %v2764_v13 = vunpack.c.h.s8.bf16 %v2428_v0  ;;  %v2820_v0 = vunpack.c.l.s8.bf16 %v2460_v54 }
 0x58b   :  { %3657 = vmatpush1.bf16.msra.mxu0 %v2700_v22  ;;  %3486 = vmatprep.subr.bf16.mxu1 %v2707_v42  ;;  %v2434_v22 = vld [vmem:[#allocation11 + $0x2a0] sm:$0xff]  ;;  %v2773_v42 = vunpack.c.l.s8.bf16 %v2437_v11 }
 0x58c   :  { %3658 = vmatprep.subr.bf16.mxu0 %v2709_v38  ;;  %v2770_v38 = vunpack.c.l.s8.bf16 %v2434_v22  ;;  %v2778_v14 = vunpack.c.h.s8.bf16 %v2434_v22  ;;  %v2468_v22 = vld [vmem:[#allocation11 + $0x3b0] sm:$0xff] }
 0x58d   :  { %v2836_v16 = vunpack.c.l.s8.bf16 %v2468_v22 }
 0x58e   :  { %3487 = vmatpush1.bf16.msra.mxu1 %v2706_v63  ;;  %v2779_v63 = vunpack.c.h.s8.bf16 %v2435_v9 }
 0x58f   :  { %3659 = vmatpush1.bf16.msra.mxu0 %v2708_v23  ;;  %3488 = vmatprep.subr.bf16.mxu1 %v2715_v62  ;;  %v2781_v23 = vunpack.c.h.s8.bf16 %v2437_v11  ;;  %v2443_v62 = vld [vmem:[#allocation11 + $0x2e8] sm:$0xff]  ;;  %v2828_v11 = vunpack.c.h.s8.bf16 %v2460_v54 }
 0x590   :  { %3660 = vmatprep.subr.bf16.mxu0 %v2717_v40  ;;  %v2445_v40 = vld [vmem:[#allocation11 + $0x2f8] sm:$0xff] }
 0x592   :  { %3489 = vmatpush1.bf16.msra.mxu1 %v2714_v57  ;;  %v2787_v57 = vunpack.c.l.s8.bf16 %v2443_v62 }
 0x593   :  { %3661 = vmatpush1.bf16.msra.mxu0 %v2716_v50  ;;  %3490 = vmatprep.subr.bf16.mxu1 %v2723_v34  ;;  %v2442_v50 = vld [vmem:[#allocation11 + $0x2e0] sm:$0xff]  ;;  %v2789_v34 = vunpack.c.l.s8.bf16 %v2445_v40 }
 0x594   :  { %3662 = vmatprep.subr.bf16.mxu0 %v2725_v6  ;;  %v2786_v6 = vunpack.c.l.s8.bf16 %v2442_v50  ;;  %v2794_v18 = vunpack.c.h.s8.bf16 %v2442_v50  ;;  %v2476_v50 = vld [vmem:[#allocation11 + $0x3f0] sm:$0xff] }
 0x595   :  { %v2852_v3 = vunpack.c.l.s8.bf16 %v2476_v50 }
 0x596   :  { %3491 = vmatpush1.bf16.msra.mxu1 %v2722_v32  ;;  %v2795_v32 = vunpack.c.h.s8.bf16 %v2443_v62 }
 0x597   :  { %3663 = vmatpush1.bf16.msra.mxu0 %v2724_v37  ;;  %3492 = vmatprep.subr.bf16.mxu1 %v2731_v41  ;;  %v2797_v37 = vunpack.c.h.s8.bf16 %v2445_v40  ;;  %v2451_v41 = vld [vmem:[#allocation11 + $0x328] sm:$0xff]  ;;  %v2844_v40 = vunpack.c.h.s8.bf16 %v2468_v22 }
 0x598   :  { %3664 = vmatprep.subr.bf16.mxu0 %v2733_v27  ;;  %v2453_v27 = vld [vmem:[#allocation11 + $0x338] sm:$0xff] }
 0x59a   :  { %3493 = vmatpush1.bf16.msra.mxu1 %v2730_v51  ;;  %v2803_v51 = vunpack.c.l.s8.bf16 %v2451_v41 }
 0x59b   :  { %3665 = vmatpush1.bf16.msra.mxu0 %v2732_v19  ;;  %3505 = vmatprep.subr.bf16.mxu1 %v2739_v59  ;;  %v2450_v19 = vld [vmem:[#allocation11 + $0x320] sm:$0xff]  ;;  %v2805_v59 = vunpack.c.l.s8.bf16 %v2453_v27 }
 0x59c   :  { %3677 = vmatprep.subr.bf16.mxu0 %v2741_v21  ;;  %v2802_v21 = vunpack.c.l.s8.bf16 %v2450_v19 }
 0x59d   :  { %3495 = vmatmul.mubr.bf16.vlgmr.msra.gmra.mrb[20].mxu1 %v10408_v39 }
 0x59e   :  { %3667 = vmatmul.mubr.bf16.vlgmr.msra.gmra.mrb[16].mxu0 %v10408_v39  ;;  %3506 = vmatpush1.bf16.msra.mxu1 %v2738_v1  ;;  %v2763_v39 = vunpack.c.h.s8.bf16 %v2427_v15  ;;  %v2811_v1 = vunpack.c.h.s8.bf16 %v2451_v41  ;;  %v2461_v15 = vld [vmem:[#allocation11 + $0x378] sm:$0xff] }
 0x59f   :  { %3537 = vmatprep.mubr.bf16.mxu1 %v10410_v12  ;;  %3678 = vmatpush1.bf16.msra.mxu0 %v2740_v60  ;;  %v2813_v60 = vunpack.c.h.s8.bf16 %v2453_v27  ;;  %v2860_v27 = vunpack.c.h.s8.bf16 %v2476_v50 }
 0x5a0   :  { %3709 = vmatprep.mubr.bf16.mxu0 %v10410_v12  ;;  %3507 = vmatprep.subr.bf16.mxu1 %v2747_v2  ;;  %v2771_v12 = vunpack.c.l.s8.bf16 %v2435_v9  ;;  %v2459_v2 = vld [vmem:[#allocation11 + $0x368] sm:$0xff] }
 0x5a1   :  { %3679 = vmatprep.subr.bf16.mxu0 %v2749_v45  ;;  %v2810_v45 = vunpack.c.h.s8.bf16 %v2450_v19  ;;  %v2484_v19 = vld [vmem:[#allocation11 + $0x430] sm:$0xff] }
 0x5a2   :  { %3508 = vmatpush1.bf16.msra.mxu1 %v2746_v46  ;;  %v2819_v46 = vunpack.c.l.s8.bf16 %v2459_v2  ;;  %v2868_v49 = vunpack.c.l.s8.bf16 %v2484_v19 }
 0x5a3   :  { %3680 = vmatpush1.bf16.msra.mxu0 %v2748_v35  ;;  %3509 = vmatprep.subr.bf16.mxu1 %v2755_v36  ;;  %v2458_v35 = vld [vmem:[#allocation11 + $0x360] sm:$0xff]  ;;  %v2821_v36 = vunpack.c.l.s8.bf16 %v2461_v15 }
 0x5a4   :  { %3681 = vmatprep.subr.bf16.mxu0 %v2757_v7  ;;  %v2818_v7 = vunpack.c.l.s8.bf16 %v2458_v35  ;;  %v2826_v9 = vunpack.c.h.s8.bf16 %v2458_v35  ;;  %v2492_v35 = vld [vmem:[#allocation11 + $0x470] sm:$0xff] }
 0x5a5   :  { %v2884_v54 = vunpack.c.l.s8.bf16 %v2492_v35 }
 0x5a6   :  { %3510 = vmatpush1.bf16.msra.mxu1 %v2754_v56  ;;  %v2827_v56 = vunpack.c.h.s8.bf16 %v2459_v2 }
 0x5a7   :  { %3682 = vmatpush1.bf16.msra.mxu0 %v2756_v4  ;;  %3511 = vmatprep.subr.bf16.mxu1 %v2763_v39  ;;  %v2829_v4 = vunpack.c.h.s8.bf16 %v2461_v15  ;;  %v2467_v39 = vld [vmem:[#allocation11 + $0x3a8] sm:$0xff]  ;;  %v2876_v15 = vunpack.c.h.s8.bf16 %v2484_v19 }
 0x5a8   :  { %3683 = vmatprep.subr.bf16.mxu0 %v2765_v10  ;;  %v2469_v10 = vld [vmem:[#allocation11 + $0x3b8] sm:$0xff] }
 0x5aa   :  { %3512 = vmatpush1.bf16.msra.mxu1 %v2762_v5  ;;  %v2835_v5 = vunpack.c.l.s8.bf16 %v2467_v39 }
 0x5ab   :  { %3684 = vmatpush1.bf16.msra.mxu0 %v2764_v13  ;;  %3513 = vmatprep.subr.bf16.mxu1 %v2771_v12  ;;  %v2466_v13 = vld [vmem:[#allocation11 + $0x3a0] sm:$0xff]  ;;  %v2837_v12 = vunpack.c.l.s8.bf16 %v2469_v10 }
 0x5ac   :  { %3685 = vmatprep.subr.bf16.mxu0 %v2773_v42  ;;  %v2834_v42 = vunpack.c.l.s8.bf16 %v2466_v13  ;;  %v2842_v62 = vunpack.c.h.s8.bf16 %v2466_v13 }
 0x5ae   :  { %3514 = vmatpush1.bf16.msra.mxu1 %v2770_v38  ;;  %v2843_v38 = vunpack.c.h.s8.bf16 %v2467_v39  ;;  %v2892_v39 = vunpack.c.h.s8.bf16 %v2492_v35 }
 0x5af   :  { %3686 = vmatpush1.bf16.msra.mxu0 %v2772_v52  ;;  %3515 = vmatprep.subr.bf16.mxu1 %v2779_v63  ;;  %v2845_v52 = vunpack.c.h.s8.bf16 %v2469_v10  ;;  %v2475_v63 = vld [vmem:[#allocation11 + $0x3e8] sm:$0xff]  ;;  %v2498_v10 = vld [vmem:[#allocation11 + $0x4a0] sm:$0xff] }
 0x5b0   :  { %3687 = vmatprep.subr.bf16.mxu0 %v2781_v23  ;;  %v2477_v23 = vld [vmem:[#allocation11 + $0x3f8] sm:$0xff] }
 0x5b2   :  { %3516 = vmatpush1.bf16.msra.mxu1 %v2778_v14  ;;  %v2851_v14 = vunpack.c.l.s8.bf16 %v2475_v63 }
 0x5b3   :  { %3688 = vmatpush1.bf16.msra.mxu0 %v2780_v58  ;;  %3517 = vmatprep.subr.bf16.mxu1 %v2787_v57  ;;  %v2474_v58 = vld [vmem:[#allocation11 + $0x3e0] sm:$0xff]  ;;  %v2853_v57 = vunpack.c.l.s8.bf16 %v2477_v23 }
 0x5b4   :  { %3689 = vmatprep.subr.bf16.mxu0 %v2789_v34  ;;  %v2850_v34 = vunpack.c.l.s8.bf16 %v2474_v58  ;;  %v2858_v41 = vunpack.c.h.s8.bf16 %v2474_v58 }
 0x5b6   :  { %3518 = vmatpush1.bf16.msra.mxu1 %v2786_v6  ;;  %v2859_v6 = vunpack.c.h.s8.bf16 %v2475_v63 }
 0x5b7   :  { %3690 = vmatpush1.bf16.msra.mxu0 %v2788_v24  ;;  %3519 = vmatprep.subr.bf16.mxu1 %v2795_v32  ;;  %v2861_v24 = vunpack.c.h.s8.bf16 %v2477_v23  ;;  %v2483_v32 = vld [vmem:[#allocation11 + $0x428] sm:$0xff]  ;;  %v2506_v23 = vld [vmem:[#allocation11 + $0x4e0] sm:$0xff] }
 0x5b8   :  { %3691 = vmatprep.subr.bf16.mxu0 %v2797_v37  ;;  %v2485_v37 = vld [vmem:[#allocation11 + $0x438] sm:$0xff] }
 0x5ba   :  { %3520 = vmatpush1.bf16.msra.mxu1 %v2794_v18  ;;  %v2867_v18 = vunpack.c.l.s8.bf16 %v2483_v32 }
 0x5bb   :  { %3692 = vmatpush1.bf16.msra.mxu0 %v2796_v47  ;;  %3521 = vmatprep.subr.bf16.mxu1 %v2803_v51  ;;  %v2482_v47 = vld [vmem:[#allocation11 + $0x420] sm:$0xff]  ;;  %v2869_v51 = vunpack.c.l.s8.bf16 %v2485_v37 }
 0x5bc   :  { %3693 = vmatprep.subr.bf16.mxu0 %v2805_v59  ;;  %v2866_v59 = vunpack.c.l.s8.bf16 %v2482_v47  ;;  %v2874_v2 = vunpack.c.h.s8.bf16 %v2482_v47 }
 0x5be   :  { %3522 = vmatpush1.bf16.msra.mxu1 %v2802_v21  ;;  %v2875_v21 = vunpack.c.h.s8.bf16 %v2483_v32 }
 0x5bf   :  { %3694 = vmatpush1.bf16.msra.mxu0 %v2804_v20  ;;  %3523 = vmatprep.subr.bf16.mxu1 %v2811_v1  ;;  %v2491_v20 = vld [vmem:[#allocation11 + $0x468] sm:$0xff]  ;;  %v2877_v1 = vunpack.c.h.s8.bf16 %v2485_v37  ;;  %v2514_v37 = vld [vmem:[#allocation11 + $0x520] sm:$0xff] }
 0x5c0   :  { %3695 = vmatprep.subr.bf16.mxu0 %v2813_v60  ;;  %v2493_v60 = vld [vmem:[#allocation11 + $0x478] sm:$0xff] }
 0x5c2   :  { %3524 = vmatpush1.bf16.msra.mxu1 %v2810_v45  ;;  %v2883_v45 = vunpack.c.l.s8.bf16 %v2491_v20 }
 0x5c3   :  { %3696 = vmatpush1.bf16.msra.mxu0 %v2812_v25  ;;  %3525 = vmatprep.subr.bf16.mxu1 %v2819_v46  ;;  %v2490_v25 = vld [vmem:[#allocation11 + $0x460] sm:$0xff]  ;;  %v2885_v46 = vunpack.c.l.s8.bf16 %v2493_v60 }
 0x5c4   :  { %3697 = vmatprep.subr.bf16.mxu0 %v2821_v36  ;;  %v2882_v36 = vunpack.c.l.s8.bf16 %v2490_v25 }
 0x5c6   :  { %3526 = vmatpush1.bf16.msra.mxu1 %v2818_v7  ;;  %v2893_v7 = vunpack.c.h.s8.bf16 %v2493_v60  ;;  %v2522_v60 = vld [vmem:[#allocation11 + $0x560] sm:$0xff] }
 0x5c7   :  { %3698 = vmatpush1.bf16.msra.mxu0 %v2820_v0  ;;  %3527 = vmatprep.subr.bf16.mxu1 %v2827_v56  ;;  %v2499_v0 = vld [vmem:[#allocation11 + $0x4a8] sm:$0xff]  ;;  %v2501_v56 = vld [vmem:[#allocation11 + $0x4b8] sm:$0xff] }
 0x5c8   :  { %3699 = vmatprep.subr.bf16.mxu0 %v2829_v4  ;;  %v2890_v4 = vunpack.c.h.s8.bf16 %v2490_v25  ;;  %v2909_v22 = vunpack.c.h.s8.bf16 %v2501_v56 }
 0x5ca   :  { %3528 = vmatpush1.bf16.msra.mxu1 %v2826_v9  ;;  %v2901_v9 = vunpack.c.l.s8.bf16 %v2501_v56  ;;  %v2530_v56 = vld [vmem:[#allocation11 + $0x5a0] sm:$0xff] }
 0x5cb   :  { %3700 = vmatpush1.bf16.msra.mxu0 %v2828_v11  ;;  %3529 = vmatprep.subr.bf16.mxu1 %v2835_v5  ;;  %v2500_v11 = vld [vmem:[#allocation11 + $0x4b0] sm:$0xff]  ;;  %v2898_v5 = vunpack.c.l.s8.bf16 %v2498_v10 }
 0x5cc   :  { %3701 = vmatprep.subr.bf16.mxu0 %v2837_v12  ;;  %v2900_v13 = vunpack.c.l.s8.bf16 %v2500_v11  ;;  %v2907_v12 = vunpack.c.h.s8.bf16 %v2499_v0 }
 0x5ce   :  { %3530 = vmatpush1.bf16.msra.mxu1 %v2834_v42  ;;  %v2507_v42 = vld [vmem:[#allocation11 + $0x4e8] sm:$0xff] }
 0x5cf   :  { %3702 = vmatpush1.bf16.msra.mxu0 %v2836_v16  ;;  %3531 = vmatprep.subr.bf16.mxu1 %v2843_v38  ;;  %v2509_v16 = vld [vmem:[#allocation11 + $0x4f8] sm:$0xff]  ;;  %v2906_v38 = vunpack.c.h.s8.bf16 %v2498_v10  ;;  %v2915_v63 = vunpack.c.l.s8.bf16 %v2507_v42 }
 0x5d0   :  { %3703 = vmatprep.subr.bf16.mxu0 %v2845_v52  ;;  %v2908_v52 = vunpack.c.h.s8.bf16 %v2500_v11  ;;  %v2925_v50 = vunpack.c.h.s8.bf16 %v2509_v16 }
 0x5d2   :  { %3532 = vmatpush1.bf16.msra.mxu1 %v2842_v62  ;;  %v2917_v62 = vunpack.c.l.s8.bf16 %v2509_v16  ;;  %v2538_v16 = vld [vmem:[#allocation11 + $0x5e0] sm:$0xff] }
 0x5d3   :  { %3704 = vmatpush1.bf16.msra.mxu0 %v2844_v40  ;;  %3533 = vmatprep.subr.bf16.mxu1 %v2851_v14  ;;  %v2508_v40 = vld [vmem:[#allocation11 + $0x4f0] sm:$0xff]  ;;  %v2914_v14 = vunpack.c.l.s8.bf16 %v2506_v23 }
 0x5d4   :  { %3705 = vmatprep.subr.bf16.mxu0 %v2853_v57  ;;  %v2916_v58 = vunpack.c.l.s8.bf16 %v2508_v40  ;;  %v2923_v57 = vunpack.c.h.s8.bf16 %v2507_v42 }
 0x5d6   :  { %3534 = vmatpush1.bf16.msra.mxu1 %v2850_v34  ;;  %v2515_v34 = vld [vmem:[#allocation11 + $0x528] sm:$0xff] }
 0x5d7   :  { %3706 = vmatpush1.bf16.msra.mxu0 %v2852_v3  ;;  %3535 = vmatprep.subr.bf16.mxu1 %v2859_v6  ;;  %v2517_v3 = vld [vmem:[#allocation11 + $0x538] sm:$0xff]  ;;  %v2922_v6 = vunpack.c.h.s8.bf16 %v2506_v23  ;;  %v2931_v32 = vunpack.c.l.s8.bf16 %v2515_v34 }
 0x5d8   :  { %3707 = vmatprep.subr.bf16.mxu0 %v2861_v24  ;;  %v2924_v24 = vunpack.c.h.s8.bf16 %v2508_v40  ;;  %v2941_v19 = vunpack.c.h.s8.bf16 %v2517_v3 }
 0x5da   :  { %3536 = vmatpush1.bf16.msra.mxu1 %v2858_v41  ;;  %v2933_v41 = vunpack.c.l.s8.bf16 %v2517_v3  ;;  %v2546_v3 = vld [vmem:[#allocation11 + $0x620] sm:$0xff] }
 0x5db   :  { %3708 = vmatpush1.bf16.msra.mxu0 %v2860_v27  ;;  %3548 = vmatprep.subr.bf16.mxu1 %v2867_v18  ;;  %v2516_v27 = vld [vmem:[#allocation11 + $0x530] sm:$0xff]  ;;  %v2930_v18 = vunpack.c.l.s8.bf16 %v2514_v37 }
 0x5dc   :  { %3720 = vmatprep.subr.bf16.mxu0 %v2869_v51  ;;  %v2932_v47 = vunpack.c.l.s8.bf16 %v2516_v27  ;;  %v2939_v51 = vunpack.c.h.s8.bf16 %v2515_v34 }
 0x5dd   :  { %3538 = vmatmul.mubr.bf16.vlgmr.msra.gmra.mrb[20].mxu1 %v10416_v61 }
 0x5de   :  { %3710 = vmatmul.mubr.bf16.vlgmr.msra.gmra.mrb[16].mxu0 %v10416_v61  ;;  %3549 = vmatpush1.bf16.msra.mxu1 %v2866_v59  ;;  %v2891_v61 = vunpack.c.h.s8.bf16 %v2491_v20  ;;  %v2523_v59 = vld [vmem:[#allocation11 + $0x568] sm:$0xff]  ;;  %v2940_v20 = vunpack.c.h.s8.bf16 %v2516_v27 }
 0x5df   :  { %3580 = vmatprep.mubr.bf16.mxu1 %v10426_v33  ;;  %3721 = vmatpush1.bf16.msra.mxu0 %v2868_v49  ;;  %v2525_v49 = vld [vmem:[#allocation11 + $0x578] sm:$0xff]  ;;  %v2555_v27 = vld [vmem:[#allocation11 + $0x668] sm:$0xff] }
 0x5e0   :  { %3752 = vmatprep.mubr.bf16.mxu0 %v10426_v33  ;;  %3550 = vmatprep.subr.bf16.mxu1 %v2875_v21  ;;  %v2899_v33 = vunpack.c.l.s8.bf16 %v2499_v0  ;;  %v2938_v21 = vunpack.c.h.s8.bf16 %v2514_v37  ;;  %v2957_v35 = vunpack.c.h.s8.bf16 %v2525_v49 }
 0x5e1   :  { %3722 = vmatprep.subr.bf16.mxu0 %v2877_v1  ;;  %v2947_v1 = vunpack.c.l.s8.bf16 %v2523_v59 }
 0x5e2   :  { %3551 = vmatpush1.bf16.msra.mxu1 %v2874_v2  ;;  %v2949_v2 = vunpack.c.l.s8.bf16 %v2525_v49  ;;  %v2554_v49 = vld [vmem:[#allocation11 + $0x660] sm:$0xff] }
 0x5e3   :  { %3723 = vmatpush1.bf16.msra.mxu0 %v2876_v15  ;;  %3552 = vmatprep.subr.bf16.mxu1 %v2883_v45  ;;  %v2524_v15 = vld [vmem:[#allocation11 + $0x570] sm:$0xff]  ;;  %v2946_v45 = vunpack.c.l.s8.bf16 %v2522_v60 }
 0x5e4   :  { %3724 = vmatprep.subr.bf16.mxu0 %v2885_v46  ;;  %v2948_v25 = vunpack.c.l.s8.bf16 %v2524_v15  ;;  %v2955_v46 = vunpack.c.h.s8.bf16 %v2523_v59  ;;  %v3011_v59 = vunpack.c.l.s8.bf16 %v2555_v27 }
 0x5e6   :  { %3553 = vmatpush1.bf16.msra.mxu1 %v2882_v36  ;;  %v2531_v36 = vld [vmem:[#allocation11 + $0x5a8] sm:$0xff] }
 0x5e7   :  { %3725 = vmatpush1.bf16.msra.mxu0 %v2884_v54  ;;  %3554 = vmatprep.subr.bf16.mxu1 %v2891_v61  ;;  %v2533_v54 = vld [vmem:[#allocation11 + $0x5b8] sm:$0xff]  ;;  %v2954_v61 = vunpack.c.h.s8.bf16 %v2522_v60  ;;  %v2963_v0 = vunpack.c.l.s8.bf16 %v2531_v36 }
 0x5e8   :  { %3726 = vmatprep.subr.bf16.mxu0 %v2893_v7  ;;  %v2956_v7 = vunpack.c.h.s8.bf16 %v2524_v15  ;;  %v2973_v11 = vunpack.c.h.s8.bf16 %v2533_v54  ;;  %v2563_v15 = vld [vmem:[#allocation11 + $0x6a8] sm:$0xff] }
 0x5ea   :  { %3555 = vmatpush1.bf16.msra.mxu1 %v2890_v4  ;;  %v2965_v4 = vunpack.c.l.s8.bf16 %v2533_v54  ;;  %v2564_v54 = vld [vmem:[#allocation11 + $0x6b0] sm:$0xff] }
 0x5eb   :  { %3727 = vmatpush1.bf16.msra.mxu0 %v2892_v39  ;;  %3556 = vmatprep.subr.bf16.mxu1 %v2899_v33  ;;  %v2532_v39 = vld [vmem:[#allocation11 + $0x5b0] sm:$0xff]  ;;  %v2962_v33 = vunpack.c.l.s8.bf16 %v2530_v56 }
 0x5ec   :  { %3728 = vmatprep.subr.bf16.mxu0 %v2901_v9  ;;  %v2964_v10 = vunpack.c.l.s8.bf16 %v2532_v39  ;;  %v2971_v9 = vunpack.c.h.s8.bf16 %v2531_v36 }
 0x5ee   :  { %3557 = vmatpush1.bf16.msra.mxu1 %v2898_v5  ;;  %v2539_v5 = vld [vmem:[#allocation11 + $0x5e8] sm:$0xff] }
 0x5ef   :  { %3729 = vmatpush1.bf16.msra.mxu0 %v2900_v13  ;;  %3558 = vmatprep.subr.bf16.mxu1 %v2907_v12  ;;  %v2541_v13 = vld [vmem:[#allocation11 + $0x5f8] sm:$0xff]  ;;  %v2970_v12 = vunpack.c.h.s8.bf16 %v2530_v56  ;;  %v2979_v42 = vunpack.c.l.s8.bf16 %v2539_v5  ;;  %v3035_v56 = vunpack.c.h.s8.bf16 %v2563_v15 }
 0x5f0   :  { %3730 = vmatprep.subr.bf16.mxu0 %v2909_v22  ;;  %v2972_v22 = vunpack.c.h.s8.bf16 %v2532_v39  ;;  %v2989_v40 = vunpack.c.h.s8.bf16 %v2541_v13 }
 0x5f2   :  { %3559 = vmatpush1.bf16.msra.mxu1 %v2906_v38  ;;  %v2981_v38 = vunpack.c.l.s8.bf16 %v2541_v13 }
 0x5f3   :  { %3731 = vmatpush1.bf16.msra.mxu0 %v2908_v52  ;;  %3560 = vmatprep.subr.bf16.mxu1 %v2915_v63  ;;  %v2540_v52 = vld [vmem:[#allocation11 + $0x5f0] sm:$0xff]  ;;  %v2978_v63 = vunpack.c.l.s8.bf16 %v2538_v16 }
 0x5f4   :  { %3732 = vmatprep.subr.bf16.mxu0 %v2917_v62  ;;  %v2980_v23 = vunpack.c.l.s8.bf16 %v2540_v52  ;;  %v2987_v62 = vunpack.c.h.s8.bf16 %v2539_v5 }
 0x5f6   :  { %3561 = vmatpush1.bf16.msra.mxu1 %v2914_v14  ;;  %v2547_v14 = vld [vmem:[#allocation11 + $0x628] sm:$0xff] }
 0x5f7   :  { %3733 = vmatpush1.bf16.msra.mxu0 %v2916_v58  ;;  %3562 = vmatprep.subr.bf16.mxu1 %v2923_v57  ;;  %v2549_v58 = vld [vmem:[#allocation11 + $0x638] sm:$0xff]  ;;  %v2986_v57 = vunpack.c.h.s8.bf16 %v2538_v16  ;;  %v2995_v34 = vunpack.c.l.s8.bf16 %v2547_v14 }
 0x5f8   :  { %3734 = vmatprep.subr.bf16.mxu0 %v2925_v50  ;;  %v2988_v50 = vunpack.c.h.s8.bf16 %v2540_v52 }
 0x5fa   :  { %3563 = vmatpush1.bf16.msra.mxu1 %v2922_v6  ;;  %v2997_v6 = vunpack.c.l.s8.bf16 %v2549_v58 }
 0x5fb   :  { %3735 = vmatpush1.bf16.msra.mxu0 %v2924_v24  ;;  %3564 = vmatprep.subr.bf16.mxu1 %v2931_v32  ;;  %v2548_v24 = vld [vmem:[#allocation11 + $0x630] sm:$0xff]  ;;  %v2994_v32 = vunpack.c.l.s8.bf16 %v2546_v3 }
 0x5fc   :  { %3736 = vmatprep.subr.bf16.mxu0 %v2933_v41  ;;  %v2996_v37 = vunpack.c.l.s8.bf16 %v2548_v24  ;;  %v3003_v41 = vunpack.c.h.s8.bf16 %v2547_v14 }
 0x5fe   :  { %3565 = vmatpush1.bf16.msra.mxu1 %v2930_v18  ;;  %v3005_v18 = vunpack.c.h.s8.bf16 %v2549_v58 }
 0x5ff   :  { %3737 = vmatpush1.bf16.msra.mxu0 %v2932_v47  ;;  %3566 = vmatprep.subr.bf16.mxu1 %v2939_v51  ;;  %v2557_v47 = vld [vmem:[#allocation11 + $0x678] sm:$0xff]  ;;  %v3002_v51 = vunpack.c.h.s8.bf16 %v2546_v3 }
 0x600   :  { %3738 = vmatprep.subr.bf16.mxu0 %v2941_v19  ;;  %v3004_v19 = vunpack.c.h.s8.bf16 %v2548_v24 }
 0x602   :  { %3567 = vmatpush1.bf16.msra.mxu1 %v2938_v21  ;;  %v3013_v21 = vunpack.c.l.s8.bf16 %v2557_v47 }
 0x603   :  { %3739 = vmatpush1.bf16.msra.mxu0 %v2940_v20  ;;  %3568 = vmatprep.subr.bf16.mxu1 %v2947_v1  ;;  %v2556_v20 = vld [vmem:[#allocation11 + $0x670] sm:$0xff]  ;;  %v3010_v1 = vunpack.c.l.s8.bf16 %v2554_v49 }
 0x604   :  { %3740 = vmatprep.subr.bf16.mxu0 %v2949_v2  ;;  %v3012_v60 = vunpack.c.l.s8.bf16 %v2556_v20  ;;  %v3021_v2 = vunpack.c.h.s8.bf16 %v2557_v47  ;;  %v2579_v47 = vld [vmem:[#allocation11 + $0x728] sm:$0xff] }
 0x606   :  { %3569 = vmatpush1.bf16.msra.mxu1 %v2946_v45  ;;  %v2565_v45 = vld [vmem:[#allocation11 + $0x6b8] sm:$0xff] }
 0x607   :  { %3741 = vmatpush1.bf16.msra.mxu0 %v2948_v25  ;;  %3570 = vmatprep.subr.bf16.mxu1 %v2955_v46  ;;  %v3018_v25 = vunpack.c.h.s8.bf16 %v2554_v49  ;;  %v3020_v46 = vunpack.c.h.s8.bf16 %v2556_v20  ;;  %v3029_v36 = vunpack.c.l.s8.bf16 %v2565_v45  ;;  %v3037_v39 = vunpack.c.h.s8.bf16 %v2565_v45 }
 0x608   :  { %3742 = vmatprep.subr.bf16.mxu0 %v2957_v35  ;;  %v2562_v35 = vld [vmem:[#allocation11 + $0x6a0] sm:$0xff] }
 0x609   :  { %v3034_v5 = vunpack.c.h.s8.bf16 %v2562_v35 }
 0x60a   :  { %3571 = vmatpush1.bf16.msra.mxu1 %v2954_v61  ;;  %v3026_v61 = vunpack.c.l.s8.bf16 %v2562_v35  ;;  %v2580_v35 = vld [vmem:[#allocation11 + $0x730] sm:$0xff] }
 0x60b   :  { %3743 = vmatpush1.bf16.msra.mxu0 %v2956_v7  ;;  %3572 = vmatprep.subr.bf16.mxu1 %v2963_v0  ;;  %v10467_v7 = vld [vmem:[#allocation13] ss:$2 sm:$0xff]  ;;  %v3028_v0 = vunpack.c.l.s8.bf16 %v2564_v54 }
 0x60c   :  { %3744 = vmatprep.subr.bf16.mxu0 %v2965_v4  ;;  %v10469_v4 = vld [vmem:[#allocation13 + $0x1] ss:$2 sm:$0xff] }
 0x60d   :  { %v3870_v13 = vrot.slane %v10469_v4, %v10139_v28 }
 0x60e   :  { %3573 = vmatpush1.bf16.msra.mxu1 %v2962_v33  ;;  %v2571_v33 = vld [vmem:[#allocation11 + $0x6e8] sm:$0xff] }
 0x60f   :  { %3745 = vmatpush1.bf16.msra.mxu0 %v2964_v10  ;;  %3574 = vmatprep.subr.bf16.mxu1 %v2971_v9  ;;  %v3811_v10 = vrot.slane %v10467_v7, %v10139_v28  ;;  %v2573_v9 = vld [vmem:[#allocation11 + $0x6f8] sm:$0xff] }
 0x610   :  { %3746 = vmatprep.subr.bf16.mxu0 %v2973_v11  ;;  %v3815_v11 = vrot.slane %v10467_v7, %v10142_v30  ;;  %v3045_v52 = vunpack.c.l.s8.bf16 %v2573_v9 }
 0x612   :  { %3575 = vmatpush1.bf16.msra.mxu1 %v2970_v12  ;;  %v3036_v12 = vunpack.c.h.s8.bf16 %v2564_v54 }
 0x613   :  { %3747 = vmatpush1.bf16.msra.mxu0 %v2972_v22  ;;  %3576 = vmatprep.subr.bf16.mxu1 %v2979_v42  ;;  %v3043_v22 = vunpack.c.l.s8.bf16 %v2571_v33  ;;  %v2570_v42 = vld [vmem:[#allocation11 + $0x6e0] sm:$0xff] }
 0x614   :  { %3748 = vmatprep.subr.bf16.mxu0 %v2981_v38  ;;  %v3874_v38 = vrot.slane %v10469_v4, %v10142_v30 }
 0x616   :  { %3577 = vmatpush1.bf16.msra.mxu1 %v2978_v63  ;;  %v2572_v63 = vld [vmem:[#allocation11 + $0x6f0] sm:$0xff] }
 0x617   :  { %3749 = vmatpush1.bf16.msra.mxu0 %v2980_v23  ;;  %3578 = vmatprep.subr.bf16.mxu1 %v2987_v62  ;;  %v3052_v20 = vunpack.c.h.s8.bf16 %v2572_v63 }
 0x618   :  { %3750 = vmatprep.subr.bf16.mxu0 %v2989_v40 }
 0x61a   :  { %3579 = vmatpush1.bf16.msra.mxu1 %v2986_v57 }
 0x61b   :  { %3751 = vmatpush1.bf16.msra.mxu0 %v2988_v50  ;;  %3591 = vmatprep.subr.bf16.mxu1 %v2995_v34  ;;  %v3042_v50 = vunpack.c.l.s8.bf16 %v2570_v42 }
 0x61c   :  { %3763 = vmatprep.subr.bf16.mxu0 %v2997_v6 }
 0x61d   :  { %3581 = vmatmul.mubr.bf16.vlgmr.msra.gmra.mrb[20].mxu1 %v10437_v17 }
 0x61e   :  { %3753 = vmatmul.mubr.bf16.vlgmr.msra.gmra.mrb[16].mxu0 %v10437_v17  ;;  %3592 = vmatpush1.bf16.msra.mxu1 %v2994_v32  ;;  %v3019_v17 = vunpack.c.h.s8.bf16 %v2555_v27  ;;  %v3044_v32 = vunpack.c.l.s8.bf16 %v2572_v63 }
 0x61f   :  { %3623 = vmatprep.mubr.bf16.mxu1 %v10439_v43  ;;  %3764 = vmatpush1.bf16.msra.mxu0 %v2996_v37 }
 0x620   :  { %3795 = vmatprep.mubr.bf16.mxu0 %v10439_v43  ;;  %3593 = vmatprep.subr.bf16.mxu1 %v3003_v41  ;;  %v3027_v43 = vunpack.c.l.s8.bf16 %v2563_v15  ;;  %v2578_v15 = vld [vmem:[#allocation11 + $0x720] sm:$0xff] }
 0x621   :  { %3765 = vmatprep.subr.bf16.mxu0 %v3005_v18  ;;  %v3051_v18 = vunpack.c.h.s8.bf16 %v2571_v33  ;;  %v3066_v63 = vunpack.c.h.s8.bf16 %v2578_v15 }
 0x622   :  { %3594 = vmatpush1.bf16.msra.mxu1 %v3002_v51 }
 0x623   :  { %3766 = vmatpush1.bf16.msra.mxu0 %v3004_v19  ;;  %3595 = vmatprep.subr.bf16.mxu1 %v3011_v59  ;;  %v3053_v19 = vunpack.c.h.s8.bf16 %v2573_v9  ;;  %v2581_v59 = vld [vmem:[#allocation11 + $0x738] sm:$0xff]  ;;  %v3067_v9 = vunpack.c.h.s8.bf16 %v2579_v47 }
 0x624   :  { %3767 = vmatprep.subr.bf16.mxu0 %v3013_v21  ;;  %v3050_v21 = vunpack.c.h.s8.bf16 %v2570_v42 }
 0x626   :  { %3596 = vmatpush1.bf16.msra.mxu1 %v3010_v1 }
 0x627   :  { %3768 = vmatpush1.bf16.msra.mxu0 %v3012_v60  ;;  %3597 = vmatprep.subr.bf16.mxu1 %v3019_v17 }
 0x628   :  { %3769 = vmatprep.subr.bf16.mxu0 %v3021_v2  ;;  %v3059_v2 = vunpack.c.l.s8.bf16 %v2579_v47 }
 0x62a   :  { %3598 = vmatpush1.bf16.msra.mxu1 %v3018_v25 }
 0x62b   :  { %3770 = vmatpush1.bf16.msra.mxu0 %v3020_v46  ;;  %3599 = vmatprep.subr.bf16.mxu1 %v3027_v43  ;;  %v3061_v43 = vunpack.c.l.s8.bf16 %v2581_v59 }
 0x62c   :  { %3771 = vmatprep.subr.bf16.mxu0 %v3029_v36 }
 0x62e   :  { %3600 = vmatpush1.bf16.msra.mxu1 %v3026_v61 }
 0x62f   :  { %3772 = vmatpush1.bf16.msra.mxu0 %v3028_v0  ;;  %3601 = vmatprep.subr.bf16.mxu1 %v3035_v56  ;;  %v3058_v56 = vunpack.c.l.s8.bf16 %v2578_v15 }
 0x630   :  { %v3281_v16 = vpop.f32.mrb[16].mxu1  ;;  %3773 = vmatprep.subr.bf16.mxu0 %v3037_v39 }
 0x631   :  { %v3848_v23 = vmul.f32 %v3811_v10, %v3281_v16  ;;  %v10479_v62 = vpop.f32.mrb[12].mxu0  ;;  %v3283_v40 = vpop.f32.mrb[17].mxu1  ;;  %v2589_v16 = vld [vmem:[#allocation11 + $0x778] sm:$0xff] }
 0x632   :  { %v3849_v14 = vmul.f32 %v3815_v11, %v3283_v40  ;;  %v10481_v58 = vpop.f32.mrb[13].mxu0  ;;  %v3285_v57 = vpop.f32.mrb[18].mxu1  ;;  %3602 = vmatpush1.bf16.msra.mxu1 %v3034_v5 }
 0x633   :  { %v10483_v34 = vadd.f32 %v3870_v13, %v3848_v23  ;;  %v3856_v3 = vmul.f32 %v3811_v10, %v3285_v57  ;;  %v10485_v6 = vpop.f32.mrb[14].mxu0  ;;  %3774 = vmatpush1.bf16.msra.mxu0 %v3036_v12  ;;  %v3287_v24 = vpop.f32.mrb[19].mxu1  ;;  %3603 = vmatprep.subr.bf16.mxu1 %v3043_v22  ;;  %v3060_v10 = vunpack.c.l.s8.bf16 %v2580_v35  ;;  %v2587_v12 = vld [vmem:[#allocation11 + $0x768] sm:$0xff] }
 0x634   :  { %v10487_v37 = vadd.f32 %v3874_v38, %v3849_v14  ;;  %v3857_v41 = vmul.f32 %v3815_v11, %v3287_v24  ;;  %v10489_v27 = vpop.f32.mrb[15].mxu0  ;;  %3775 = vmatprep.subr.bf16.mxu0 %v3045_v52  ;;  %v3068_v14 = vunpack.c.h.s8.bf16 %v2580_v35  ;;  %v3075_v57 = vunpack.c.l.s8.bf16 %v2587_v12  ;;  %v2597_v35 = vld [vmem:[#allocation11 + $0x7b8] sm:$0xff] }
 0x635   :  { %12015 = vst [vmem:[#allocation50_spill] sm:$0xff] %v10483_v34  ;;  %v10491_v51 = vadd.f32 %v3870_v13, %v3856_v3  ;;  %v3987_v1 = vmul.f32 %v10483_v34, %v10483_v34  ;;  %v3069_v13 = vunpack.c.h.s8.bf16 %v2581_v59 }
 0x636   :  { %v10493_v49 = vadd.f32 %v3874_v38, %v3857_v41  ;;  %3604 = vmatpush1.bf16.msra.mxu1 %v3042_v50  ;;  %v3988_v45 = vmul.f32 %v10487_v37, %v10487_v37  ;;  %v2586_v50 = vld [vmem:[#allocation11 + $0x760] sm:$0xff]  ;;  %v2588_v41 = vld [vmem:[#allocation11 + $0x770] sm:$0xff] }
 0x637   :  { %12016 = vst [vmem:[#allocation49_spill] sm:$0xff] %v10491_v51  ;;  %v3923_v60 = vadd.f32 %v10491_v51, %v10483_v34  ;;  %v3995_v17 = vmul.f32 %v10491_v51, %v10491_v51  ;;  %3776 = vmatpush1.bf16.msra.mxu0 %v3044_v32  ;;  %3605 = vmatprep.subr.bf16.mxu1 %v3051_v18  ;;  %v3077_v32 = vunpack.c.l.s8.bf16 %v2589_v16 }
 0x638   :  { %v3930_v25 = vadd.f32 %v10493_v49, %v10487_v37  ;;  %v3996_v46 = vmul.f32 %v10493_v49, %v10493_v49  ;;  %3777 = vmatprep.subr.bf16.mxu0 %v3053_v19 }
 0x639   :  { %v3924_v36 = vrot.slane %v3923_v60, 4  ;;  %v4003_v54 = vadd.f32 %v3995_v17, %v3987_v1  ;;  %v3083_v17 = vunpack.c.h.s8.bf16 %v2587_v12 }
 0x63a   :  { %v3931_v61 = vrot.slane %v3930_v25, 4  ;;  %v4010_v0 = vadd.f32 %v3996_v46, %v3988_v45  ;;  %3606 = vmatpush1.bf16.msra.mxu1 %v3050_v21  ;;  %v3074_v21 = vunpack.c.l.s8.bf16 %v2586_v50  ;;  %v3085_v45 = vunpack.c.h.s8.bf16 %v2589_v16 }
 0x63b   :  { %v3925_v39 = vadd.f32 %v3924_v36, %v3923_v60  ;;  %v4004_v33 = vrot.slane %v4003_v54, 4  ;;  %3778 = vmatpush1.bf16.msra.mxu0 %v3052_v20  ;;  %3607 = vmatprep.subr.bf16.mxu1 %v3059_v2  ;;  %v3076_v60 = vunpack.c.l.s8.bf16 %v2588_v41 }
 0x63c   :  { %v3932_v11 = vadd.f32 %v3931_v61, %v3930_v25  ;;  %v4011_v5 = vrot.slane %v4010_v0, 4  ;;  %3779 = vmatprep.subr.bf16.mxu0 %v3061_v43  ;;  %v2595_v25 = vld [vmem:[#allocation11 + $0x7a8] sm:$0xff]  ;;  %v3082_v61 = vunpack.c.h.s8.bf16 %v2586_v50 }
 0x63d   :  { %v3926_v22 = vrot.slane %v3925_v39, 2  ;;  %v4005_v42 = vadd.f32 %v4004_v33, %v4003_v54  ;;  %v3091_v33 = vunpack.c.l.s8.bf16 %v2595_v25 }
 0x63e   :  { %v3933_v38 = vrot.slane %v3932_v11, 2  ;;  %v4012_v52 = vadd.f32 %v4011_v5, %v4010_v0  ;;  %3608 = vmatpush1.bf16.msra.mxu1 %v3058_v56  ;;  %v3093_v5 = vunpack.c.l.s8.bf16 %v2597_v35 }
 0x63f   :  { %v3927_v23 = vadd.f32 %v3926_v22, %v3925_v39  ;;  %v4006_v40 = vrot.slane %v4005_v42, 2  ;;  %3780 = vmatpush1.bf16.msra.mxu0 %v3060_v10  ;;  %3609 = vmatprep.subr.bf16.mxu1 %v3067_v9  ;;  %v3084_v39 = vunpack.c.h.s8.bf16 %v2588_v41  ;;  %v2594_v10 = vld [vmem:[#allocation11 + $0x7a0] sm:$0xff] }
 0x640   :  { %v3934_v3 = vadd.f32 %v3933_v38, %v3932_v11  ;;  %v4013_v24 = vrot.slane %v4012_v52, 2  ;;  %3781 = vmatprep.subr.bf16.mxu0 %v3069_v13  ;;  %v2596_v13 = vld [vmem:[#allocation11 + $0x7b0] sm:$0xff]  ;;  %v2602_v41 = vld [vmem:[#allocation11 + $0x7e0] sm:$0xff] }
 0x641   :  { %v3928_v18 = vrot.slane %v3927_v23, 1  ;;  %v4007_v47 = vadd.f32 %v4006_v40, %v4005_v42  ;;  %v3090_v42 = vunpack.c.l.s8.bf16 %v2594_v10  ;;  %v3092_v38 = vunpack.c.l.s8.bf16 %v2596_v13  ;;  %v2603_v40 = vld [vmem:[#allocation11 + $0x7e8] sm:$0xff] }
 0x642   :  { %v3935_v19 = vrot.slane %v3934_v3, 1  ;;  %v4014_v59 = vadd.f32 %v4013_v24, %v4012_v52  ;;  %3610 = vmatpush1.bf16.msra.mxu1 %v3066_v63  ;;  %v3099_v52 = vunpack.c.h.s8.bf16 %v2595_v25  ;;  %v3100_v24 = vunpack.c.h.s8.bf16 %v2596_v13 }
 0x643   :  { %v3929_v20 = vadd.f32 %v3928_v18, %v3927_v23  ;;  %v4008_v1 = vrot.slane %v4007_v47, 1  ;;  %3782 = vmatpush1.bf16.msra.mxu0 %v3068_v14  ;;  %3611 = vmatprep.subr.bf16.mxu1 %v3075_v57  ;;  %v3101_v23 = vunpack.c.h.s8.bf16 %v2597_v35  ;;  %v2605_v57 = vld [vmem:[#allocation11 + $0x7f8] sm:$0xff] }
 0x644   :  { %v3936_v2 = vadd.f32 %v3935_v19, %v3934_v3  ;;  %v4015_v15 = vrot.slane %v4014_v59, 1  ;;  %3783 = vmatprep.subr.bf16.mxu0 %v3077_v32  ;;  %v3098_v3 = vunpack.c.h.s8.bf16 %v2594_v10  ;;  %v3107_v32 = vunpack.c.l.s8.bf16 %v2603_v40  ;;  %v4776_v19 = vld [vmem:[%s11924_s13] sm:$0xff]  ;;  %v4777_v10 = vld [vmem:[%s11924_s13 + $0x8] sm:$0xff] }
 0x645   :  { %v10507_v46 = vmul.f32 0.0625, %v3929_v20  ;;  %v4009_v43 = vadd.f32 %v4008_v1, %v4007_v47  ;;  %v3109_v18 = vunpack.c.l.s8.bf16 %v2605_v57  ;;  %v2604_v47 = vld [vmem:[#allocation11 + $0x7f0] sm:$0xff]  ;;  %v3115_v1 = vunpack.c.h.s8.bf16 %v2603_v40 }
 0x646   :  { %v10509_v36 = vmul.f32 0.0625, %v3936_v2  ;;  %v4016_v54 = vadd.f32 %v4015_v15, %v4014_v59  ;;  %3612 = vmatpush1.bf16.msra.mxu1 %v3074_v21  ;;  %v4778_v59 = vld [vmem:[%s11924_s13 + $0x10] sm:$0x55]  ;;  %v3106_v21 = vunpack.c.l.s8.bf16 %v2602_v41  ;;  %v3108_v20 = vunpack.c.l.s8.bf16 %v2604_v47 }
 0x647   :  { %v4059_v0 = vmul.f32 0.0625, %v4009_v43  ;;  %v4067_v56 = vmul.f32 %v10507_v46, %v10507_v46  ;;  %3784 = vmatpush1.bf16.msra.mxu0 %v3076_v60  ;;  %3613 = vmatprep.subr.bf16.mxu1 %v3083_v17  ;;  %v3117_v60 = vunpack.c.h.s8.bf16 %v2605_v57  ;;  %v4780_v17 = vunpack.c.l.s8.bf16 %v4776_v19  ;;  %v4375_v57 = vld [vmem:[#allocation16 + $0x8] sm:$0xff] }
 0x648   :  { %v4060_v9 = vmul.f32 0.0625, %v4016_v54  ;;  %v4068_v11 = vmul.f32 %v10509_v36, %v10509_v36  ;;  %3785 = vmatprep.subr.bf16.mxu0 %v3085_v45  ;;  %v4784_v2 = vunpack.c.l.s8.bf16 %v4778_v59  ;;  %v3114_v15 = vunpack.c.h.s8.bf16 %v2602_v41 }
 0x649   :  { %v4075_v12 = vsub.f32 %v4059_v0, %v4067_v56  ;;  %v3116_v45 = vunpack.c.h.s8.bf16 %v2604_v47  ;;  %v4781_v35 = vunpack.c.h.s8.bf16 %v4776_v19  ;;  %v4785_v54 = vunpack.c.h.s8.bf16 %v4778_v59  ;;  %v4376_v19 = vld [vmem:[#allocation16 + $0x10] sm:$0xff] }
 0x64a   :  { %v4076_v22 = vsub.f32 %v4060_v9, %v4068_v11  ;;  %3614 = vmatpush1.bf16.msra.mxu1 %v3082_v61  ;;  %v8622_v25 = vcombine.high %v4780_v17, %v4784_v2  ;;  %v8621_v43 = vcombine.low %v4780_v17, %v4784_v2  ;;  %v4779_v9 = vld [vmem:[%s11924_s13 + $0x18] sm:$0x55]  ;;  %v12017_v11 = vmov 0  }
 0x64b   :  { %v4083_v16 = vmax.f32 %v4075_v12, 0.0  ;;  %3786 = vmatpush1.bf16.msra.mxu0 %v3084_v39  ;;  %3615 = vmatprep.subr.bf16.mxu1 %v3091_v33  ;;  %v8624_v33 = vcombine.high %v4781_v35, %v4785_v54  ;;  %v4782_v13 = vunpack.c.l.s8.bf16 %v4777_v10  ;;  %v4786_v12 = vunpack.c.l.s8.bf16 %v4779_v9 }
 0x64c   :  { %v4084_v63 = vmax.f32 %v4076_v22, 0.0  ;;  %3787 = vmatprep.subr.bf16.mxu0 %v3093_v5  ;;  %v4825_v39 = vsel %vm4823_vm2, %v8621_v43, 0  ;;  %v8623_v5 = vcombine.low %v4781_v35, %v4785_v54  ;;  %v4442_v59 = vunpack.c.l.s8.bf16 %v4376_v19 }
 0x64d   :  { %v4092_v14 = vadd.f32 1e-05, %v4083_v16  ;;  %v12018_v16 = vld [vmem:[#allocation46_spill] sm:$0xff]  ;;  %v3878_v2 = vrot.slane %v10469_v4, %v10222_v26 }
 0x64e   :  { %v4093_v50 = vadd.f32 1e-05, %v4084_v63  ;;  %3616 = vmatpush1.bf16.msra.mxu1 %v3090_v42  ;;  %v4831_v22 = vsel %vm4823_vm2, %v8623_v5, 0  ;;  %v8626_v42 = vcombine.high %v4782_v13, %v4786_v12 }
 0x64f   :  { %8979 = vrsqrt.f32 %v4092_v14  ;;  %3788 = vmatpush1.bf16.msra.mxu0 %v3092_v38  ;;  %3617 = vmatprep.subr.bf16.mxu1 %v3099_v52  ;;  %v4783_v38 = vunpack.c.h.s8.bf16 %v4777_v10  ;;  %v4787_v52 = vunpack.c.h.s8.bf16 %v4779_v9  ;;  %v4444_v9 = vunpack.c.h.s8.bf16 %v4376_v19  ;;  %v4381_v19 = vld [vmem:[#allocation16 + $0x38] sm:$0xff] }
 0x650   :  { %3789 = vmatprep.subr.bf16.mxu0 %v3101_v23  ;;  %8981 = vrsqrt.f32 %v4093_v50  ;;  %v4439_v50 = vunpack.c.l.s8.bf16 %v4375_v57 }
 0x651   :  { %v8628_v23 = vcombine.high %v4783_v38, %v4787_v52  ;;  %v8627_v40 = vcombine.low %v4783_v38, %v4787_v52 }
 0x652   :  { %3618 = vmatpush1.bf16.msra.mxu1 %v3098_v3  ;;  %v4374_v3 = vld [vmem:[#allocation16] sm:$0xff] }
 0x653   :  { %3790 = vmatpush1.bf16.msra.mxu0 %v3100_v24  ;;  %3619 = vmatprep.subr.bf16.mxu1 %v3107_v32  ;;  %v4843_v14 = vsel %vm4823_vm2, %v8627_v40, 0  ;;  %v4438_v24 = vunpack.c.l.s8.bf16 %v4374_v3  ;;  %v4441_v32 = vunpack.c.h.s8.bf16 %v4375_v57  ;;  %v4440_v41 = vunpack.c.h.s8.bf16 %v4374_v3 }
 0x654   :  { %3791 = vmatprep.subr.bf16.mxu0 %v3109_v18  ;;  %v4377_v18 = vld [vmem:[#allocation16 + $0x18] sm:$0xff] }
 0x655   :  { %v4443_v47 = vunpack.c.l.s8.bf16 %v4377_v18 }
 0x656   :  { %3620 = vmatpush1.bf16.msra.mxu1 %v3106_v21  ;;  %v3819_v21 = vrot.slane %v10467_v7, %v10222_v26 }
 0x657   :  { %3792 = vmatpush1.bf16.msra.mxu0 %v3108_v20  ;;  %3621 = vmatprep.subr.bf16.mxu1 %v3115_v1  ;;  %v3823_v20 = vrot.slane %v10467_v7, %v10225_v29 }
 0x658   :  { %3793 = vmatprep.subr.bf16.mxu0 %v3117_v60  ;;  %v3858_v1 = vmul.f32 %v3819_v21, %v10485_v6  ;;  %v3850_v17 = vmul.f32 %v3819_v21, %v10479_v62  ;;  %v4380_v21 = vld [vmem:[#allocation16 + $0x30] sm:$0xff] }
 0x659   :  { %v10521_v61 = vpop.eup %8979  ;;  %v3859_v60 = vmul.f32 %v3823_v20, %v10489_v27 }
 0x65a   :  { %3622 = vmatpush1.bf16.msra.mxu1 %v3114_v15  ;;  %v10523_v0 = vpop.eup %8981  ;;  %v3851_v15 = vmul.f32 %v3823_v20, %v10481_v58  ;;  %v10571_v35 = vadd.f32 %v3878_v2, %v3850_v17 }
 0x65b   :  { %3794 = vmatpush1.bf16.msra.mxu0 %v3116_v45  ;;  %v4116_v56 = vcombine.low %v10521_v61, %v10523_v0  ;;  %4566 = vmatprep.subr.bf16.mxu1 %v4439_v50  ;;  %v3882_v45 = vrot.slane %v10469_v4, %v10225_v29  ;;  %v3886_v61 = vrot.slane %v10469_v4, %v10296_v44 }
 0x65c   :  { %8629 = vmatprep.subr.msk.bf16.mxu0 %vm4823_vm2, %v8622_v25  ;;  %v10567_v25 = vadd.f32 %v3878_v2, %v3858_v1  ;;  %12021 = vst [vmem:[#allocation46_spill] sm:$0xff] %v10571_v35  ;;  %v3835_v0 = vrot.slane %v10467_v7, %v10230_v48 }
 0x65d   :  { %3624 = vmatmul.mubr.bf16.vlgmr.msra.gmra.mrb[20].mxu1 %v10441_v31  ;;  %v10569_v43 = vadd.f32 %v3882_v45, %v3859_v60  ;;  %v10573_v54 = vadd.f32 %v3882_v45, %v3851_v15  ;;  %v4450_v60 = vunpack.c.l.s8.bf16 %v4380_v21  ;;  %v4453_v15 = vunpack.c.h.s8.bf16 %v4381_v19 }
 0x65e   :  { %3796 = vmatmul.mubr.bf16.vlgmr.msra.gmra.mrb[16].mxu0 %v10441_v31  ;;  %v8625_v31 = vcombine.low %v4782_v13, %v4786_v12  ;;  %4567 = vmatpush1.bf16.msra.mxu1 %v4438_v24  ;;  %12019 = vst [vmem:[#allocation48_spill] sm:$0xff] %v10567_v25  ;;  %v3937_v6 = vadd.f32 %v10567_v25, %v10571_v35 }
 0x65f   :  { %4849 = vmatpush1.bf16.msra.mxu0 %v4825_v39  ;;  %4880 = vmatprep.mubr.bf16.mxu0 %v12017_v11  ;;  %12020 = vst [vmem:[#allocation47_spill] sm:$0xff] %v10569_v43  ;;  %12022 = vst [vmem:[#allocation51_spill] sm:$0xff] %v10573_v54  ;;  %v3997_v62 = vmul.f32 %v10567_v25, %v10567_v25  ;;  %v3944_v58 = vadd.f32 %v10569_v43, %v10573_v54 }
 0x660   :  { %8631 = vmatprep.subr.msk.bf16.mxu0 %vm4823_vm2, %v8624_v33  ;;  %v4837_v63 = vsel %vm4823_vm2, %v8625_v31, 0  ;;  %4568 = vmatprep.subr.bf16.mxu1 %v4441_v32  ;;  %v3998_v27 = vmul.f32 %v10569_v43, %v10569_v43  ;;  %v3989_v39 = vmul.f32 %v10571_v35, %v10571_v35  ;;  %v4445_v33 = vunpack.c.h.s8.bf16 %v4377_v18 }
 0x661   :  { %v3990_v10 = vmul.f32 %v10573_v54, %v10573_v54  ;;  %v3945_v13 = vrot.slane %v3944_v58, 4 }
 0x662   :  { %4569 = vmatpush1.bf16.msra.mxu1 %v4440_v41  ;;  %v4017_v5 = vadd.f32 %v3997_v62, %v3989_v39  ;;  %v4452_v62 = vunpack.c.h.s8.bf16 %v4380_v21  ;;  %v4383_v39 = vld [vmem:[#allocation16 + $0x48] sm:$0xff] }
 0x663   :  { %4570 = vmatprep.subr.bf16.mxu1 %v4443_v47  ;;  %v4024_v12 = vadd.f32 %v3998_v27, %v3990_v10  ;;  %v4455_v10 = vunpack.c.l.s8.bf16 %v4383_v39 }
 0x664   :  { %v4018_v52 = vrot.slane %v4017_v5, 4 }
 0x666   :  { %8630 = vmatmul.mubr.msk.bf16.vlgmr.msra.gmra.mrb[20].mxu0 %vm1412_vm1, %v12018_v16  ;;  %4571 = vmatpush1.bf16.msra.mxu1 %v4442_v59  ;;  %v4451_v59 = vunpack.c.l.s8.bf16 %v4381_v19 }
 0x667   :  { %4892 = vmatpush1.bf16.msra.mxu0 %v4831_v22  ;;  %4923 = vmatprep.mubr.bf16.mxu0 %v12017_v11  ;;  %v4379_v22 = vld [vmem:[#allocation16 + $0x28] sm:$0xff] }
 0x668   :  { %8633 = vmatprep.subr.msk.bf16.mxu0 %vm4823_vm2, %v8626_v42  ;;  %4572 = vmatprep.subr.bf16.mxu1 %v4445_v33  ;;  %v4447_v42 = vunpack.c.l.s8.bf16 %v4379_v22  ;;  %v4449_v57 = vunpack.c.h.s8.bf16 %v4379_v22  ;;  %v5589_v33 = vld [vmem:[#allocation22 + $0x8] sm:$0xff] }
 0x66a   :  { %4573 = vmatpush1.bf16.msra.mxu1 %v4444_v9  ;;  %v5845_v9 = vunpack.c.l.s8.bf16 %v5589_v33 }
 0x66b   :  { %4574 = vmatprep.subr.bf16.mxu1 %v4447_v42 }
 0x66e   :  { %8632 = vmatmul.mubr.msk.bf16.vlgmr.msra.gmra.mrb[24].mxu0 %vm1412_vm1, %v12018_v16 }
 0x66f   :  { %4935 = vmatpush1.bf16.msra.mxu0 %v4837_v63  ;;  %4966 = vmatprep.mubr.bf16.mxu0 %v12017_v11  ;;  %v3946_v63 = vadd.f32 %v3945_v13, %v3944_v58 }
 0x670   :  { %8635 = vmatprep.subr.msk.bf16.mxu0 %vm4823_vm2, %v8628_v23  ;;  %v4025_v23 = vrot.slane %v4024_v12, 4 }
 0x671   :  { %v3947_v50 = vrot.slane %v3946_v63, 2 }
 0x672   :  { %v4026_v3 = vadd.f32 %v4025_v23, %v4024_v12 }
 0x673   :  { %v3948_v18 = vadd.f32 %v3947_v50, %v3946_v63 }
 0x674   :  { %v4027_v47 = vrot.slane %v4026_v3, 2 }
 0x675   :  { %v3949_v17 = vrot.slane %v3948_v18, 1 }
 0x676   :  { %8634 = vmatmul.mubr.msk.bf16.vlgmr.msra.gmra.mrb[28].mxu0 %vm1412_vm1, %v12018_v16  ;;  %v4028_v2 = vadd.f32 %v4027_v47, %v4026_v3  ;;  %v4385_v3 = vld [vmem:[#allocation16 + $0x58] sm:$0xff]  ;;  %v5596_v47 = vld [vmem:[#allocation22 + $0x40] sm:$0xff] }
 0x677   :  { %4978 = vmatpush1.bf16.msra.mxu0 %v4843_v14  ;;  %5009 = vmatprep.mubr.bf16.mxu0 %v12017_v11  ;;  %v3938_v11 = vrot.slane %v3937_v6, 4  ;;  %v4019_v14 = vadd.f32 %v4018_v52, %v4017_v5  ;;  %v3950_v58 = vadd.f32 %v3949_v17, %v3948_v18  ;;  %v5588_v5 = vld [vmem:[#allocation22] sm:$0xff]  ;;  %v5853_v52 = vunpack.c.h.s8.bf16 %v5589_v33  ;;  %v4384_v18 = vld [vmem:[#allocation16 + $0x50] sm:$0xff] }
 0x678   :  { %v4029_v27 = vrot.slane %v4028_v2, 1  ;;  %v5844_v42 = vunpack.c.l.s8.bf16 %v5588_v5  ;;  %6356 = vmatprep.subr.bf16.mxu0 %v5845_v9  ;;  %v5860_v21 = vunpack.c.l.s8.bf16 %v5596_v47  ;;  %v5604_v33 = vld [vmem:[#allocation22 + $0x80] sm:$0xff] }
 0x679   :  { %v3939_v38 = vadd.f32 %v3938_v11, %v3937_v6  ;;  %v4020_v32 = vrot.slane %v4019_v14, 2  ;;  %v4382_v11 = vld [vmem:[#allocation16 + $0x40] sm:$0xff] }
 0x67a   :  { %v4454_v22 = vunpack.c.l.s8.bf16 %v4382_v11 }
 0x67b   :  { %v3940_v40 = vrot.slane %v3939_v38, 2  ;;  %v4021_v1 = vadd.f32 %v4020_v32, %v4019_v14  ;;  %v5852_v14 = vunpack.c.h.s8.bf16 %v5588_v5  ;;  %v4459_v32 = vunpack.c.l.s8.bf16 %v4385_v3 }
 0x67d   :  { %v3941_v24 = vadd.f32 %v3940_v40, %v3939_v38  ;;  %v4022_v6 = vrot.slane %v4021_v1, 1  ;;  %v4457_v38 = vunpack.c.h.s8.bf16 %v4383_v39  ;;  %v4456_v40 = vunpack.c.h.s8.bf16 %v4382_v11  ;;  %v4386_v39 = vld [vmem:[#allocation16 + $0x60] sm:$0xff] }
 0x67e   :  { %8636 = vmatmul.mubr.msk.bf16.vlgmr.msra.gmra.mrb[32].mxu0 %vm1412_vm1, %v12018_v16  ;;  %v4378_v16 = vld [vmem:[#allocation16 + $0x20] sm:$0xff]  ;;  %v4462_v9 = vunpack.c.l.s8.bf16 %v4386_v39  ;;  %v5876_v11 = vunpack.c.l.s8.bf16 %v5604_v33 }
 0x67f   :  { %v4446_v31 = vunpack.c.l.s8.bf16 %v4378_v16  ;;  %v4448_v41 = vunpack.c.h.s8.bf16 %v4378_v16  ;;  %v3942_v20 = vrot.slane %v3941_v24, 1  ;;  %v4023_v12 = vadd.f32 %v4022_v6, %v4021_v1  ;;  %6357 = vmatpush1.bf16.msra.mxu0 %v5844_v42  ;;  %v4387_v6 = vld [vmem:[#allocation16 + $0x68] sm:$0xff] }
 0x680   :  { %v10589_v16 = vmul.f32 0.0625, %v3950_v58  ;;  %6358 = vmatprep.subr.bf16.mxu0 %v5853_v52  ;;  %v4461_v1 = vunpack.c.h.s8.bf16 %v4385_v3  ;;  %v4463_v58 = vunpack.c.l.s8.bf16 %v4387_v6  ;;  %v4464_v42 = vunpack.c.h.s8.bf16 %v4386_v39  ;;  %v5613_v52 = vld [vmem:[#allocation22 + $0xc8] sm:$0xff] }
 0x681   :  { %4575 = vmatpush1.bf16.msra.mxu1 %v4446_v31  ;;  %v3943_v45 = vadd.f32 %v3942_v20, %v3941_v24  ;;  %v4030_v31 = vadd.f32 %v4029_v27, %v4028_v2  ;;  %v4061_v63 = vmul.f32 0.0625, %v4023_v12  ;;  %v5597_v24 = vld [vmem:[#allocation22 + $0x48] sm:$0xff]  ;;  %v4460_v2 = vunpack.c.h.s8.bf16 %v4384_v18 }
 0x682   :  { %4576 = vmatprep.subr.bf16.mxu1 %v4449_v57  ;;  %v4070_v50 = vmul.f32 %v10589_v16, %v10589_v16  ;;  %v4465_v12 = vunpack.c.h.s8.bf16 %v4387_v6 }
 0x683   :  { %v10587_v13 = vmul.f32 0.0625, %v3943_v45  ;;  %v4062_v57 = vmul.f32 0.0625, %v4030_v31  ;;  %6359 = vmatpush1.bf16.msra.mxu0 %v5852_v14  ;;  %v5884_v31 = vunpack.c.h.s8.bf16 %v5604_v33  ;;  %v5612_v14 = vld [vmem:[#allocation22 + $0xc0] sm:$0xff]  ;;  %v3827_v33 = vrot.slane %v10467_v7, %v10296_v44 }
 0x685   :  { %4577 = vmatpush1.bf16.msra.mxu1 %v4448_v41  ;;  %v4069_v23 = vmul.f32 %v10587_v13, %v10587_v13  ;;  %v5861_v41 = vunpack.c.l.s8.bf16 %v5597_v24  ;;  %v4078_v20 = vsub.f32 %v4062_v57, %v4070_v50  ;;  %v5892_v50 = vunpack.c.l.s8.bf16 %v5612_v14 }
 0x686   :  { %4578 = vmatprep.subr.bf16.mxu1 %v4451_v59  ;;  %v4458_v59 = vunpack.c.l.s8.bf16 %v4384_v18 }
 0x687   :  { %v4077_v19 = vsub.f32 %v4061_v63, %v4069_v23  ;;  %6360 = vmatprep.subr.bf16.mxu0 %v5861_v41  ;;  %v4086_v45 = vmax.f32 %v4078_v20, 0.0  ;;  %v5893_v23 = vunpack.c.l.s8.bf16 %v5613_v52  ;;  %v5900_v41 = vunpack.c.h.s8.bf16 %v5612_v14 }
 0x688   :  { %6361 = vmatpush1.bf16.msra.mxu0 %v5860_v21 }
 0x689   :  { %4579 = vmatpush1.bf16.msra.mxu1 %v4450_v60  ;;  %v5869_v60 = vunpack.c.h.s8.bf16 %v5597_v24  ;;  %v4085_v17 = vmax.f32 %v4077_v19, 0.0  ;;  %v4095_v5 = vadd.f32 1e-05, %v4086_v45  ;;  %v5901_v24 = vunpack.c.h.s8.bf16 %v5613_v52  ;;  %v5621_v19 = vld [vmem:[#allocation22 + $0x108] sm:$0xff] }
 0x68a   :  { %4580 = vmatprep.subr.bf16.mxu1 %v4453_v15  ;;  %v5868_v15 = vunpack.c.h.s8.bf16 %v5596_v47  ;;  %v10595_v47 = vld [vmem:[#allocation16 + $0x88] sm:$0xff]  ;;  %v5909_v20 = vunpack.c.l.s8.bf16 %v5621_v19  ;;  %v10602_v45 = vrot.slane %v4116_v56, %v10346_v8  ;;  %v3831_v56 = vrot.slane %v10467_v7, %v10299_v53 }
 0x68b   :  { %6362 = vmatprep.subr.bf16.mxu0 %v5869_v60  ;;  %12023 = vst [vmem:[#allocation52_spill] sm:$0xff] %v10595_v47  ;;  %v4471_v21 = vunpack.c.l.s8.bf16 %v10595_v47 }
 0x68c   :  { %6363 = vmatpush1.bf16.msra.mxu0 %v5868_v15 }
 0x68d   :  { %4581 = vmatpush1.bf16.msra.mxu1 %v4452_v62  ;;  %v5605_v62 = vld [vmem:[#allocation22 + $0x88] sm:$0xff] }
 0x68e   :  { %4582 = vmatprep.subr.bf16.mxu1 %v4455_v10  ;;  %v5877_v27 = vunpack.c.l.s8.bf16 %v5605_v62  ;;  %v4094_v10 = vadd.f32 1e-05, %v4085_v17 }
 0x690   :  { %6364 = vmatprep.subr.bf16.mxu0 %v5877_v27  ;;  %8983 = vrsqrt.f32 %v4094_v10  ;;  %v5628_v27 = vld [vmem:[#allocation22 + $0x140] sm:$0xff] }
 0x691   :  { %4583 = vmatpush1.bf16.msra.mxu1 %v4454_v22  ;;  %6365 = vmatpush1.bf16.msra.mxu0 %v5876_v11  ;;  %v5885_v22 = vunpack.c.h.s8.bf16 %v5605_v62  ;;  %8985 = vrsqrt.f32 %v4095_v5  ;;  %v5629_v62 = vld [vmem:[#allocation22 + $0x148] sm:$0xff]  ;;  %v5924_v39 = vunpack.c.l.s8.bf16 %v5628_v27  ;;  %v3894_v5 = vrot.slane %v10469_v4, %v10230_v48 }
 0x692   :  { %4584 = vmatprep.subr.bf16.mxu1 %v4457_v38  ;;  %v4389_v38 = vld [vmem:[#allocation16 + $0x78] sm:$0xff]  ;;  %v10609_v10 = vld [vmem:[#allocation19] ss:$2 sm:$0xff]  ;;  %v10619_v11 = vld [vmem:[#allocation19 + $0x1] ss:$2 sm:$0xff] }
 0x693   :  { %6366 = vmatprep.subr.bf16.mxu0 %v5885_v22  ;;  %v4467_v63 = vunpack.c.l.s8.bf16 %v4389_v38  ;;  %v4469_v3 = vunpack.c.h.s8.bf16 %v4389_v38  ;;  %v3839_v22 = vrot.slane %v10467_v7, %v10235_v55  ;;  %v3898_v38 = vrot.slane %v10469_v4, %v10235_v55 }
 0x694   :  { %v10631_v52 = vrot.slane %v10609_v10, %v10139_v28  ;;  %v10639_v7 = vrot.slane %v10619_v11, %v10139_v28 }
 0x695   :  { %4585 = vmatpush1.bf16.msra.mxu1 %v4456_v40  ;;  %6367 = vmatpush1.bf16.msra.mxu0 %v5884_v31  ;;  %v4388_v40 = vld [vmem:[#allocation16 + $0x70] sm:$0xff] }
 0x696   :  { %4586 = vmatprep.subr.bf16.mxu1 %v4459_v32  ;;  %v4466_v57 = vunpack.c.l.s8.bf16 %v4388_v40  ;;  %6368 = vmatprep.subr.bf16.mxu0 %v5893_v23  ;;  %v4468_v32 = vunpack.c.h.s8.bf16 %v4388_v40  ;;  %v5932_v23 = vunpack.c.h.s8.bf16 %v5628_v27 }
 0x699   :  { %4587 = vmatpush1.bf16.msra.mxu1 %v4458_v59  ;;  %6369 = vmatpush1.bf16.msra.mxu0 %v5892_v50  ;;  %v10643_v50 = vrot.slane %v10619_v11, %v10142_v30 }
 0x69a   :  { %4588 = vmatprep.subr.bf16.mxu1 %v4461_v1  ;;  %6370 = vmatprep.subr.bf16.mxu0 %v5901_v24  ;;  %v8984_v18 = vpop.eup %8983  ;;  %v5620_v1 = vld [vmem:[#allocation22 + $0x100] sm:$0xff] }
 0x69b   :  { %v8986_v59 = vpop.eup %8985  ;;  %v5908_v60 = vunpack.c.l.s8.bf16 %v5620_v1  ;;  %v5916_v15 = vunpack.c.h.s8.bf16 %v5620_v1 }
 0x69c   :  { %v4117_v17 = vcombine.low %v8984_v18, %v8986_v59  ;;  %v10651_v18 = vrot.slane %v10619_v11, %v10222_v26 }
 0x69d   :  { %4589 = vmatpush1.bf16.msra.mxu1 %v4460_v2  ;;  %6371 = vmatpush1.bf16.msra.mxu0 %v5900_v41  ;;  %v5917_v2 = vunpack.c.h.s8.bf16 %v5621_v19  ;;  %v10655_v19 = vrot.slane %v10609_v10, %v10225_v29 }
 0x69e   :  { %4590 = vmatprep.subr.bf16.mxu1 %v4463_v58  ;;  %6372 = vmatprep.subr.bf16.mxu0 %v5909_v20  ;;  %v10605_v6 = vrot.slane %v4117_v17, %v10346_v8  ;;  %v5925_v58 = vunpack.c.l.s8.bf16 %v5629_v62  ;;  %v10661_v17 = vrot.slane %v10619_v11, %v10225_v29 }
 0x6a1   :  { %4591 = vmatpush1.bf16.msra.mxu1 %v4462_v9  ;;  %6373 = vmatpush1.bf16.msra.mxu0 %v5908_v60 }
 0x6a2   :  { %4592 = vmatprep.subr.bf16.mxu1 %v4465_v12  ;;  %6374 = vmatprep.subr.bf16.mxu0 %v5917_v2  ;;  %v3890_v12 = vrot.slane %v10469_v4, %v10299_v53  ;;  %v10647_v4 = vrot.slane %v10609_v10, %v10222_v26 }
 0x6a5   :  { %4593 = vmatpush1.bf16.msra.mxu1 %v4464_v42  ;;  %6375 = vmatpush1.bf16.msra.mxu0 %v5916_v15  ;;  %v5933_v42 = vunpack.c.h.s8.bf16 %v5629_v62 }
 0x6a6   :  { %4594 = vmatprep.subr.bf16.mxu1 %v4467_v63  ;;  %6376 = vmatprep.subr.bf16.mxu0 %v5925_v58  ;;  %v10635_v63 = vrot.slane %v10609_v10, %v10142_v30 }
 0x6a9   :  { %4595 = vmatpush1.bf16.msra.mxu1 %v4466_v57  ;;  %6377 = vmatpush1.bf16.msra.mxu0 %v5924_v39 }
 0x6aa   :  { %4596 = vmatprep.subr.bf16.mxu1 %v4469_v3  ;;  %6378 = vmatprep.subr.bf16.mxu0 %v5933_v42 }
 0x6ad   :  { %4597 = vmatpush1.bf16.msra.mxu1 %v4468_v32  ;;  %6379 = vmatpush1.bf16.msra.mxu0 %v5932_v23 }
 0x6ae   :  { %4609 = vmatprep.subr.bf16.mxu1 %v4471_v21 }
 0x730   :  { %v3625_v31 = vpop.f32.mrb[20].mxu1 }
 0x731   :  { %v3852_v40 = vmul.f32 %v3827_v33, %v3625_v31  ;;  %v3797_v14 = vpop.f32.mrb[16].mxu0  ;;  %v3627_v57 = vpop.f32.mrb[21].mxu1 }
 0x732   :  { %v3854_v3 = vmul.f32 %v3835_v0, %v3797_v14  ;;  %v3853_v24 = vmul.f32 %v3831_v56, %v3627_v57  ;;  %v3799_v32 = vpop.f32.mrb[17].mxu0  ;;  %v3629_v41 = vpop.f32.mrb[22].mxu1 }
 0x733   :  { %v10657_v59 = vadd.f32 %v3886_v61, %v3852_v40  ;;  %v3855_v21 = vmul.f32 %v3839_v22, %v3799_v32  ;;  %v3860_v20 = vmul.f32 %v3827_v33, %v3629_v41  ;;  %v3801_v1 = vpop.f32.mrb[18].mxu0  ;;  %v3631_v60 = vpop.f32.mrb[23].mxu1 }
 0x734   :  { %v10663_v2 = vadd.f32 %v3894_v5, %v3854_v3  ;;  %v10665_v15 = vadd.f32 %v3890_v12, %v3853_v24  ;;  %v3862_v62 = vmul.f32 %v3835_v0, %v3801_v1  ;;  %v3861_v58 = vmul.f32 %v3831_v56, %v3631_v60  ;;  %v3803_v27 = vpop.f32.mrb[19].mxu0 }
 0x735   :  { %12024 = vst [vmem:[#allocation53_spill] sm:$0xff] %v10657_v59  ;;  %v3991_v39 = vmul.f32 %v10657_v59, %v10657_v59  ;;  %v10669_v42 = vadd.f32 %v3898_v38, %v3855_v21  ;;  %v10671_v31 = vadd.f32 %v3886_v61, %v3860_v20  ;;  %v3863_v33 = vmul.f32 %v3839_v22, %v3803_v27 }
 0x736   :  { %12025 = vst [vmem:[#allocation54_spill] sm:$0xff] %v10663_v2  ;;  %12026 = vst [vmem:[#allocation55_spill] sm:$0xff] %v10665_v15  ;;  %v3993_v23 = vmul.f32 %v10663_v2, %v10663_v2  ;;  %v3992_v40 = vmul.f32 %v10665_v15, %v10665_v15  ;;  %v10677_v14 = vadd.f32 %v3894_v5, %v3862_v62 }
 0x737   :  { %12027 = vst [vmem:[#allocation56_spill] sm:$0xff] %v10669_v42  ;;  %12028 = vst [vmem:[#allocation57_spill] sm:$0xff] %v10671_v31  ;;  %v10679_v57 = vadd.f32 %v3890_v12, %v3861_v58  ;;  %v3994_v0 = vmul.f32 %v10669_v42, %v10669_v42  ;;  %v3951_v56 = vadd.f32 %v10671_v31, %v10657_v59 }
 0x738   :  { %12029 = vst [vmem:[#allocation58_spill] sm:$0xff] %v10677_v14  ;;  %v3999_v61 = vmul.f32 %v10671_v31, %v10671_v31  ;;  %v10687_v22 = vadd.f32 %v3898_v38, %v3863_v33  ;;  %v3965_v3 = vadd.f32 %v10677_v14, %v10663_v2  ;;  %v4001_v5 = vmul.f32 %v10677_v14, %v10677_v14 }
 0x739   :  { %12030 = vst [vmem:[#allocation59_spill] sm:$0xff] %v10679_v57  ;;  %v3958_v12 = vadd.f32 %v10679_v57, %v10665_v15  ;;  %v4000_v24 = vmul.f32 %v10679_v57, %v10679_v57  ;;  %v3952_v32 = vrot.slane %v3951_v56, 4  ;;  %v10701_v20 = vpop.f32.mrb[20].mxu0 }
 0x73a   :  { %12031 = vst [vmem:[#allocation60_spill] sm:$0xff] %v10687_v22  ;;  %v4031_v41 = vadd.f32 %v3999_v61, %v3991_v39  ;;  %v3972_v21 = vadd.f32 %v10687_v22, %v10669_v42  ;;  %v4002_v38 = vmul.f32 %v10687_v22, %v10687_v22  ;;  %v3966_v1 = vrot.slane %v3965_v3, 4  ;;  %v10703_v27 = vpop.f32.mrb[21].mxu0 }
 0x73b   :  { %v4045_v60 = vadd.f32 %v4001_v5, %v3993_v23  ;;  %v3959_v62 = vrot.slane %v3958_v12, 4  ;;  %v4038_v58 = vadd.f32 %v4000_v24, %v3992_v40  ;;  %v3953_v33 = vadd.f32 %v3952_v32, %v3951_v56  ;;  %v10705_v31 = vpop.f32.mrb[22].mxu0 }
 0x73c   :  { %v4032_v9 = vrot.slane %v4031_v41, 4  ;;  %v3973_v14 = vrot.slane %v3972_v21, 4  ;;  %v4052_v2 = vadd.f32 %v4002_v38, %v3994_v0  ;;  %v3967_v39 = vadd.f32 %v3966_v1, %v3965_v3  ;;  %v10707_v57 = vpop.f32.mrb[23].mxu0 }
 0x73d   :  { %v4046_v61 = vrot.slane %v4045_v60, 4  ;;  %v3960_v42 = vadd.f32 %v3959_v62, %v3958_v12  ;;  %v4039_v59 = vrot.slane %v4038_v58, 4  ;;  %v3954_v22 = vrot.slane %v3953_v33, 2 }
 0x73e   :  { %v4033_v15 = vadd.f32 %v4032_v9, %v4031_v41  ;;  %v3974_v25 = vadd.f32 %v3973_v14, %v3972_v21  ;;  %v4053_v23 = vrot.slane %v4052_v2, 4  ;;  %v3968_v5 = vrot.slane %v3967_v39, 2 }
 0x73f   :  { %v4047_v40 = vadd.f32 %v4046_v61, %v4045_v60  ;;  %v3961_v24 = vrot.slane %v3960_v42, 2  ;;  %v4040_v35 = vadd.f32 %v4039_v59, %v4038_v58  ;;  %v3955_v56 = vadd.f32 %v3954_v22, %v3953_v33 }
 0x740   :  { %v4034_v32 = vrot.slane %v4033_v15, 2  ;;  %v3975_v47 = vrot.slane %v3974_v25, 2  ;;  %v4054_v0 = vadd.f32 %v4053_v23, %v4052_v2  ;;  %v3969_v38 = vadd.f32 %v3968_v5, %v3967_v39 }
 0x741   :  { %v4048_v43 = vrot.slane %v4047_v40, 2  ;;  %v3962_v3 = vadd.f32 %v3961_v24, %v3960_v42  ;;  %v4041_v1 = vrot.slane %v4040_v35, 2  ;;  %v3956_v12 = vrot.slane %v3955_v56, 1  ;;  %v10709_v34 = vpop.f32.mrb[24].mxu0 }
 0x742   :  { %v4035_v62 = vadd.f32 %v4034_v32, %v4033_v15  ;;  %v3976_v54 = vadd.f32 %v3975_v47, %v3974_v25  ;;  %v4055_v51 = vrot.slane %v4054_v0, 2  ;;  %v3970_v9 = vrot.slane %v3969_v38, 1  ;;  %v10711_v60 = vpop.f32.mrb[25].mxu0 }
 0x743   :  { %v4049_v14 = vadd.f32 %v4048_v43, %v4047_v40  ;;  %v3963_v41 = vrot.slane %v3962_v3, 1  ;;  %v4042_v21 = vadd.f32 %v4041_v1, %v4040_v35  ;;  %v3957_v59 = vadd.f32 %v3956_v12, %v3955_v56  ;;  %v10713_v33 = vpop.f32.mrb[26].mxu0 }
 0x744   :  { %v4036_v22 = vrot.slane %v4035_v62, 1  ;;  %v3977_v58 = vrot.slane %v3976_v54, 1  ;;  %v4056_v2 = vadd.f32 %v4055_v51, %v4054_v0  ;;  %v3971_v42 = vadd.f32 %v3970_v9, %v3969_v38  ;;  %v10715_v25 = vpop.f32.mrb[27].mxu0 }
 0x745   :  { %v4050_v39 = vrot.slane %v4049_v14, 1  ;;  %v3964_v61 = vadd.f32 %v3963_v41, %v3962_v3  ;;  %v4043_v15 = vrot.slane %v4042_v21, 1  ;;  %v10717_v47 = vmul.f32 0.0625, %v3957_v59 }
 0x746   :  { %v4037_v23 = vadd.f32 %v4036_v22, %v4035_v62  ;;  %v3978_v43 = vadd.f32 %v3977_v58, %v3976_v54  ;;  %v4057_v5 = vrot.slane %v4056_v2, 1  ;;  %v10719_v35 = vmul.f32 0.0625, %v3971_v42 }
 0x747   :  { %v4051_v40 = vadd.f32 %v4050_v39, %v4049_v14  ;;  %v10721_v24 = vmul.f32 0.0625, %v3964_v61  ;;  %v4044_v56 = vadd.f32 %v4043_v15, %v4042_v21  ;;  %v4071_v32 = vmul.f32 %v10717_v47, %v10717_v47 }
 0x748   :  { %v4063_v51 = vmul.f32 0.0625, %v4037_v23  ;;  %v10725_v0 = vmul.f32 0.0625, %v3978_v43  ;;  %v4058_v38 = vadd.f32 %v4057_v5, %v4056_v2  ;;  %v4073_v1 = vmul.f32 %v10719_v35, %v10719_v35 }
 0x749   :  { %v4065_v3 = vmul.f32 0.0625, %v4051_v40  ;;  %v4064_v12 = vmul.f32 0.0625, %v4044_v56  ;;  %v4072_v54 = vmul.f32 %v10721_v24, %v10721_v24  ;;  %v5062_v41 = vmul.f32 %v10631_v52, %v10701_v20  ;;  %v10735_v21 = vpop.f32.mrb[28].mxu0 }
 0x74a   :  { %v4079_v62 = vsub.f32 %v4063_v51, %v4071_v32  ;;  %v4066_v9 = vmul.f32 0.0625, %v4058_v38  ;;  %v4074_v14 = vmul.f32 %v10725_v0, %v10725_v0  ;;  %v5063_v58 = vmul.f32 %v10635_v63, %v10703_v27  ;;  %v10741_v42 = vpop.f32.mrb[29].mxu0 }
 0x74b   :  { %v4081_v59 = vsub.f32 %v4065_v3, %v4073_v1  ;;  %v4080_v22 = vsub.f32 %v4064_v12, %v4072_v54  ;;  %v5070_v2 = vmul.f32 %v10631_v52, %v10705_v31  ;;  %v10744_v15 = vadd.f32 %v10639_v7, %v5062_v41  ;;  %v10748_v23 = vpop.f32.mrb[30].mxu0 }
 0x74c   :  { %v4087_v39 = vmax.f32 %v4079_v62, 0.0  ;;  %v4082_v61 = vsub.f32 %v4066_v9, %v4074_v14  ;;  %v5071_v20 = vmul.f32 %v10635_v63, %v10707_v57  ;;  %v10751_v40 = vadd.f32 %v10643_v50, %v5063_v58  ;;  %v10756_v52 = vpop.f32.mrb[31].mxu0 }
 0x74d   :  { %12032 = vst [vmem:[#allocation61_spill] sm:$0xff] %v10744_v15  ;;  %v4089_v43 = vmax.f32 %v4081_v59, 0.0  ;;  %v4088_v5 = vmax.f32 %v4080_v22, 0.0  ;;  %v10754_v27 = vadd.f32 %v10639_v7, %v5070_v2  ;;  %v5201_v51 = vmul.f32 %v10744_v15, %v10744_v15 }
 0x74e   :  { %12033 = vst [vmem:[#allocation62_spill] sm:$0xff] %v10751_v40  ;;  %v4096_v31 = vadd.f32 1e-05, %v4087_v39  ;;  %v4090_v56 = vmax.f32 %v4082_v61, 0.0  ;;  %v10761_v32 = vadd.f32 %v10643_v50, %v5071_v20  ;;  %v5202_v38 = vmul.f32 %v10751_v40, %v10751_v40 }
 0x74f   :  { %12034 = vst [vmem:[#allocation63_spill] sm:$0xff] %v10754_v27  ;;  %v4098_v63 = vadd.f32 1e-05, %v4089_v43  ;;  %v4097_v57 = vadd.f32 1e-05, %v4088_v5  ;;  %v5137_v3 = vadd.f32 %v10754_v27, %v10744_v15  ;;  %v5209_v1 = vmul.f32 %v10754_v27, %v10754_v27 }
 0x750   :  { %12035 = vst [vmem:[#allocation64_spill] sm:$0xff] %v10761_v32  ;;  %8987 = vrsqrt.f32 %v4096_v31  ;;  %v4099_v7 = vadd.f32 1e-05, %v4090_v56  ;;  %v5144_v12 = vadd.f32 %v10761_v32, %v10751_v40  ;;  %v5210_v50 = vmul.f32 %v10761_v32, %v10761_v32 }
 0x751   :  { %8989 = vrsqrt.f32 %v4098_v63  ;;  %v5138_v54 = vrot.slane %v5137_v3, 4  ;;  %v5064_v62 = vmul.f32 %v10647_v4, %v10709_v34  ;;  %v5217_v9 = vadd.f32 %v5209_v1, %v5201_v51  ;;  %v10777_v59 = vpop.f32.mrb[32].mxu0 }
 0x752   :  { %8991 = vrsqrt.f32 %v4097_v57  ;;  %v5145_v14 = vrot.slane %v5144_v12, 4  ;;  %v5065_v41 = vmul.f32 %v10655_v19, %v10711_v60  ;;  %v5224_v58 = vadd.f32 %v5210_v50, %v5202_v38  ;;  %v10782_v39 = vpop.f32.mrb[33].mxu0 }
 0x753   :  { %8993 = vrsqrt.f32 %v4099_v7  ;;  %v5139_v22 = vadd.f32 %v5138_v54, %v5137_v3  ;;  %v10780_v2 = vadd.f32 %v10651_v18, %v5064_v62  ;;  %v5218_v61 = vrot.slane %v5217_v9, 4  ;;  %v10789_v5 = vpop.f32.mrb[34].mxu0 }
 0x754   :  { %v5146_v20 = vadd.f32 %v5145_v14, %v5144_v12  ;;  %v10785_v34 = vadd.f32 %v10661_v17, %v5065_v41  ;;  %v5072_v43 = vmul.f32 %v10647_v4, %v10713_v33  ;;  %v12038_v60 = vcombine.low %v10602_v45, %v10605_v6  ;;  %v10799_v57 = vpop.f32.mrb[35].mxu0 }
 0x755   :  { %12036 = vst [vmem:[#allocation65_spill] sm:$0xff] %v10780_v2  ;;  %v5140_v56 = vrot.slane %v5139_v22, 2  ;;  %v5225_v51 = vrot.slane %v5224_v58, 4  ;;  %v5073_v63 = vmul.f32 %v10655_v19, %v10715_v25  ;;  %v5219_v38 = vadd.f32 %v5218_v61, %v5217_v9 }
 0x756   :  { %12037 = vst [vmem:[#allocation66_spill] sm:$0xff] %v10785_v34  ;;  %v10795_v31 = vrot.slane %v12038_v60, %v10346_v8  ;;  %v5147_v3 = vrot.slane %v5146_v20, 2  ;;  %v5203_v4 = vmul.f32 %v10780_v2, %v10780_v2  ;;  %v10804_v33 = vadd.f32 %v10651_v18, %v5072_v43 }
 0x757   :  { %v5141_v7 = vadd.f32 %v5140_v56, %v5139_v22  ;;  %v5226_v1 = vadd.f32 %v5225_v51, %v5224_v58  ;;  %v5204_v45 = vmul.f32 %v10785_v34, %v10785_v34  ;;  %v10809_v6 = vadd.f32 %v10661_v17, %v5073_v63 }
 0x758   :  { %12039 = vst [vmem:[#allocation67_spill] sm:$0xff] %v10804_v33  ;;  %v5220_v12 = vrot.slane %v5219_v38, 2  ;;  %v5148_v19 = vadd.f32 %v5147_v3, %v5146_v20  ;;  %v5151_v25 = vadd.f32 %v10804_v33, %v10780_v2  ;;  %v5211_v54 = vmul.f32 %v10804_v33, %v10804_v33 }
 0x759   :  { %12040 = vst [vmem:[#allocation68_spill] sm:$0xff] %v10809_v6  ;;  %v5142_v50 = vrot.slane %v5141_v7, 1  ;;  %v5227_v62 = vrot.slane %v5226_v1, 2  ;;  %v5158_v18 = vadd.f32 %v10809_v6, %v10785_v34  ;;  %v5212_v9 = vmul.f32 %v10809_v6, %v10809_v6 }
 0x75a   :  { %v8988_v14 = vpop.eup %8987  ;;  %v5221_v41 = vadd.f32 %v5220_v12, %v5219_v38  ;;  %v5149_v17 = vrot.slane %v5148_v19, 1  ;;  %v5152_v22 = vrot.slane %v5151_v25, 4  ;;  %v5231_v58 = vadd.f32 %v5211_v54, %v5203_v4 }
 0x75b   :  { %v8990_v61 = vpop.eup %8989  ;;  %v5143_v20 = vadd.f32 %v5142_v50, %v5141_v7  ;;  %v5228_v43 = vadd.f32 %v5227_v62, %v5226_v1  ;;  %v5159_v60 = vrot.slane %v5158_v18, 4  ;;  %v5238_v56 = vadd.f32 %v5212_v9, %v5204_v45 }
 0x75c   :  { %v8992_v51 = vpop.eup %8991  ;;  %v5222_v63 = vrot.slane %v5221_v41, 1  ;;  %v5150_v3 = vadd.f32 %v5149_v17, %v5148_v19  ;;  %v5153_v33 = vadd.f32 %v5152_v22, %v5151_v25  ;;  %v5232_v2 = vrot.slane %v5231_v58, 4 }
 0x75d   :  { %v8994_v27 = vpop.eup %8993  ;;  %v4118_v34 = vcombine.low %v8988_v14, %v8992_v51  ;;  %v10819_v15 = vmul.f32 0.0625, %v5143_v20  ;;  %v5229_v6 = vrot.slane %v5228_v43, 1  ;;  %v5160_v32 = vadd.f32 %v5159_v60, %v5158_v18  ;;  %v4091_v51 = vld [vmem:[#allocation14] ss:$2 sm:$0xff] }
 0x75e   :  { %v4119_v38 = vcombine.low %v8990_v61, %v8994_v27  ;;  %v5223_v12 = vadd.f32 %v5222_v63, %v5221_v41  ;;  %v10821_v40 = vmul.f32 0.0625, %v5150_v3  ;;  %v5154_v4 = vrot.slane %v5153_v33, 2 }
 0x75f   :  { %v4140_v7 = vrot.slane %v4118_v34, %v10346_v8  ;;  %v5281_v1 = vmul.f32 %v10819_v15, %v10819_v15  ;;  %v5230_v45 = vadd.f32 %v5229_v6, %v5228_v43  ;;  %v5233_v19 = vadd.f32 %v5232_v2, %v5231_v58 }
 0x760   :  { %v4147_v25 = vrot.slane %v4119_v38, %v10346_v8  ;;  %v5273_v54 = vmul.f32 0.0625, %v5223_v12  ;;  %v5282_v50 = vmul.f32 %v10821_v40, %v10821_v40  ;;  %v5155_v62 = vadd.f32 %v5154_v4, %v5153_v33 }
 0x761   :  { %v5274_v18 = vmul.f32 0.0625, %v5230_v45  ;;  %v5234_v27 = vrot.slane %v5233_v19, 2  ;;  %v5161_v9 = vrot.slane %v5160_v32, 2  ;;  %v5239_v14 = vrot.slane %v5238_v56, 4 }
 0x762   :  { %v4149_v41 = vcombine.low %v4140_v7, %v4147_v25  ;;  %v5289_v17 = vsub.f32 %v5273_v54, %v5281_v1  ;;  %v5156_v22 = vrot.slane %v5155_v62, 1  ;;  %v5041_v34 = vrot.slane %v10609_v10, %v10296_v44 }
 0x763   :  { %v5290_v61 = vsub.f32 %v5274_v18, %v5282_v50  ;;  %v5235_v6 = vadd.f32 %v5234_v27, %v5233_v19  ;;  %v5162_v2 = vadd.f32 %v5161_v9, %v5160_v32  ;;  %v5240_v58 = vadd.f32 %v5239_v14, %v5238_v56 }
 0x764   :  { %v4163_v20 = vrot.slane %v4149_v41, %v10346_v8  ;;  %v5297_v43 = vmax.f32 %v5289_v17, 0.0  ;;  %v5157_v60 = vadd.f32 %v5156_v22, %v5155_v62  ;;  %v5100_v33 = vrot.slane %v10619_v11, %v10296_v44 }
 0x765   :  { %v5298_v63 = vmax.f32 %v5290_v61, 0.0  ;;  %v5236_v3 = vrot.slane %v5235_v6, 1  ;;  %v5241_v38 = vrot.slane %v5240_v58, 2  ;;  %v5045_v12 = vrot.slane %v10609_v10, %v10299_v53 }
 0x766   :  { %v4164_v4 = vcombine.low %v10795_v31, %v4163_v20  ;;  %v5306_v7 = vadd.f32 1e-05, %v5297_v43  ;;  %v10837_v1 = vmul.f32 0.0625, %v5157_v60  ;;  %v5066_v32 = vmul.f32 %v5041_v34, %v10735_v21 }
 0x767   :  { %v5307_v56 = vadd.f32 1e-05, %v5298_v63  ;;  %v5237_v45 = vadd.f32 %v5236_v3, %v5235_v6  ;;  %v5163_v19 = vrot.slane %v5162_v2, 1  ;;  %v5242_v25 = vadd.f32 %v5241_v38, %v5240_v58 }
 0x768   :  { %v10840_v54 = vmul.f32 %v4164_v4, %v4091_v51  ;;  %8995 = vrsqrt.f32 %v5306_v7  ;;  %v5104_v50 = vrot.slane %v10619_v11, %v10299_v53  ;;  %v5049_v62 = vrot.slane %v10609_v10, %v10230_v48 }
 0x769   :  { %8997 = vrsqrt.f32 %v5307_v56  ;;  %v5275_v31 = vmul.f32 0.0625, %v5237_v45  ;;  %v5283_v18 = vmul.f32 %v10837_v1, %v10837_v1  ;;  %v5067_v21 = vmul.f32 %v5045_v12, %v10741_v42 }
 0x76a   :  { %v10851_v27 = vrot.slane %v10840_v54, %v10296_v44  ;;  %v10855_v9 = vrot.slane %v10840_v54, %v10299_v53  ;;  %v10859_v14 = vrot.slane %v10840_v54, %v10230_v48  ;;  %v10863_v41 = vrot.slane %v10840_v54, %v10235_v55 }
 0x76b   :  { %v5164_v17 = vadd.f32 %v5163_v19, %v5162_v2  ;;  %v5243_v22 = vrot.slane %v5242_v25, 1  ;;  %v10865_v61 = vadd.f32 %v5100_v33, %v5066_v32  ;;  %v5053_v42 = vrot.slane %v10609_v10, %v10235_v55 }
 0x76c   :  { %12041 = vst [vmem:[#allocation69_spill] sm:$0xff] %v10851_v27  ;;  %12042 = vst [vmem:[#allocation70_spill] sm:$0xff] %v10859_v14  ;;  %v4214_v6 = vmul.f32 %v10851_v27, %v10717_v47  ;;  %v4215_v58 = vmul.f32 %v10855_v9, %v10721_v24  ;;  %v4216_v20 = vmul.f32 %v10859_v14, %v10719_v35 }
 0x76d   :  { %12043 = vst [vmem:[#allocation71_spill] sm:$0xff] %v10863_v41  ;;  %v4217_v43 = vmul.f32 %v10863_v41, %v10725_v0  ;;  %v10877_v60 = vadd.f32 %v5104_v50, %v5067_v21  ;;  %v5074_v2 = vmul.f32 %v5041_v34, %v10748_v23  ;;  %v5108_v51 = vrot.slane %v10619_v11, %v10230_v48 }
 0x76e   :  { %v5112_v10 = vrot.slane %v10619_v11, %v10235_v55  ;;  %v4228_v47 = vcombine.low %v4214_v6, %v4215_v58  ;;  %v5291_v3 = vsub.f32 %v5275_v31, %v5283_v18  ;;  %v5075_v24 = vmul.f32 %v5045_v12, %v10756_v52 }
 0x76f   :  { %v4229_v63 = vcombine.low %v4216_v20, %v4217_v43  ;;  %v10885_v38 = vmul.f32 0.0625, %v5164_v17  ;;  %v5244_v35 = vadd.f32 %v5243_v22, %v5242_v25  ;;  %v5205_v0 = vmul.f32 %v10865_v61, %v10865_v61 }
 0x770   :  { %v10889_v4 = vadd.f32 %v5100_v33, %v5074_v2  ;;  %v10892_v23 = vrot.slane %v4228_v47, %v10346_v8  ;;  %v10897_v11 = vadd.f32 %v5104_v50, %v5075_v24  ;;  %v5068_v7 = vmul.f32 %v5049_v62, %v10777_v59 }
 0x771   :  { %v10895_v34 = vrot.slane %v4229_v63, %v10346_v8  ;;  %v5206_v52 = vmul.f32 %v10877_v60, %v10877_v60  ;;  %v5069_v32 = vmul.f32 %v5053_v42, %v10782_v39  ;;  %v5299_v19 = vmax.f32 %v5291_v3, 0.0 }
 0x772   :  { %v5165_v12 = vadd.f32 %v10889_v4, %v10865_v61  ;;  %v5213_v33 = vmul.f32 %v10889_v4, %v10889_v4  ;;  %v10907_v56 = vpop.eup %8995  ;;  %v5172_v59 = vadd.f32 %v10897_v11, %v10877_v60  ;;  %v5214_v25 = vmul.f32 %v10897_v11, %v10897_v11 }
 0x773   :  { %v10915_v50 = vpop.eup %8997  ;;  %v5276_v31 = vmul.f32 0.0625, %v5244_v35  ;;  %v5284_v18 = vmul.f32 %v10885_v38, %v10885_v38  ;;  %v10921_v58 = vadd.f32 %v5108_v51, %v5068_v7  ;;  %v10923_v2 = vadd.f32 %v5112_v10, %v5069_v32 }
 0x774   :  { %v5166_v21 = vrot.slane %v5165_v12, 4  ;;  %v5245_v39 = vadd.f32 %v5213_v33, %v5205_v0  ;;  %v5173_v22 = vrot.slane %v5172_v59, 4  ;;  %v5252_v6 = vadd.f32 %v5214_v25, %v5206_v52 }
 0x775   :  { %12044 = vst [vmem:[#allocation72_spill] sm:$0xff] %v10921_v58  ;;  %v10925_v47 = vadd.f32 1e-05, %v5299_v19  ;;  %v5076_v24 = vmul.f32 %v5049_v62, %v10789_v5  ;;  %v5292_v35 = vsub.f32 %v5276_v31, %v5284_v18  ;;  %v5077_v33 = vmul.f32 %v5053_v42, %v10799_v57 }
 0x776   :  { %v5167_v20 = vadd.f32 %v5166_v21, %v5165_v12  ;;  %v5246_v43 = vrot.slane %v5245_v39, 4  ;;  %v5174_v63 = vadd.f32 %v5173_v22, %v5172_v59  ;;  %v5253_v3 = vrot.slane %v5252_v6, 4 }
 0x777   :  { %v5207_v7 = vmul.f32 %v10921_v58, %v10921_v58  ;;  %v10931_v52 = vadd.f32 %v5108_v51, %v5076_v24  ;;  %v5208_v19 = vmul.f32 %v10923_v2, %v10923_v2  ;;  %v10935_v59 = vadd.f32 %v5112_v10, %v5077_v33 }
 0x778   :  { %v5168_v45 = vrot.slane %v5167_v20, 2  ;;  %v5247_v0 = vadd.f32 %v5246_v43, %v5245_v39  ;;  %v5175_v17 = vrot.slane %v5174_v63, 2  ;;  %v5254_v14 = vadd.f32 %v5253_v3, %v5252_v6 }
 0x779   :  { %12045 = vst [vmem:[#allocation73_spill] sm:$0xff] %v10931_v52  ;;  %v5179_v25 = vadd.f32 %v10931_v52, %v10921_v58  ;;  %v5215_v57 = vmul.f32 %v10931_v52, %v10931_v52  ;;  %v5186_v51 = vadd.f32 %v10935_v59, %v10923_v2  ;;  %v5300_v27 = vmax.f32 %v5292_v35, 0.0 }
 0x77a   :  { %v5169_v12 = vadd.f32 %v5168_v45, %v5167_v20  ;;  %v5248_v32 = vrot.slane %v5247_v0, 2  ;;  %v5176_v5 = vadd.f32 %v5175_v17, %v5174_v63  ;;  %v5255_v62 = vrot.slane %v5254_v14, 2 }
 0x77b   :  { %v5216_v45 = vmul.f32 %v10935_v59, %v10935_v59  ;;  %v5180_v10 = vrot.slane %v5179_v25, 4  ;;  %v5259_v39 = vadd.f32 %v5215_v57, %v5207_v7  ;;  %v5187_v6 = vrot.slane %v5186_v51, 4 }
 0x77c   :  { %v5170_v42 = vrot.slane %v5169_v12, 1  ;;  %v5249_v31 = vadd.f32 %v5248_v32, %v5247_v0  ;;  %v5177_v18 = vrot.slane %v5176_v5, 1  ;;  %v5256_v21 = vadd.f32 %v5255_v62, %v5254_v14 }
 0x77d   :  { %v5266_v20 = vadd.f32 %v5216_v45, %v5208_v19  ;;  %v5181_v3 = vadd.f32 %v5180_v10, %v5179_v25  ;;  %v5260_v24 = vrot.slane %v5259_v39, 4  ;;  %v5188_v32 = vadd.f32 %v5187_v6, %v5186_v51 }
 0x77e   :  { %v5171_v17 = vadd.f32 %v5170_v42, %v5169_v12  ;;  %v5250_v22 = vrot.slane %v5249_v31, 1  ;;  %v5178_v43 = vadd.f32 %v5177_v18, %v5176_v5  ;;  %v5257_v63 = vrot.slane %v5256_v21, 1 }
 0x77f   :  { %v5267_v41 = vrot.slane %v5266_v20, 4  ;;  %v5182_v14 = vrot.slane %v5181_v3, 2  ;;  %v5261_v12 = vadd.f32 %v5260_v24, %v5259_v39  ;;  %v5189_v19 = vrot.slane %v5188_v32, 2 }
 0x780   :  { %v10945_v33 = vmul.f32 0.0625, %v5171_v17  ;;  %v5251_v0 = vadd.f32 %v5250_v22, %v5249_v31  ;;  %v10947_v52 = vmul.f32 0.0625, %v5178_v43  ;;  %v5258_v58 = vadd.f32 %v5257_v63, %v5256_v21 }
 0x781   :  { %v5183_v57 = vadd.f32 %v5182_v14, %v5181_v3  ;;  %v4173_v42 = vrot.slane %v10840_v54, %v10139_v28  ;;  %v5262_v35 = vrot.slane %v5261_v12, 2  ;;  %v5190_v51 = vadd.f32 %v5189_v19, %v5188_v32 }
 0x782   :  { %v5277_v62 = vmul.f32 0.0625, %v5251_v0  ;;  %v5285_v7 = vmul.f32 %v10945_v33, %v10945_v33  ;;  %v5278_v5 = vmul.f32 0.0625, %v5258_v58  ;;  %v5286_v25 = vmul.f32 %v10947_v52, %v10947_v52 }
 0x783   :  { %v5268_v45 = vadd.f32 %v5267_v41, %v5266_v20  ;;  %v5309_v18 = vadd.f32 1e-05, %v5300_v27  ;;  %v5184_v21 = vrot.slane %v5183_v57, 1  ;;  %v4177_v10 = vrot.slane %v10840_v54, %v10142_v30 }
 0x784   :  { %v5293_v31 = vsub.f32 %v5277_v62, %v5285_v7  ;;  %v10959_v39 = vrot.slane %v10840_v54, %v10222_v26  ;;  %v5294_v58 = vsub.f32 %v5278_v5, %v5286_v25  ;;  %v5263_v17 = vadd.f32 %v5262_v35, %v5261_v12 }
 0x785   :  { %v5191_v22 = vrot.slane %v5190_v51, 1  ;;  %v5269_v6 = vrot.slane %v5268_v45, 2  ;;  %v5185_v63 = vadd.f32 %v5184_v21, %v5183_v57  ;;  %v10963_v3 = vrot.slane %v10840_v54, %v10225_v29 }
 0x786   :  { %v5301_v43 = vmax.f32 %v5293_v31, 0.0  ;;  %v4210_v27 = vmul.f32 %v4173_v42, %v10507_v46  ;;  %8999 = vrsqrt.f32 %v10925_v47  ;;  %v5264_v41 = vrot.slane %v5263_v17, 1  ;;  %v5637_v31 = vld [vmem:[#allocation22 + $0x188] sm:$0xff] }
 0x787   :  { %v5192_v20 = vadd.f32 %v5191_v22, %v5190_v51  ;;  %v5270_v24 = vadd.f32 %v5269_v6, %v5268_v45  ;;  %9001 = vrsqrt.f32 %v5309_v18  ;;  %v10967_v0 = vmul.f32 0.0625, %v5185_v63  ;;  %v12046_v18 = vld [vmem:[#allocation50_spill] sm:$0xff]  ;;  %v12047_v6 = vld [vmem:[#allocation49_spill] sm:$0xff] }
 0x788   :  { %v4211_v32 = vmul.f32 %v4177_v10, %v10509_v36  ;;  %v4212_v14 = vmul.f32 %v10959_v39, %v10587_v13  ;;  %v5302_v62 = vmax.f32 %v5294_v58, 0.0  ;;  %v5265_v7 = vadd.f32 %v5264_v41, %v5263_v17  ;;  %v5636_v58 = vld [vmem:[#allocation22 + $0x180] sm:$0xff] }
 0x789   :  { %v10972_v12 = vmul.f32 0.0625, %v5192_v20  ;;  %v5271_v54 = vrot.slane %v5270_v24, 1  ;;  %v5310_v19 = vadd.f32 1e-05, %v5301_v43  ;;  %v5287_v46 = vmul.f32 %v10967_v0, %v10967_v0 }
 0x78a   :  { %v4213_v47 = vmul.f32 %v10963_v3, %v10589_v16  ;;  %v4226_v5 = vcombine.low %v4210_v27, %v4211_v32  ;;  %v5279_v25 = vmul.f32 0.0625, %v5265_v7  ;;  %v4278_v13 = vmul.f32 %v4177_v10, %v10487_v37 }
 0x78b   :  { %v5272_v57 = vadd.f32 %v5271_v54, %v5270_v24  ;;  %v5288_v36 = vmul.f32 %v10972_v12, %v10972_v12  ;;  %v4286_v45 = vmul.f32 %v4177_v10, %v10493_v49  ;;  %v4277_v21 = vmul.f32 %v4173_v42, %v12046_v18  ;;  %v5645_v24 = vld [vmem:[#allocation22 + $0x1c8] sm:$0xff] }
 0x78c   :  { %v4227_v35 = vcombine.low %v4212_v14, %v4213_v47  ;;  %v4236_v51 = vrot.slane %v4226_v5, %v10346_v8  ;;  %v5311_v17 = vadd.f32 1e-05, %v5302_v62  ;;  %v5295_v22 = vsub.f32 %v5279_v25, %v5287_v46  ;;  %v5644_v25 = vld [vmem:[#allocation22 + $0x1c0] sm:$0xff] }
 0x78d   :  { %v5280_v16 = vmul.f32 0.0625, %v5272_v57  ;;  %v4285_v43 = vmul.f32 %v4173_v42, %v12047_v6  ;;  %v5941_v27 = vunpack.c.l.s8.bf16 %v5637_v31  ;;  %v5940_v37 = vunpack.c.l.s8.bf16 %v5636_v58  ;;  %v12050_v6 = vld [vmem:[#allocation47_spill] sm:$0xff] }
 0x78e   :  { %v4243_v63 = vrot.slane %v4227_v35, %v10346_v8  ;;  %v5303_v41 = vmax.f32 %v5295_v22, 0.0  ;;  %v12048_v32 = vcombine.low %v10892_v23, %v10895_v34  ;;  %9003 = vrsqrt.f32 %v5310_v19  ;;  %v4168_v23 = vld [vmem:[#allocation14 + $0x1] ss:$2 sm:$0xff] }
 0x78f   :  { %v5296_v20 = vsub.f32 %v5280_v16, %v5288_v36  ;;  %6380 = vmatprep.subr.bf16.mxu0 %v5941_v27  ;;  %v5949_v14 = vunpack.c.h.s8.bf16 %v5637_v31  ;;  %9005 = vrsqrt.f32 %v5311_v17  ;;  %v5948_v54 = vunpack.c.h.s8.bf16 %v5636_v58  ;;  %v10993_v35 = vld [vmem:[#allocation22 + $0x208] sm:$0xff] }
 0x790   :  { %v4273_v49 = vrot.slane %v12048_v32, %v10346_v8  ;;  %v4258_v10 = vcombine.low %v4236_v51, %v4243_v63  ;;  %v9000_v62 = vpop.eup %8999  ;;  %v5312_v7 = vadd.f32 1e-05, %v5303_v41  ;;  %6381 = vmatpush1.bf16.msra.mxu0 %v5940_v37  ;;  %v5957_v5 = vunpack.c.l.s8.bf16 %v5645_v24  ;;  %v12049_v22 = vld [vmem:[#allocation51_spill] sm:$0xff] }
 0x791   :  { %v5304_v42 = vmax.f32 %v5296_v20, 0.0  ;;  %v9002_v46 = vpop.eup %9001  ;;  %6382 = vmatprep.subr.bf16.mxu0 %v5949_v14  ;;  %v5956_v19 = vunpack.c.l.s8.bf16 %v5644_v25  ;;  %v5965_v31 = vunpack.c.h.s8.bf16 %v5645_v24  ;;  %v4280_v16 = vmul.f32 %v10963_v3, %v12049_v22  ;;  %v4393_v22 = vld [vmem:[#allocation16 + $0x98] sm:$0xff] }
 0x792   :  { %v4266_v47 = vrot.slane %v4258_v10, %v10346_v8  ;;  %9007 = vrsqrt.f32 %v5312_v7  ;;  %v5331_v51 = vcombine.low %v9000_v62, %v9002_v46  ;;  %v4288_v63 = vmul.f32 %v10963_v3, %v12050_v6  ;;  %v4390_v10 = vld [vmem:[#allocation16 + $0x80] sm:$0xff] }
 0x793   :  { %v5313_v57 = vadd.f32 1e-05, %v5304_v42  ;;  %v5964_v27 = vunpack.c.h.s8.bf16 %v5644_v25  ;;  %v5973_v41 = vunpack.c.l.s8.bf16 %v10993_v35  ;;  %v4470_v3 = vunpack.c.l.s8.bf16 %v4390_v10 }
 0x794   :  { %v4274_v34 = vcombine.low %v4266_v47, %v4273_v49  ;;  %6383 = vmatpush1.bf16.msra.mxu0 %v5948_v54 }
 0x795   :  { %9009 = vrsqrt.f32 %v5313_v57  ;;  %6384 = vmatprep.subr.bf16.mxu0 %v5957_v5 }
 0x796   :  { %v10991_v36 = vsub.f32 %v4168_v23, %v4274_v34  ;;  %v5347_v23 = vrot.slane %v5331_v51, %v10346_v8  ;;  %v12051_v34 = vld [vmem:[#allocation52_spill] sm:$0xff] }
 0x798   :  { %v4301_v18 = vrot.slane %v10991_v36, %v10142_v30  ;;  %v4297_v58 = vrot.slane %v10991_v36, %v10139_v28  ;;  %v4309_v17 = vrot.slane %v10991_v36, %v10225_v29  ;;  %6385 = vmatpush1.bf16.msra.mxu0 %v5956_v19  ;;  %v9004_v20 = vpop.eup %9003  ;;  %v4473_v19 = vunpack.c.h.s8.bf16 %v12051_v34 }
 0x799   :  { %6386 = vmatprep.subr.bf16.mxu0 %v5965_v31  ;;  %v9006_v14 = vpop.eup %9005  ;;  %v12052_v31 = vcombine.low %v10907_v56, %v10915_v50 }
 0x79a   :  { %v4335_v37 = vadd.f32 %v4301_v18, %v4278_v13  ;;  %v4343_v24 = vadd.f32 %v4301_v18, %v4286_v45  ;;  %v4334_v32 = vadd.f32 %v4297_v58, %v4277_v21  ;;  %v4342_v49 = vadd.f32 %v4297_v58, %v4285_v43 }
 0x79b   :  { %v4337_v62 = vadd.f32 %v4309_v17, %v4280_v16  ;;  %v4345_v7 = vadd.f32 %v4309_v17, %v4288_v63  ;;  %v5332_v13 = vcombine.low %v9004_v20, %v9006_v14  ;;  %v5340_v18 = vrot.slane %v12052_v31, %v10346_v8  ;;  %v4395_v14 = vld [vmem:[#allocation16 + $0xa8] sm:$0xff] }
 0x79c   :  { %v4351_v42 = vmax.f32 %v4335_v37, 0.0  ;;  %v4359_v54 = vmax.f32 %v4343_v24, 0.0  ;;  %v4350_v46 = vmax.f32 %v4334_v32, 0.0  ;;  %v4358_v47 = vmax.f32 %v4342_v49, 0.0  ;;  %v9008_v5 = vpop.eup %9007  ;;  %6387 = vmatpush1.bf16.msra.mxu0 %v5964_v27  ;;  %v5305_v24 = vld [vmem:[#allocation20] ss:$2 sm:$0xff] }
 0x79d   :  { %v4353_v57 = vmax.f32 %v4337_v62, 0.0  ;;  %v4361_v25 = vmax.f32 %v4345_v7, 0.0  ;;  %6399 = vmatprep.subr.bf16.mxu0 %v5973_v41  ;;  %v5362_v16 = vcombine.low %v5340_v18, %v5347_v23  ;;  %v5354_v51 = vrot.slane %v5332_v13, %v10346_v8  ;;  %v4392_v41 = vld [vmem:[#allocation16 + $0x90] sm:$0xff]  ;;  %v4394_v62 = vld [vmem:[#allocation16 + $0xa0] sm:$0xff] }
 0x79e   :  { %v4367_v45 = vpack.c.bf16 %v4359_v54, %v4351_v42  ;;  %v4366_v21 = vpack.c.bf16 %v4358_v47, %v4350_v46  ;;  %v4472_v63 = vunpack.c.h.s8.bf16 %v4390_v10  ;;  %v4475_v27 = vunpack.c.l.s8.bf16 %v4393_v22 }
 0x79f   :  { %v9010_v43 = vpop.eup %9009  ;;  %v4369_v17 = vpack.c.bf16 %v4361_v25, %v4353_v57  ;;  %v5370_v56 = vrot.slane %v5362_v16, %v10346_v8  ;;  %v4474_v37 = vunpack.c.l.s8.bf16 %v4392_v41  ;;  %v4477_v32 = vunpack.c.h.s8.bf16 %v4393_v22  ;;  %v12053_v22 = vld [vmem:[#allocation62_spill] sm:$0xff] }
 0x7a0   :  { %v5333_v58 = vcombine.low %v9008_v5, %v9010_v43  ;;  %4598 = vmatprep.mubr.bf16.mxu1 %v4367_v45  ;;  %v4476_v42 = vunpack.c.h.s8.bf16 %v4392_v41  ;;  %v4479_v10 = vunpack.c.l.s8.bf16 %v4395_v14  ;;  %v4478_v54 = vunpack.c.l.s8.bf16 %v4394_v62 }
 0x7a1   :  { %4599 = vmatmul.mubr.bf16.vlgmr.msra.gmra.mrb[24].mxu1 %v4366_v21  ;;  %v4481_v46 = vunpack.c.h.s8.bf16 %v4395_v14 }
 0x7a2   :  { %v5361_v6 = vrot.slane %v5333_v58, %v10346_v8  ;;  %4610 = vmatpush1.bf16.msra.mxu1 %v4470_v3  ;;  %4641 = vmatprep.mubr.bf16.mxu1 %v4369_v17 }
 0x7a3   :  { %4611 = vmatprep.subr.bf16.mxu1 %v4473_v19 }
 0x7a4   :  { %v5363_v20 = vcombine.low %v5354_v51, %v5361_v6  ;;  %v12054_v6 = vld [vmem:[#allocation64_spill] sm:$0xff] }
 0x7a6   :  { %v5377_v50 = vrot.slane %v5363_v20, %v10346_v8  ;;  %4612 = vmatpush1.bf16.msra.mxu1 %v4472_v63  ;;  %v12056_v20 = vld [vmem:[#allocation63_spill] sm:$0xff] }
 0x7a7   :  { %4613 = vmatprep.subr.bf16.mxu1 %v4475_v27 }
 0x7a8   :  { %v5378_v49 = vcombine.low %v5370_v56, %v5377_v50 }
 0x7aa   :  { %v5380_v7 = vmul.f32 %v5378_v49, %v5305_v24  ;;  %4614 = vmatpush1.bf16.msra.mxu1 %v4474_v37  ;;  %v4396_v24 = vld [vmem:[#allocation16 + $0xb0] sm:$0xff] }
 0x7ab   :  { %4615 = vmatprep.subr.bf16.mxu1 %v4477_v32 }
 0x7ac   :  { %v5387_v47 = vrot.slane %v5380_v7, %v10139_v28  ;;  %v5391_v5 = vrot.slane %v5380_v7, %v10142_v30  ;;  %v5395_v3 = vrot.slane %v5380_v7, %v10222_v26  ;;  %v5399_v57 = vrot.slane %v5380_v7, %v10225_v29 }
 0x7ad   :  { %v11021_v25 = vrot.slane %v5380_v7, %v10296_v44  ;;  %v11024_v23 = vrot.slane %v5380_v7, %v10299_v53  ;;  %v11027_v13 = vrot.slane %v5380_v7, %v10230_v48  ;;  %v11030_v45 = vrot.slane %v5380_v7, %v10235_v55 }
 0x7ae   :  { %v5424_v21 = vmul.f32 %v5387_v47, %v10819_v15  ;;  %v5425_v43 = vmul.f32 %v5391_v5, %v10821_v40  ;;  %v5426_v34 = vmul.f32 %v5395_v3, %v10837_v1  ;;  %v5427_v19 = vmul.f32 %v5399_v57, %v10885_v38  ;;  %4616 = vmatpush1.bf16.msra.mxu1 %v4476_v42  ;;  %v4397_v38 = vld [vmem:[#allocation16 + $0xb8] sm:$0xff] }
 0x7af   :  { %v5428_v31 = vmul.f32 %v11021_v25, %v10945_v33  ;;  %v5429_v18 = vmul.f32 %v11024_v23, %v10947_v52  ;;  %v5430_v58 = vmul.f32 %v11027_v13, %v10967_v0  ;;  %v5431_v17 = vmul.f32 %v11030_v45, %v10972_v12  ;;  %4617 = vmatprep.subr.bf16.mxu1 %v4479_v10  ;;  %v12055_v52 = vld [vmem:[#allocation61_spill] sm:$0xff] }
 0x7b0   :  { %v5440_v15 = vcombine.low %v5424_v21, %v5425_v43  ;;  %v5441_v40 = vcombine.low %v5426_v34, %v5427_v19  ;;  %v5506_v1 = vmul.f32 %v11030_v45, %v10935_v59  ;;  %v5492_v16 = vmul.f32 %v5391_v5, %v12053_v22  ;;  %v12059_v22 = vld [vmem:[#allocation65_spill] sm:$0xff] }
 0x7b1   :  { %v5442_v51 = vcombine.low %v5428_v31, %v5429_v18  ;;  %v5443_v33 = vcombine.low %v5430_v58, %v5431_v17  ;;  %v5500_v63 = vmul.f32 %v5391_v5, %v12054_v6  ;;  %v5491_v27 = vmul.f32 %v5387_v47, %v12055_v52  ;;  %v11056_v5 = vld [vmem:[#allocation22 + $0x200] sm:$0xff] }
 0x7b2   :  { %v5450_v0 = vrot.slane %v5440_v15, %v10346_v8  ;;  %v5457_v41 = vrot.slane %v5441_v40, %v10346_v8  ;;  %4618 = vmatpush1.bf16.msra.mxu1 %v4478_v54  ;;  %v4480_v12 = vunpack.c.h.s8.bf16 %v4394_v62  ;;  %v5499_v56 = vmul.f32 %v5387_v47, %v12056_v20  ;;  %v4399_v62 = vld [vmem:[#allocation16 + $0xc8] sm:$0xff]  ;;  %v4398_v54 = vld [vmem:[#allocation16 + $0xc0] sm:$0xff]  ;;  %v12058_v40 = vld [vmem:[#allocation68_spill] sm:$0xff] }
 0x7b3   :  { %v5464_v50 = vrot.slane %v5442_v51, %v10346_v8  ;;  %v5471_v59 = vrot.slane %v5443_v33, %v10346_v8  ;;  %4619 = vmatprep.subr.bf16.mxu1 %v4481_v46  ;;  %v4483_v37 = vunpack.c.l.s8.bf16 %v4397_v38  ;;  %v4482_v7 = vunpack.c.l.s8.bf16 %v4396_v24  ;;  %v5382_v47 = vld [vmem:[#allocation20 + $0x1] ss:$2 sm:$0xff]  ;;  %v12057_v17 = vld [vmem:[#allocation66_spill] sm:$0xff] }
 0x7b4   :  { %v5472_v32 = vcombine.low %v5450_v0, %v5457_v41  ;;  %v4485_v10 = vunpack.c.h.s8.bf16 %v4397_v38  ;;  %v4484_v46 = vunpack.c.h.s8.bf16 %v4396_v24  ;;  %v4487_v43 = vunpack.c.l.s8.bf16 %v4399_v62  ;;  %v12060_v33 = vld [vmem:[#allocation67_spill] sm:$0xff] }
 0x7b5   :  { %v5473_v49 = vcombine.low %v5464_v50, %v5471_v59  ;;  %v4486_v34 = vunpack.c.l.s8.bf16 %v4398_v54  ;;  %v5972_v31 = vunpack.c.l.s8.bf16 %v11056_v5  ;;  %v4489_v18 = vunpack.c.h.s8.bf16 %v4399_v62 }
 0x7b6   :  { %v5480_v14 = vrot.slane %v5472_v32, %v10346_v8  ;;  %4620 = vmatpush1.bf16.msra.mxu1 %v4480_v12  ;;  %v4488_v58 = vunpack.c.h.s8.bf16 %v4398_v54  ;;  %v5494_v15 = vmul.f32 %v5399_v57, %v12057_v17  ;;  %v5502_v38 = vmul.f32 %v5399_v57, %v12058_v40  ;;  %v4401_v54 = vld [vmem:[#allocation16 + $0xd8] sm:$0xff] }
 0x7b7   :  { %v5487_v42 = vrot.slane %v5473_v49, %v10346_v8  ;;  %4621 = vmatprep.subr.bf16.mxu1 %v4483_v37  ;;  %v5493_v51 = vmul.f32 %v5395_v3, %v12059_v22  ;;  %v5501_v6 = vmul.f32 %v5395_v3, %v12060_v33  ;;  %v5496_v3 = vmul.f32 %v11024_v23, %v10877_v60 }
 0x7b8   :  { %v5504_v20 = vmul.f32 %v11024_v23, %v10897_v11  ;;  %v4491_v40 = vunpack.c.l.s8.bf16 %v4401_v54  ;;  %v5980_v33 = vunpack.c.h.s8.bf16 %v11056_v5 }
 0x7b9   :  { %v5488_v21 = vcombine.low %v5480_v14, %v5487_v42 }
 0x7ba   :  { %4622 = vmatpush1.bf16.msra.mxu1 %v4482_v7 }
 0x7bb   :  { %v11058_v19 = vsub.f32 %v5382_v47, %v5488_v21  ;;  %4623 = vmatprep.subr.bf16.mxu1 %v4485_v10 }
 0x7bd   :  { %v11067_v52 = vrot.slane %v11058_v19, %v10235_v55  ;;  %v5515_v0 = vrot.slane %v11058_v19, %v10142_v30  ;;  %v5511_v41 = vrot.slane %v11058_v19, %v10139_v28  ;;  %v5523_v12 = vrot.slane %v11058_v19, %v10225_v29 }
 0x7be   :  { %4624 = vmatpush1.bf16.msra.mxu1 %v4484_v46  ;;  %v5519_v57 = vrot.slane %v11058_v19, %v10222_v26  ;;  %v5531_v50 = vrot.slane %v11058_v19, %v10299_v53 }
 0x7bf   :  { %v11084_v59 = vadd.f32 %v11067_v52, %v5506_v1  ;;  %4625 = vmatprep.subr.bf16.mxu1 %v4487_v43  ;;  %v5549_v37 = vadd.f32 %v5515_v0, %v5492_v16  ;;  %v5557_v24 = vadd.f32 %v5515_v0, %v5500_v63  ;;  %v5548_v32 = vadd.f32 %v5511_v41, %v5491_v27  ;;  %v4400_v16 = vld [vmem:[#allocation16 + $0xd0] sm:$0xff] }
 0x7c0   :  { %v5556_v49 = vadd.f32 %v5511_v41, %v5499_v56  ;;  %v5551_v14 = vadd.f32 %v5523_v12, %v5494_v15  ;;  %v5559_v7 = vadd.f32 %v5523_v12, %v5502_v38  ;;  %v5550_v42 = vadd.f32 %v5519_v57, %v5493_v51  ;;  %v5660_v41 = vld [vmem:[#allocation22 + $0x240] sm:$0xff] }
 0x7c1   :  { %v5565_v10 = vmax.f32 %v5549_v37, 0.0  ;;  %v5573_v62 = vmax.f32 %v5557_v24, 0.0  ;;  %v5564_v60 = vmax.f32 %v5548_v32, 0.0  ;;  %v5558_v47 = vadd.f32 %v5519_v57, %v5501_v6  ;;  %v4403_v12 = vld [vmem:[#allocation16 + $0xe8] sm:$0xff] }
 0x7c2   :  { %4626 = vmatpush1.bf16.msra.mxu1 %v4486_v34  ;;  %v5572_v11 = vmax.f32 %v5556_v49, 0.0  ;;  %v5567_v23 = vmax.f32 %v5551_v14, 0.0  ;;  %v5575_v21 = vmax.f32 %v5559_v7, 0.0  ;;  %v5566_v46 = vmax.f32 %v5550_v42, 0.0  ;;  %v5661_v34 = vld [vmem:[#allocation22 + $0x248] sm:$0xff]  ;;  %v5668_v49 = vld [vmem:[#allocation22 + $0x280] sm:$0xff] }
 0x7c3   :  { %v11086_v1 = vpack.c.bf16 %v5573_v62, %v5565_v10  ;;  %4627 = vmatprep.subr.bf16.mxu1 %v4489_v18  ;;  %v5574_v63 = vmax.f32 %v5558_v47, 0.0  ;;  %v5553_v27 = vadd.f32 %v5531_v50, %v5496_v3  ;;  %v5561_v56 = vadd.f32 %v5531_v50, %v5504_v20  ;;  %v4402_v20 = vld [vmem:[#allocation16 + $0xe0] sm:$0xff]  ;;  %v5669_v50 = vld [vmem:[#allocation22 + $0x288] sm:$0xff]  ;;  %v4405_v14 = vld [vmem:[#allocation16 + $0xf8] sm:$0xff] }
 0x7c4   :  { %v11088_v43 = vpack.c.bf16 %v5572_v11, %v5564_v60  ;;  %v11090_v17 = vpack.c.bf16 %v5575_v21, %v5567_v23  ;;  %v5981_v15 = vunpack.c.h.s8.bf16 %v10993_v35  ;;  %v4490_v18 = vunpack.c.l.s8.bf16 %v4400_v16  ;;  %v11101_v7 = vld [vmem:[#allocation22 + $0x2c8] sm:$0xff] }
 0x7c5   :  { %6388 = vmatprep.mubr.bf16.mxu0 %v11086_v1  ;;  %v11094_v38 = vpack.c.bf16 %v5574_v63, %v5566_v46  ;;  %v5569_v22 = vmax.f32 %v5553_v27, 0.0  ;;  %v5577_v51 = vmax.f32 %v5561_v56, 0.0  ;;  %v4493_v6 = vunpack.c.h.s8.bf16 %v4401_v54  ;;  %v4404_v10 = vld [vmem:[#allocation16 + $0xf0] sm:$0xff] }
 0x7c6   :  { %6389 = vmatmul.mubr.bf16.vlgmr.msra.gmra.mrb[36].mxu0 %v11088_v43  ;;  %4628 = vmatpush1.bf16.msra.mxu1 %v4488_v58  ;;  %v5989_v35 = vunpack.c.l.s8.bf16 %v5661_v34  ;;  %v4492_v57 = vunpack.c.h.s8.bf16 %v4400_v16  ;;  %v5988_v3 = vunpack.c.l.s8.bf16 %v5660_v41  ;;  %v4495_v58 = vunpack.c.l.s8.bf16 %v4403_v12  ;;  %v12061_v16 = vld [vmem:[#allocation46_spill] sm:$0xff]  ;;  %v12062_v27 = vld [vmem:[#allocation48_spill] sm:$0xff] }
 0x7c7   :  { %6400 = vmatpush1.bf16.msra.mxu0 %v5972_v31  ;;  %6431 = vmatprep.mubr.bf16.mxu0 %v11090_v17  ;;  %v11099_v0 = vpack.c.bf16 %v5577_v51, %v5569_v22  ;;  %v5997_v31 = vunpack.c.h.s8.bf16 %v5661_v34  ;;  %v4494_v5 = vunpack.c.l.s8.bf16 %v4402_v20  ;;  %v5996_v37 = vunpack.c.h.s8.bf16 %v5660_v41  ;;  %v12064_v34 = vld [vmem:[#allocation59_spill] sm:$0xff] }
 0x7c8   :  { %6401 = vmatprep.subr.bf16.mxu0 %v5981_v15  ;;  %4629 = vmatprep.subr.bf16.mxu1 %v4491_v40  ;;  %v4497_v24 = vunpack.c.h.s8.bf16 %v4403_v12  ;;  %v6005_v32 = vunpack.c.l.s8.bf16 %v5669_v50  ;;  %v4496_v42 = vunpack.c.h.s8.bf16 %v4402_v20  ;;  %v6004_v62 = vunpack.c.l.s8.bf16 %v5668_v49  ;;  %v12063_v15 = vld [vmem:[#allocation55_spill] sm:$0xff] }
 0x7c9   :  { %v4499_v60 = vunpack.c.l.s8.bf16 %v4405_v14  ;;  %v4305_v54 = vrot.slane %v10991_v36, %v10222_v26  ;;  %v6013_v47 = vunpack.c.h.s8.bf16 %v5669_v50  ;;  %v6012_v11 = vunpack.c.h.s8.bf16 %v5668_v49 }
 0x7ca   :  { %4630 = vmatpush1.bf16.msra.mxu1 %v4490_v18  ;;  %v6021_v23 = vunpack.c.l.s8.bf16 %v11101_v7  ;;  %v4317_v21 = vrot.slane %v10991_v36, %v10299_v53  ;;  %v4498_v46 = vunpack.c.l.s8.bf16 %v4404_v10  ;;  %v4279_v63 = vmul.f32 %v10959_v39, %v12061_v16  ;;  %v12065_v16 = vld [vmem:[#allocation72_spill] sm:$0xff] }
 0x7cb   :  { %6402 = vmatpush1.bf16.msra.mxu0 %v5980_v33  ;;  %4631 = vmatprep.subr.bf16.mxu1 %v4493_v6  ;;  %v4287_v56 = vmul.f32 %v10959_v39, %v12062_v27  ;;  %v4282_v40 = vmul.f32 %v10855_v9, %v12063_v15  ;;  %v4290_v22 = vmul.f32 %v10855_v9, %v12064_v34  ;;  %v5676_v6 = vld [vmem:[#allocation22 + $0x2c0] sm:$0xff]  ;;  %v4501_v39 = vunpack.c.h.s8.bf16 %v4405_v14 }
 0x7cc   :  { %6403 = vmatprep.subr.bf16.mxu0 %v5989_v35  ;;  %v5495_v51 = vmul.f32 %v11021_v25, %v10865_v61  ;;  %v5503_v18 = vmul.f32 %v11021_v25, %v10889_v4  ;;  %v5527_v33 = vrot.slane %v11058_v19, %v10296_v44  ;;  %v4336_v35 = vadd.f32 %v4305_v54, %v4279_v63  ;;  %v4407_v9 = vld [vmem:[#allocation16 + $0x108] sm:$0xff]  ;;  %v12066_v27 = vld [vmem:[#allocation73_spill] sm:$0xff] }
 0x7cd   :  { %v4344_v41 = vadd.f32 %v4305_v54, %v4287_v56  ;;  %v5498_v12 = vmul.f32 %v11030_v45, %v10923_v2  ;;  %v5579_v25 = vmax.f32 %v11084_v59, 0.0  ;;  %v6020_v20 = vunpack.c.l.s8.bf16 %v5676_v6  ;;  %v4406_v45 = vld [vmem:[#allocation16 + $0x100] sm:$0xff]  ;;  %v5685_v59 = vld [vmem:[#allocation22 + $0x308] sm:$0xff] }
 0x7ce   :  { %4632 = vmatpush1.bf16.msra.mxu1 %v4492_v57  ;;  %v4339_v57 = vadd.f32 %v4317_v21, %v4282_v40  ;;  %v5552_v61 = vadd.f32 %v5527_v33, %v5495_v51  ;;  %v4503_v2 = vunpack.c.l.s8.bf16 %v4407_v9  ;;  %v6029_v49 = vunpack.c.h.s8.bf16 %v11101_v7 }
 0x7cf   :  { %6404 = vmatpush1.bf16.msra.mxu0 %v5988_v3  ;;  %4633 = vmatprep.subr.bf16.mxu1 %v4495_v58  ;;  %v4347_v3 = vadd.f32 %v4317_v21, %v4290_v22  ;;  %v5560_v58 = vadd.f32 %v5527_v33, %v5503_v18  ;;  %v5555_v4 = vadd.f32 %v11067_v52, %v5498_v12  ;;  %v4504_v7 = vunpack.c.h.s8.bf16 %v4406_v45  ;;  %v4408_v22 = vld [vmem:[#allocation16 + $0x110] sm:$0xff] }
 0x7d0   :  { %6405 = vmatprep.subr.bf16.mxu0 %v5997_v31  ;;  %v4500_v31 = vunpack.c.h.s8.bf16 %v4404_v10  ;;  %v5568_v50 = vmax.f32 %v5552_v61, 0.0  ;;  %v4355_v14 = vmax.f32 %v4339_v57, 0.0  ;;  %v4502_v10 = vunpack.c.l.s8.bf16 %v4406_v45  ;;  %v4411_v57 = vld [vmem:[#allocation16 + $0x128] sm:$0xff]  ;;  %v4413_v45 = vld [vmem:[#allocation16 + $0x138] sm:$0xff] }
 0x7d1   :  { %v5497_v63 = vmul.f32 %v11027_v13, %v12065_v16  ;;  %v5505_v56 = vmul.f32 %v11027_v13, %v12066_v27  ;;  %v5535_v15 = vrot.slane %v11058_v19, %v10230_v48  ;;  %v6045_v51 = vunpack.c.h.s8.bf16 %v5685_v59 }
 0x7d2   :  { %4634 = vmatpush1.bf16.msra.mxu1 %v4494_v5  ;;  %v5576_v5 = vmax.f32 %v5560_v58, 0.0  ;;  %v4508_v61 = vunpack.c.h.s8.bf16 %v4408_v22 }
 0x7d3   :  { %6406 = vmatpush1.bf16.msra.mxu0 %v5996_v37  ;;  %4635 = vmatprep.subr.bf16.mxu1 %v4497_v24  ;;  %v4352_v37 = vmax.f32 %v4336_v35, 0.0  ;;  %v4360_v24 = vmax.f32 %v4344_v41, 0.0  ;;  %v5554_v18 = vadd.f32 %v5535_v15, %v5497_v63  ;;  %v5562_v33 = vadd.f32 %v5535_v15, %v5505_v56  ;;  %v4414_v63 = vld [vmem:[#allocation16 + $0x140] sm:$0xff]  ;;  %v5717_v56 = vld [vmem:[#allocation22 + $0x408] sm:$0xff] }
 0x7d4   :  { %6407 = vmatprep.subr.bf16.mxu0 %v6005_v32  ;;  %v5571_v32 = vmax.f32 %v5555_v4, 0.0  ;;  %v11127_v52 = vpack.c.bf16 %v5576_v5, %v5568_v50  ;;  %v4511_v4 = vunpack.c.l.s8.bf16 %v4411_v57  ;;  %v4518_v15 = vunpack.c.l.s8.bf16 %v4414_v63 }
 0x7d5   :  { %v4368_v54 = vpack.c.bf16 %v4360_v24, %v4352_v37  ;;  %v5570_v35 = vmax.f32 %v5554_v18, 0.0  ;;  %v5578_v41 = vmax.f32 %v5562_v33, 0.0  ;;  %v4513_v37 = vunpack.c.h.s8.bf16 %v4411_v57  ;;  %v4417_v18 = vld [vmem:[#allocation16 + $0x158] sm:$0xff] }
 0x7d6   :  { %4636 = vmatpush1.bf16.msra.mxu1 %v4496_v42  ;;  %v4363_v42 = vmax.f32 %v4347_v3, 0.0  ;;  %v4520_v33 = vunpack.c.h.s8.bf16 %v4414_v63  ;;  %v12070_v63 = vld [vmem:[#allocation60_spill] sm:$0xff] }
 0x7d7   :  { %6408 = vmatpush1.bf16.msra.mxu0 %v6004_v62  ;;  %4637 = vmatprep.subr.bf16.mxu1 %v4499_v60  ;;  %v11129_v62 = vpack.c.bf16 %v5579_v25, %v5571_v32  ;;  %v6028_v60 = vunpack.c.h.s8.bf16 %v5676_v6  ;;  %v5693_v6 = vld [vmem:[#allocation22 + $0x348] sm:$0xff]  ;;  %v11137_v3 = vpack.c.bf16 %v5578_v41, %v5570_v35  ;;  %v4410_v25 = vld [vmem:[#allocation16 + $0x120] sm:$0xff]  ;;  %v6109_v35 = vunpack.c.h.s8.bf16 %v5717_v56 }
 0x7d8   :  { %6409 = vmatprep.subr.bf16.mxu0 %v6013_v47  ;;  %v4505_v47 = vunpack.c.h.s8.bf16 %v4407_v9  ;;  %v4371_v21 = vpack.c.bf16 %v4363_v42, %v4355_v14  ;;  %v6053_v19 = vunpack.c.l.s8.bf16 %v5693_v6  ;;  %v5692_v9 = vld [vmem:[#allocation22 + $0x340] sm:$0xff]  ;;  %v4510_v50 = vunpack.c.l.s8.bf16 %v4410_v25  ;;  %v4412_v42 = vld [vmem:[#allocation16 + $0x130] sm:$0xff] }
 0x7d9   :  { %v6052_v58 = vunpack.c.l.s8.bf16 %v5692_v9  ;;  %v6060_v5 = vunpack.c.h.s8.bf16 %v5692_v9  ;;  %v4512_v32 = vunpack.c.h.s8.bf16 %v4410_v25  ;;  %v4515_v14 = vunpack.c.l.s8.bf16 %v4413_v45 }
 0x7da   :  { %4638 = vmatpush1.bf16.msra.mxu1 %v4498_v46  ;;  %v4409_v46 = vld [vmem:[#allocation16 + $0x118] sm:$0xff]  ;;  %v4523_v41 = vunpack.c.l.s8.bf16 %v4417_v18  ;;  %v4525_v9 = vunpack.c.h.s8.bf16 %v4417_v18 }
 0x7db   :  { %6410 = vmatpush1.bf16.msra.mxu0 %v6012_v11  ;;  %4639 = vmatprep.subr.bf16.mxu1 %v4501_v39  ;;  %v6037_v11 = vunpack.c.l.s8.bf16 %v5685_v59  ;;  %v4507_v34 = vunpack.c.l.s8.bf16 %v4409_v46  ;;  %v4506_v39 = vunpack.c.l.s8.bf16 %v4408_v22  ;;  %v4509_v13 = vunpack.c.h.s8.bf16 %v4409_v46 }
 0x7dc   :  { %6411 = vmatprep.subr.bf16.mxu0 %v6021_v23  ;;  %v5684_v23 = vld [vmem:[#allocation22 + $0x300] sm:$0xff]  ;;  %v4516_v46 = vunpack.c.h.s8.bf16 %v4412_v42  ;;  %v6101_v22 = vunpack.c.l.s8.bf16 %v5717_v56 }
 0x7dd   :  { %v6036_v40 = vunpack.c.l.s8.bf16 %v5684_v23  ;;  %v6044_v12 = vunpack.c.h.s8.bf16 %v5684_v23  ;;  %v4415_v23 = vld [vmem:[#allocation16 + $0x148] sm:$0xff] }
 0x7de   :  { %4640 = vmatpush1.bf16.msra.mxu1 %v4500_v31  ;;  %v5701_v31 = vld [vmem:[#allocation22 + $0x388] sm:$0xff]  ;;  %v4519_v16 = vunpack.c.l.s8.bf16 %v4415_v23 }
 0x7df   :  { %6412 = vmatpush1.bf16.msra.mxu0 %v6020_v20  ;;  %4652 = vmatprep.subr.bf16.mxu1 %v4503_v2  ;;  %v6061_v20 = vunpack.c.h.s8.bf16 %v5693_v6  ;;  %v6069_v24 = vunpack.c.l.s8.bf16 %v5701_v31  ;;  %v5700_v2 = vld [vmem:[#allocation22 + $0x380] sm:$0xff]  ;;  %v6077_v59 = vunpack.c.h.s8.bf16 %v5701_v31 }
 0x7e0   :  { %6413 = vmatprep.subr.bf16.mxu0 %v6029_v49  ;;  %v6068_v49 = vunpack.c.l.s8.bf16 %v5700_v2  ;;  %v4418_v31 = vld [vmem:[#allocation16 + $0x160] sm:$0xff] }
 0x7e1   :  { %4642 = vmatmul.mubr.bf16.vlgmr.msra.gmra.mrb[24].mxu1 %v4368_v54  ;;  %v6076_v54 = vunpack.c.h.s8.bf16 %v5700_v2 }
 0x7e2   :  { %4653 = vmatpush1.bf16.msra.mxu1 %v4502_v10  ;;  %4684 = vmatprep.mubr.bf16.mxu1 %v4371_v21  ;;  %v5709_v10 = vld [vmem:[#allocation22 + $0x3c8] sm:$0xff]  ;;  %v5708_v21 = vld [vmem:[#allocation22 + $0x3c0] sm:$0xff] }
 0x7e3   :  { %6414 = vmatpush1.bf16.msra.mxu0 %v6028_v60  ;;  %4654 = vmatprep.subr.bf16.mxu1 %v4505_v47  ;;  %v4514_v60 = vunpack.c.l.s8.bf16 %v4412_v42  ;;  %v4517_v47 = vunpack.c.h.s8.bf16 %v4413_v45  ;;  %v6093_v27 = vunpack.c.h.s8.bf16 %v5709_v10 }
 0x7e4   :  { %6415 = vmatprep.subr.bf16.mxu0 %v6037_v11  ;;  %v6085_v11 = vunpack.c.l.s8.bf16 %v5709_v10  ;;  %v4420_v10 = vld [vmem:[#allocation16 + $0x170] sm:$0xff] }
 0x7e6   :  { %4655 = vmatpush1.bf16.msra.mxu1 %v4504_v7  ;;  %v6084_v7 = vunpack.c.l.s8.bf16 %v5708_v21 }
 0x7e7   :  { %6416 = vmatpush1.bf16.msra.mxu0 %v6036_v40  ;;  %4656 = vmatprep.subr.bf16.mxu1 %v4507_v34  ;;  %v6092_v40 = vunpack.c.h.s8.bf16 %v5708_v21  ;;  %v4521_v34 = vunpack.c.h.s8.bf16 %v4415_v23  ;;  %v12067_v21 = vld [vmem:[#allocation53_spill] sm:$0xff] }
 0x7e8   :  { %6417 = vmatprep.subr.bf16.mxu0 %v6045_v51  ;;  %v5716_v51 = vld [vmem:[#allocation22 + $0x400] sm:$0xff] }
 0x7e9   :  { %v6100_v6 = vunpack.c.l.s8.bf16 %v5716_v51  ;;  %v12068_v23 = vld [vmem:[#allocation69_spill] sm:$0xff] }
 0x7ea   :  { %4657 = vmatpush1.bf16.msra.mxu1 %v4506_v39  ;;  %v4416_v39 = vld [vmem:[#allocation16 + $0x150] sm:$0xff] }
 0x7eb   :  { %6418 = vmatpush1.bf16.msra.mxu0 %v6044_v12  ;;  %4658 = vmatprep.subr.bf16.mxu1 %v4509_v13  ;;  %v5725_v12 = vld [vmem:[#allocation22 + $0x448] sm:$0xff]  ;;  %v4522_v13 = vunpack.c.l.s8.bf16 %v4416_v39 }
 0x7ec   :  { %6419 = vmatprep.subr.bf16.mxu0 %v6053_v19  ;;  %v6108_v19 = vunpack.c.h.s8.bf16 %v5716_v51  ;;  %v6117_v57 = vunpack.c.l.s8.bf16 %v5725_v12 }
 0x7ee   :  { %4659 = vmatpush1.bf16.msra.mxu1 %v4508_v61  ;;  %v5724_v61 = vld [vmem:[#allocation22 + $0x440] sm:$0xff] }
 0x7ef   :  { %6420 = vmatpush1.bf16.msra.mxu0 %v6052_v58  ;;  %4660 = vmatprep.subr.bf16.mxu1 %v4511_v4  ;;  %v4419_v58 = vld [vmem:[#allocation16 + $0x168] sm:$0xff]  ;;  %v4524_v4 = vunpack.c.h.s8.bf16 %v4416_v39  ;;  %v6116_v25 = vunpack.c.l.s8.bf16 %v5724_v61 }
 0x7f0   :  { %6421 = vmatprep.subr.bf16.mxu0 %v6061_v20  ;;  %v4527_v20 = vunpack.c.l.s8.bf16 %v4419_v58  ;;  %v4529_v2 = vunpack.c.h.s8.bf16 %v4419_v58  ;;  %v5740_v39 = vld [vmem:[#allocation22 + $0x4c0] sm:$0xff] }
 0x7f1   :  { %v4422_v58 = vld [vmem:[#allocation16 + $0x180] sm:$0xff] }
 0x7f2   :  { %4661 = vmatpush1.bf16.msra.mxu1 %v4510_v50  ;;  %v6125_v50 = vunpack.c.h.s8.bf16 %v5725_v12 }
 0x7f3   :  { %6422 = vmatpush1.bf16.msra.mxu0 %v6060_v5  ;;  %4662 = vmatprep.subr.bf16.mxu1 %v4513_v37  ;;  %v5733_v5 = vld [vmem:[#allocation22 + $0x488] sm:$0xff]  ;;  %v4526_v37 = vunpack.c.l.s8.bf16 %v4418_v31 }
 0x7f4   :  { %6423 = vmatprep.subr.bf16.mxu0 %v6069_v24  ;;  %v6124_v24 = vunpack.c.h.s8.bf16 %v5724_v61  ;;  %v6133_v45 = vunpack.c.l.s8.bf16 %v5733_v5 }
 0x7f6   :  { %4663 = vmatpush1.bf16.msra.mxu1 %v4512_v32  ;;  %v5732_v32 = vld [vmem:[#allocation22 + $0x480] sm:$0xff] }
 0x7f7   :  { %6424 = vmatpush1.bf16.msra.mxu0 %v6068_v49  ;;  %4664 = vmatprep.subr.bf16.mxu1 %v4515_v14  ;;  %v4421_v49 = vld [vmem:[#allocation16 + $0x178] sm:$0xff]  ;;  %v4528_v14 = vunpack.c.h.s8.bf16 %v4418_v31  ;;  %v6132_v42 = vunpack.c.l.s8.bf16 %v5732_v32  ;;  %v5749_v31 = vld [vmem:[#allocation22 + $0x508] sm:$0xff] }
 0x7f8   :  { %6425 = vmatprep.subr.bf16.mxu0 %v6077_v59  ;;  %v4531_v59 = vunpack.c.l.s8.bf16 %v4421_v49  ;;  %v4533_v51 = vunpack.c.h.s8.bf16 %v4421_v49  ;;  %v4425_v49 = vld [vmem:[#allocation16 + $0x198] sm:$0xff] }
 0x7fa   :  { %4665 = vmatpush1.bf16.msra.mxu1 %v4514_v60  ;;  %v4313_v60 = vrot.slane %v10991_v36, %v10296_v44 }
 0x7fb   :  { %6426 = vmatpush1.bf16.msra.mxu0 %v6076_v54  ;;  %4666 = vmatprep.subr.bf16.mxu1 %v4517_v47  ;;  %v6141_v54 = vunpack.c.h.s8.bf16 %v5733_v5  ;;  %v4325_v47 = vrot.slane %v10991_v36, %v10235_v55  ;;  %v6156_v5 = vunpack.c.h.s8.bf16 %v5740_v39 }
 0x7fc   :  { %6427 = vmatprep.subr.bf16.mxu0 %v6085_v11  ;;  %v5741_v11 = vld [vmem:[#allocation22 + $0x4c8] sm:$0xff] }
 0x7fe   :  { %4667 = vmatpush1.bf16.msra.mxu1 %v4516_v46  ;;  %v4281_v46 = vmul.f32 %v12068_v23, %v12067_v21  ;;  %v4541_v21 = vunpack.c.h.s8.bf16 %v4425_v49 }
 0x7ff   :  { %6428 = vmatpush1.bf16.msra.mxu0 %v6084_v7  ;;  %4668 = vmatprep.subr.bf16.mxu1 %v4519_v16  ;;  %v12069_v7 = vld [vmem:[#allocation57_spill] sm:$0xff] }
 0x800   :  { %6429 = vmatprep.subr.bf16.mxu0 %v6093_v27  ;;  %v4289_v16 = vmul.f32 %v12068_v23, %v12069_v7  ;;  %v12071_v27 = vld [vmem:[#allocation71_spill] sm:$0xff]  ;;  %v4338_v18 = vadd.f32 %v4313_v60, %v4281_v46  ;;  %v5756_v46 = vld [vmem:[#allocation22 + $0x540] sm:$0xff] }
 0x801   :  { %v4292_v56 = vmul.f32 %v12071_v27, %v12070_v63  ;;  %v4427_v7 = vld [vmem:[#allocation16 + $0x1a8] sm:$0xff]  ;;  %v6180_v63 = vunpack.c.l.s8.bf16 %v5756_v46 }
 0x802   :  { %4669 = vmatpush1.bf16.msra.mxu1 %v4518_v15  ;;  %v4530_v15 = vunpack.c.l.s8.bf16 %v4420_v10 }
 0x803   :  { %6430 = vmatpush1.bf16.msra.mxu0 %v6092_v40  ;;  %4670 = vmatprep.subr.bf16.mxu1 %v4521_v34  ;;  %v12072_v40 = vld [vmem:[#allocation56_spill] sm:$0xff]  ;;  %v4349_v12 = vadd.f32 %v4325_v47, %v4292_v56  ;;  %v4426_v56 = vld [vmem:[#allocation16 + $0x1a0] sm:$0xff] }
 0x804   :  { %6442 = vmatprep.subr.bf16.mxu0 %v6101_v22  ;;  %v4284_v34 = vmul.f32 %v12071_v27, %v12072_v40  ;;  %v6140_v22 = vunpack.c.h.s8.bf16 %v5732_v32  ;;  %v5748_v32 = vld [vmem:[#allocation22 + $0x500] sm:$0xff]  ;;  %v4543_v27 = vunpack.c.l.s8.bf16 %v4427_v7  ;;  %v5765_v40 = vld [vmem:[#allocation22 + $0x588] sm:$0xff] }
 0x806   :  { %6432 = vmatmul.mubr.bf16.vlgmr.msra.gmra.mrb[36].mxu0 %v11094_v38  ;;  %4671 = vmatpush1.bf16.msra.mxu1 %v4520_v33  ;;  %v4346_v33 = vadd.f32 %v4313_v60, %v4289_v16  ;;  %v6173_v60 = vunpack.c.h.s8.bf16 %v5749_v31 }
 0x807   :  { %6443 = vmatpush1.bf16.msra.mxu0 %v6100_v6  ;;  %6474 = vmatprep.mubr.bf16.mxu0 %v11099_v0  ;;  %v6149_v6 = vunpack.c.l.s8.bf16 %v5741_v11 }
 0x808   :  { %6444 = vmatprep.subr.bf16.mxu0 %v6109_v35  ;;  %4672 = vmatprep.subr.bf16.mxu1 %v4523_v41  ;;  %v4423_v35 = vld [vmem:[#allocation16 + $0x188] sm:$0xff]  ;;  %v4341_v41 = vadd.f32 %v4325_v47, %v4284_v34  ;;  %v4542_v34 = vunpack.c.l.s8.bf16 %v4426_v56 }
 0x809   :  { %v4535_v61 = vunpack.c.l.s8.bf16 %v4423_v35 }
 0x80a   :  { %4673 = vmatpush1.bf16.msra.mxu1 %v4522_v13  ;;  %v4532_v13 = vunpack.c.h.s8.bf16 %v4420_v10  ;;  %v4424_v10 = vld [vmem:[#allocation16 + $0x190] sm:$0xff] }
 0x80b   :  { %6445 = vmatpush1.bf16.msra.mxu0 %v6108_v19  ;;  %4674 = vmatprep.subr.bf16.mxu1 %v4525_v9  ;;  %v6148_v19 = vunpack.c.l.s8.bf16 %v5740_v39  ;;  %v4354_v9 = vmax.f32 %v4338_v18, 0.0  ;;  %v4538_v47 = vunpack.c.l.s8.bf16 %v4424_v10  ;;  %v4540_v16 = vunpack.c.h.s8.bf16 %v4424_v10 }
 0x80c   :  { %6446 = vmatprep.subr.bf16.mxu0 %v6117_v57  ;;  %v4362_v57 = vmax.f32 %v4346_v33, 0.0  ;;  %v6197_v18 = vunpack.c.l.s8.bf16 %v5765_v40  ;;  %v5764_v33 = vld [vmem:[#allocation22 + $0x580] sm:$0xff]  ;;  %v4544_v39 = vunpack.c.h.s8.bf16 %v4426_v56 }
 0x80e   :  { %4675 = vmatpush1.bf16.msra.mxu1 %v4524_v4  ;;  %v6157_v4 = vunpack.c.h.s8.bf16 %v5741_v11  ;;  %v6172_v11 = vunpack.c.h.s8.bf16 %v5748_v32 }
 0x80f   :  { %6447 = vmatpush1.bf16.msra.mxu0 %v6116_v25  ;;  %4676 = vmatprep.subr.bf16.mxu1 %v4527_v20  ;;  %v4357_v25 = vmax.f32 %v4341_v41, 0.0  ;;  %v4365_v20 = vmax.f32 %v4349_v12, 0.0  ;;  %v4428_v12 = vld [vmem:[#allocation16 + $0x1b0] sm:$0xff] }
 0x810   :  { %6448 = vmatprep.subr.bf16.mxu0 %v6125_v50  ;;  %v4534_v50 = vunpack.c.l.s8.bf16 %v4422_v58 }
 0x812   :  { %4677 = vmatpush1.bf16.msra.mxu1 %v4526_v37  ;;  %v4370_v37 = vpack.c.bf16 %v4362_v57, %v4354_v9  ;;  %v4546_v9 = vunpack.c.l.s8.bf16 %v4428_v12  ;;  %v6204_v57 = vunpack.c.h.s8.bf16 %v5764_v33 }
 0x813   :  { %6449 = vmatpush1.bf16.msra.mxu0 %v6124_v24  ;;  %4678 = vmatprep.subr.bf16.mxu1 %v4529_v2  ;;  %v4537_v24 = vunpack.c.h.s8.bf16 %v4423_v35  ;;  %v6165_v2 = vunpack.c.l.s8.bf16 %v5749_v31  ;;  %v6196_v35 = vunpack.c.l.s8.bf16 %v5764_v33 }
 0x814   :  { %6450 = vmatprep.subr.bf16.mxu0 %v6133_v45  ;;  %v4373_v45 = vpack.c.bf16 %v4365_v20, %v4357_v25  ;;  %v4431_v25 = vld [vmem:[#allocation16 + $0x1c8] sm:$0xff]  ;;  %v4548_v20 = vunpack.c.h.s8.bf16 %v4428_v12 }
 0x816   :  { %4679 = vmatpush1.bf16.msra.mxu1 %v4528_v14  ;;  %v4536_v14 = vunpack.c.h.s8.bf16 %v4422_v58 }
 0x817   :  { %6451 = vmatpush1.bf16.msra.mxu0 %v6132_v42  ;;  %4680 = vmatprep.subr.bf16.mxu1 %v4531_v59  ;;  %v6164_v42 = vunpack.c.l.s8.bf16 %v5748_v32  ;;  %v4539_v59 = vunpack.c.l.s8.bf16 %v4425_v49  ;;  %v4553_v32 = vunpack.c.h.s8.bf16 %v4431_v25 }
 0x818   :  { %6452 = vmatprep.subr.bf16.mxu0 %v6141_v54  ;;  %v5757_v54 = vld [vmem:[#allocation22 + $0x548] sm:$0xff] }
 0x819   :  { %v6181_v23 = vunpack.c.l.s8.bf16 %v5757_v54 }
 0x81a   :  { %4681 = vmatpush1.bf16.msra.mxu1 %v4530_v15  ;;  %v6189_v15 = vunpack.c.h.s8.bf16 %v5757_v54 }
 0x81b   :  { %6453 = vmatpush1.bf16.msra.mxu0 %v6140_v22  ;;  %4682 = vmatprep.subr.bf16.mxu1 %v4533_v51  ;;  %v6188_v22 = vunpack.c.h.s8.bf16 %v5756_v46  ;;  %v4545_v51 = vunpack.c.h.s8.bf16 %v4427_v7 }
 0x81c   :  { %6454 = vmatprep.subr.bf16.mxu0 %v6149_v6  ;;  %v4429_v6 = vld [vmem:[#allocation16 + $0x1b8] sm:$0xff] }
 0x81d   :  { %v4547_v41 = vunpack.c.l.s8.bf16 %v4429_v6 }
 0x81e   :  { %4683 = vmatpush1.bf16.msra.mxu1 %v4532_v13  ;;  %v6205_v13 = vunpack.c.h.s8.bf16 %v5765_v40  ;;  %v4434_v40 = vld [vmem:[#allocation16 + $0x1e0] sm:$0xff] }
 0x81f   :  { %6455 = vmatpush1.bf16.msra.mxu0 %v6148_v19  ;;  %4695 = vmatprep.subr.bf16.mxu1 %v4535_v61  ;;  %v5773_v19 = vld [vmem:[#allocation22 + $0x5c8] sm:$0xff]  ;;  %v4549_v61 = vunpack.c.h.s8.bf16 %v4429_v6 }
 0x820   :  { %6456 = vmatprep.subr.bf16.mxu0 %v6157_v4  ;;  %v6213_v58 = vunpack.c.l.s8.bf16 %v5773_v19  ;;  %v5772_v4 = vld [vmem:[#allocation22 + $0x5c0] sm:$0xff] }
 0x821   :  { %4685 = vmatmul.mubr.bf16.vlgmr.msra.gmra.mrb[24].mxu1 %v4370_v37  ;;  %v6212_v31 = vunpack.c.l.s8.bf16 %v5772_v4  ;;  %v6221_v37 = vunpack.c.h.s8.bf16 %v5773_v19  ;;  %v4436_v19 = vld [vmem:[#allocation16 + $0x1f0] sm:$0xff] }
 0x822   :  { %4696 = vmatpush1.bf16.msra.mxu1 %v4534_v50  ;;  %4727 = vmatprep.mubr.bf16.mxu1 %v4373_v45  ;;  %v4551_v50 = vunpack.c.l.s8.bf16 %v4431_v25  ;;  %v6220_v45 = vunpack.c.h.s8.bf16 %v5772_v4  ;;  %v12074_v4 = vld [vmem:[#allocation70_spill] sm:$0xff] }
 0x823   :  { %6457 = vmatpush1.bf16.msra.mxu0 %v6156_v5  ;;  %4697 = vmatprep.subr.bf16.mxu1 %v4537_v24  ;;  %v4430_v5 = vld [vmem:[#allocation16 + $0x1c0] sm:$0xff]  ;;  %v5781_v24 = vld [vmem:[#allocation22 + $0x608] sm:$0xff] }
 0x824   :  { %6458 = vmatprep.subr.bf16.mxu0 %v6165_v2  ;;  %v4550_v2 = vunpack.c.l.s8.bf16 %v4430_v5  ;;  %v6229_v49 = vunpack.c.l.s8.bf16 %v5781_v24  ;;  %v6237_v54 = vunpack.c.h.s8.bf16 %v5781_v24 }
 0x826   :  { %4698 = vmatpush1.bf16.msra.mxu1 %v4536_v14  ;;  %v5780_v14 = vld [vmem:[#allocation22 + $0x600] sm:$0xff] }
 0x827   :  { %6459 = vmatpush1.bf16.msra.mxu0 %v6164_v42  ;;  %4699 = vmatprep.subr.bf16.mxu1 %v4539_v59  ;;  %v4433_v42 = vld [vmem:[#allocation16 + $0x1d8] sm:$0xff]  ;;  %v4552_v59 = vunpack.c.h.s8.bf16 %v4430_v5  ;;  %v6228_v10 = vunpack.c.l.s8.bf16 %v5780_v14 }
 0x828   :  { %6460 = vmatprep.subr.bf16.mxu0 %v6173_v60  ;;  %v4432_v60 = vld [vmem:[#allocation16 + $0x1d0] sm:$0xff]  ;;  %v4557_v46 = vunpack.c.h.s8.bf16 %v4433_v42 }
 0x82a   :  { %4700 = vmatpush1.bf16.msra.mxu1 %v4538_v47  ;;  %v4555_v47 = vunpack.c.l.s8.bf16 %v4433_v42 }
 0x82b   :  { %6461 = vmatpush1.bf16.msra.mxu0 %v6172_v11  ;;  %4701 = vmatprep.subr.bf16.mxu1 %v4541_v21  ;;  %v5789_v11 = vld [vmem:[#allocation22 + $0x648] sm:$0xff]  ;;  %v4554_v21 = vunpack.c.l.s8.bf16 %v4432_v60 }
 0x82c   :  { %6462 = vmatprep.subr.bf16.mxu0 %v6181_v23  ;;  %v6236_v23 = vunpack.c.h.s8.bf16 %v5780_v14  ;;  %v6245_v7 = vunpack.c.l.s8.bf16 %v5789_v11 }
 0x82e   :  { %4702 = vmatpush1.bf16.msra.mxu1 %v4540_v16  ;;  %v5788_v16 = vld [vmem:[#allocation22 + $0x640] sm:$0xff] }
 0x82f   :  { %6463 = vmatpush1.bf16.msra.mxu0 %v6180_v63  ;;  %4703 = vmatprep.subr.bf16.mxu1 %v4543_v27  ;;  %v4435_v63 = vld [vmem:[#allocation16 + $0x1e8] sm:$0xff]  ;;  %v4556_v27 = vunpack.c.h.s8.bf16 %v4432_v60  ;;  %v6244_v56 = vunpack.c.l.s8.bf16 %v5788_v16  ;;  %v5590_v60 = vld [vmem:[#allocation22 + $0x10] sm:$0xff] }
 0x830   :  { %6464 = vmatprep.subr.bf16.mxu0 %v6189_v15  ;;  %v4559_v15 = vunpack.c.l.s8.bf16 %v4435_v63  ;;  %v4561_v33 = vunpack.c.h.s8.bf16 %v4435_v63  ;;  %v5599_v63 = vld [vmem:[#allocation22 + $0x58] sm:$0xff] }
 0x832   :  { %4704 = vmatpush1.bf16.msra.mxu1 %v4542_v34  ;;  %v6253_v34 = vunpack.c.h.s8.bf16 %v5789_v11  ;;  %v5846_v11 = vunpack.c.l.s8.bf16 %v5590_v60 }
 0x833   :  { %6465 = vmatpush1.bf16.msra.mxu0 %v6188_v22  ;;  %4705 = vmatprep.subr.bf16.mxu1 %v4545_v51  ;;  %v5797_v22 = vld [vmem:[#allocation22 + $0x688] sm:$0xff]  ;;  %v4558_v51 = vunpack.c.l.s8.bf16 %v4434_v40 }
 0x834   :  { %6466 = vmatprep.subr.bf16.mxu0 %v6197_v18  ;;  %v6252_v18 = vunpack.c.h.s8.bf16 %v5788_v16  ;;  %v6261_v6 = vunpack.c.l.s8.bf16 %v5797_v22  ;;  %v5812_v16 = vld [vmem:[#allocation22 + $0x700] sm:$0xff] }
 0x836   :  { %4706 = vmatpush1.bf16.msra.mxu1 %v4544_v39  ;;  %v5796_v39 = vld [vmem:[#allocation22 + $0x680] sm:$0xff] }
 0x837   :  { %6467 = vmatpush1.bf16.msra.mxu0 %v6196_v35  ;;  %4707 = vmatprep.subr.bf16.mxu1 %v4547_v41  ;;  %v4437_v35 = vld [vmem:[#allocation16 + $0x1f8] sm:$0xff]  ;;  %v4560_v41 = vunpack.c.h.s8.bf16 %v4434_v40  ;;  %v6260_v12 = vunpack.c.l.s8.bf16 %v5796_v39  ;;  %v6268_v5 = vunpack.c.h.s8.bf16 %v5796_v39  ;;  %v5820_v39 = vld [vmem:[#allocation22 + $0x740] sm:$0xff] }
 0x838   :  { %6468 = vmatprep.subr.bf16.mxu0 %v6205_v13  ;;  %v4563_v13 = vunpack.c.l.s8.bf16 %v4437_v35  ;;  %v5598_v40 = vld [vmem:[#allocation22 + $0x50] sm:$0xff] }
 0x83a   :  { %4708 = vmatpush1.bf16.msra.mxu1 %v4546_v9  ;;  %v4321_v9 = vrot.slane %v10991_v36, %v10230_v48  ;;  %v5804_v36 = vld [vmem:[#allocation22 + $0x6c0] sm:$0xff] }
 0x83b   :  { %6469 = vmatpush1.bf16.msra.mxu0 %v6204_v57  ;;  %4709 = vmatprep.subr.bf16.mxu1 %v4549_v61  ;;  %v6269_v57 = vunpack.c.h.s8.bf16 %v5797_v22  ;;  %v5805_v61 = vld [vmem:[#allocation22 + $0x6c8] sm:$0xff]  ;;  %v6276_v14 = vunpack.c.l.s8.bf16 %v5804_v36 }
 0x83c   :  { %6470 = vmatprep.subr.bf16.mxu0 %v6213_v58  ;;  %v12073_v58 = vld [vmem:[#allocation54_spill] sm:$0xff] }
 0x83d   :  { %v4283_v25 = vmul.f32 %v12074_v4, %v12073_v58  ;;  %v5821_v22 = vld [vmem:[#allocation22 + $0x748] sm:$0xff]  ;;  %v6316_v58 = vunpack.c.h.s8.bf16 %v5820_v39 }
 0x83e   :  { %4710 = vmatpush1.bf16.msra.mxu1 %v4548_v20  ;;  %v12075_v20 = vld [vmem:[#allocation58_spill] sm:$0xff] }
 0x83f   :  { %6471 = vmatpush1.bf16.msra.mxu0 %v6212_v31  ;;  %4711 = vmatprep.subr.bf16.mxu1 %v4551_v50  ;;  %v4291_v31 = vmul.f32 %v12074_v4, %v12075_v20  ;;  %v4562_v50 = vunpack.c.l.s8.bf16 %v4436_v19  ;;  %v4340_v24 = vadd.f32 %v4321_v9, %v4283_v25  ;;  %v5828_v20 = vld [vmem:[#allocation22 + $0x780] sm:$0xff] }
 0x840   :  { %6472 = vmatprep.subr.bf16.mxu0 %v6221_v37  ;;  %v4565_v37 = vunpack.c.h.s8.bf16 %v4437_v35  ;;  %v5607_v35 = vld [vmem:[#allocation22 + $0x98] sm:$0xff] }
 0x841   :  { %v4356_v42 = vmax.f32 %v4340_v24, 0.0  ;;  %v5887_v4 = vunpack.c.h.s8.bf16 %v5607_v35  ;;  %v5614_v24 = vld [vmem:[#allocation22 + $0xd0] sm:$0xff] }
 0x842   :  { %4712 = vmatpush1.bf16.msra.mxu1 %v4550_v2  ;;  %v4348_v2 = vadd.f32 %v4321_v9, %v4291_v31  ;;  %v6317_v9 = vunpack.c.h.s8.bf16 %v5821_v22  ;;  %v5615_v31 = vld [vmem:[#allocation22 + $0xd8] sm:$0xff] }
 0x843   :  { %6473 = vmatpush1.bf16.msra.mxu0 %v6220_v45  ;;  %4713 = vmatprep.subr.bf16.mxu1 %v4553_v32  ;;  %v6277_v45 = vunpack.c.l.s8.bf16 %v5805_v61  ;;  %v5591_v32 = vld [vmem:[#allocation22 + $0x18] sm:$0xff] }
 0x844   :  { %6485 = vmatprep.subr.bf16.mxu0 %v6229_v49  ;;  %v4564_v49 = vunpack.c.h.s8.bf16 %v4436_v19  ;;  %v5606_v19 = vld [vmem:[#allocation22 + $0x90] sm:$0xff] }
 0x846   :  { %6475 = vmatmul.mubr.bf16.vlgmr.msra.gmra.mrb[36].mxu0 %v11127_v52  ;;  %4714 = vmatpush1.bf16.msra.mxu1 %v4552_v59  ;;  %v4364_v59 = vmax.f32 %v4348_v2, 0.0 }
 0x847   :  { %6486 = vmatpush1.bf16.msra.mxu0 %v6228_v10  ;;  %6517 = vmatprep.mubr.bf16.mxu0 %v11129_v62  ;;  %v5847_v10 = vunpack.c.l.s8.bf16 %v5591_v32 }
 0x848   :  { %6487 = vmatprep.subr.bf16.mxu0 %v6237_v54  ;;  %4715 = vmatprep.subr.bf16.mxu1 %v4555_v47  ;;  %v6285_v54 = vunpack.c.h.s8.bf16 %v5805_v61  ;;  %v5813_v47 = vld [vmem:[#allocation22 + $0x708] sm:$0xff]  ;;  %v5878_v61 = vunpack.c.l.s8.bf16 %v5606_v19 }
 0x84a   :  { %4716 = vmatpush1.bf16.msra.mxu1 %v4554_v21  ;;  %v6284_v21 = vunpack.c.h.s8.bf16 %v5804_v36  ;;  %v5894_v36 = vunpack.c.l.s8.bf16 %v5614_v24 }
 0x84b   :  { %6488 = vmatpush1.bf16.msra.mxu0 %v6236_v23  ;;  %4717 = vmatprep.subr.bf16.mxu1 %v4557_v46  ;;  %v4372_v23 = vpack.c.bf16 %v4364_v59, %v4356_v42  ;;  %v5855_v46 = vunpack.c.h.s8.bf16 %v5591_v32  ;;  %v6332_v32 = vunpack.c.h.s8.bf16 %v5828_v20  ;;  %v5836_v42 = vld [vmem:[#allocation22 + $0x7c0] sm:$0xff]  ;;  %v5623_v59 = vld [vmem:[#allocation22 + $0x118] sm:$0xff] }
 0x84c   :  { %6489 = vmatprep.subr.bf16.mxu0 %v6245_v7  ;;  %v6293_v7 = vunpack.c.l.s8.bf16 %v5813_v47 }
 0x84e   :  { %4718 = vmatpush1.bf16.msra.mxu1 %v4556_v27  ;;  %v5854_v27 = vunpack.c.h.s8.bf16 %v5590_v60  ;;  %v6340_v60 = vunpack.c.l.s8.bf16 %v5836_v42 }
 0x84f   :  { %6490 = vmatpush1.bf16.msra.mxu0 %v6244_v56  ;;  %4719 = vmatprep.subr.bf16.mxu1 %v4559_v15  ;;  %v6292_v56 = vunpack.c.l.s8.bf16 %v5812_v16  ;;  %v5863_v15 = vunpack.c.l.s8.bf16 %v5599_v63 }
 0x850   :  { %6491 = vmatprep.subr.bf16.mxu0 %v6253_v34  ;;  %v6301_v34 = vunpack.c.h.s8.bf16 %v5813_v47  ;;  %v5622_v47 = vld [vmem:[#allocation22 + $0x110] sm:$0xff] }
 0x852   :  { %4720 = vmatpush1.bf16.msra.mxu1 %v4558_v51  ;;  %v5862_v51 = vunpack.c.l.s8.bf16 %v5598_v40 }
 0x853   :  { %6492 = vmatpush1.bf16.msra.mxu0 %v6252_v18  ;;  %4721 = vmatprep.subr.bf16.mxu1 %v4561_v33  ;;  %v6300_v18 = vunpack.c.h.s8.bf16 %v5812_v16  ;;  %v5871_v33 = vunpack.c.h.s8.bf16 %v5599_v63  ;;  %v5592_v63 = vld [vmem:[#allocation22 + $0x20] sm:$0xff] }
 0x854   :  { %6493 = vmatprep.subr.bf16.mxu0 %v6261_v6  ;;  %v6309_v6 = vunpack.c.l.s8.bf16 %v5821_v22 }
 0x856   :  { %4722 = vmatpush1.bf16.msra.mxu1 %v4560_v41  ;;  %v5870_v41 = vunpack.c.h.s8.bf16 %v5598_v40  ;;  %v5630_v40 = vld [vmem:[#allocation22 + $0x150] sm:$0xff] }
 0x857   :  { %6494 = vmatpush1.bf16.msra.mxu0 %v6260_v12  ;;  %4723 = vmatprep.subr.bf16.mxu1 %v4563_v13  ;;  %v6308_v12 = vunpack.c.l.s8.bf16 %v5820_v39  ;;  %v5879_v13 = vunpack.c.l.s8.bf16 %v5607_v35  ;;  %v5600_v35 = vld [vmem:[#allocation22 + $0x60] sm:$0xff] }
 0x858   :  { %6495 = vmatprep.subr.bf16.mxu0 %v6269_v57  ;;  %v5829_v57 = vld [vmem:[#allocation22 + $0x788] sm:$0xff] }
 0x859   :  { %v6325_v25 = vunpack.c.l.s8.bf16 %v5829_v57  ;;  %v6333_v2 = vunpack.c.h.s8.bf16 %v5829_v57 }
 0x85a   :  { %4724 = vmatpush1.bf16.msra.mxu1 %v4562_v50  ;;  %v5886_v50 = vunpack.c.h.s8.bf16 %v5606_v19 }
 0x85b   :  { %6496 = vmatpush1.bf16.msra.mxu0 %v6268_v5  ;;  %4725 = vmatprep.subr.bf16.mxu1 %v4565_v37  ;;  %v6324_v5 = vunpack.c.l.s8.bf16 %v5828_v20  ;;  %v5895_v37 = vunpack.c.l.s8.bf16 %v5615_v31 }
 0x85c   :  { %6497 = vmatprep.subr.bf16.mxu0 %v6277_v45  ;;  %v5837_v45 = vld [vmem:[#allocation22 + $0x7c8] sm:$0xff] }
 0x85e   :  { %4726 = vmatpush1.bf16.msra.mxu1 %v4564_v49  ;;  %v5903_v49 = vunpack.c.h.s8.bf16 %v5615_v31  ;;  %v5608_v31 = vld [vmem:[#allocation22 + $0xa0] sm:$0xff] }
 0x85f   :  { %6498 = vmatpush1.bf16.msra.mxu0 %v6276_v14  ;;  %6528 = vmatprep.subr.bf16.mxu1 %v5847_v10  ;;  %v6341_v14 = vunpack.c.l.s8.bf16 %v5837_v45  ;;  %v5902_v10 = vunpack.c.h.s8.bf16 %v5614_v24 }
 0x860   :  { %6499 = vmatprep.subr.bf16.mxu0 %v6285_v54  ;;  %v5911_v54 = vunpack.c.l.s8.bf16 %v5623_v59 }
 0x861   :  { %4728 = vmatmul.mubr.bf16.vlgmr.msra.gmra.mrb[24].mxu1 %v4372_v23  ;;  %v5910_v23 = vunpack.c.l.s8.bf16 %v5622_v47 }
 0x862   :  { %6529 = vmatpush1.bf16.msra.mxu1 %v5846_v11  ;;  %6560 = vmatprep.mubr.bf16.mxu1 %v11086_v1  ;;  %v6349_v11 = vunpack.c.h.s8.bf16 %v5837_v45 }
 0x863   :  { %6500 = vmatpush1.bf16.msra.mxu0 %v6284_v21  ;;  %6530 = vmatprep.subr.bf16.mxu1 %v5855_v46  ;;  %v5593_v21 = vld [vmem:[#allocation22 + $0x28] sm:$0xff]  ;;  %v6348_v46 = vunpack.c.h.s8.bf16 %v5836_v42 }
 0x864   :  { %6501 = vmatprep.subr.bf16.mxu0 %v6293_v7  ;;  %v5919_v7 = vunpack.c.h.s8.bf16 %v5623_v59  ;;  %v5849_v16 = vunpack.c.l.s8.bf16 %v5593_v21  ;;  %v5616_v59 = vld [vmem:[#allocation22 + $0xe0] sm:$0xff] }
 0x866   :  { %6531 = vmatpush1.bf16.msra.mxu1 %v5854_v27  ;;  %v5631_v27 = vld [vmem:[#allocation22 + $0x158] sm:$0xff] }
 0x867   :  { %6502 = vmatpush1.bf16.msra.mxu0 %v6292_v56  ;;  %6532 = vmatprep.subr.bf16.mxu1 %v5863_v15  ;;  %v5918_v56 = vunpack.c.h.s8.bf16 %v5622_v47  ;;  %v5848_v15 = vunpack.c.l.s8.bf16 %v5592_v63  ;;  %v5927_v22 = vunpack.c.l.s8.bf16 %v5631_v27 }
 0x868   :  { %6503 = vmatprep.subr.bf16.mxu0 %v6301_v34  ;;  %v5857_v34 = vunpack.c.h.s8.bf16 %v5593_v21 }
 0x86a   :  { %6533 = vmatpush1.bf16.msra.mxu1 %v5862_v51  ;;  %v5601_v51 = vld [vmem:[#allocation22 + $0x68] sm:$0xff] }
 0x86b   :  { %6504 = vmatpush1.bf16.msra.mxu0 %v6300_v18  ;;  %6534 = vmatprep.subr.bf16.mxu1 %v5871_v33  ;;  %v5926_v18 = vunpack.c.l.s8.bf16 %v5630_v40  ;;  %v5856_v33 = vunpack.c.h.s8.bf16 %v5592_v63  ;;  %v5865_v39 = vunpack.c.l.s8.bf16 %v5601_v51  ;;  %v5873_v57 = vunpack.c.h.s8.bf16 %v5601_v51 }
 0x86c   :  { %6505 = vmatprep.subr.bf16.mxu0 %v6309_v6  ;;  %v5935_v6 = vunpack.c.h.s8.bf16 %v5631_v27  ;;  %v5624_v27 = vld [vmem:[#allocation22 + $0x120] sm:$0xff] }
 0x86e   :  { %6535 = vmatpush1.bf16.msra.mxu1 %v5870_v41  ;;  %v5639_v41 = vld [vmem:[#allocation22 + $0x198] sm:$0xff] }
 0x86f   :  { %6506 = vmatpush1.bf16.msra.mxu0 %v6308_v12  ;;  %6536 = vmatprep.subr.bf16.mxu1 %v5879_v13  ;;  %v5934_v12 = vunpack.c.h.s8.bf16 %v5630_v40  ;;  %v5864_v13 = vunpack.c.l.s8.bf16 %v5600_v35  ;;  %v5943_v19 = vunpack.c.l.s8.bf16 %v5639_v41  ;;  %v5912_v40 = vunpack.c.l.s8.bf16 %v5624_v27 }
 0x870   :  { %6507 = vmatprep.subr.bf16.mxu0 %v6317_v9  ;;  %v5638_v9 = vld [vmem:[#allocation22 + $0x190] sm:$0xff] }
 0x872   :  { %6537 = vmatpush1.bf16.msra.mxu1 %v5878_v61  ;;  %v5609_v61 = vld [vmem:[#allocation22 + $0xa8] sm:$0xff] }
 0x873   :  { %6508 = vmatpush1.bf16.msra.mxu0 %v6316_v58  ;;  %6538 = vmatprep.subr.bf16.mxu1 %v5887_v4  ;;  %v5942_v58 = vunpack.c.l.s8.bf16 %v5638_v9  ;;  %v5872_v4 = vunpack.c.h.s8.bf16 %v5600_v35  ;;  %v5881_v20 = vunpack.c.l.s8.bf16 %v5609_v61  ;;  %v5889_v45 = vunpack.c.h.s8.bf16 %v5609_v61 }
 0x874   :  { %6509 = vmatprep.subr.bf16.mxu0 %v6325_v25  ;;  %v5951_v25 = vunpack.c.h.s8.bf16 %v5639_v41  ;;  %v5632_v41 = vld [vmem:[#allocation22 + $0x160] sm:$0xff] }
 0x876   :  { %6539 = vmatpush1.bf16.msra.mxu1 %v5886_v50  ;;  %v5647_v50 = vld [vmem:[#allocation22 + $0x1d8] sm:$0xff] }
 0x877   :  { %6510 = vmatpush1.bf16.msra.mxu0 %v6324_v5  ;;  %6540 = vmatprep.subr.bf16.mxu1 %v5895_v37  ;;  %v5950_v5 = vunpack.c.h.s8.bf16 %v5638_v9  ;;  %v5880_v37 = vunpack.c.l.s8.bf16 %v5608_v31  ;;  %v5959_v24 = vunpack.c.l.s8.bf16 %v5647_v50 }
 0x878   :  { %6511 = vmatprep.subr.bf16.mxu0 %v6333_v2  ;;  %v5646_v2 = vld [vmem:[#allocation22 + $0x1d0] sm:$0xff] }
 0x87a   :  { %6541 = vmatpush1.bf16.msra.mxu1 %v5894_v36  ;;  %v5617_v36 = vld [vmem:[#allocation22 + $0xe8] sm:$0xff] }
 0x87b   :  { %6512 = vmatpush1.bf16.msra.mxu0 %v6332_v32  ;;  %6542 = vmatprep.subr.bf16.mxu1 %v5903_v49  ;;  %v5958_v32 = vunpack.c.l.s8.bf16 %v5646_v2  ;;  %v5888_v49 = vunpack.c.h.s8.bf16 %v5608_v31  ;;  %v5897_v42 = vunpack.c.l.s8.bf16 %v5617_v36  ;;  %v5905_v21 = vunpack.c.h.s8.bf16 %v5617_v36 }
 0x87c   :  { %6513 = vmatprep.subr.bf16.mxu0 %v6341_v14  ;;  %v5967_v14 = vunpack.c.h.s8.bf16 %v5647_v50  ;;  %v5640_v50 = vld [vmem:[#allocation22 + $0x1a0] sm:$0xff] }
 0x87e   :  { %6543 = vmatpush1.bf16.msra.mxu1 %v5902_v10  ;;  %v5655_v10 = vld [vmem:[#allocation22 + $0x218] sm:$0xff] }
 0x87f   :  { %6514 = vmatpush1.bf16.msra.mxu0 %v6340_v60  ;;  %6544 = vmatprep.subr.bf16.mxu1 %v5911_v54  ;;  %v5966_v60 = vunpack.c.h.s8.bf16 %v5646_v2  ;;  %v5896_v54 = vunpack.c.l.s8.bf16 %v5616_v59  ;;  %v5975_v47 = vunpack.c.l.s8.bf16 %v5655_v10 }
 0x880   :  { %6515 = vmatprep.subr.bf16.mxu0 %v6349_v11  ;;  %v5654_v11 = vld [vmem:[#allocation22 + $0x210] sm:$0xff] }
 0x882   :  { %6545 = vmatpush1.bf16.msra.mxu1 %v5910_v23  ;;  %v5625_v23 = vld [vmem:[#allocation22 + $0x128] sm:$0xff] }
 0x883   :  { %6516 = vmatpush1.bf16.msra.mxu0 %v6348_v46  ;;  %6546 = vmatprep.subr.bf16.mxu1 %v5919_v7  ;;  %v5974_v46 = vunpack.c.l.s8.bf16 %v5654_v11  ;;  %v5904_v7 = vunpack.c.h.s8.bf16 %v5616_v59  ;;  %v5913_v63 = vunpack.c.l.s8.bf16 %v5625_v23  ;;  %v5921_v51 = vunpack.c.h.s8.bf16 %v5625_v23 }
 0x884   :  { %6700 = vmatprep.subr.bf16.mxu0 %v5849_v16  ;;  %v5983_v16 = vunpack.c.h.s8.bf16 %v5655_v10  ;;  %v5648_v10 = vld [vmem:[#allocation22 + $0x1e0] sm:$0xff] }
 0x886   :  { %6518 = vmatmul.mubr.bf16.vlgmr.msra.gmra.mrb[36].mxu0 %v11137_v3  ;;  %6547 = vmatpush1.bf16.msra.mxu1 %v5918_v56  ;;  %v5663_v56 = vld [vmem:[#allocation22 + $0x258] sm:$0xff] }
 0x887   :  { %6701 = vmatpush1.bf16.msra.mxu0 %v5848_v15  ;;  %6732 = vmatprep.mubr.bf16.mxu0 %v11086_v1  ;;  %v5982_v15 = vunpack.c.h.s8.bf16 %v5654_v11 }
 0x888   :  { %6702 = vmatprep.subr.bf16.mxu0 %v5857_v34  ;;  %6548 = vmatprep.subr.bf16.mxu1 %v5927_v22  ;;  %v5991_v34 = vunpack.c.l.s8.bf16 %v5663_v56  ;;  %v5662_v22 = vld [vmem:[#allocation22 + $0x250] sm:$0xff] }
 0x88a   :  { %6549 = vmatpush1.bf16.msra.mxu1 %v5926_v18  ;;  %v5633_v18 = vld [vmem:[#allocation22 + $0x168] sm:$0xff] }
 0x88b   :  { %6703 = vmatpush1.bf16.msra.mxu0 %v5856_v33  ;;  %6550 = vmatprep.subr.bf16.mxu1 %v5935_v6  ;;  %v5990_v33 = vunpack.c.l.s8.bf16 %v5662_v22  ;;  %v5920_v6 = vunpack.c.h.s8.bf16 %v5624_v27  ;;  %v5929_v35 = vunpack.c.l.s8.bf16 %v5633_v18  ;;  %v5937_v61 = vunpack.c.h.s8.bf16 %v5633_v18 }
 0x88c   :  { %6704 = vmatprep.subr.bf16.mxu0 %v5865_v39  ;;  %v5999_v39 = vunpack.c.h.s8.bf16 %v5663_v56  ;;  %v5656_v56 = vld [vmem:[#allocation22 + $0x220] sm:$0xff] }
 0x88e   :  { %6551 = vmatpush1.bf16.msra.mxu1 %v5934_v12  ;;  %v5671_v12 = vld [vmem:[#allocation22 + $0x298] sm:$0xff] }
 0x88f   :  { %6705 = vmatpush1.bf16.msra.mxu0 %v5864_v13  ;;  %6552 = vmatprep.subr.bf16.mxu1 %v5943_v19  ;;  %v5998_v13 = vunpack.c.h.s8.bf16 %v5662_v22  ;;  %v5928_v19 = vunpack.c.l.s8.bf16 %v5632_v41  ;;  %v6007_v9 = vunpack.c.l.s8.bf16 %v5671_v12  ;;  %v5694_v22 = vld [vmem:[#allocation22 + $0x350] sm:$0xff] }
 0x890   :  { %6706 = vmatprep.subr.bf16.mxu0 %v5873_v57  ;;  %v5670_v57 = vld [vmem:[#allocation22 + $0x290] sm:$0xff] }
 0x892   :  { %6553 = vmatpush1.bf16.msra.mxu1 %v5942_v58  ;;  %v5641_v58 = vld [vmem:[#allocation22 + $0x1a8] sm:$0xff] }
 0x893   :  { %6707 = vmatpush1.bf16.msra.mxu0 %v5872_v4  ;;  %6554 = vmatprep.subr.bf16.mxu1 %v5951_v25  ;;  %v6006_v4 = vunpack.c.l.s8.bf16 %v5670_v57  ;;  %v5936_v25 = vunpack.c.h.s8.bf16 %v5632_v41  ;;  %v5945_v31 = vunpack.c.l.s8.bf16 %v5641_v58  ;;  %v5953_v36 = vunpack.c.h.s8.bf16 %v5641_v58 }
 0x894   :  { %6708 = vmatprep.subr.bf16.mxu0 %v5881_v20  ;;  %v6015_v20 = vunpack.c.h.s8.bf16 %v5671_v12  ;;  %v5664_v12 = vld [vmem:[#allocation22 + $0x260] sm:$0xff] }
 0x896   :  { %6555 = vmatpush1.bf16.msra.mxu1 %v5950_v5  ;;  %v5679_v5 = vld [vmem:[#allocation22 + $0x2d8] sm:$0xff] }
 0x897   :  { %6709 = vmatpush1.bf16.msra.mxu0 %v5880_v37  ;;  %6556 = vmatprep.subr.bf16.mxu1 %v5959_v24  ;;  %v6014_v37 = vunpack.c.h.s8.bf16 %v5670_v57  ;;  %v5944_v24 = vunpack.c.l.s8.bf16 %v5640_v50  ;;  %v6023_v2 = vunpack.c.l.s8.bf16 %v5679_v5 }
 0x898   :  { %6710 = vmatprep.subr.bf16.mxu0 %v5889_v45  ;;  %v5678_v45 = vld [vmem:[#allocation22 + $0x2d0] sm:$0xff] }
 0x89a   :  { %6557 = vmatpush1.bf16.msra.mxu1 %v5958_v32  ;;  %v5649_v32 = vld [vmem:[#allocation22 + $0x1e8] sm:$0xff] }
 0x89b   :  { %6711 = vmatpush1.bf16.msra.mxu0 %v5888_v49  ;;  %6558 = vmatprep.subr.bf16.mxu1 %v5967_v14  ;;  %v6022_v49 = vunpack.c.l.s8.bf16 %v5678_v45  ;;  %v5952_v14 = vunpack.c.h.s8.bf16 %v5640_v50  ;;  %v5961_v59 = vunpack.c.l.s8.bf16 %v5649_v32  ;;  %v5969_v23 = vunpack.c.h.s8.bf16 %v5649_v32 }
 0x89c   :  { %6712 = vmatprep.subr.bf16.mxu0 %v5897_v42  ;;  %v6031_v42 = vunpack.c.h.s8.bf16 %v5679_v5  ;;  %v5672_v5 = vld [vmem:[#allocation22 + $0x2a0] sm:$0xff] }
 0x89e   :  { %6559 = vmatpush1.bf16.msra.mxu1 %v5966_v60  ;;  %v5687_v60 = vld [vmem:[#allocation22 + $0x318] sm:$0xff] }
 0x89f   :  { %6713 = vmatpush1.bf16.msra.mxu0 %v5896_v54  ;;  %6571 = vmatprep.subr.bf16.mxu1 %v5975_v47  ;;  %v6030_v54 = vunpack.c.h.s8.bf16 %v5678_v45  ;;  %v5960_v47 = vunpack.c.l.s8.bf16 %v5648_v10  ;;  %v6039_v11 = vunpack.c.l.s8.bf16 %v5687_v60 }
 0x8a0   :  { %6714 = vmatprep.subr.bf16.mxu0 %v5905_v21  ;;  %v5686_v21 = vld [vmem:[#allocation22 + $0x310] sm:$0xff] }
 0x8a1   :  { %6561 = vmatmul.mubr.bf16.vlgmr.msra.gmra.mrb[28].mxu1 %v11088_v43 }
 0x8a2   :  { %6572 = vmatpush1.bf16.msra.mxu1 %v5974_v46  ;;  %6603 = vmatprep.mubr.bf16.mxu1 %v11090_v17  ;;  %v5657_v46 = vld [vmem:[#allocation22 + $0x228] sm:$0xff] }
 0x8a3   :  { %6715 = vmatpush1.bf16.msra.mxu0 %v5904_v7  ;;  %6573 = vmatprep.subr.bf16.mxu1 %v5983_v16  ;;  %v6038_v7 = vunpack.c.l.s8.bf16 %v5686_v21  ;;  %v5968_v16 = vunpack.c.h.s8.bf16 %v5648_v10  ;;  %v5977_v27 = vunpack.c.l.s8.bf16 %v5657_v46 }
 0x8a4   :  { %6716 = vmatprep.subr.bf16.mxu0 %v5913_v63  ;;  %v6047_v63 = vunpack.c.h.s8.bf16 %v5687_v60  ;;  %v5680_v60 = vld [vmem:[#allocation22 + $0x2e0] sm:$0xff] }
 0x8a6   :  { %6574 = vmatpush1.bf16.msra.mxu1 %v5982_v15  ;;  %v5695_v15 = vld [vmem:[#allocation22 + $0x358] sm:$0xff] }
 0x8a7   :  { %6717 = vmatpush1.bf16.msra.mxu0 %v5912_v40  ;;  %6575 = vmatprep.subr.bf16.mxu1 %v5991_v34  ;;  %v6046_v40 = vunpack.c.h.s8.bf16 %v5686_v21  ;;  %v5976_v34 = vunpack.c.l.s8.bf16 %v5656_v56  ;;  %v6055_v18 = vunpack.c.l.s8.bf16 %v5695_v15 }
 0x8a8   :  { %6718 = vmatprep.subr.bf16.mxu0 %v5921_v51  ;;  %v5985_v51 = vunpack.c.h.s8.bf16 %v5657_v46 }
 0x8aa   :  { %6576 = vmatpush1.bf16.msra.mxu1 %v5990_v33  ;;  %v5665_v33 = vld [vmem:[#allocation22 + $0x268] sm:$0xff] }
 0x8ab   :  { %6719 = vmatpush1.bf16.msra.mxu0 %v5920_v6  ;;  %6577 = vmatprep.subr.bf16.mxu1 %v5999_v39  ;;  %v6054_v6 = vunpack.c.l.s8.bf16 %v5694_v22  ;;  %v5984_v39 = vunpack.c.h.s8.bf16 %v5656_v56  ;;  %v5993_v41 = vunpack.c.l.s8.bf16 %v5665_v33  ;;  %v6001_v58 = vunpack.c.h.s8.bf16 %v5665_v33 }
 0x8ac   :  { %6720 = vmatprep.subr.bf16.mxu0 %v5929_v35  ;;  %v6063_v35 = vunpack.c.h.s8.bf16 %v5695_v15  ;;  %v5688_v15 = vld [vmem:[#allocation22 + $0x320] sm:$0xff] }
 0x8ae   :  { %6578 = vmatpush1.bf16.msra.mxu1 %v5998_v13  ;;  %v5703_v13 = vld [vmem:[#allocation22 + $0x398] sm:$0xff] }
 0x8af   :  { %6721 = vmatpush1.bf16.msra.mxu0 %v5928_v19  ;;  %6579 = vmatprep.subr.bf16.mxu1 %v6007_v9  ;;  %v6062_v19 = vunpack.c.h.s8.bf16 %v5694_v22  ;;  %v5992_v9 = vunpack.c.l.s8.bf16 %v5664_v12  ;;  %v6071_v57 = vunpack.c.l.s8.bf16 %v5703_v13  ;;  %v6040_v22 = vunpack.c.l.s8.bf16 %v5688_v15 }
 0x8b0   :  { %6722 = vmatprep.subr.bf16.mxu0 %v5937_v61  ;;  %v5702_v61 = vld [vmem:[#allocation22 + $0x390] sm:$0xff] }
 0x8b2   :  { %6580 = vmatpush1.bf16.msra.mxu1 %v6006_v4  ;;  %v5673_v4 = vld [vmem:[#allocation22 + $0x2a8] sm:$0xff] }
 0x8b3   :  { %6723 = vmatpush1.bf16.msra.mxu0 %v5936_v25  ;;  %6581 = vmatprep.subr.bf16.mxu1 %v6015_v20  ;;  %v6070_v25 = vunpack.c.l.s8.bf16 %v5702_v61  ;;  %v6000_v20 = vunpack.c.h.s8.bf16 %v5664_v12  ;;  %v6009_v50 = vunpack.c.l.s8.bf16 %v5673_v4  ;;  %v6017_v32 = vunpack.c.h.s8.bf16 %v5673_v4 }
 0x8b4   :  { %6724 = vmatprep.subr.bf16.mxu0 %v5945_v31  ;;  %v6079_v31 = vunpack.c.h.s8.bf16 %v5703_v13  ;;  %v5696_v13 = vld [vmem:[#allocation22 + $0x360] sm:$0xff] }
 0x8b6   :  { %6582 = vmatpush1.bf16.msra.mxu1 %v6014_v37  ;;  %v5711_v37 = vld [vmem:[#allocation22 + $0x3d8] sm:$0xff] }
 0x8b7   :  { %6725 = vmatpush1.bf16.msra.mxu0 %v5944_v24  ;;  %6583 = vmatprep.subr.bf16.mxu1 %v6023_v2  ;;  %v6078_v24 = vunpack.c.h.s8.bf16 %v5702_v61  ;;  %v6008_v2 = vunpack.c.l.s8.bf16 %v5672_v5  ;;  %v6087_v45 = vunpack.c.l.s8.bf16 %v5711_v37 }
 0x8b8   :  { %6726 = vmatprep.subr.bf16.mxu0 %v5953_v36  ;;  %v5710_v36 = vld [vmem:[#allocation22 + $0x3d0] sm:$0xff] }
 0x8ba   :  { %6584 = vmatpush1.bf16.msra.mxu1 %v6022_v49  ;;  %v5681_v49 = vld [vmem:[#allocation22 + $0x2e8] sm:$0xff] }
 0x8bb   :  { %6727 = vmatpush1.bf16.msra.mxu0 %v5952_v14  ;;  %6585 = vmatprep.subr.bf16.mxu1 %v6031_v42  ;;  %v6086_v14 = vunpack.c.l.s8.bf16 %v5710_v36  ;;  %v6016_v42 = vunpack.c.h.s8.bf16 %v5672_v5  ;;  %v6025_v10 = vunpack.c.l.s8.bf16 %v5681_v49  ;;  %v6033_v46 = vunpack.c.h.s8.bf16 %v5681_v49 }
 0x8bc   :  { %6728 = vmatprep.subr.bf16.mxu0 %v5961_v59  ;;  %v6095_v59 = vunpack.c.h.s8.bf16 %v5711_v37  ;;  %v5704_v37 = vld [vmem:[#allocation22 + $0x3a0] sm:$0xff] }
 0x8be   :  { %6586 = vmatpush1.bf16.msra.mxu1 %v6030_v54  ;;  %v5719_v54 = vld [vmem:[#allocation22 + $0x418] sm:$0xff] }
 0x8bf   :  { %6729 = vmatpush1.bf16.msra.mxu0 %v5960_v47  ;;  %6587 = vmatprep.subr.bf16.mxu1 %v6039_v11  ;;  %v6094_v47 = vunpack.c.h.s8.bf16 %v5710_v36  ;;  %v6024_v11 = vunpack.c.l.s8.bf16 %v5680_v60  ;;  %v6103_v21 = vunpack.c.l.s8.bf16 %v5719_v54 }
 0x8c0   :  { %6730 = vmatprep.subr.bf16.mxu0 %v5969_v23  ;;  %v5718_v23 = vld [vmem:[#allocation22 + $0x410] sm:$0xff] }
 0x8c2   :  { %6588 = vmatpush1.bf16.msra.mxu1 %v6038_v7  ;;  %v5689_v7 = vld [vmem:[#allocation22 + $0x328] sm:$0xff] }
 0x8c3   :  { %6731 = vmatpush1.bf16.msra.mxu0 %v5968_v16  ;;  %6589 = vmatprep.subr.bf16.mxu1 %v6047_v63  ;;  %v6102_v16 = vunpack.c.l.s8.bf16 %v5718_v23  ;;  %v6032_v63 = vunpack.c.h.s8.bf16 %v5680_v60  ;;  %v6041_v56 = vunpack.c.l.s8.bf16 %v5689_v7  ;;  %v6049_v33 = vunpack.c.h.s8.bf16 %v5689_v7 }
 0x8c4   :  { %6743 = vmatprep.subr.bf16.mxu0 %v5977_v27  ;;  %v6111_v27 = vunpack.c.h.s8.bf16 %v5719_v54  ;;  %v5712_v54 = vld [vmem:[#allocation22 + $0x3e0] sm:$0xff] }
 0x8c6   :  { %6733 = vmatmul.mubr.bf16.vlgmr.msra.gmra.mrb[40].mxu0 %v11088_v43  ;;  %6590 = vmatpush1.bf16.msra.mxu1 %v6046_v40  ;;  %v5727_v40 = vld [vmem:[#allocation22 + $0x458] sm:$0xff] }
 0x8c7   :  { %6744 = vmatpush1.bf16.msra.mxu0 %v5976_v34  ;;  %6775 = vmatprep.mubr.bf16.mxu0 %v11090_v17  ;;  %v6110_v34 = vunpack.c.h.s8.bf16 %v5718_v23 }
 0x8c8   :  { %6745 = vmatprep.subr.bf16.mxu0 %v5985_v51  ;;  %6591 = vmatprep.subr.bf16.mxu1 %v6055_v18  ;;  %v6119_v51 = vunpack.c.l.s8.bf16 %v5727_v40  ;;  %v5726_v18 = vld [vmem:[#allocation22 + $0x450] sm:$0xff] }
 0x8ca   :  { %6592 = vmatpush1.bf16.msra.mxu1 %v6054_v6  ;;  %v5697_v6 = vld [vmem:[#allocation22 + $0x368] sm:$0xff] }
 0x8cb   :  { %6746 = vmatpush1.bf16.msra.mxu0 %v5984_v39  ;;  %6593 = vmatprep.subr.bf16.mxu1 %v6063_v35  ;;  %v6118_v39 = vunpack.c.l.s8.bf16 %v5726_v18  ;;  %v6048_v35 = vunpack.c.h.s8.bf16 %v5688_v15  ;;  %v6057_v12 = vunpack.c.l.s8.bf16 %v5697_v6  ;;  %v6065_v4 = vunpack.c.h.s8.bf16 %v5697_v6 }
 0x8cc   :  { %6747 = vmatprep.subr.bf16.mxu0 %v5993_v41  ;;  %v6127_v41 = vunpack.c.h.s8.bf16 %v5727_v40  ;;  %v5720_v40 = vld [vmem:[#allocation22 + $0x420] sm:$0xff] }
 0x8ce   :  { %6594 = vmatpush1.bf16.msra.mxu1 %v6062_v19  ;;  %v5735_v19 = vld [vmem:[#allocation22 + $0x498] sm:$0xff] }
 0x8cf   :  { %6748 = vmatpush1.bf16.msra.mxu0 %v5992_v9  ;;  %6595 = vmatprep.subr.bf16.mxu1 %v6071_v57  ;;  %v6126_v9 = vunpack.c.h.s8.bf16 %v5726_v18  ;;  %v6056_v57 = vunpack.c.l.s8.bf16 %v5696_v13  ;;  %v6135_v61 = vunpack.c.l.s8.bf16 %v5735_v19  ;;  %v5758_v18 = vld [vmem:[#allocation22 + $0x550] sm:$0xff] }
 0x8d0   :  { %6749 = vmatprep.subr.bf16.mxu0 %v6001_v58  ;;  %v5734_v58 = vld [vmem:[#allocation22 + $0x490] sm:$0xff] }
 0x8d2   :  { %6596 = vmatpush1.bf16.msra.mxu1 %v6070_v25  ;;  %v5705_v25 = vld [vmem:[#allocation22 + $0x3a8] sm:$0xff] }
 0x8d3   :  { %6750 = vmatpush1.bf16.msra.mxu0 %v6000_v20  ;;  %6597 = vmatprep.subr.bf16.mxu1 %v6079_v31  ;;  %v6134_v20 = vunpack.c.l.s8.bf16 %v5734_v58  ;;  %v6064_v31 = vunpack.c.h.s8.bf16 %v5696_v13  ;;  %v6073_v5 = vunpack.c.l.s8.bf16 %v5705_v25  ;;  %v6081_v49 = vunpack.c.h.s8.bf16 %v5705_v25 }
 0x8d4   :  { %6751 = vmatprep.subr.bf16.mxu0 %v6009_v50  ;;  %v6143_v50 = vunpack.c.h.s8.bf16 %v5735_v19  ;;  %v5728_v19 = vld [vmem:[#allocation22 + $0x460] sm:$0xff] }
 0x8d6   :  { %6598 = vmatpush1.bf16.msra.mxu1 %v6078_v24  ;;  %v5743_v24 = vld [vmem:[#allocation22 + $0x4d8] sm:$0xff] }
 0x8d7   :  { %6752 = vmatpush1.bf16.msra.mxu0 %v6008_v2  ;;  %6599 = vmatprep.subr.bf16.mxu1 %v6087_v45  ;;  %v6142_v2 = vunpack.c.h.s8.bf16 %v5734_v58  ;;  %v6072_v45 = vunpack.c.l.s8.bf16 %v5704_v37  ;;  %v6151_v36 = vunpack.c.l.s8.bf16 %v5743_v24 }
 0x8d8   :  { %6753 = vmatprep.subr.bf16.mxu0 %v6017_v32  ;;  %v5742_v32 = vld [vmem:[#allocation22 + $0x4d0] sm:$0xff] }
 0x8da   :  { %6600 = vmatpush1.bf16.msra.mxu1 %v6086_v14  ;;  %v5713_v14 = vld [vmem:[#allocation22 + $0x3e8] sm:$0xff] }
 0x8db   :  { %6754 = vmatpush1.bf16.msra.mxu0 %v6016_v42  ;;  %6601 = vmatprep.subr.bf16.mxu1 %v6095_v59  ;;  %v6150_v42 = vunpack.c.l.s8.bf16 %v5742_v32  ;;  %v6080_v59 = vunpack.c.h.s8.bf16 %v5704_v37  ;;  %v6089_v60 = vunpack.c.l.s8.bf16 %v5713_v14  ;;  %v6097_v7 = vunpack.c.h.s8.bf16 %v5713_v14 }
 0x8dc   :  { %6755 = vmatprep.subr.bf16.mxu0 %v6025_v10  ;;  %v6159_v10 = vunpack.c.h.s8.bf16 %v5743_v24  ;;  %v5736_v24 = vld [vmem:[#allocation22 + $0x4a0] sm:$0xff] }
 0x8de   :  { %6602 = vmatpush1.bf16.msra.mxu1 %v6094_v47  ;;  %v5751_v47 = vld [vmem:[#allocation22 + $0x518] sm:$0xff] }
 0x8df   :  { %6756 = vmatpush1.bf16.msra.mxu0 %v6024_v11  ;;  %6614 = vmatprep.subr.bf16.mxu1 %v6103_v21  ;;  %v6158_v11 = vunpack.c.h.s8.bf16 %v5742_v32  ;;  %v6088_v21 = vunpack.c.l.s8.bf16 %v5712_v54  ;;  %v6167_v23 = vunpack.c.l.s8.bf16 %v5751_v47 }
 0x8e0   :  { %6757 = vmatprep.subr.bf16.mxu0 %v6033_v46  ;;  %v5750_v46 = vld [vmem:[#allocation22 + $0x510] sm:$0xff] }
 0x8e1   :  { %6604 = vmatmul.mubr.bf16.vlgmr.msra.gmra.mrb[28].mxu1 %v11094_v38 }
 0x8e2   :  { %6615 = vmatpush1.bf16.msra.mxu1 %v6102_v16  ;;  %6646 = vmatprep.mubr.bf16.mxu1 %v11099_v0  ;;  %v5721_v16 = vld [vmem:[#allocation22 + $0x428] sm:$0xff] }
 0x8e3   :  { %6758 = vmatpush1.bf16.msra.mxu0 %v6032_v63  ;;  %6616 = vmatprep.subr.bf16.mxu1 %v6111_v27  ;;  %v6166_v63 = vunpack.c.l.s8.bf16 %v5750_v46  ;;  %v6096_v27 = vunpack.c.h.s8.bf16 %v5712_v54  ;;  %v6105_v15 = vunpack.c.l.s8.bf16 %v5721_v16 }
 0x8e4   :  { %6759 = vmatprep.subr.bf16.mxu0 %v6041_v56  ;;  %v6175_v56 = vunpack.c.h.s8.bf16 %v5751_v47  ;;  %v5744_v47 = vld [vmem:[#allocation22 + $0x4e0] sm:$0xff] }
 0x8e6   :  { %6617 = vmatpush1.bf16.msra.mxu1 %v6110_v34  ;;  %v5759_v34 = vld [vmem:[#allocation22 + $0x558] sm:$0xff] }
 0x8e7   :  { %6760 = vmatpush1.bf16.msra.mxu0 %v6040_v22  ;;  %6618 = vmatprep.subr.bf16.mxu1 %v6119_v51  ;;  %v6174_v22 = vunpack.c.h.s8.bf16 %v5750_v46  ;;  %v6104_v51 = vunpack.c.l.s8.bf16 %v5720_v40  ;;  %v6183_v6 = vunpack.c.l.s8.bf16 %v5759_v34 }
 0x8e8   :  { %6761 = vmatprep.subr.bf16.mxu0 %v6049_v33  ;;  %v6113_v33 = vunpack.c.h.s8.bf16 %v5721_v16 }
 0x8ea   :  { %6619 = vmatpush1.bf16.msra.mxu1 %v6118_v39  ;;  %v5729_v39 = vld [vmem:[#allocation22 + $0x468] sm:$0xff] }
 0x8eb   :  { %6762 = vmatpush1.bf16.msra.mxu0 %v6048_v35  ;;  %6620 = vmatprep.subr.bf16.mxu1 %v6127_v41  ;;  %v6182_v35 = vunpack.c.l.s8.bf16 %v5758_v18  ;;  %v6112_v41 = vunpack.c.h.s8.bf16 %v5720_v40  ;;  %v6121_v13 = vunpack.c.l.s8.bf16 %v5729_v39  ;;  %v6129_v25 = vunpack.c.h.s8.bf16 %v5729_v39 }
 0x8ec   :  { %6763 = vmatprep.subr.bf16.mxu0 %v6057_v12  ;;  %v6191_v12 = vunpack.c.h.s8.bf16 %v5759_v34  ;;  %v5752_v34 = vld [vmem:[#allocation22 + $0x520] sm:$0xff] }
 0x8ee   :  { %6621 = vmatpush1.bf16.msra.mxu1 %v6126_v9  ;;  %v5767_v9 = vld [vmem:[#allocation22 + $0x598] sm:$0xff] }
 0x8ef   :  { %6764 = vmatpush1.bf16.msra.mxu0 %v6056_v57  ;;  %6622 = vmatprep.subr.bf16.mxu1 %v6135_v61  ;;  %v6190_v57 = vunpack.c.h.s8.bf16 %v5758_v18  ;;  %v6120_v61 = vunpack.c.l.s8.bf16 %v5728_v19  ;;  %v6199_v58 = vunpack.c.l.s8.bf16 %v5767_v9  ;;  %v6168_v18 = vunpack.c.l.s8.bf16 %v5752_v34 }
 0x8f0   :  { %6765 = vmatprep.subr.bf16.mxu0 %v6065_v4  ;;  %v5766_v4 = vld [vmem:[#allocation22 + $0x590] sm:$0xff] }
 0x8f2   :  { %6623 = vmatpush1.bf16.msra.mxu1 %v6134_v20  ;;  %v5737_v20 = vld [vmem:[#allocation22 + $0x4a8] sm:$0xff] }
 0x8f3   :  { %6766 = vmatpush1.bf16.msra.mxu0 %v6064_v31  ;;  %6624 = vmatprep.subr.bf16.mxu1 %v6143_v50  ;;  %v6198_v31 = vunpack.c.l.s8.bf16 %v5766_v4  ;;  %v6128_v50 = vunpack.c.h.s8.bf16 %v5728_v19  ;;  %v6137_v37 = vunpack.c.l.s8.bf16 %v5737_v20  ;;  %v6145_v14 = vunpack.c.h.s8.bf16 %v5737_v20 }
 0x8f4   :  { %6767 = vmatprep.subr.bf16.mxu0 %v6073_v5  ;;  %v6207_v5 = vunpack.c.h.s8.bf16 %v5767_v9  ;;  %v5760_v9 = vld [vmem:[#allocation22 + $0x560] sm:$0xff] }
 0x8f6   :  { %6625 = vmatpush1.bf16.msra.mxu1 %v6142_v2  ;;  %v5775_v2 = vld [vmem:[#allocation22 + $0x5d8] sm:$0xff] }
 0x8f7   :  { %6768 = vmatpush1.bf16.msra.mxu0 %v6072_v45  ;;  %6626 = vmatprep.subr.bf16.mxu1 %v6151_v36  ;;  %v6206_v45 = vunpack.c.h.s8.bf16 %v5766_v4  ;;  %v6136_v36 = vunpack.c.l.s8.bf16 %v5736_v24  ;;  %v6215_v32 = vunpack.c.l.s8.bf16 %v5775_v2 }
 0x8f8   :  { %6769 = vmatprep.subr.bf16.mxu0 %v6081_v49  ;;  %v5774_v49 = vld [vmem:[#allocation22 + $0x5d0] sm:$0xff] }
 0x8fa   :  { %6627 = vmatpush1.bf16.msra.mxu1 %v6150_v42  ;;  %v5745_v42 = vld [vmem:[#allocation22 + $0x4e8] sm:$0xff] }
 0x8fb   :  { %6770 = vmatpush1.bf16.msra.mxu0 %v6080_v59  ;;  %6628 = vmatprep.subr.bf16.mxu1 %v6159_v10  ;;  %v6214_v59 = vunpack.c.l.s8.bf16 %v5774_v49  ;;  %v6144_v10 = vunpack.c.h.s8.bf16 %v5736_v24  ;;  %v6153_v54 = vunpack.c.l.s8.bf16 %v5745_v42  ;;  %v6161_v16 = vunpack.c.h.s8.bf16 %v5745_v42 }
 0x8fc   :  { %6771 = vmatprep.subr.bf16.mxu0 %v6089_v60  ;;  %v6223_v60 = vunpack.c.h.s8.bf16 %v5775_v2 }
 0x8fe   :  { %6629 = vmatpush1.bf16.msra.mxu1 %v6158_v11  ;;  %v5783_v11 = vld [vmem:[#allocation22 + $0x618] sm:$0xff] }
 0x8ff   :  { %6772 = vmatpush1.bf16.msra.mxu0 %v6088_v21  ;;  %6630 = vmatprep.subr.bf16.mxu1 %v6167_v23  ;;  %v6222_v21 = vunpack.c.h.s8.bf16 %v5774_v49  ;;  %v6152_v23 = vunpack.c.l.s8.bf16 %v5744_v47  ;;  %v6231_v46 = vunpack.c.l.s8.bf16 %v5783_v11 }
 0x900   :  { %6773 = vmatprep.subr.bf16.mxu0 %v6097_v7  ;;  %v5782_v7 = vld [vmem:[#allocation22 + $0x610] sm:$0xff] }
 0x902   :  { %6631 = vmatpush1.bf16.msra.mxu1 %v6166_v63  ;;  %v5753_v63 = vld [vmem:[#allocation22 + $0x528] sm:$0xff] }
 0x903   :  { %6774 = vmatpush1.bf16.msra.mxu0 %v6096_v27  ;;  %6632 = vmatprep.subr.bf16.mxu1 %v6175_v56  ;;  %v6230_v27 = vunpack.c.l.s8.bf16 %v5782_v7  ;;  %v6160_v56 = vunpack.c.h.s8.bf16 %v5744_v47  ;;  %v6169_v40 = vunpack.c.l.s8.bf16 %v5753_v63  ;;  %v6177_v39 = vunpack.c.h.s8.bf16 %v5753_v63 }
 0x904   :  { %6786 = vmatprep.subr.bf16.mxu0 %v6105_v15  ;;  %v6239_v15 = vunpack.c.h.s8.bf16 %v5783_v11 }
 0x906   :  { %6776 = vmatmul.mubr.bf16.vlgmr.msra.gmra.mrb[40].mxu0 %v11094_v38  ;;  %6633 = vmatpush1.bf16.msra.mxu1 %v6174_v22  ;;  %v5791_v22 = vld [vmem:[#allocation22 + $0x658] sm:$0xff] }
 0x907   :  { %6787 = vmatpush1.bf16.msra.mxu0 %v6104_v51  ;;  %6818 = vmatprep.mubr.bf16.mxu0 %v11099_v0  ;;  %v6238_v51 = vunpack.c.h.s8.bf16 %v5782_v7  ;;  %v5777_v7 = vld [vmem:[#allocation22 + $0x5e8] sm:$0xff] }
 0x908   :  { %6788 = vmatprep.subr.bf16.mxu0 %v6113_v33  ;;  %6634 = vmatprep.subr.bf16.mxu1 %v6183_v6  ;;  %v6247_v33 = vunpack.c.l.s8.bf16 %v5791_v22  ;;  %v5790_v6 = vld [vmem:[#allocation22 + $0x650] sm:$0xff] }
 0x90a   :  { %6635 = vmatpush1.bf16.msra.mxu1 %v6182_v35  ;;  %v5761_v35 = vld [vmem:[#allocation22 + $0x568] sm:$0xff] }
 0x90b   :  { %6789 = vmatpush1.bf16.msra.mxu0 %v6112_v41  ;;  %6636 = vmatprep.subr.bf16.mxu1 %v6191_v12  ;;  %v6246_v41 = vunpack.c.l.s8.bf16 %v5790_v6  ;;  %v6176_v12 = vunpack.c.h.s8.bf16 %v5752_v34  ;;  %v6185_v19 = vunpack.c.l.s8.bf16 %v5761_v35  ;;  %v6193_v20 = vunpack.c.h.s8.bf16 %v5761_v35 }
 0x90c   :  { %6790 = vmatprep.subr.bf16.mxu0 %v6121_v13  ;;  %v6255_v13 = vunpack.c.h.s8.bf16 %v5791_v22 }
 0x90e   :  { %6637 = vmatpush1.bf16.msra.mxu1 %v6190_v57  ;;  %v5799_v57 = vld [vmem:[#allocation22 + $0x698] sm:$0xff] }
 0x90f   :  { %6791 = vmatpush1.bf16.msra.mxu0 %v6120_v61  ;;  %6638 = vmatprep.subr.bf16.mxu1 %v6199_v58  ;;  %v6254_v61 = vunpack.c.h.s8.bf16 %v5790_v6  ;;  %v6184_v58 = vunpack.c.l.s8.bf16 %v5760_v9  ;;  %v6263_v4 = vunpack.c.l.s8.bf16 %v5799_v57  ;;  %v6271_v24 = vunpack.c.h.s8.bf16 %v5799_v57  ;;  %v5776_v6 = vld [vmem:[#allocation22 + $0x5e0] sm:$0xff] }
 0x910   :  { %6792 = vmatprep.subr.bf16.mxu0 %v6129_v25  ;;  %v5798_v25 = vld [vmem:[#allocation22 + $0x690] sm:$0xff]  ;;  %v6225_v57 = vunpack.c.h.s8.bf16 %v5777_v7 }
 0x911   :  { %v6270_v42 = vunpack.c.h.s8.bf16 %v5798_v25 }
 0x912   :  { %6639 = vmatpush1.bf16.msra.mxu1 %v6198_v31  ;;  %v5769_v31 = vld [vmem:[#allocation22 + $0x5a8] sm:$0xff] }
 0x913   :  { %6793 = vmatpush1.bf16.msra.mxu0 %v6128_v50  ;;  %6640 = vmatprep.subr.bf16.mxu1 %v6207_v5  ;;  %v6262_v50 = vunpack.c.l.s8.bf16 %v5798_v25  ;;  %v4738_v5 = vld [vmem:[#allocation17] ss:$2 sm:$0x3]  ;;  %v6201_v2 = vunpack.c.l.s8.bf16 %v5769_v31 }
 0x914   :  { %6794 = vmatprep.subr.bf16.mxu0 %v6137_v37  ;;  %v6192_v37 = vunpack.c.h.s8.bf16 %v5760_v9  ;;  %v4743_v49 = vrot.slane %v4738_v5, %v10139_v28  ;;  %v5814_v9 = vld [vmem:[#allocation22 + $0x710] sm:$0xff] }
 0x916   :  { %6641 = vmatpush1.bf16.msra.mxu1 %v6206_v45  ;;  %v5768_v45 = vld [vmem:[#allocation22 + $0x5a0] sm:$0xff] }
 0x917   :  { %6795 = vmatpush1.bf16.msra.mxu0 %v6136_v36  ;;  %6642 = vmatprep.subr.bf16.mxu1 %v6215_v32  ;;  %v4755_v36 = vld [vmem:[#allocation17 + $0x1] ss:$2 sm:$0x3] }
 0x918   :  { %6796 = vmatprep.subr.bf16.mxu0 %v6145_v14  ;;  %v5807_v32 = vld [vmem:[#allocation22 + $0x6d8] sm:$0xff]  ;;  %v4747_v14 = vrot.slane %v4738_v5, %v10142_v30  ;;  %v4764_v11 = vrot.slane %v4755_v36, %v10142_v30  ;;  %v6302_v5 = vunpack.c.h.s8.bf16 %v5814_v9 }
 0x919   :  { %v6287_v22 = vunpack.c.h.s8.bf16 %v5807_v32 }
 0x91a   :  { %6643 = vmatpush1.bf16.msra.mxu1 %v6214_v59  ;;  %v6200_v59 = vunpack.c.l.s8.bf16 %v5768_v45 }
 0x91b   :  { %6797 = vmatpush1.bf16.msra.mxu0 %v6144_v10  ;;  %6644 = vmatprep.subr.bf16.mxu1 %v6223_v60  ;;  %v4760_v10 = vrot.slane %v4755_v36, %v10139_v28  ;;  %v6279_v60 = vunpack.c.l.s8.bf16 %v5807_v32  ;;  %v5793_v36 = vld [vmem:[#allocation22 + $0x668] sm:$0xff] }
 0x91c   :  { %6798 = vmatprep.subr.bf16.mxu0 %v6153_v54  ;;  %v5806_v54 = vld [vmem:[#allocation22 + $0x6d0] sm:$0xff] }
 0x91e   :  { %6645 = vmatpush1.bf16.msra.mxu1 %v6222_v21  ;;  %v6209_v21 = vunpack.c.h.s8.bf16 %v5769_v31  ;;  %v5784_v31 = vld [vmem:[#allocation22 + $0x620] sm:$0xff] }
 0x91f   :  { %6799 = vmatpush1.bf16.msra.mxu0 %v6152_v23  ;;  %6657 = vmatprep.subr.bf16.mxu1 %v6231_v46 }
 0x920   :  { %6800 = vmatprep.subr.bf16.mxu0 %v6161_v16 }
 0x921   :  { %6647 = vmatmul.mubr.bf16.vlgmr.msra.gmra.mrb[28].mxu1 %v11127_v52 }
 0x922   :  { %6658 = vmatpush1.bf16.msra.mxu1 %v6230_v27  ;;  %6689 = vmatprep.mubr.bf16.mxu1 %v11129_v62  ;;  %v6278_v27 = vunpack.c.l.s8.bf16 %v5806_v54 }
 0x923   :  { %6801 = vmatpush1.bf16.msra.mxu0 %v6160_v56  ;;  %6659 = vmatprep.subr.bf16.mxu1 %v6239_v15 }
 0x924   :  { %6802 = vmatprep.subr.bf16.mxu0 %v6169_v40  ;;  %v6208_v40 = vunpack.c.h.s8.bf16 %v5768_v45 }
 0x926   :  { %6660 = vmatpush1.bf16.msra.mxu1 %v6238_v51 }
 0x927   :  { %6803 = vmatpush1.bf16.msra.mxu0 %v6168_v18  ;;  %6661 = vmatprep.subr.bf16.mxu1 %v6247_v33  ;;  %v6217_v33 = vunpack.c.l.s8.bf16 %v5777_v7 }
 0x928   :  { %6804 = vmatprep.subr.bf16.mxu0 %v6177_v39  ;;  %v5815_v39 = vld [vmem:[#allocation22 + $0x718] sm:$0xff] }
 0x929   :  { %v6303_v25 = vunpack.c.h.s8.bf16 %v5815_v39 }
 0x92a   :  { %6662 = vmatpush1.bf16.msra.mxu1 %v6246_v41 }
 0x92b   :  { %6805 = vmatpush1.bf16.msra.mxu0 %v6176_v12  ;;  %6663 = vmatprep.subr.bf16.mxu1 %v6255_v13  ;;  %v6286_v12 = vunpack.c.h.s8.bf16 %v5806_v54  ;;  %v6216_v13 = vunpack.c.l.s8.bf16 %v5776_v6 }
 0x92c   :  { %6806 = vmatprep.subr.bf16.mxu0 %v6185_v19  ;;  %v6295_v19 = vunpack.c.l.s8.bf16 %v5815_v39 }
 0x92e   :  { %6664 = vmatpush1.bf16.msra.mxu1 %v6254_v61  ;;  %v5785_v61 = vld [vmem:[#allocation22 + $0x628] sm:$0xff] }
 0x92f   :  { %6807 = vmatpush1.bf16.msra.mxu0 %v6184_v58  ;;  %6665 = vmatprep.subr.bf16.mxu1 %v6263_v4  ;;  %v6294_v58 = vunpack.c.l.s8.bf16 %v5814_v9  ;;  %v6224_v4 = vunpack.c.h.s8.bf16 %v5776_v6  ;;  %v5809_v6 = vld [vmem:[#allocation22 + $0x6e8] sm:$0xff] }
 0x930   :  { %6808 = vmatprep.subr.bf16.mxu0 %v6193_v20  ;;  %v6233_v20 = vunpack.c.l.s8.bf16 %v5785_v61  ;;  %v6281_v9 = vunpack.c.l.s8.bf16 %v5809_v6 }
 0x932   :  { %6666 = vmatpush1.bf16.msra.mxu1 %v6262_v50  ;;  %v5823_v50 = vld [vmem:[#allocation22 + $0x758] sm:$0xff] }
 0x933   :  { %6809 = vmatpush1.bf16.msra.mxu0 %v6192_v37  ;;  %6667 = vmatprep.subr.bf16.mxu1 %v6271_v24  ;;  %v6232_v37 = vunpack.c.l.s8.bf16 %v5784_v31  ;;  %v5822_v24 = vld [vmem:[#allocation22 + $0x750] sm:$0xff]  ;;  %v6311_v45 = vunpack.c.l.s8.bf16 %v5823_v50 }
 0x934   :  { %6810 = vmatprep.subr.bf16.mxu0 %v6201_v2  ;;  %v4729_v47 = vpop.f32.mrb[24].mxu1  ;;  %v6241_v2 = vunpack.c.h.s8.bf16 %v5785_v61  ;;  %v6310_v32 = vunpack.c.l.s8.bf16 %v5822_v24  ;;  %v5595_v61 = vld [vmem:[#allocation22 + $0x38] sm:$0xff] }
 0x935   :  { %v4750_v23 = vmul.f32 %v4743_v49, %v4729_v47  ;;  %v4731_v46 = vpop.f32.mrb[25].mxu1 }
 0x936   :  { %v4751_v16 = vmul.f32 %v4747_v14, %v4731_v46  ;;  %v4733_v63 = vpop.f32.mrb[26].mxu1  ;;  %6668 = vmatpush1.bf16.msra.mxu1 %v6270_v42  ;;  %v6249_v42 = vunpack.c.l.s8.bf16 %v5793_v36 }
 0x937   :  { %6811 = vmatpush1.bf16.msra.mxu0 %v6200_v59  ;;  %v4767_v56 = vadd.f32 %v4760_v10, %v4750_v23  ;;  %v4752_v15 = vmul.f32 %v4743_v49, %v4733_v63  ;;  %v4735_v34 = vpop.f32.mrb[27].mxu1  ;;  %6669 = vmatprep.subr.bf16.mxu1 %v6279_v60  ;;  %v6240_v49 = vunpack.c.h.s8.bf16 %v5784_v31  ;;  %v5792_v59 = vld [vmem:[#allocation22 + $0x660] sm:$0xff]  ;;  %v6318_v60 = vunpack.c.h.s8.bf16 %v5822_v24  ;;  %v5801_v23 = vld [vmem:[#allocation22 + $0x6a8] sm:$0xff] }
 0x938   :  { %v4768_v51 = vadd.f32 %v4764_v11, %v4751_v16  ;;  %6812 = vmatprep.subr.bf16.mxu0 %v6209_v21  ;;  %v4753_v18 = vmul.f32 %v4747_v14, %v4735_v34  ;;  %v6319_v14 = vunpack.c.h.s8.bf16 %v5823_v50  ;;  %v6248_v54 = vunpack.c.l.s8.bf16 %v5792_v59  ;;  %v7044_v34 = vld [vmem:[#allocation23] ss:$2 sm:$0xff] }
 0x939   :  { %4771 = vst [vmem:[#allocation31] sm:$0xff] %v4767_v56  ;;  %v4769_v35 = vadd.f32 %v4760_v10, %v4752_v15  ;;  %v5831_v10 = vld [vmem:[#allocation22 + $0x798] sm:$0xff]  ;;  %v6257_v21 = vunpack.c.h.s8.bf16 %v5793_v36  ;;  %v6256_v7 = vunpack.c.h.s8.bf16 %v5792_v59  ;;  %v6265_v63 = vunpack.c.l.s8.bf16 %v5801_v23  ;;  %v5817_v59 = vld [vmem:[#allocation22 + $0x728] sm:$0xff] }
 0x93a   :  { %4772 = vst [vmem:[#allocation31 + $0x8] sm:$0xff] %v4768_v51  ;;  %v4770_v41 = vadd.f32 %v4764_v11, %v4753_v18  ;;  %6670 = vmatpush1.bf16.msra.mxu1 %v6278_v27  ;;  %v6327_v47 = vunpack.c.l.s8.bf16 %v5831_v10  ;;  %v5830_v11 = vld [vmem:[#allocation22 + $0x790] sm:$0xff]  ;;  %v6335_v16 = vunpack.c.h.s8.bf16 %v5831_v10  ;;  %v5800_v27 = vld [vmem:[#allocation22 + $0x6a0] sm:$0xff]  ;;  %v5839_v56 = vld [vmem:[#allocation22 + $0x7d8] sm:$0xff]  ;;  %v6273_v18 = vunpack.c.h.s8.bf16 %v5801_v23 }
 0x93b   :  { %4773 = vst [vmem:[#allocation31 + $0x10] sm:$0xff] %v4769_v35  ;;  %6813 = vmatpush1.bf16.msra.mxu0 %v6208_v40  ;;  %6671 = vmatprep.subr.bf16.mxu1 %v6287_v22  ;;  %v6326_v46 = vunpack.c.l.s8.bf16 %v5830_v11  ;;  %v6334_v15 = vunpack.c.h.s8.bf16 %v5830_v11  ;;  %v6264_v40 = vunpack.c.l.s8.bf16 %v5800_v27  ;;  %v6343_v22 = vunpack.c.l.s8.bf16 %v5839_v56  ;;  %v5838_v51 = vld [vmem:[#allocation22 + $0x7d0] sm:$0xff] }
 0x93c   :  { %4774 = vst [vmem:[#allocation31 + $0x18] sm:$0xff] %v4770_v41  ;;  %6814 = vmatprep.subr.bf16.mxu0 %v6217_v33  ;;  %v7103_v33 = vld [vmem:[#allocation23 + $0x1] ss:$2 sm:$0xff]  ;;  %v7049_v39 = vrot.slane %v7044_v34, %v10139_v28  ;;  %v6342_v35 = vunpack.c.l.s8.bf16 %v5838_v51  ;;  %v7053_v41 = vrot.slane %v7044_v34, %v10142_v30  ;;  %v6350_v31 = vunpack.c.h.s8.bf16 %v5838_v51 }
 0x93d   :  { %v5851_v24 = vunpack.c.l.s8.bf16 %v5595_v61  ;;  %v5859_v11 = vunpack.c.h.s8.bf16 %v5595_v61 }
 0x93e   :  { %6672 = vmatpush1.bf16.msra.mxu1 %v6286_v12  ;;  %v6272_v12 = vunpack.c.h.s8.bf16 %v5800_v27 }
 0x93f   :  { %6815 = vmatpush1.bf16.msra.mxu0 %v6216_v13  ;;  %6673 = vmatprep.subr.bf16.mxu1 %v6295_v19  ;;  %v6351_v13 = vunpack.c.h.s8.bf16 %v5839_v56  ;;  %v7108_v19 = vrot.slane %v7103_v33, %v10139_v28 }
 0x940   :  { %6816 = vmatprep.subr.bf16.mxu0 %v6225_v57  ;;  %v5808_v57 = vld [vmem:[#allocation22 + $0x6e0] sm:$0xff] }
 0x942   :  { %6674 = vmatpush1.bf16.msra.mxu1 %v6294_v58 }
 0x943   :  { %6817 = vmatpush1.bf16.msra.mxu0 %v6224_v4  ;;  %6675 = vmatprep.subr.bf16.mxu1 %v6303_v25  ;;  %v7112_v4 = vrot.slane %v7103_v33, %v10142_v30 }
 0x944   :  { %6829 = vmatprep.subr.bf16.mxu0 %v6233_v20 }
 0x946   :  { %6819 = vmatmul.mubr.bf16.vlgmr.msra.gmra.mrb[40].mxu0 %v11127_v52  ;;  %6676 = vmatpush1.bf16.msra.mxu1 %v6302_v5 }
 0x947   :  { %6830 = vmatpush1.bf16.msra.mxu0 %v6232_v37  ;;  %6861 = vmatprep.mubr.bf16.mxu0 %v11129_v62  ;;  %v6280_v37 = vunpack.c.l.s8.bf16 %v5808_v57 }
 0x948   :  { %6831 = vmatprep.subr.bf16.mxu0 %v6241_v2  ;;  %6677 = vmatprep.subr.bf16.mxu1 %v6311_v45  ;;  %v5594_v2 = vld [vmem:[#allocation22 + $0x30] sm:$0xff] }
 0x94a   :  { %6678 = vmatpush1.bf16.msra.mxu1 %v6310_v32 }
 0x94b   :  { %6832 = vmatpush1.bf16.msra.mxu0 %v6240_v49  ;;  %6679 = vmatprep.subr.bf16.mxu1 %v6319_v14  ;;  %v6289_v49 = vunpack.c.h.s8.bf16 %v5809_v6 }
 0x94c   :  { %6833 = vmatprep.subr.bf16.mxu0 %v6249_v42 }
 0x94e   :  { %6680 = vmatpush1.bf16.msra.mxu1 %v6318_v60  ;;  %v5850_v60 = vunpack.c.l.s8.bf16 %v5594_v2 }
 0x94f   :  { %6834 = vmatpush1.bf16.msra.mxu0 %v6248_v54  ;;  %6681 = vmatprep.subr.bf16.mxu1 %v6327_v47  ;;  %v6288_v47 = vunpack.c.h.s8.bf16 %v5808_v57 }
 0x950   :  { %6835 = vmatprep.subr.bf16.mxu0 %v6257_v21 }
 0x952   :  { %6682 = vmatpush1.bf16.msra.mxu1 %v6326_v46 }
 0x953   :  { %6836 = vmatpush1.bf16.msra.mxu0 %v6256_v7  ;;  %6683 = vmatprep.subr.bf16.mxu1 %v6335_v16  ;;  %v6297_v7 = vunpack.c.l.s8.bf16 %v5817_v59  ;;  %v5816_v16 = vld [vmem:[#allocation22 + $0x720] sm:$0xff] }
 0x954   :  { %6837 = vmatprep.subr.bf16.mxu0 %v6265_v63  ;;  %v5603_v63 = vld [vmem:[#allocation22 + $0x78] sm:$0xff]  ;;  %v6296_v33 = vunpack.c.l.s8.bf16 %v5816_v16 }
 0x955   :  { %v5867_v6 = vunpack.c.l.s8.bf16 %v5603_v63 }
 0x956   :  { %6684 = vmatpush1.bf16.msra.mxu1 %v6334_v15 }
 0x957   :  { %6838 = vmatpush1.bf16.msra.mxu0 %v6264_v40  ;;  %6685 = vmatprep.subr.bf16.mxu1 %v6343_v22  ;;  %v5858_v22 = vunpack.c.h.s8.bf16 %v5594_v2 }
 0x958   :  { %6839 = vmatprep.subr.bf16.mxu0 %v6273_v18 }
 0x959   :  { %v6519_v58 = vpop.f32.mrb[36].mxu0 }
 0x95a   :  { %v7086_v25 = vmul.f32 %v7049_v39, %v6519_v58  ;;  %v6521_v20 = vpop.f32.mrb[37].mxu0  ;;  %6686 = vmatpush1.bf16.msra.mxu1 %v6342_v35 }
 0x95b   :  { %v7087_v50 = vmul.f32 %v7053_v41, %v6521_v20  ;;  %v6523_v5 = vpop.f32.mrb[38].mxu0  ;;  %6840 = vmatpush1.bf16.msra.mxu0 %v6272_v12  ;;  %6687 = vmatprep.subr.bf16.mxu1 %v6351_v13  ;;  %v6305_v12 = vunpack.c.h.s8.bf16 %v5817_v59  ;;  %v5875_v20 = vunpack.c.h.s8.bf16 %v5603_v63 }
 0x95c   :  { %v11184_v45 = vadd.f32 %v7108_v19, %v7086_v25  ;;  %v7094_v36 = vmul.f32 %v7049_v39, %v6523_v5  ;;  %v6525_v32 = vpop.f32.mrb[39].mxu0  ;;  %6841 = vmatprep.subr.bf16.mxu0 %v6281_v9  ;;  %v5602_v39 = vld [vmem:[#allocation22 + $0x70] sm:$0xff]  ;;  %v5825_v9 = vld [vmem:[#allocation22 + $0x768] sm:$0xff]  ;;  %v6304_v25 = vunpack.c.h.s8.bf16 %v5816_v16 }
 0x95d   :  { %v11186_v14 = vadd.f32 %v7112_v4, %v7087_v50  ;;  %v7095_v42 = vmul.f32 %v7053_v41, %v6525_v32  ;;  %v5866_v58 = vunpack.c.l.s8.bf16 %v5602_v39  ;;  %v6313_v5 = vunpack.c.l.s8.bf16 %v5825_v9 }
 0x95e   :  { %v11188_v10 = vadd.f32 %v7108_v19, %v7094_v36  ;;  %6688 = vmatpush1.bf16.msra.mxu1 %v6350_v31  ;;  %v7225_v21 = vmul.f32 %v11184_v45, %v11184_v45 }
 0x95f   :  { %v11190_v54 = vadd.f32 %v7112_v4, %v7095_v42  ;;  %6842 = vmatpush1.bf16.msra.mxu0 %v6280_v37  ;;  %6872 = vmatprep.subr.bf16.mxu1 %v5851_v24  ;;  %v7226_v27 = vmul.f32 %v11186_v14, %v11186_v14  ;;  %v5824_v37 = vld [vmem:[#allocation22 + $0x760] sm:$0xff]  ;;  %v5611_v24 = vld [vmem:[#allocation22 + $0xb8] sm:$0xff]  ;;  %v5874_v42 = vunpack.c.h.s8.bf16 %v5602_v39 }
 0x960   :  { %v7161_v23 = vadd.f32 %v11188_v10, %v11184_v45  ;;  %v7233_v46 = vmul.f32 %v11188_v10, %v11188_v10  ;;  %6843 = vmatprep.subr.bf16.mxu0 %v6289_v49 }
 0x961   :  { %v7168_v56 = vadd.f32 %v11190_v54, %v11186_v14  ;;  %v7234_v15 = vmul.f32 %v11190_v54, %v11190_v54  ;;  %6690 = vmatmul.mubr.bf16.vlgmr.msra.gmra.mrb[28].mxu1 %v11137_v3 }
 0x962   :  { %v7162_v40 = vrot.slane %v7161_v23, 4  ;;  %v7241_v34 = vadd.f32 %v7233_v46, %v7225_v21  ;;  %6873 = vmatpush1.bf16.msra.mxu1 %v5850_v60  ;;  %6904 = vmatprep.mubr.bf16.mxu1 %v11086_v1  ;;  %v5610_v21 = vld [vmem:[#allocation22 + $0xb0] sm:$0xff] }
 0x963   :  { %v7169_v51 = vrot.slane %v7168_v56, 4  ;;  %v7248_v18 = vadd.f32 %v7234_v15, %v7226_v27  ;;  %6844 = vmatpush1.bf16.msra.mxu0 %v6288_v47  ;;  %6874 = vmatprep.subr.bf16.mxu1 %v5859_v11  ;;  %v6312_v47 = vunpack.c.l.s8.bf16 %v5824_v37  ;;  %v5883_v11 = vunpack.c.l.s8.bf16 %v5611_v24  ;;  %v5833_v27 = vld [vmem:[#allocation22 + $0x7a8] sm:$0xff] }
 0x964   :  { %v7163_v35 = vadd.f32 %v7162_v40, %v7161_v23  ;;  %v7242_v41 = vrot.slane %v7241_v34, 4  ;;  %6845 = vmatprep.subr.bf16.mxu0 %v6297_v7  ;;  %v6321_v7 = vunpack.c.h.s8.bf16 %v5825_v9  ;;  %v5882_v40 = vunpack.c.l.s8.bf16 %v5610_v21 }
 0x965   :  { %v7170_v13 = vadd.f32 %v7169_v51, %v7168_v56  ;;  %v7249_v19 = vrot.slane %v7248_v18, 4  ;;  %v6320_v51 = vunpack.c.h.s8.bf16 %v5824_v37  ;;  %v6329_v39 = vunpack.c.l.s8.bf16 %v5833_v27 }
 0x966   :  { %v7164_v57 = vrot.slane %v7163_v35, 2  ;;  %v7243_v61 = vadd.f32 %v7242_v41, %v7241_v34  ;;  %6875 = vmatpush1.bf16.msra.mxu1 %v5858_v22  ;;  %v5619_v41 = vld [vmem:[#allocation22 + $0xf8] sm:$0xff]  ;;  %v5890_v9 = vunpack.c.h.s8.bf16 %v5610_v21 }
 0x967   :  { %v7171_v1 = vrot.slane %v7170_v13, 2  ;;  %v7250_v4 = vadd.f32 %v7249_v19, %v7248_v18  ;;  %6846 = vmatpush1.bf16.msra.mxu0 %v6296_v33  ;;  %6876 = vmatprep.subr.bf16.mxu1 %v5867_v6  ;;  %v5891_v18 = vunpack.c.h.s8.bf16 %v5611_v24 }
 0x968   :  { %v7165_v31 = vadd.f32 %v7164_v57, %v7163_v35  ;;  %v7244_v50 = vrot.slane %v7243_v61, 2  ;;  %6847 = vmatprep.subr.bf16.mxu0 %v6305_v12  ;;  %v5832_v35 = vld [vmem:[#allocation22 + $0x7a0] sm:$0xff] }
 0x969   :  { %v7172_v2 = vadd.f32 %v7171_v1, %v7170_v13  ;;  %v7251_v36 = vrot.slane %v7250_v4, 2  ;;  %v5618_v1 = vld [vmem:[#allocation22 + $0xf0] sm:$0xff]  ;;  %v6336_v24 = vunpack.c.h.s8.bf16 %v5832_v35 }
 0x96a   :  { %v7166_v32 = vrot.slane %v7165_v31, 1  ;;  %v7245_v49 = vadd.f32 %v7244_v50, %v7243_v61  ;;  %6877 = vmatpush1.bf16.msra.mxu1 %v5866_v58  ;;  %v6328_v61 = vunpack.c.l.s8.bf16 %v5832_v35  ;;  %v5899_v58 = vunpack.c.l.s8.bf16 %v5619_v41  ;;  %v5642_v35 = vld [vmem:[#allocation22 + $0x1b0] sm:$0xff] }
 0x96b   :  { %v7173_v59 = vrot.slane %v7172_v2, 1  ;;  %v7252_v60 = vadd.f32 %v7251_v36, %v7250_v4  ;;  %6848 = vmatpush1.bf16.msra.mxu0 %v6304_v25  ;;  %6878 = vmatprep.subr.bf16.mxu1 %v5875_v20  ;;  %v6337_v25 = vunpack.c.h.s8.bf16 %v5833_v27 }
 0x96c   :  { %v7167_v23 = vadd.f32 %v7166_v32, %v7165_v31  ;;  %v7246_v46 = vrot.slane %v7245_v49, 1  ;;  %6849 = vmatprep.subr.bf16.mxu0 %v6313_v5  ;;  %v5841_v31 = vld [vmem:[#allocation22 + $0x7e8] sm:$0xff]  ;;  %v5898_v5 = vunpack.c.l.s8.bf16 %v5618_v1  ;;  %v5840_v32 = vld [vmem:[#allocation22 + $0x7e0] sm:$0xff] }
 0x96d   :  { %v7174_v16 = vadd.f32 %v7173_v59, %v7172_v2  ;;  %v7253_v63 = vrot.slane %v7252_v60, 1  ;;  %v5907_v2 = vunpack.c.h.s8.bf16 %v5619_v41  ;;  %v6345_v36 = vunpack.c.l.s8.bf16 %v5841_v31 }
 0x96e   :  { %v11206_v56 = vmul.f32 0.0625, %v7167_v23  ;;  %v7247_v15 = vadd.f32 %v7246_v46, %v7245_v49  ;;  %6879 = vmatpush1.bf16.msra.mxu1 %v5874_v42  ;;  %v5627_v49 = vld [vmem:[#allocation22 + $0x138] sm:$0xff]  ;;  %v5906_v42 = vunpack.c.h.s8.bf16 %v5618_v1  ;;  %v6344_v59 = vunpack.c.l.s8.bf16 %v5840_v32 }
 0x96f   :  { %v11208_v34 = vmul.f32 0.0625, %v7174_v16  ;;  %v7254_v22 = vadd.f32 %v7253_v63, %v7252_v60  ;;  %6850 = vmatpush1.bf16.msra.mxu0 %v6312_v47  ;;  %6880 = vmatprep.subr.bf16.mxu1 %v5883_v11  ;;  %v5915_v60 = vunpack.c.l.s8.bf16 %v5627_v49  ;;  %v5626_v47 = vld [vmem:[#allocation22 + $0x130] sm:$0xff]  ;;  %v6353_v11 = vunpack.c.h.s8.bf16 %v5841_v31  ;;  %v5659_v1 = vld [vmem:[#allocation22 + $0x238] sm:$0xff] }
 0x970   :  { %v7297_v33 = vmul.f32 0.0625, %v7247_v15  ;;  %v7305_v6 = vmul.f32 %v11206_v56, %v11206_v56  ;;  %6851 = vmatprep.subr.bf16.mxu0 %v6321_v7  ;;  %v5914_v21 = vunpack.c.l.s8.bf16 %v5626_v47  ;;  %v6352_v23 = vunpack.c.h.s8.bf16 %v5840_v32  ;;  %v5635_v7 = vld [vmem:[#allocation22 + $0x178] sm:$0xff] }
 0x971   :  { %v7298_v12 = vmul.f32 0.0625, %v7254_v22  ;;  %v7306_v13 = vmul.f32 %v11208_v34, %v11208_v34  ;;  %v5923_v46 = vunpack.c.h.s8.bf16 %v5627_v49  ;;  %v5922_v63 = vunpack.c.h.s8.bf16 %v5626_v47  ;;  %v5675_v49 = vld [vmem:[#allocation22 + $0x2b8] sm:$0xff] }
 0x972   :  { %v7313_v19 = vsub.f32 %v7297_v33, %v7305_v6  ;;  %6881 = vmatpush1.bf16.msra.mxu1 %v5882_v40  ;;  %v5931_v15 = vunpack.c.l.s8.bf16 %v5635_v7  ;;  %v5634_v40 = vld [vmem:[#allocation22 + $0x170] sm:$0xff]  ;;  %v5643_v33 = vld [vmem:[#allocation22 + $0x1b8] sm:$0xff]  ;;  %v5946_v41 = vunpack.c.l.s8.bf16 %v5642_v35 }
 0x973   :  { %v7314_v57 = vsub.f32 %v7298_v12, %v7306_v13  ;;  %6852 = vmatpush1.bf16.msra.mxu0 %v6320_v51  ;;  %6882 = vmatprep.subr.bf16.mxu1 %v5891_v18  ;;  %v5930_v51 = vunpack.c.l.s8.bf16 %v5634_v40  ;;  %v5939_v18 = vunpack.c.h.s8.bf16 %v5635_v7  ;;  %v5938_v6 = vunpack.c.h.s8.bf16 %v5634_v40  ;;  %v5651_v13 = vld [vmem:[#allocation22 + $0x1f8] sm:$0xff] }
 0x974   :  { %v7321_v4 = vmax.f32 %v7313_v19, 0.0  ;;  %6853 = vmatprep.subr.bf16.mxu0 %v6329_v39  ;;  %v5947_v39 = vunpack.c.l.s8.bf16 %v5643_v33  ;;  %v5955_v12 = vunpack.c.h.s8.bf16 %v5643_v33  ;;  %v5954_v19 = vunpack.c.h.s8.bf16 %v5642_v35 }
 0x975   :  { %v7322_v20 = vmax.f32 %v7314_v57, 0.0  ;;  %v5650_v57 = vld [vmem:[#allocation22 + $0x1f0] sm:$0xff] }
 0x976   :  { %v7330_v50 = vadd.f32 1e-05, %v7321_v4  ;;  %6883 = vmatpush1.bf16.msra.mxu1 %v5890_v9  ;;  %v5963_v9 = vunpack.c.l.s8.bf16 %v5651_v13  ;;  %v5970_v4 = vunpack.c.h.s8.bf16 %v5650_v57 }
 0x977   :  { %v7331_v37 = vadd.f32 1e-05, %v7322_v20  ;;  %6854 = vmatpush1.bf16.msra.mxu0 %v6328_v61  ;;  %6884 = vmatprep.subr.bf16.mxu1 %v5899_v58  ;;  %v5962_v61 = vunpack.c.l.s8.bf16 %v5650_v57  ;;  %v5971_v58 = vunpack.c.h.s8.bf16 %v5651_v13  ;;  %v5658_v20 = vld [vmem:[#allocation22 + $0x230] sm:$0xff] }
 0x978   :  { %9011 = vrsqrt.f32 %v7330_v50  ;;  %6855 = vmatprep.subr.bf16.mxu0 %v6337_v25  ;;  %v5979_v25 = vunpack.c.l.s8.bf16 %v5659_v1  ;;  %v5978_v31 = vunpack.c.l.s8.bf16 %v5658_v20  ;;  %v5987_v50 = vunpack.c.h.s8.bf16 %v5659_v1 }
 0x979   :  { %9013 = vrsqrt.f32 %v7331_v37  ;;  %v5986_v37 = vunpack.c.h.s8.bf16 %v5658_v20 }
 0x97a   :  { %6885 = vmatpush1.bf16.msra.mxu1 %v5898_v5  ;;  %v5667_v5 = vld [vmem:[#allocation22 + $0x278] sm:$0xff] }
 0x97b   :  { %6856 = vmatpush1.bf16.msra.mxu0 %v6336_v24  ;;  %6886 = vmatprep.subr.bf16.mxu1 %v5907_v2  ;;  %v5995_v24 = vunpack.c.l.s8.bf16 %v5667_v5  ;;  %v5666_v2 = vld [vmem:[#allocation22 + $0x270] sm:$0xff]  ;;  %v6003_v32 = vunpack.c.h.s8.bf16 %v5667_v5 }
 0x97c   :  { %6857 = vmatprep.subr.bf16.mxu0 %v6345_v36  ;;  %v5994_v36 = vunpack.c.l.s8.bf16 %v5666_v2 }
 0x97e   :  { %6887 = vmatpush1.bf16.msra.mxu1 %v5906_v42  ;;  %v6002_v42 = vunpack.c.h.s8.bf16 %v5666_v2 }
 0x97f   :  { %6858 = vmatpush1.bf16.msra.mxu0 %v6344_v59  ;;  %6888 = vmatprep.subr.bf16.mxu1 %v5915_v60  ;;  %v6011_v59 = vunpack.c.l.s8.bf16 %v5675_v49  ;;  %v5674_v60 = vld [vmem:[#allocation22 + $0x2b0] sm:$0xff] }
 0x980   :  { %6859 = vmatprep.subr.bf16.mxu0 %v6353_v11  ;;  %v6010_v47 = vunpack.c.l.s8.bf16 %v5674_v60  ;;  %v5683_v11 = vld [vmem:[#allocation22 + $0x2f8] sm:$0xff] }
 0x981   :  { %v6035_v7 = vunpack.c.h.s8.bf16 %v5683_v11 }
 0x982   :  { %v11214_v16 = vpop.eup %9011  ;;  %6889 = vmatpush1.bf16.msra.mxu1 %v5914_v21  ;;  %v6027_v21 = vunpack.c.l.s8.bf16 %v5683_v11 }
 0x983   :  { %v11216_v27 = vpop.eup %9013  ;;  %6860 = vmatpush1.bf16.msra.mxu0 %v6352_v23  ;;  %6890 = vmatprep.subr.bf16.mxu1 %v5923_v46  ;;  %v5682_v23 = vld [vmem:[#allocation22 + $0x2f0] sm:$0xff] }
 0x984   :  { %v6026_v46 = vunpack.c.l.s8.bf16 %v5682_v23 }
 0x986   :  { %6862 = vmatmul.mubr.bf16.vlgmr.msra.gmra.mrb[40].mxu0 %v11137_v3  ;;  %6891 = vmatpush1.bf16.msra.mxu1 %v5922_v63  ;;  %v5691_v63 = vld [vmem:[#allocation22 + $0x338] sm:$0xff] }
 0x987   :  { %6892 = vmatprep.subr.bf16.mxu1 %v5931_v15  ;;  %v6034_v15 = vunpack.c.h.s8.bf16 %v5682_v23  ;;  %v6043_v40 = vunpack.c.l.s8.bf16 %v5691_v63  ;;  %v6051_v33 = vunpack.c.h.s8.bf16 %v5691_v63  ;;  %v5747_v63 = vld [vmem:[#allocation22 + $0x4f8] sm:$0xff] }
 0x98a   :  { %6893 = vmatpush1.bf16.msra.mxu1 %v5930_v51  ;;  %v5690_v51 = vld [vmem:[#allocation22 + $0x330] sm:$0xff] }
 0x98b   :  { %6894 = vmatprep.subr.bf16.mxu1 %v5939_v18  ;;  %v6042_v18 = vunpack.c.l.s8.bf16 %v5690_v51 }
 0x98e   :  { %6895 = vmatpush1.bf16.msra.mxu1 %v5938_v6  ;;  %v5699_v6 = vld [vmem:[#allocation22 + $0x378] sm:$0xff] }
 0x98f   :  { %6896 = vmatprep.subr.bf16.mxu1 %v5947_v39  ;;  %v6050_v39 = vunpack.c.h.s8.bf16 %v5690_v51  ;;  %v6059_v35 = vunpack.c.l.s8.bf16 %v5699_v6  ;;  %v6067_v13 = vunpack.c.h.s8.bf16 %v5699_v6 }
 0x992   :  { %6897 = vmatpush1.bf16.msra.mxu1 %v5946_v41  ;;  %v5698_v41 = vld [vmem:[#allocation22 + $0x370] sm:$0xff] }
 0x993   :  { %6898 = vmatprep.subr.bf16.mxu1 %v5955_v12  ;;  %v6058_v12 = vunpack.c.l.s8.bf16 %v5698_v41 }
 0x996   :  { %6899 = vmatpush1.bf16.msra.mxu1 %v5954_v19  ;;  %v5707_v19 = vld [vmem:[#allocation22 + $0x3b8] sm:$0xff] }
 0x997   :  { %6900 = vmatprep.subr.bf16.mxu1 %v5963_v9  ;;  %v6066_v9 = vunpack.c.h.s8.bf16 %v5698_v41  ;;  %v6075_v57 = vunpack.c.l.s8.bf16 %v5707_v19  ;;  %v6083_v1 = vunpack.c.h.s8.bf16 %v5707_v19 }
 0x99a   :  { %6901 = vmatpush1.bf16.msra.mxu1 %v5962_v61  ;;  %v5706_v61 = vld [vmem:[#allocation22 + $0x3b0] sm:$0xff] }
 0x99b   :  { %6902 = vmatprep.subr.bf16.mxu1 %v5971_v58  ;;  %v6074_v58 = vunpack.c.l.s8.bf16 %v5706_v61 }
 0x99e   :  { %6903 = vmatpush1.bf16.msra.mxu1 %v5970_v4  ;;  %v5715_v4 = vld [vmem:[#allocation22 + $0x3f8] sm:$0xff] }
 0x99f   :  { %6915 = vmatprep.subr.bf16.mxu1 %v5979_v25  ;;  %v6082_v25 = vunpack.c.h.s8.bf16 %v5706_v61  ;;  %v6091_v20 = vunpack.c.l.s8.bf16 %v5715_v4  ;;  %v6099_v5 = vunpack.c.h.s8.bf16 %v5715_v4 }
 0x9a1   :  { %6905 = vmatmul.mubr.bf16.vlgmr.msra.gmra.mrb[32].mxu1 %v11088_v43  ;;  %v6019_v43 = vunpack.c.h.s8.bf16 %v5675_v49 }
 0x9a2   :  { %6916 = vmatpush1.bf16.msra.mxu1 %v5978_v31  ;;  %6947 = vmatprep.mubr.bf16.mxu1 %v11090_v17  ;;  %v6018_v17 = vunpack.c.h.s8.bf16 %v5674_v60  ;;  %v5714_v31 = vld [vmem:[#allocation22 + $0x3f0] sm:$0xff] }
 0x9a3   :  { %6917 = vmatprep.subr.bf16.mxu1 %v5987_v50  ;;  %v6090_v50 = vunpack.c.l.s8.bf16 %v5714_v31 }
 0x9a6   :  { %6918 = vmatpush1.bf16.msra.mxu1 %v5986_v37  ;;  %v5723_v37 = vld [vmem:[#allocation22 + $0x438] sm:$0xff] }
 0x9a7   :  { %6919 = vmatprep.subr.bf16.mxu1 %v5995_v24  ;;  %v6098_v24 = vunpack.c.h.s8.bf16 %v5714_v31  ;;  %v6107_v2 = vunpack.c.l.s8.bf16 %v5723_v37  ;;  %v6115_v49 = vunpack.c.h.s8.bf16 %v5723_v37 }
 0x9aa   :  { %6920 = vmatpush1.bf16.msra.mxu1 %v5994_v36  ;;  %v5722_v36 = vld [vmem:[#allocation22 + $0x430] sm:$0xff] }
 0x9ab   :  { %6921 = vmatprep.subr.bf16.mxu1 %v6003_v32  ;;  %v6106_v32 = vunpack.c.l.s8.bf16 %v5722_v36 }
 0x9ae   :  { %6922 = vmatpush1.bf16.msra.mxu1 %v6002_v42  ;;  %v5731_v42 = vld [vmem:[#allocation22 + $0x478] sm:$0xff] }
 0x9af   :  { %6923 = vmatprep.subr.bf16.mxu1 %v6011_v59  ;;  %v6114_v59 = vunpack.c.h.s8.bf16 %v5722_v36  ;;  %v6123_v60 = vunpack.c.l.s8.bf16 %v5731_v42  ;;  %v6131_v11 = vunpack.c.h.s8.bf16 %v5731_v42 }
 0x9b2   :  { %6924 = vmatpush1.bf16.msra.mxu1 %v6010_v47  ;;  %v5730_v47 = vld [vmem:[#allocation22 + $0x470] sm:$0xff] }
 0x9b3   :  { %6925 = vmatprep.subr.bf16.mxu1 %v6019_v43  ;;  %v6122_v43 = vunpack.c.l.s8.bf16 %v5730_v47 }
 0x9b6   :  { %6926 = vmatpush1.bf16.msra.mxu1 %v6018_v17  ;;  %v5739_v17 = vld [vmem:[#allocation22 + $0x4b8] sm:$0xff] }
 0x9b7   :  { %6927 = vmatprep.subr.bf16.mxu1 %v6027_v21  ;;  %v6130_v21 = vunpack.c.h.s8.bf16 %v5730_v47  ;;  %v6139_v23 = vunpack.c.l.s8.bf16 %v5739_v17 }
 0x9ba   :  { %6928 = vmatpush1.bf16.msra.mxu1 %v6026_v46  ;;  %v5738_v46 = vld [vmem:[#allocation22 + $0x4b0] sm:$0xff] }
 0x9bb   :  { %6929 = vmatprep.subr.bf16.mxu1 %v6035_v7  ;;  %v6138_v7 = vunpack.c.l.s8.bf16 %v5738_v46 }
 0x9be   :  { %6930 = vmatpush1.bf16.msra.mxu1 %v6034_v15  ;;  %v6155_v15 = vunpack.c.l.s8.bf16 %v5747_v63 }
 0x9bf   :  { %6931 = vmatprep.subr.bf16.mxu1 %v6043_v40  ;;  %v5746_v40 = vld [vmem:[#allocation22 + $0x4f0] sm:$0xff] }
 0x9c0   :  { %v6154_v51 = vunpack.c.l.s8.bf16 %v5746_v40  ;;  %v6162_v6 = vunpack.c.h.s8.bf16 %v5746_v40 }
 0x9c2   :  { %6932 = vmatpush1.bf16.msra.mxu1 %v6042_v18  ;;  %v6163_v18 = vunpack.c.h.s8.bf16 %v5747_v63 }
 0x9c3   :  { %6933 = vmatprep.subr.bf16.mxu1 %v6051_v33  ;;  %v5755_v33 = vld [vmem:[#allocation22 + $0x538] sm:$0xff] }
 0x9c6   :  { %6934 = vmatpush1.bf16.msra.mxu1 %v6050_v39  ;;  %v6171_v39 = vunpack.c.l.s8.bf16 %v5755_v33 }
 0x9c7   :  { %6935 = vmatprep.subr.bf16.mxu1 %v6059_v35  ;;  %v5754_v35 = vld [vmem:[#allocation22 + $0x530] sm:$0xff] }
 0x9c8   :  { %v6170_v41 = vunpack.c.l.s8.bf16 %v5754_v35  ;;  %v6178_v19 = vunpack.c.h.s8.bf16 %v5754_v35 }
 0x9ca   :  { %6936 = vmatpush1.bf16.msra.mxu1 %v6058_v12  ;;  %v6179_v12 = vunpack.c.h.s8.bf16 %v5755_v33  ;;  %v5810_v33 = vld [vmem:[#allocation22 + $0x6f0] sm:$0xff] }
 0x9cb   :  { %6937 = vmatprep.subr.bf16.mxu1 %v6067_v13  ;;  %v5763_v13 = vld [vmem:[#allocation22 + $0x578] sm:$0xff] }
 0x9ce   :  { %6938 = vmatpush1.bf16.msra.mxu1 %v6066_v9  ;;  %v6187_v9 = vunpack.c.l.s8.bf16 %v5763_v13 }
 0x9cf   :  { %6939 = vmatprep.subr.bf16.mxu1 %v6075_v57  ;;  %v5762_v57 = vld [vmem:[#allocation22 + $0x570] sm:$0xff] }
 0x9d0   :  { %v6186_v61 = vunpack.c.l.s8.bf16 %v5762_v57  ;;  %v6194_v4 = vunpack.c.h.s8.bf16 %v5762_v57 }
 0x9d2   :  { %6940 = vmatpush1.bf16.msra.mxu1 %v6074_v58  ;;  %v6195_v58 = vunpack.c.h.s8.bf16 %v5763_v13 }
 0x9d3   :  { %6941 = vmatprep.subr.bf16.mxu1 %v6083_v1  ;;  %v5771_v1 = vld [vmem:[#allocation22 + $0x5b8] sm:$0xff] }
 0x9d6   :  { %6942 = vmatpush1.bf16.msra.mxu1 %v6082_v25  ;;  %v6203_v25 = vunpack.c.l.s8.bf16 %v5771_v1 }
 0x9d7   :  { %6943 = vmatprep.subr.bf16.mxu1 %v6091_v20  ;;  %v5770_v20 = vld [vmem:[#allocation22 + $0x5b0] sm:$0xff] }
 0x9d8   :  { %v6202_v31 = vunpack.c.l.s8.bf16 %v5770_v20  ;;  %v6210_v37 = vunpack.c.h.s8.bf16 %v5770_v20 }
 0x9da   :  { %6944 = vmatpush1.bf16.msra.mxu1 %v6090_v50  ;;  %v6211_v50 = vunpack.c.h.s8.bf16 %v5771_v1 }
 0x9db   :  { %6945 = vmatprep.subr.bf16.mxu1 %v6099_v5  ;;  %v5779_v5 = vld [vmem:[#allocation22 + $0x5f8] sm:$0xff] }
 0x9de   :  { %6946 = vmatpush1.bf16.msra.mxu1 %v6098_v24  ;;  %v6219_v24 = vunpack.c.l.s8.bf16 %v5779_v5 }
 0x9df   :  { %6958 = vmatprep.subr.bf16.mxu1 %v6107_v2  ;;  %v5778_v2 = vld [vmem:[#allocation22 + $0x5f0] sm:$0xff] }
 0x9e0   :  { %v6218_v36 = vunpack.c.l.s8.bf16 %v5778_v2  ;;  %v6226_v42 = vunpack.c.h.s8.bf16 %v5778_v2 }
 0x9e1   :  { %6948 = vmatmul.mubr.bf16.vlgmr.msra.gmra.mrb[32].mxu1 %v11094_v38  ;;  %v6147_v38 = vunpack.c.h.s8.bf16 %v5739_v17 }
 0x9e2   :  { %6959 = vmatpush1.bf16.msra.mxu1 %v6106_v32  ;;  %6990 = vmatprep.mubr.bf16.mxu1 %v11099_v0  ;;  %v6146_v0 = vunpack.c.h.s8.bf16 %v5738_v46  ;;  %v6227_v32 = vunpack.c.h.s8.bf16 %v5779_v5 }
 0x9e3   :  { %6960 = vmatprep.subr.bf16.mxu1 %v6115_v49  ;;  %v5787_v49 = vld [vmem:[#allocation22 + $0x638] sm:$0xff] }
 0x9e6   :  { %6961 = vmatpush1.bf16.msra.mxu1 %v6114_v59  ;;  %v6235_v59 = vunpack.c.l.s8.bf16 %v5787_v49 }
 0x9e7   :  { %6962 = vmatprep.subr.bf16.mxu1 %v6123_v60  ;;  %v5786_v60 = vld [vmem:[#allocation22 + $0x630] sm:$0xff] }
 0x9e8   :  { %v6234_v47 = vunpack.c.l.s8.bf16 %v5786_v60  ;;  %v6242_v17 = vunpack.c.h.s8.bf16 %v5786_v60 }
 0x9ea   :  { %6963 = vmatpush1.bf16.msra.mxu1 %v6122_v43  ;;  %v6243_v43 = vunpack.c.h.s8.bf16 %v5787_v49 }
 0x9eb   :  { %6964 = vmatprep.subr.bf16.mxu1 %v6131_v11  ;;  %v5795_v11 = vld [vmem:[#allocation22 + $0x678] sm:$0xff] }
 0x9ee   :  { %6965 = vmatpush1.bf16.msra.mxu1 %v6130_v21  ;;  %v6251_v21 = vunpack.c.l.s8.bf16 %v5795_v11 }
 0x9ef   :  { %6966 = vmatprep.subr.bf16.mxu1 %v6139_v23  ;;  %v5794_v23 = vld [vmem:[#allocation22 + $0x670] sm:$0xff] }
 0x9f0   :  { %v6250_v46 = vunpack.c.l.s8.bf16 %v5794_v23  ;;  %v6258_v63 = vunpack.c.h.s8.bf16 %v5794_v23 }
 0x9f2   :  { %6967 = vmatpush1.bf16.msra.mxu1 %v6138_v7  ;;  %v6259_v7 = vunpack.c.h.s8.bf16 %v5795_v11 }
 0x9f3   :  { %6968 = vmatprep.subr.bf16.mxu1 %v6147_v38  ;;  %v5803_v38 = vld [vmem:[#allocation22 + $0x6b8] sm:$0xff] }
 0x9f6   :  { %6969 = vmatpush1.bf16.msra.mxu1 %v6146_v0  ;;  %v6267_v0 = vunpack.c.l.s8.bf16 %v5803_v38 }
 0x9f7   :  { %6970 = vmatprep.subr.bf16.mxu1 %v6155_v15  ;;  %v5802_v15 = vld [vmem:[#allocation22 + $0x6b0] sm:$0xff] }
 0x9f8   :  { %v6266_v40 = vunpack.c.l.s8.bf16 %v5802_v15 }
 0x9fa   :  { %6971 = vmatpush1.bf16.msra.mxu1 %v6154_v51  ;;  %v5811_v51 = vld [vmem:[#allocation22 + $0x6f8] sm:$0xff] }
 0x9fb   :  { %6972 = vmatprep.subr.bf16.mxu1 %v6163_v18  ;;  %v6283_v18 = vunpack.c.l.s8.bf16 %v5811_v51  ;;  %v6291_v13 = vunpack.c.h.s8.bf16 %v5811_v51 }
 0x9fe   :  { %6973 = vmatpush1.bf16.msra.mxu1 %v6162_v6 }
 0x9ff   :  { %6974 = vmatprep.subr.bf16.mxu1 %v6171_v39 }
 0xa02   :  { %6975 = vmatpush1.bf16.msra.mxu1 %v6170_v41  ;;  %v6282_v41 = vunpack.c.l.s8.bf16 %v5810_v33 }
 0xa03   :  { %6976 = vmatprep.subr.bf16.mxu1 %v6179_v12 }
 0xa06   :  { %6977 = vmatpush1.bf16.msra.mxu1 %v6178_v19  ;;  %v5819_v19 = vld [vmem:[#allocation22 + $0x738] sm:$0xff] }
 0xa07   :  { %6978 = vmatprep.subr.bf16.mxu1 %v6187_v9  ;;  %v6290_v9 = vunpack.c.h.s8.bf16 %v5810_v33  ;;  %v6299_v57 = vunpack.c.l.s8.bf16 %v5819_v19  ;;  %v6307_v1 = vunpack.c.h.s8.bf16 %v5819_v19  ;;  %v7615_v19 = vld [vmem:[%s11930_s19 + $0x6] sm:$0x3] }
 0xa0a   :  { %6979 = vmatpush1.bf16.msra.mxu1 %v6186_v61  ;;  %v5818_v61 = vld [vmem:[#allocation22 + $0x730] sm:$0xff] }
 0xa0b   :  { %6980 = vmatprep.subr.bf16.mxu1 %v6195_v58  ;;  %v6298_v58 = vunpack.c.l.s8.bf16 %v5818_v61 }
 0xa0e   :  { %6981 = vmatpush1.bf16.msra.mxu1 %v6194_v4  ;;  %v5827_v4 = vld [vmem:[#allocation22 + $0x778] sm:$0xff] }
 0xa0f   :  { %6982 = vmatprep.subr.bf16.mxu1 %v6203_v25  ;;  %v6306_v25 = vunpack.c.h.s8.bf16 %v5818_v61  ;;  %v6315_v20 = vunpack.c.l.s8.bf16 %v5827_v4  ;;  %v6323_v5 = vunpack.c.h.s8.bf16 %v5827_v4 }
 0xa12   :  { %6983 = vmatpush1.bf16.msra.mxu1 %v6202_v31  ;;  %v5826_v31 = vld [vmem:[#allocation22 + $0x770] sm:$0xff] }
 0xa13   :  { %6984 = vmatprep.subr.bf16.mxu1 %v6211_v50  ;;  %v6314_v50 = vunpack.c.l.s8.bf16 %v5826_v31 }
 0xa16   :  { %6985 = vmatpush1.bf16.msra.mxu1 %v6210_v37  ;;  %v5835_v37 = vld [vmem:[#allocation22 + $0x7b8] sm:$0xff] }
 0xa17   :  { %6986 = vmatprep.subr.bf16.mxu1 %v6219_v24  ;;  %v6322_v24 = vunpack.c.h.s8.bf16 %v5826_v31  ;;  %v6331_v2 = vunpack.c.l.s8.bf16 %v5835_v37  ;;  %v6339_v49 = vunpack.c.h.s8.bf16 %v5835_v37  ;;  %v7634_v37 = vld [vmem:[%s11930_s19 + $0x2c] sm:$0x3] }
 0xa1a   :  { %6987 = vmatpush1.bf16.msra.mxu1 %v6218_v36  ;;  %v5834_v36 = vld [vmem:[#allocation22 + $0x7b0] sm:$0xff] }
 0xa1b   :  { %6988 = vmatprep.subr.bf16.mxu1 %v6227_v32  ;;  %v6330_v32 = vunpack.c.l.s8.bf16 %v5834_v36 }
 0xa1e   :  { %6989 = vmatpush1.bf16.msra.mxu1 %v6226_v42  ;;  %v5843_v42 = vld [vmem:[#allocation22 + $0x7f8] sm:$0xff] }
 0xa1f   :  { %7001 = vmatprep.subr.bf16.mxu1 %v6235_v59  ;;  %v6338_v59 = vunpack.c.h.s8.bf16 %v5834_v36  ;;  %v6347_v60 = vunpack.c.l.s8.bf16 %v5843_v42  ;;  %v6355_v11 = vunpack.c.h.s8.bf16 %v5843_v42  ;;  %v7762_v42 = vunpack.c.l.s8.bf16 %v7634_v37  ;;  %v7624_v37 = vld [vmem:[%s11930_s19 + $0x18] sm:$0x3] }
 0xa21   :  { %6991 = vmatmul.mubr.bf16.vlgmr.msra.gmra.mrb[32].mxu1 %v11127_v52  ;;  %v6275_v52 = vunpack.c.h.s8.bf16 %v5803_v38  ;;  %v7628_v38 = vld [vmem:[%s11930_s19 + $0x20] sm:$0x3] }
 0xa22   :  { %7002 = vmatpush1.bf16.msra.mxu1 %v6234_v47  ;;  %7033 = vmatprep.mubr.bf16.mxu1 %v11129_v62  ;;  %v6274_v62 = vunpack.c.h.s8.bf16 %v5802_v15  ;;  %v5842_v47 = vld [vmem:[#allocation22 + $0x7f0] sm:$0xff]  ;;  %v7756_v15 = vunpack.c.l.s8.bf16 %v7628_v38 }
 0xa23   :  { %7003 = vmatprep.subr.bf16.mxu1 %v6243_v43  ;;  %v6346_v43 = vunpack.c.l.s8.bf16 %v5842_v47  ;;  %v6354_v23 = vunpack.c.h.s8.bf16 %v5842_v47  ;;  %v7619_v47 = vld [vmem:[%s11930_s19 + $0xe] sm:$0x3] }
 0xa26   :  { %7004 = vmatpush1.bf16.msra.mxu1 %v6242_v17 }
 0xa27   :  { %7005 = vmatprep.subr.bf16.mxu1 %v6251_v21 }
 0xa2a   :  { %7006 = vmatpush1.bf16.msra.mxu1 %v6250_v46 }
 0xa2b   :  { %7007 = vmatprep.subr.bf16.mxu1 %v6259_v7 }
 0xa2e   :  { %7008 = vmatpush1.bf16.msra.mxu1 %v6258_v63  ;;  %v7629_v63 = vld [vmem:[%s11930_s19 + $0x22] sm:$0x3] }
 0xa2f   :  { %7009 = vmatprep.subr.bf16.mxu1 %v6267_v0  ;;  %v7612_v0 = vld [vmem:[%s11930_s19] sm:$0x3] }
 0xa30   :  { %v7740_v51 = vunpack.c.l.s8.bf16 %v7612_v0 }
 0xa32   :  { %7010 = vmatpush1.bf16.msra.mxu1 %v6266_v40  ;;  %v7757_v40 = vunpack.c.l.s8.bf16 %v7629_v63  ;;  %v7747_v63 = vunpack.c.l.s8.bf16 %v7619_v47 }
 0xa33   :  { %7011 = vmatprep.subr.bf16.mxu1 %v6275_v52  ;;  %v7613_v52 = vld [vmem:[%s11930_s19 + $0x2] sm:$0x3] }
 0xa34   :  { %v11227_v6 = vpop.f32.mrb[28].mxu1 }
 0xa35   :  { %v11229_v39 = vpop.f32.mrb[29].mxu1 }
 0xa36   :  { %v11231_v35 = vpop.f32.mrb[30].mxu1  ;;  %7012 = vmatpush1.bf16.msra.mxu1 %v6274_v62  ;;  %v7631_v62 = vld [vmem:[%s11930_s19 + $0x26] sm:$0x3] }
 0xa37   :  { %v11233_v12 = vpop.f32.mrb[31].mxu1  ;;  %7013 = vmatprep.subr.bf16.mxu1 %v6283_v18  ;;  %v7741_v18 = vunpack.c.l.s8.bf16 %v7613_v52  ;;  %v7620_v52 = vld [vmem:[%s11930_s19 + $0x10] sm:$0x3] }
 0xa39   :  { %v8637_v31 = vcombine.low %v7740_v51, %v7741_v18  ;;  %v7621_v51 = vld [vmem:[%s11930_s19 + $0x12] sm:$0x3] }
 0xa3a   :  { %7014 = vmatpush1.bf16.msra.mxu1 %v6282_v41  ;;  %v7759_v41 = vunpack.c.l.s8.bf16 %v7631_v62  ;;  %v7639_v62 = vld [vmem:[%s11930_s19 + $0x36] sm:$0x3] }
 0xa3b   :  { %7015 = vmatprep.subr.bf16.mxu1 %v6291_v13  ;;  %v7614_v13 = vld [vmem:[%s11930_s19 + $0x4] sm:$0x3] }
 0xa3c   :  { %v7742_v61 = vunpack.c.l.s8.bf16 %v7614_v13 }
 0xa3e   :  { %7016 = vmatpush1.bf16.msra.mxu1 %v6290_v9  ;;  %v7632_v9 = vld [vmem:[%s11930_s19 + $0x28] sm:$0x3] }
 0xa3f   :  { %7017 = vmatprep.subr.bf16.mxu1 %v6299_v57  ;;  %v8645_v57 = vcombine.low %v7756_v15, %v7757_v40  ;;  %v7760_v4 = vunpack.c.l.s8.bf16 %v7632_v9  ;;  %v7767_v9 = vunpack.c.l.s8.bf16 %v7639_v62 }
 0xa41   :  { %8725 = vmatprep.subr.bf16.mxu0 %v8645_v57  ;;  %v7622_v57 = vld [vmem:[%s11930_s19 + $0x14] sm:$0x3] }
 0xa42   :  { %7018 = vmatpush1.bf16.msra.mxu1 %v6298_v58  ;;  %v7743_v58 = vunpack.c.l.s8.bf16 %v7615_v19  ;;  %8726 = vmatpush3.bf16.msra.mxu0 %v8637_v31 }
 0xa43   :  { %7019 = vmatprep.subr.bf16.mxu1 %v6307_v1  ;;  %v7633_v1 = vld [vmem:[%s11930_s19 + $0x2a] sm:$0x3] }
 0xa46   :  { %7020 = vmatpush1.bf16.msra.mxu1 %v6306_v25  ;;  %v7616_v25 = vld [vmem:[%s11930_s19 + $0x8] sm:$0x3] }
 0xa47   :  { %7021 = vmatprep.subr.bf16.mxu1 %v6315_v20  ;;  %v7617_v20 = vld [vmem:[%s11930_s19 + $0xa] sm:$0x3]  ;;  %v7744_v36 = vunpack.c.l.s8.bf16 %v7616_v25  ;;  %v7750_v25 = vunpack.c.l.s8.bf16 %v7622_v57 }
 0xa4a   :  { %7022 = vmatpush1.bf16.msra.mxu1 %v6314_v50 }
 0xa4b   :  { %7023 = vmatprep.subr.bf16.mxu1 %v6323_v5  ;;  %v7761_v5 = vunpack.c.l.s8.bf16 %v7633_v1  ;;  %v7641_v1 = vld [vmem:[%s11930_s19 + $0x3a] sm:$0x3] }
 0xa4e   :  { %7024 = vmatpush1.bf16.msra.mxu1 %v6322_v24  ;;  %v7635_v24 = vld [vmem:[%s11930_s19 + $0x2e] sm:$0x3] }
 0xa4f   :  { %7025 = vmatprep.subr.bf16.mxu1 %v6331_v2  ;;  %v8638_v2 = vcombine.low %v7742_v61, %v7743_v58  ;;  %v7623_v61 = vld [vmem:[%s11930_s19 + $0x16] sm:$0x3]  ;;  %v7640_v58 = vld [vmem:[%s11930_s19 + $0x38] sm:$0x3] }
 0xa52   :  { %7026 = vmatpush1.bf16.msra.mxu1 %v6330_v32  ;;  %v7745_v32 = vunpack.c.l.s8.bf16 %v7617_v20  ;;  %v7751_v20 = vunpack.c.l.s8.bf16 %v7623_v61 }
 0xa53   :  { %7027 = vmatprep.subr.bf16.mxu1 %v6339_v49  ;;  %v8647_v49 = vcombine.low %v7760_v4, %v7761_v5  ;;  %v7769_v5 = vunpack.c.l.s8.bf16 %v7641_v1 }
 0xa56   :  { %7028 = vmatpush1.bf16.msra.mxu1 %v6338_v59  ;;  %v7763_v59 = vunpack.c.l.s8.bf16 %v7635_v24  ;;  %v7625_v24 = vld [vmem:[%s11930_s19 + $0x1a] sm:$0x3] }
 0xa57   :  { %7029 = vmatprep.subr.bf16.mxu1 %v6347_v60  ;;  %v7618_v60 = vld [vmem:[%s11930_s19 + $0xc] sm:$0x3] }
 0xa58   :  { %v7746_v38 = vunpack.c.l.s8.bf16 %v7618_v60  ;;  %v8648_v0 = vcombine.low %v7762_v42, %v7763_v59  ;;  %v7753_v42 = vunpack.c.l.s8.bf16 %v7625_v24 }
 0xa59   :  { %v11235_v17 = vpop.f32.mrb[40].mxu0 }
 0xa5a   :  { %v11237_v21 = vpop.f32.mrb[41].mxu0  ;;  %7030 = vmatpush1.bf16.msra.mxu1 %v6346_v43  ;;  %v7636_v43 = vld [vmem:[%s11930_s19 + $0x30] sm:$0x3]  ;;  %v8640_v18 = vcombine.low %v7746_v38, %v7747_v63  ;;  %v7661_v38 = vld [vmem:[%s11930_s19 + $0x62] sm:$0x3] }
 0xa5b   :  { %v11239_v46 = vpop.f32.mrb[42].mxu0  ;;  %7031 = vmatprep.subr.bf16.mxu1 %v6355_v11  ;;  %v7637_v11 = vld [vmem:[%s11930_s19 + $0x32] sm:$0x3]  ;;  %v7764_v15 = vunpack.c.l.s8.bf16 %v7636_v43  ;;  %v7626_v43 = vld [vmem:[%s11930_s19 + $0x1c] sm:$0x3] }
 0xa5c   :  { %v11241_v7 = vpop.f32.mrb[43].mxu0  ;;  %v7765_v40 = vunpack.c.l.s8.bf16 %v7637_v11  ;;  %v7627_v11 = vld [vmem:[%s11930_s19 + $0x1e] sm:$0x3] }
 0xa5d   :  { %v11346_v63 = vld [vmem:[#allocation23] ss:$2 sm:$0xff] }
 0xa5e   :  { %7032 = vmatpush1.bf16.msra.mxu1 %v6354_v23  ;;  %v8639_v23 = vcombine.low %v7744_v36, %v7745_v32  ;;  %v8649_v13 = vcombine.low %v7764_v15, %v7765_v40  ;;  %v7643_v36 = vld [vmem:[%s11930_s19 + $0x3e] sm:$0x3]  ;;  %v8642_v32 = vcombine.low %v7750_v25, %v7751_v20  ;;  %v7061_v15 = vrot.slane %v11346_v63, %v10225_v29 }
 0xa5f   :  { %v7771_v47 = vunpack.c.l.s8.bf16 %v7643_v36  ;;  %v7065_v1 = vrot.slane %v11346_v63, %v10296_v44  ;;  %v7069_v25 = vrot.slane %v11346_v63, %v10299_v53 }
 0xa60   :  { %v7089_v57 = vmul.f32 %v7061_v15, %v11229_v39 }
 0xa61   :  { %7034 = vmatmul.mubr.bf16.vlgmr.msra.gmra.mrb[32].mxu1 %v11137_v3  ;;  %v7630_v3 = vld [vmem:[%s11930_s19 + $0x24] sm:$0x3] }
 0xa62   :  { %v7758_v33 = vunpack.c.l.s8.bf16 %v7630_v3  ;;  %v7638_v3 = vld [vmem:[%s11930_s19 + $0x34] sm:$0x3] }
 0xa63   :  { %v7766_v19 = vunpack.c.l.s8.bf16 %v7638_v3 }
 0xa64   :  { %v8646_v50 = vcombine.low %v7758_v33, %v7759_v41  ;;  %v7748_v33 = vunpack.c.l.s8.bf16 %v7620_v52  ;;  %v7749_v41 = vunpack.c.l.s8.bf16 %v7621_v51  ;;  %v7754_v52 = vunpack.c.l.s8.bf16 %v7626_v43 }
 0xa65   :  { %v8650_v31 = vcombine.low %v7766_v19, %v7767_v9  ;;  %v7755_v51 = vunpack.c.l.s8.bf16 %v7627_v11 }
 0xa66   :  { %8727 = vmatprep.subr.bf16.mxu0 %v8646_v50  ;;  %v8641_v4 = vcombine.low %v7748_v33, %v7749_v41  ;;  %v7768_v50 = vunpack.c.l.s8.bf16 %v7640_v58  ;;  %v7097_v41 = vmul.f32 %v7061_v15, %v11233_v12 }
 0xa67   :  { %8728 = vmatpush3.bf16.msra.mxu0 %v8638_v2  ;;  %v7642_v2 = vld [vmem:[%s11930_s19 + $0x3c] sm:$0x3]  ;;  %v8644_v58 = vcombine.low %v7754_v52, %v7755_v51 }
 0xa68   :  { %8729 = vmatprep.subr.bf16.mxu0 %v8647_v49  ;;  %v7752_v49 = vunpack.c.l.s8.bf16 %v7624_v37  ;;  %v8651_v59 = vcombine.low %v7768_v50, %v7769_v5  ;;  %v7770_v60 = vunpack.c.l.s8.bf16 %v7642_v2  ;;  %v7090_v50 = vmul.f32 %v7065_v1, %v11235_v17 }
 0xa6a   :  { %v8643_v40 = vcombine.low %v7752_v49, %v7753_v42  ;;  %v8652_v3 = vcombine.low %v7770_v60, %v7771_v47 }
 0xa6b   :  { %8730 = vmatpush3.bf16.msra.mxu0 %v8639_v23  ;;  %v7660_v23 = vld [vmem:[%s11930_s19 + $0x60] sm:$0x3] }
 0xa6c   :  { %8731 = vmatprep.subr.bf16.mxu0 %v8648_v0  ;;  %v7057_v0 = vrot.slane %v11346_v63, %v10222_v26  ;;  %v7788_v62 = vunpack.c.l.s8.bf16 %v7660_v23 }
 0xa6e   :  { %v7096_v33 = vmul.f32 %v7057_v0, %v11231_v35  ;;  %v7088_v9 = vmul.f32 %v7057_v0, %v11227_v6  ;;  %v7098_v6 = vmul.f32 %v7065_v1, %v11239_v46 }
 0xa6f   :  { %8732 = vmatpush3.bf16.msra.mxu0 %v8640_v18  ;;  %v7789_v18 = vunpack.c.l.s8.bf16 %v7661_v38 }
 0xa70   :  { %8733 = vmatprep.subr.bf16.mxu0 %v8649_v13  ;;  %v11354_v13 = vld [vmem:[#allocation23 + $0x1] ss:$2 sm:$0xff] }
 0xa71   :  { %v7116_v19 = vrot.slane %v11354_v13, %v10222_v26  ;;  %v7120_v61 = vrot.slane %v11354_v13, %v10225_v29  ;;  %v8661_v35 = vcombine.low %v7788_v62, %v7789_v18  ;;  %v7124_v5 = vrot.slane %v11354_v13, %v10296_v44 }
 0xa72   :  { %v7128_v37 = vrot.slane %v11354_v13, %v10299_v53 }
 0xa73   :  { %8734 = vmatpush3.bf16.msra.mxu0 %v8641_v4  ;;  %v11364_v12 = vadd.f32 %v7116_v19, %v7096_v33  ;;  %v11366_v4 = vadd.f32 %v7120_v61, %v7097_v41  ;;  %v11371_v39 = vadd.f32 %v7116_v19, %v7088_v9  ;;  %v11373_v20 = vadd.f32 %v7120_v61, %v7089_v57 }
 0xa74   :  { %8735 = vmatprep.subr.bf16.mxu0 %v8650_v31  ;;  %v7099_v31 = vmul.f32 %v7069_v25, %v11241_v7  ;;  %v7091_v7 = vmul.f32 %v7069_v25, %v11237_v21  ;;  %v11390_v36 = vadd.f32 %v7124_v5, %v7098_v6 }
 0xa75   :  { %v7175_v24 = vadd.f32 %v11364_v12, %v11371_v39  ;;  %v7235_v46 = vmul.f32 %v11364_v12, %v11364_v12  ;;  %v7236_v2 = vmul.f32 %v11366_v4, %v11366_v4  ;;  %v7182_v17 = vadd.f32 %v11366_v4, %v11373_v20 }
 0xa76   :  { %12076 = vst [vmem:[#allocation50_spill] sm:$0xff] %v11390_v36  ;;  %v7228_v49 = vmul.f32 %v11373_v20, %v11373_v20  ;;  %v11396_v42 = vadd.f32 %v7128_v37, %v7099_v31  ;;  %v11400_v11 = vadd.f32 %v7128_v37, %v7091_v7  ;;  %v7237_v38 = vmul.f32 %v11390_v36, %v11390_v36 }
 0xa77   :  { %8736 = vmatpush3.bf16.msra.mxu0 %v8642_v32  ;;  %v7227_v32 = vmul.f32 %v11371_v39, %v11371_v39  ;;  %v7176_v60 = vrot.slane %v7175_v24, 4  ;;  %v7183_v21 = vrot.slane %v7182_v17, 4 }
 0xa78   :  { %8737 = vmatprep.subr.bf16.mxu0 %v8651_v59  ;;  %v11398_v59 = vadd.f32 %v7124_v5, %v7090_v50  ;;  %v7262_v43 = vadd.f32 %v7236_v2, %v7228_v49  ;;  %v7196_v0 = vadd.f32 %v11396_v42, %v11400_v11  ;;  %v7230_v18 = vmul.f32 %v11400_v11, %v11400_v11 }
 0xa79   :  { %v7255_v47 = vadd.f32 %v7235_v46, %v7227_v32  ;;  %v7177_v52 = vadd.f32 %v7176_v60, %v7175_v24  ;;  %v7184_v62 = vadd.f32 %v7183_v21, %v7182_v17 }
 0xa7a   :  { %12077 = vst [vmem:[#allocation49_spill] sm:$0xff] %v11398_v59  ;;  %v7189_v23 = vadd.f32 %v11390_v36, %v11398_v59  ;;  %v7229_v15 = vmul.f32 %v11398_v59, %v11398_v59  ;;  %v7197_v19 = vrot.slane %v7196_v0, 4 }
 0xa7b   :  { %8738 = vmatpush3.bf16.msra.mxu0 %v8643_v40  ;;  %v7238_v40 = vmul.f32 %v11396_v42, %v11396_v42  ;;  %v7256_v51 = vrot.slane %v7255_v47, 4  ;;  %v7178_v57 = vrot.slane %v7177_v52, 2  ;;  %v7185_v1 = vrot.slane %v7184_v62, 2 }
 0xa7c   :  { %8739 = vmatprep.subr.bf16.mxu0 %v8652_v3  ;;  %v7263_v3 = vrot.slane %v7262_v43, 4  ;;  %v7190_v33 = vrot.slane %v7189_v23, 4  ;;  %v7269_v41 = vadd.f32 %v7237_v38, %v7229_v15  ;;  %v7198_v6 = vadd.f32 %v7197_v19, %v7196_v0 }
 0xa7d   :  { %v7276_v9 = vadd.f32 %v7238_v40, %v7230_v18  ;;  %v7257_v61 = vadd.f32 %v7256_v51, %v7255_v47  ;;  %v7179_v50 = vadd.f32 %v7178_v57, %v7177_v52  ;;  %v7186_v24 = vadd.f32 %v7185_v1, %v7184_v62 }
 0xa7e   :  { %v7270_v25 = vrot.slane %v7269_v41, 4  ;;  %v7199_v7 = vrot.slane %v7198_v6, 2  ;;  %v7073_v52 = vrot.slane %v11346_v63, %v10230_v48  ;;  %v7077_v18 = vrot.slane %v11346_v63, %v10235_v55 }
 0xa7f   :  { %8740 = vmatpush3.bf16.msra.mxu0 %v8644_v58  ;;  %v7264_v58 = vadd.f32 %v7263_v3, %v7262_v43  ;;  %v7277_v31 = vrot.slane %v7276_v9, 4  ;;  %v7258_v5 = vrot.slane %v7257_v61, 2  ;;  %v7180_v32 = vrot.slane %v7179_v50, 1 }
 0xa80   :  { %8747 = vmatprep.subr.bf16.mxu0 %v8661_v35  ;;  %v7191_v35 = vadd.f32 %v7190_v33, %v7189_v23  ;;  %v7271_v2 = vadd.f32 %v7270_v25, %v7269_v41  ;;  %v7187_v21 = vrot.slane %v7186_v24, 1  ;;  %v7200_v43 = vadd.f32 %v7199_v7, %v7198_v6 }
 0xa81   :  { %v7265_v37 = vrot.slane %v7264_v58, 2  ;;  %v7278_v17 = vadd.f32 %v7277_v31, %v7276_v9  ;;  %v7259_v49 = vadd.f32 %v7258_v5, %v7257_v61  ;;  %v7181_v23 = vadd.f32 %v7180_v32, %v7179_v50 }
 0xa82   :  { %v7192_v46 = vrot.slane %v7191_v35, 2  ;;  %v7272_v47 = vrot.slane %v7271_v2, 2  ;;  %v7188_v51 = vadd.f32 %v7187_v21, %v7186_v24  ;;  %v7201_v33 = vrot.slane %v7200_v43, 1 }
 0xa83   :  { %v7266_v60 = vadd.f32 %v7265_v37, %v7264_v58  ;;  %v7279_v15 = vrot.slane %v7278_v17, 2  ;;  %v7260_v40 = vrot.slane %v7259_v49, 1  ;;  %v7132_v41 = vrot.slane %v11354_v13, %v10230_v48 }
 0xa84   :  { %v7193_v38 = vadd.f32 %v7192_v46, %v7191_v35  ;;  %v7273_v62 = vadd.f32 %v7272_v47, %v7271_v2  ;;  %v7136_v57 = vrot.slane %v11354_v13, %v10235_v55  ;;  %v11422_v61 = vmul.f32 0.0625, %v7181_v23 }
 0xa85   :  { %v7267_v0 = vrot.slane %v7266_v60, 1  ;;  %v7280_v19 = vadd.f32 %v7279_v15, %v7278_v17  ;;  %v7261_v58 = vadd.f32 %v7260_v40, %v7259_v49  ;;  %v11424_v6 = vmul.f32 0.0625, %v7188_v51 }
 0xa86   :  { %v7194_v3 = vrot.slane %v7193_v38, 1  ;;  %v7274_v50 = vrot.slane %v7273_v62, 1  ;;  %v7202_v37 = vadd.f32 %v7201_v33, %v7200_v43  ;;  %v7307_v49 = vmul.f32 %v11422_v61, %v11422_v61 }
 0xa87   :  { %v7268_v1 = vadd.f32 %v7267_v0, %v7266_v60  ;;  %v7281_v7 = vrot.slane %v7280_v19, 1  ;;  %v7299_v32 = vmul.f32 0.0625, %v7261_v58 }
 0xa88   :  { %v7195_v31 = vadd.f32 %v7194_v3, %v7193_v38  ;;  %v7308_v38 = vmul.f32 %v11424_v6, %v11424_v6  ;;  %v7275_v43 = vadd.f32 %v7274_v50, %v7273_v62  ;;  %v11440_v23 = vmul.f32 0.0625, %v7202_v37 }
 0xa89   :  { %v7300_v60 = vmul.f32 0.0625, %v7268_v1  ;;  %v7282_v51 = vadd.f32 %v7281_v7, %v7280_v19 }
 0xa8a   :  { %v11436_v47 = vmul.f32 0.0625, %v7195_v31 }
 0xa8b   :  { %v7302_v50 = vmul.f32 0.0625, %v7282_v51 }
 0xb34   :  { %v7035_v9 = vpop.f32.mrb[32].mxu1 }
 0xb35   :  { %v7092_v35 = vmul.f32 %v7073_v52, %v7035_v9  ;;  %v7037_v25 = vpop.f32.mrb[33].mxu1  ;;  %v7315_v9 = vsub.f32 %v7299_v32, %v7307_v49 }
 0xb36   :  { %v7093_v63 = vmul.f32 %v7077_v18, %v7037_v25  ;;  %v7039_v5 = vpop.f32.mrb[34].mxu1  ;;  %v7309_v25 = vmul.f32 %v11436_v47, %v11436_v47 }
 0xb37   :  { %v11426_v24 = vadd.f32 %v7132_v41, %v7092_v35  ;;  %v7100_v46 = vmul.f32 %v7073_v52, %v7039_v5  ;;  %v7041_v2 = vpop.f32.mrb[35].mxu1  ;;  %v7301_v35 = vmul.f32 0.0625, %v7275_v43  ;;  %v7323_v32 = vmax.f32 %v7315_v9, 0.0 }
 0xb38   :  { %v11428_v17 = vadd.f32 %v7136_v57, %v7093_v63  ;;  %v7101_v13 = vmul.f32 %v7077_v18, %v7041_v2  ;;  %v7310_v63 = vmul.f32 %v11440_v23, %v11440_v23 }
 0xb39   :  { %v11432_v21 = vadd.f32 %v7132_v41, %v7100_v46  ;;  %v7231_v40 = vmul.f32 %v11426_v24, %v11426_v24  ;;  %v7317_v49 = vsub.f32 %v7301_v35, %v7309_v25  ;;  %v7332_v22 = vadd.f32 1e-05, %v7323_v32 }
 0xb3a   :  { %v11438_v15 = vadd.f32 %v7136_v57, %v7101_v13  ;;  %v7232_v3 = vmul.f32 %v11428_v17, %v11428_v17  ;;  %v7316_v57 = vsub.f32 %v7300_v60, %v7308_v38 }
 0xb3b   :  { %v7203_v0 = vadd.f32 %v11432_v21, %v11426_v24  ;;  %v7239_v52 = vmul.f32 %v11432_v21, %v11432_v21  ;;  %v7325_v36 = vmax.f32 %v7317_v49, 0.0  ;;  %9015 = vrsqrt.f32 %v7332_v22 }
 0xb3c   :  { %v7210_v62 = vadd.f32 %v11438_v15, %v11428_v17  ;;  %v7240_v18 = vmul.f32 %v11438_v15, %v11438_v15  ;;  %v7324_v43 = vmax.f32 %v7316_v57, 0.0 }
 0xb3d   :  { %v7204_v33 = vrot.slane %v7203_v0, 4  ;;  %v7283_v41 = vadd.f32 %v7239_v52, %v7231_v40  ;;  %v7318_v40 = vsub.f32 %v7302_v50, %v7310_v63  ;;  %v7334_v57 = vadd.f32 1e-05, %v7325_v36 }
 0xb3e   :  { %v7211_v58 = vrot.slane %v7210_v62, 4  ;;  %v7290_v1 = vadd.f32 %v7240_v18, %v7232_v3  ;;  %v7333_v59 = vadd.f32 1e-05, %v7324_v43 }
 0xb3f   :  { %v7205_v19 = vadd.f32 %v7204_v33, %v7203_v0  ;;  %v7284_v31 = vrot.slane %v7283_v41, 4 }
 0xb40   :  { %v7212_v5 = vadd.f32 %v7211_v58, %v7210_v62  ;;  %v7291_v37 = vrot.slane %v7290_v1, 4  ;;  %9017 = vrsqrt.f32 %v7333_v59 }
 0xb41   :  { %v7206_v46 = vrot.slane %v7205_v19, 2  ;;  %v7285_v2 = vadd.f32 %v7284_v31, %v7283_v41  ;;  %v7326_v41 = vmax.f32 %v7318_v40, 0.0  ;;  %9019 = vrsqrt.f32 %v7334_v57 }
 0xb42   :  { %v7213_v7 = vrot.slane %v7212_v5, 2  ;;  %v7292_v13 = vadd.f32 %v7291_v37, %v7290_v1 }
 0xb43   :  { %v7207_v60 = vadd.f32 %v7206_v46, %v7205_v19  ;;  %v7286_v38 = vrot.slane %v7285_v2, 2 }
 0xb44   :  { %v7214_v52 = vadd.f32 %v7213_v7, %v7212_v5  ;;  %v7293_v3 = vrot.slane %v7292_v13, 2  ;;  %v7335_v5 = vadd.f32 1e-05, %v7326_v41 }
 0xb45   :  { %v7208_v0 = vrot.slane %v7207_v60, 1  ;;  %v7287_v18 = vadd.f32 %v7286_v38, %v7285_v2  ;;  %v9016_v38 = vpop.eup %9015 }
 0xb46   :  { %v7215_v51 = vrot.slane %v7214_v52, 1  ;;  %v7294_v33 = vadd.f32 %v7293_v3, %v7292_v13  ;;  %9021 = vrsqrt.f32 %v7335_v5 }
 0xb47   :  { %v7209_v62 = vadd.f32 %v7208_v0, %v7207_v60  ;;  %v7288_v58 = vrot.slane %v7287_v18, 1 }
 0xb48   :  { %v7216_v31 = vadd.f32 %v7215_v51, %v7214_v52  ;;  %v7295_v1 = vrot.slane %v7294_v33, 1 }
 0xb49   :  { %v7223_v9 = vmul.f32 0.0625, %v7209_v62  ;;  %v7289_v35 = vadd.f32 %v7288_v58, %v7287_v18  ;;  %v12078_v18 = vcombine.low %v11214_v16, %v11216_v27 }
 0xb4a   :  { %v7224_v25 = vmul.f32 0.0625, %v7216_v31  ;;  %v7296_v19 = vadd.f32 %v7295_v1, %v7294_v33  ;;  %v9018_v43 = vpop.eup %9017 }
 0xb4b   :  { %v7303_v50 = vmul.f32 0.0625, %v7289_v35  ;;  %v7311_v63 = vmul.f32 %v7223_v9, %v7223_v9  ;;  %v9020_v22 = vpop.eup %9019  ;;  %v7355_v36 = vcombine.low %v9016_v38, %v9018_v43  ;;  %v7364_v51 = vrot.slane %v12078_v18, %v10346_v8  ;;  %v7647_v18 = vld [vmem:[%s11930_s19 + $0x46] sm:$0x3] }
 0xb4c   :  { %v7304_v37 = vmul.f32 0.0625, %v7296_v19  ;;  %v7312_v46 = vmul.f32 %v7224_v25, %v7224_v25  ;;  %v7329_v19 = vld [vmem:[#allocation25] ss:$2 sm:$0xff] }
 0xb4d   :  { %v7319_v2 = vsub.f32 %v7303_v50, %v7311_v63  ;;  %v7371_v59 = vrot.slane %v7355_v36, %v10346_v8 }
 0xb4e   :  { %v7320_v7 = vsub.f32 %v7304_v37, %v7312_v46 }
 0xb4f   :  { %v7327_v13 = vmax.f32 %v7319_v2, 0.0  ;;  %v7386_v62 = vcombine.low %v7364_v51, %v7371_v59 }
 0xb50   :  { %v7328_v32 = vmax.f32 %v7320_v7, 0.0  ;;  %v9022_v40 = vpop.eup %9021 }
 0xb51   :  { %v7336_v49 = vadd.f32 1e-05, %v7327_v13  ;;  %v7356_v3 = vcombine.low %v9020_v22, %v9022_v40  ;;  %v7394_v1 = vrot.slane %v7386_v62, %v10346_v8 }
 0xb52   :  { %v7337_v60 = vadd.f32 1e-05, %v7328_v32 }
 0xb53   :  { %9023 = vrsqrt.f32 %v7336_v49  ;;  %v7378_v58 = vrot.slane %v7356_v3, %v10346_v8 }
 0xb54   :  { %9025 = vrsqrt.f32 %v7337_v60 }
 0xb5d   :  { %v9024_v52 = vpop.eup %9023 }
 0xb5e   :  { %v9026_v0 = vpop.eup %9025 }
 0xb5f   :  { %v7357_v33 = vcombine.low %v9024_v52, %v9026_v0 }
 0xb61   :  { %v7385_v41 = vrot.slane %v7357_v33, %v10346_v8 }
 0xb63   :  { %v7387_v31 = vcombine.low %v7378_v58, %v7385_v41  ;;  %v7664_v41 = vld [vmem:[%s11930_s19 + $0x68] sm:$0x3] }
 0xb65   :  { %v7401_v35 = vrot.slane %v7387_v31, %v10346_v8  ;;  %v7665_v31 = vld [vmem:[%s11930_s19 + $0x6a] sm:$0x3] }
 0xb67   :  { %v7402_v57 = vcombine.low %v7394_v1, %v7401_v35 }
 0xb69   :  { %v7404_v50 = vmul.f32 %v7402_v57, %v7329_v19 }
 0xb6b   :  { %v11468_v63 = vrot.slane %v7404_v50, %v10296_v44  ;;  %v11471_v16 = vrot.slane %v7404_v50, %v10299_v53  ;;  %v7435_v27 = vrot.slane %v7404_v50, %v10230_v48  ;;  %v7439_v5 = vrot.slane %v7404_v50, %v10235_v55 }
 0xb6c   :  { %v7411_v37 = vrot.slane %v7404_v50, %v10139_v28  ;;  %v7415_v46 = vrot.slane %v7404_v50, %v10142_v30  ;;  %v7419_v2 = vrot.slane %v7404_v50, %v10222_v26  ;;  %v7423_v7 = vrot.slane %v7404_v50, %v10225_v29 }
 0xb6d   :  { %v7452_v13 = vmul.f32 %v11468_v63, %v11436_v47  ;;  %v7453_v32 = vmul.f32 %v11471_v16, %v11440_v23  ;;  %v7454_v49 = vmul.f32 %v7435_v27, %v7223_v9  ;;  %v7455_v60 = vmul.f32 %v7439_v5, %v7224_v25  ;;  %v7644_v23 = vld [vmem:[%s11930_s19 + $0x40] sm:$0x3] }
 0xb6e   :  { %v11484_v38 = vmul.f32 %v7439_v5, %v11438_v15  ;;  %v7448_v43 = vmul.f32 %v7411_v37, %v11206_v56  ;;  %v7449_v22 = vmul.f32 %v7415_v46, %v11208_v34  ;;  %v7450_v36 = vmul.f32 %v7419_v2, %v11422_v61  ;;  %v7645_v34 = vld [vmem:[%s11930_s19 + $0x42] sm:$0x3]  ;;  %v7662_v61 = vld [vmem:[%s11930_s19 + $0x64] sm:$0x3] }
 0xb6f   :  { %v7466_v40 = vcombine.low %v7452_v13, %v7453_v32  ;;  %v7467_v52 = vcombine.low %v7454_v49, %v7455_v60  ;;  %v7451_v59 = vmul.f32 %v7423_v7, %v11424_v6  ;;  %v7516_v47 = vmul.f32 %v7415_v46, %v11186_v14 }
 0xb70   :  { %v7464_v9 = vcombine.low %v7448_v43, %v7449_v22  ;;  %v7524_v15 = vmul.f32 %v7415_v46, %v11190_v54  ;;  %v7515_v25 = vmul.f32 %v7411_v37, %v11184_v45  ;;  %v7523_v56 = vmul.f32 %v7411_v37, %v11188_v10  ;;  %v7663_v54 = vld [vmem:[%s11930_s19 + $0x66] sm:$0x3]  ;;  %v7646_v45 = vld [vmem:[%s11930_s19 + $0x44] sm:$0x3]  ;;  %v11536_v43 = vld [vmem:[%s11930_s19 + $0x48] sm:$0x3] }
 0xb71   :  { %v7488_v14 = vrot.slane %v7466_v40, %v10346_v8  ;;  %v7495_v6 = vrot.slane %v7467_v52, %v10346_v8  ;;  %v7465_v3 = vcombine.low %v7450_v36, %v7451_v59  ;;  %v7772_v0 = vunpack.c.l.s8.bf16 %v7644_v23 }
 0xb72   :  { %v7474_v10 = vrot.slane %v7464_v9, %v10346_v8  ;;  %v7773_v62 = vunpack.c.l.s8.bf16 %v7645_v34  ;;  %v7790_v58 = vunpack.c.l.s8.bf16 %v7662_v61  ;;  %v7791_v1 = vunpack.c.l.s8.bf16 %v7663_v54 }
 0xb73   :  { %v7497_v51 = vcombine.low %v7488_v14, %v7495_v6  ;;  %v7481_v33 = vrot.slane %v7465_v3, %v10346_v8  ;;  %v7774_v35 = vunpack.c.l.s8.bf16 %v7646_v45  ;;  %v11523_v19 = vmul.f32 %v7439_v5, %v11428_v17  ;;  %v7406_v17 = vld [vmem:[#allocation25 + $0x1] ss:$2 sm:$0xff]  ;;  %v12080_v3 = vld [vmem:[#allocation50_spill] sm:$0xff] }
 0xb74   :  { %v11526_v57 = vmul.f32 %v7435_v27, %v11426_v24  ;;  %v7775_v46 = vunpack.c.l.s8.bf16 %v7647_v18  ;;  %v11530_v13 = vmul.f32 %v7435_v27, %v11432_v21  ;;  %v7792_v32 = vunpack.c.l.s8.bf16 %v7664_v41  ;;  %v11541_v24 = vld [vmem:[%s11930_s19 + $0x4a] sm:$0x3] }
 0xb75   :  { %v7511_v50 = vrot.slane %v7497_v51, %v10346_v8  ;;  %v7496_v37 = vcombine.low %v7474_v10, %v7481_v33  ;;  %v7793_v49 = vunpack.c.l.s8.bf16 %v7665_v31  ;;  %v8653_v22 = vcombine.low %v7772_v0, %v7773_v62 }
 0xb76   :  { %v11543_v36 = vcombine.low %v7790_v58, %v7791_v1  ;;  %v11545_v21 = vcombine.low %v7774_v35, %v7775_v46  ;;  %v7518_v27 = vmul.f32 %v7423_v7, %v11373_v20  ;;  %v7776_v40 = vunpack.c.l.s8.bf16 %v11536_v43  ;;  %v12079_v20 = vld [vmem:[#allocation49_spill] sm:$0xff] }
 0xb77   :  { %v7504_v60 = vrot.slane %v7496_v37, %v10346_v8  ;;  %v11548_v8 = vcombine.low %v7792_v32, %v7793_v49  ;;  %v7777_v52 = vunpack.c.l.s8.bf16 %v11541_v24  ;;  %v7526_v23 = vmul.f32 %v7423_v7, %v11366_v4  ;;  %v7670_v43 = vld [vmem:[%s11930_s19 + $0x74] sm:$0x3]  ;;  %v7671_v24 = vld [vmem:[%s11930_s19 + $0x76] sm:$0x3] }
 0xb78   :  { %v7517_v9 = vmul.f32 %v7419_v2, %v11371_v39  ;;  %v7525_v34 = vmul.f32 %v7419_v2, %v11364_v12  ;;  %v7520_v61 = vmul.f32 %v11471_v16, %v11400_v11  ;;  %v7528_v14 = vmul.f32 %v11471_v16, %v11396_v42 }
 0xb79   :  { %v7512_v5 = vcombine.low %v7504_v60, %v7511_v50  ;;  %v7519_v6 = vmul.f32 %v11468_v63, %v12079_v20  ;;  %v7527_v54 = vmul.f32 %v11468_v63, %v12080_v3  ;;  %v7667_v50 = vld [vmem:[%s11930_s19 + $0x6e] sm:$0x3]  ;;  %v8655_v3 = vcombine.low %v7776_v40, %v7777_v52 }
 0xb7b   :  { %v7514_v59 = vsub.f32 %v7406_v17, %v7512_v5 }
 0xb7d   :  { %v7539_v45 = vrot.slane %v7514_v59, %v10142_v30  ;;  %v7535_v4 = vrot.slane %v7514_v59, %v10139_v28  ;;  %v7547_v39 = vrot.slane %v7514_v59, %v10225_v29  ;;  %v7543_v12 = vrot.slane %v7514_v59, %v10222_v26 }
 0xb7e   :  { %v7555_v2 = vrot.slane %v7514_v59, %v10299_v53  ;;  %v7551_v11 = vrot.slane %v7514_v59, %v10296_v44  ;;  %v7563_v42 = vrot.slane %v7514_v59, %v10235_v55  ;;  %v7559_v16 = vrot.slane %v7514_v59, %v10230_v48 }
 0xb7f   :  { %v7573_v7 = vadd.f32 %v7539_v45, %v7516_v47  ;;  %v7581_v10 = vadd.f32 %v7539_v45, %v7524_v15  ;;  %v7572_v0 = vadd.f32 %v7535_v4, %v7515_v25  ;;  %v7580_v63 = vadd.f32 %v7535_v4, %v7523_v56  ;;  %v7666_v15 = vld [vmem:[%s11930_s19 + $0x6c] sm:$0x3] }
 0xb80   :  { %v7575_v18 = vadd.f32 %v7547_v39, %v7518_v27  ;;  %v7583_v30 = vadd.f32 %v7547_v39, %v7526_v23  ;;  %v7574_v51 = vadd.f32 %v7543_v12, %v7517_v9  ;;  %v7582_v28 = vadd.f32 %v7543_v12, %v7525_v34 }
 0xb81   :  { %v7589_v33 = vmax.f32 %v7573_v7, 0.0  ;;  %v7597_v29 = vmax.f32 %v7581_v10, 0.0  ;;  %v7588_v62 = vmax.f32 %v7572_v0, 0.0  ;;  %v7596_v26 = vmax.f32 %v7580_v63, 0.0  ;;  %v7654_v7 = vld [vmem:[%s11930_s19 + $0x54] sm:$0x3] }
 0xb82   :  { %v7591_v58 = vmax.f32 %v7575_v18, 0.0  ;;  %v7599_v53 = vmax.f32 %v7583_v30, 0.0  ;;  %v7590_v41 = vmax.f32 %v7574_v51, 0.0  ;;  %v7598_v44 = vmax.f32 %v7582_v28, 0.0  ;;  %v7655_v10 = vld [vmem:[%s11930_s19 + $0x56] sm:$0x3] }
 0xb83   :  { %v7605_v31 = vpack.c.bf16 %v7597_v29, %v7589_v33  ;;  %v7604_v55 = vpack.c.bf16 %v7596_v26, %v7588_v62  ;;  %v7577_v1 = vadd.f32 %v7555_v2, %v7520_v61  ;;  %v7585_v48 = vadd.f32 %v7555_v2, %v7528_v14  ;;  %v7668_v14 = vld [vmem:[%s11930_s19 + $0x70] sm:$0x3]  ;;  %v7672_v0 = vld [vmem:[%s11930_s19 + $0x78] sm:$0x3]  ;;  %v7673_v63 = vld [vmem:[%s11930_s19 + $0x7a] sm:$0x3] }
 0xb84   :  { %v7607_v47 = vpack.c.bf16 %v7599_v53, %v7591_v58  ;;  %v11574_v25 = vpack.c.bf16 %v7598_v44, %v7590_v41  ;;  %v7576_v56 = vadd.f32 %v7551_v11, %v7519_v6  ;;  %v7584_v35 = vadd.f32 %v7551_v11, %v7527_v54  ;;  %v7652_v2 = vld [vmem:[%s11930_s19 + $0x50] sm:$0x3]  ;;  %v7656_v62 = vld [vmem:[%s11930_s19 + $0x58] sm:$0x3]  ;;  %v7657_v26 = vld [vmem:[%s11930_s19 + $0x5a] sm:$0x3] }
 0xb85   :  { %8284 = vmatprep.mubr.bf16.mxu0 %v7605_v31  ;;  %v7593_v37 = vmax.f32 %v7577_v1, 0.0  ;;  %v7601_v46 = vmax.f32 %v7585_v48, 0.0  ;;  %v7579_v32 = vadd.f32 %v7563_v42, %v11523_v19  ;;  %v7587_v49 = vadd.f32 %v7563_v42, %v11484_v38  ;;  %v7650_v38 = vld [vmem:[%s11930_s19 + $0x4c] sm:$0x3]  ;;  %v7651_v19 = vld [vmem:[%s11930_s19 + $0x4e] sm:$0x3] }
 0xb86   :  { %8285 = vmatmul.mubr.bf16.vlgmr.msra.gmra.mrb[44].mxu0 %v7604_v55  ;;  %v7592_v60 = vmax.f32 %v7576_v56, 0.0  ;;  %v7600_v17 = vmax.f32 %v7584_v35, 0.0  ;;  %v7578_v5 = vadd.f32 %v7559_v16, %v11526_v57  ;;  %v7586_v27 = vadd.f32 %v7559_v16, %v11530_v13  ;;  %v7674_v58 = vld [vmem:[%s11930_s19 + $0x7c] sm:$0x3]  ;;  %v7675_v53 = vld [vmem:[%s11930_s19 + $0x7e] sm:$0x3] }
 0xb87   :  { %8748 = vmatpush3.bf16.msra.mxu0 %v8653_v22  ;;  %8325 = vmatprep.mubr.bf16.mxu0 %v7607_v47  ;;  %v7794_v59 = vunpack.c.l.s8.bf16 %v7666_v15  ;;  %v11583_v23 = vpack.c.bf16 %v7601_v46, %v7593_v37  ;;  %v7595_v9 = vmax.f32 %v7579_v32, 0.0  ;;  %v7603_v34 = vmax.f32 %v7587_v49, 0.0  ;;  %v7658_v47 = vld [vmem:[%s11930_s19 + $0x5c] sm:$0x3]  ;;  %v7659_v15 = vld [vmem:[%s11930_s19 + $0x5e] sm:$0x3] }
 0xb88   :  { %8749 = vmatprep.subr.bf16.mxu0 %v11543_v36  ;;  %v7795_v61 = vunpack.c.l.s8.bf16 %v7667_v50  ;;  %v11592_v57 = vpack.c.bf16 %v7600_v17, %v7592_v60  ;;  %v7594_v13 = vmax.f32 %v7578_v5, 0.0  ;;  %v7602_v22 = vmax.f32 %v7586_v27, 0.0  ;;  %v7669_v36 = vld [vmem:[%s11930_s19 + $0x72] sm:$0x3]  ;;  %v7692_v56 = vld [vmem:[%s11930_s19 + $0xa0] sm:$0x3] }
 0xb89   :  { %v11600_v20 = vpack.c.bf16 %v7603_v34, %v7595_v9  ;;  %v7778_v54 = vunpack.c.l.s8.bf16 %v7650_v38  ;;  %v7779_v45 = vunpack.c.l.s8.bf16 %v7651_v19  ;;  %v7796_v39 = vunpack.c.l.s8.bf16 %v7668_v14  ;;  %v7693_v35 = vld [vmem:[%s11930_s19 + $0xa2] sm:$0x3]  ;;  %v7676_v17 = vld [vmem:[%s11930_s19 + $0x80] sm:$0x3]  ;;  %v7694_v27 = vld [vmem:[%s11930_s19 + $0xa4] sm:$0x3] }
 0xb8a   :  { %v11602_v6 = vpack.c.bf16 %v7602_v22, %v7594_v13  ;;  %v8664_v4 = vcombine.low %v7794_v59, %v7795_v61  ;;  %v7797_v12 = vunpack.c.l.s8.bf16 %v7669_v36  ;;  %v7780_v40 = vunpack.c.l.s8.bf16 %v7652_v2  ;;  %v7677_v5 = vld [vmem:[%s11930_s19 + $0x82] sm:$0x3]  ;;  %v7695_v59 = vld [vmem:[%s11930_s19 + $0xa6] sm:$0x3]  ;;  %v7678_v22 = vld [vmem:[%s11930_s19 + $0x84] sm:$0x3] }
 0xb8b   :  { %8750 = vmatpush3.bf16.msra.mxu0 %v11545_v21  ;;  %v7653_v21 = vld [vmem:[%s11930_s19 + $0x52] sm:$0x3]  ;;  %v7798_v42 = vunpack.c.l.s8.bf16 %v7670_v43  ;;  %v7799_v16 = vunpack.c.l.s8.bf16 %v7671_v24  ;;  %v7782_v30 = vunpack.c.l.s8.bf16 %v7654_v7  ;;  %v7783_v51 = vunpack.c.l.s8.bf16 %v7655_v10  ;;  %v7679_v14 = vld [vmem:[%s11930_s19 + $0x86] sm:$0x3]  ;;  %v7696_v36 = vld [vmem:[%s11930_s19 + $0xa8] sm:$0x3] }
 0xb8c   :  { %8751 = vmatprep.subr.bf16.mxu0 %v11548_v8  ;;  %v8656_v8 = vcombine.low %v7778_v54, %v7779_v45  ;;  %v7781_v52 = vunpack.c.l.s8.bf16 %v7653_v21  ;;  %v8665_v11 = vcombine.low %v7796_v39, %v7797_v12  ;;  %v7800_v33 = vunpack.c.l.s8.bf16 %v7672_v0  ;;  %v7680_v21 = vld [vmem:[%s11930_s19 + $0x88] sm:$0x3]  ;;  %v7681_v43 = vld [vmem:[%s11930_s19 + $0x8a] sm:$0x3]  ;;  %v7698_v24 = vld [vmem:[%s11930_s19 + $0xac] sm:$0x3] }
 0xb8d   :  { %v8666_v28 = vcombine.low %v7798_v42, %v7799_v16  ;;  %v7801_v29 = vunpack.c.l.s8.bf16 %v7673_v63  ;;  %v8658_v41 = vcombine.low %v7782_v30, %v7783_v51  ;;  %v7784_v44 = vunpack.c.l.s8.bf16 %v7656_v62  ;;  %v7682_v10 = vld [vmem:[%s11930_s19 + $0x8c] sm:$0x3]  ;;  %v7683_v0 = vld [vmem:[%s11930_s19 + $0x8e] sm:$0x3]  ;;  %v7685_v62 = vld [vmem:[%s11930_s19 + $0x92] sm:$0x3] }
 0xb8e   :  { %v8657_v18 = vcombine.low %v7780_v40, %v7781_v52  ;;  %v7785_v31 = vunpack.c.l.s8.bf16 %v7657_v26  ;;  %v7802_v1 = vunpack.c.l.s8.bf16 %v7674_v58  ;;  %v7803_v48 = vunpack.c.l.s8.bf16 %v7675_v53  ;;  %v7702_v26 = vld [vmem:[%s11930_s19 + $0xb4] sm:$0x3]  ;;  %v7703_v58 = vld [vmem:[%s11930_s19 + $0xb6] sm:$0x3] }
 0xb8f   :  { %8752 = vmatpush3.bf16.msra.mxu0 %v8655_v3  ;;  %v8667_v55 = vcombine.low %v7800_v33, %v7801_v29  ;;  %v7786_v37 = vunpack.c.l.s8.bf16 %v7658_v47  ;;  %v7787_v46 = vunpack.c.l.s8.bf16 %v7659_v15  ;;  %v7820_v49 = vunpack.c.l.s8.bf16 %v7692_v56  ;;  %v7697_v3 = vld [vmem:[%s11930_s19 + $0xaa] sm:$0x3]  ;;  %v7684_v29 = vld [vmem:[%s11930_s19 + $0x90] sm:$0x3]  ;;  %v7687_v47 = vld [vmem:[%s11930_s19 + $0x96] sm:$0x3] }
 0xb90   :  { %8753 = vmatprep.subr.bf16.mxu0 %v8664_v4  ;;  %v8659_v50 = vcombine.low %v7784_v44, %v7785_v31  ;;  %v8668_v32 = vcombine.low %v7802_v1, %v7803_v48  ;;  %v7821_v60 = vunpack.c.l.s8.bf16 %v7693_v35  ;;  %v7804_v34 = vunpack.c.l.s8.bf16 %v7676_v17  ;;  %v7686_v48 = vld [vmem:[%s11930_s19 + $0x94] sm:$0x3]  ;;  %v7704_v15 = vld [vmem:[%s11930_s19 + $0xb8] sm:$0x3]  ;;  %v7705_v56 = vld [vmem:[%s11930_s19 + $0xba] sm:$0x3] }
 0xb91   :  { %v8660_v9 = vcombine.low %v7786_v37, %v7787_v46  ;;  %v7805_v61 = vunpack.c.l.s8.bf16 %v7677_v5  ;;  %v7822_v19 = vunpack.c.l.s8.bf16 %v7694_v27  ;;  %v7823_v13 = vunpack.c.l.s8.bf16 %v7695_v59  ;;  %v7689_v17 = vld [vmem:[%s11930_s19 + $0x9a] sm:$0x3]  ;;  %v7706_v5 = vld [vmem:[%s11930_s19 + $0xbc] sm:$0x3]  ;;  %v7707_v27 = vld [vmem:[%s11930_s19 + $0xbe] sm:$0x3] }
 0xb92   :  { %v8677_v38 = vcombine.low %v7820_v49, %v7821_v60  ;;  %v7806_v45 = vunpack.c.l.s8.bf16 %v7678_v22  ;;  %v7807_v4 = vunpack.c.l.s8.bf16 %v7679_v14  ;;  %v7824_v12 = vunpack.c.l.s8.bf16 %v7696_v36  ;;  %v7688_v60 = vld [vmem:[%s11930_s19 + $0x98] sm:$0x3]  ;;  %v7691_v22 = vld [vmem:[%s11930_s19 + $0x9e] sm:$0x3]  ;;  %v7724_v14 = vld [vmem:[%s11930_s19 + $0xe0] sm:$0x3] }
 0xb93   :  { %8754 = vmatpush3.bf16.msra.mxu0 %v8656_v8  ;;  %v8669_v54 = vcombine.low %v7804_v34, %v7805_v61  ;;  %v8678_v39 = vcombine.low %v7822_v19, %v7823_v13  ;;  %v7825_v2 = vunpack.c.l.s8.bf16 %v7697_v3  ;;  %v7699_v8 = vld [vmem:[%s11930_s19 + $0xae] sm:$0x3]  ;;  %v7808_v52 = vunpack.c.l.s8.bf16 %v7680_v21  ;;  %v7690_v13 = vld [vmem:[%s11930_s19 + $0x9c] sm:$0x3]  ;;  %v7725_v36 = vld [vmem:[%s11930_s19 + $0xe2] sm:$0x3] }
 0xb94   :  { %8755 = vmatprep.subr.bf16.mxu0 %v8665_v11  ;;  %v8670_v40 = vcombine.low %v7806_v45, %v7807_v4  ;;  %v7809_v11 = vunpack.c.l.s8.bf16 %v7681_v43  ;;  %v7826_v16 = vunpack.c.l.s8.bf16 %v7698_v24  ;;  %v7827_v7 = vunpack.c.l.s8.bf16 %v7699_v8  ;;  %v7709_v21 = vld [vmem:[%s11930_s19 + $0xc2] sm:$0x3]  ;;  %v7726_v43 = vld [vmem:[%s11930_s19 + $0xe4] sm:$0x3]  ;;  %v7727_v24 = vld [vmem:[%s11930_s19 + $0xe6] sm:$0x3] }
 0xb95   :  { %v8679_v42 = vcombine.low %v7824_v12, %v7825_v2  ;;  %v7811_v30 = vunpack.c.l.s8.bf16 %v7683_v0  ;;  %v7813_v44 = vunpack.c.l.s8.bf16 %v7685_v62  ;;  %v7831_v1 = vunpack.c.l.s8.bf16 %v7703_v58  ;;  %v7708_v2 = vld [vmem:[%s11930_s19 + $0xc0] sm:$0x3]  ;;  %v7728_v0 = vld [vmem:[%s11930_s19 + $0xe8] sm:$0x3]  ;;  %v7730_v62 = vld [vmem:[%s11930_s19 + $0xec] sm:$0x3] }
 0xb96   :  { %v8671_v63 = vcombine.low %v7808_v52, %v7809_v11  ;;  %v8680_v51 = vcombine.low %v7826_v16, %v7827_v7  ;;  %v7815_v37 = vunpack.c.l.s8.bf16 %v7687_v47  ;;  %v7833_v49 = vunpack.c.l.s8.bf16 %v7705_v56  ;;  %v7710_v7 = vld [vmem:[%s11930_s19 + $0xc4] sm:$0x3] }
 0xb97   :  { %8756 = vmatpush3.bf16.msra.mxu0 %v8657_v18  ;;  %v7810_v18 = vunpack.c.l.s8.bf16 %v7682_v10  ;;  %v7817_v34 = vunpack.c.l.s8.bf16 %v7689_v17  ;;  %v7835_v19 = vunpack.c.l.s8.bf16 %v7707_v27  ;;  %v7819_v45 = vunpack.c.l.s8.bf16 %v7691_v22  ;;  %v7711_v10 = vld [vmem:[%s11930_s19 + $0xc6] sm:$0x3] }
 0xb98   :  { %8757 = vmatprep.subr.bf16.mxu0 %v8666_v28  ;;  %v7853_v12 = vunpack.c.l.s8.bf16 %v7725_v36  ;;  %v7837_v52 = vunpack.c.l.s8.bf16 %v7709_v21  ;;  %v7855_v16 = vunpack.c.l.s8.bf16 %v7727_v24 }
 0xb99   :  { %v8672_v53 = vcombine.low %v7810_v18, %v7811_v30  ;;  %v7839_v18 = vunpack.c.l.s8.bf16 %v7711_v10 }
 0xb9b   :  { %8758 = vmatpush3.bf16.msra.mxu0 %v8658_v41  ;;  %v7812_v41 = vunpack.c.l.s8.bf16 %v7684_v29  ;;  %v7713_v29 = vld [vmem:[%s11930_s19 + $0xca] sm:$0x3] }
 0xb9c   :  { %8759 = vmatprep.subr.bf16.mxu0 %v8667_v55  ;;  %v7830_v55 = vunpack.c.l.s8.bf16 %v7702_v26  ;;  %v7731_v26 = vld [vmem:[%s11930_s19 + $0xee] sm:$0x3] }
 0xb9d   :  { %v8673_v35 = vcombine.low %v7812_v41, %v7813_v44  ;;  %v7841_v41 = vunpack.c.l.s8.bf16 %v7713_v29 }
 0xb9e   :  { %v8682_v46 = vcombine.low %v7830_v55, %v7831_v1  ;;  %v7859_v55 = vunpack.c.l.s8.bf16 %v7731_v26  ;;  %v7714_v1 = vld [vmem:[%s11930_s19 + $0xcc] sm:$0x3] }
 0xb9f   :  { %8760 = vmatpush3.bf16.msra.mxu0 %v8659_v50  ;;  %v7814_v50 = vunpack.c.l.s8.bf16 %v7686_v48  ;;  %v7715_v48 = vld [vmem:[%s11930_s19 + $0xce] sm:$0x3] }
 0xba0   :  { %8761 = vmatprep.subr.bf16.mxu0 %v8668_v32  ;;  %v7832_v32 = vunpack.c.l.s8.bf16 %v7704_v15  ;;  %v7842_v15 = vunpack.c.l.s8.bf16 %v7714_v1  ;;  %v7843_v56 = vunpack.c.l.s8.bf16 %v7715_v48 }
 0xba1   :  { %v8674_v59 = vcombine.low %v7814_v50, %v7815_v37 }
 0xba2   :  { %v8683_v61 = vcombine.low %v7832_v32, %v7833_v49  ;;  %v7717_v32 = vld [vmem:[%s11930_s19 + $0xd2] sm:$0x3]  ;;  %v7734_v49 = vld [vmem:[%s11930_s19 + $0xf4] sm:$0x3]  ;;  %v8688_v17 = vcombine.low %v7842_v15, %v7843_v56 }
 0xba3   :  { %8762 = vmatpush3.bf16.msra.mxu0 %v8660_v9  ;;  %v7816_v9 = vunpack.c.l.s8.bf16 %v7688_v60  ;;  %v7735_v60 = vld [vmem:[%s11930_s19 + $0xf6] sm:$0x3]  ;;  %v7845_v27 = vunpack.c.l.s8.bf16 %v7717_v32 }
 0xba4   :  { %8769 = vmatprep.subr.bf16.mxu0 %v8677_v38  ;;  %v7834_v38 = vunpack.c.l.s8.bf16 %v7706_v5 }
 0xba5   :  { %v8675_v3 = vcombine.low %v7816_v9, %v7817_v34  ;;  %v7862_v9 = vunpack.c.l.s8.bf16 %v7734_v49  ;;  %v7863_v34 = vunpack.c.l.s8.bf16 %v7735_v60 }
 0xba6   :  { %8326 = vmatmul.mubr.bf16.vlgmr.msra.gmra.mrb[48].mxu0 %v11574_v25  ;;  %v7700_v25 = vld [vmem:[%s11930_s19 + $0xb0] sm:$0x3]  ;;  %v8684_v4 = vcombine.low %v7834_v38, %v7835_v19  ;;  %v7719_v38 = vld [vmem:[%s11930_s19 + $0xd6] sm:$0x3]  ;;  %v7736_v19 = vld [vmem:[%s11930_s19 + $0xf8] sm:$0x3] }
 0xba7   :  { %8770 = vmatpush3.bf16.msra.mxu0 %v8669_v54  ;;  %8366 = vmatprep.mubr.bf16.mxu0 %v11583_v23  ;;  %v7701_v23 = vld [vmem:[%s11930_s19 + $0xb2] sm:$0x3]  ;;  %v7828_v28 = vunpack.c.l.s8.bf16 %v7700_v25  ;;  %v7818_v54 = vunpack.c.l.s8.bf16 %v7690_v13  ;;  %v7729_v25 = vld [vmem:[%s11930_s19 + $0xea] sm:$0x3]  ;;  %v7737_v13 = vld [vmem:[%s11930_s19 + $0xfa] sm:$0x3]  ;;  %v7847_v36 = vunpack.c.l.s8.bf16 %v7719_v38 }
 0xba8   :  { %8771 = vmatprep.subr.bf16.mxu0 %v8678_v39  ;;  %v7829_v33 = vunpack.c.l.s8.bf16 %v7701_v23  ;;  %v7852_v39 = vunpack.c.l.s8.bf16 %v7724_v14 }
 0xba9   :  { %v8676_v8 = vcombine.low %v7818_v54, %v7819_v45  ;;  %v7864_v54 = vunpack.c.l.s8.bf16 %v7736_v19  ;;  %v7865_v45 = vunpack.c.l.s8.bf16 %v7737_v13 }
 0xbaa   :  { %v8681_v31 = vcombine.low %v7828_v28, %v7829_v33  ;;  %v8693_v11 = vcombine.low %v7852_v39, %v7853_v12  ;;  %v7857_v28 = vunpack.c.l.s8.bf16 %v7729_v25  ;;  %v7712_v33 = vld [vmem:[%s11930_s19 + $0xc8] sm:$0x3]  ;;  %v7721_v39 = vld [vmem:[%s11930_s19 + $0xda] sm:$0x3]  ;;  %v7738_v12 = vld [vmem:[%s11930_s19 + $0xfc] sm:$0x3] }
 0xbab   :  { %8772 = vmatpush3.bf16.msra.mxu0 %v8670_v40  ;;  %v7836_v40 = vunpack.c.l.s8.bf16 %v7708_v2  ;;  %v7739_v2 = vld [vmem:[%s11930_s19 + $0xfe] sm:$0x3]  ;;  %v7849_v24 = vunpack.c.l.s8.bf16 %v7721_v39 }
 0xbac   :  { %8773 = vmatprep.subr.bf16.mxu0 %v8679_v42  ;;  %v7854_v42 = vunpack.c.l.s8.bf16 %v7726_v43 }
 0xbad   :  { %v8685_v23 = vcombine.low %v7836_v40, %v7837_v52  ;;  %v7866_v40 = vunpack.c.l.s8.bf16 %v7738_v12  ;;  %v7867_v52 = vunpack.c.l.s8.bf16 %v7739_v2 }
 0xbae   :  { %v8694_v30 = vcombine.low %v7854_v42, %v7855_v16  ;;  %v7723_v42 = vld [vmem:[%s11930_s19 + $0xde] sm:$0x3] }
 0xbaf   :  { %8774 = vmatpush3.bf16.msra.mxu0 %v8671_v63  ;;  %v7838_v63 = vunpack.c.l.s8.bf16 %v7710_v7  ;;  %v7851_v10 = vunpack.c.l.s8.bf16 %v7723_v42 }
 0xbb0   :  { %8775 = vmatprep.subr.bf16.mxu0 %v8680_v51  ;;  %v7856_v51 = vunpack.c.l.s8.bf16 %v7728_v0  ;;  %v8700_v0 = vcombine.low %v7866_v40, %v7867_v52 }
 0xbb1   :  { %v8686_v58 = vcombine.low %v7838_v63, %v7839_v18 }
 0xbb2   :  { %v8695_v44 = vcombine.low %v7856_v51, %v7857_v28 }
 0xbb3   :  { %8776 = vmatpush3.bf16.msra.mxu0 %v8672_v53  ;;  %v7840_v53 = vunpack.c.l.s8.bf16 %v7712_v33 }
 0xbb4   :  { %8777 = vmatprep.subr.bf16.mxu0 %v8681_v31  ;;  %v7858_v31 = vunpack.c.l.s8.bf16 %v7730_v62 }
 0xbb5   :  { %v8687_v47 = vcombine.low %v7840_v53, %v7841_v41 }
 0xbb7   :  { %8778 = vmatpush3.bf16.msra.mxu0 %v8673_v35  ;;  %v8696_v35 = vcombine.low %v7858_v31, %v7859_v55 }
 0xbb8   :  { %8779 = vmatprep.subr.bf16.mxu0 %v8682_v46  ;;  %v7716_v46 = vld [vmem:[%s11930_s19 + $0xd0] sm:$0x3] }
 0xbb9   :  { %v7844_v5 = vunpack.c.l.s8.bf16 %v7716_v46 }
 0xbbb   :  { %8780 = vmatpush3.bf16.msra.mxu0 %v8674_v59  ;;  %v8689_v22 = vcombine.low %v7844_v5, %v7845_v27 }
 0xbbc   :  { %8781 = vmatprep.subr.bf16.mxu0 %v8683_v61  ;;  %v7718_v61 = vld [vmem:[%s11930_s19 + $0xd4] sm:$0x3] }
 0xbbd   :  { %v7846_v14 = vunpack.c.l.s8.bf16 %v7718_v61 }
 0xbbf   :  { %8782 = vmatpush3.bf16.msra.mxu0 %v8675_v3  ;;  %v8698_v3 = vcombine.low %v7862_v9, %v7863_v34  ;;  %v8690_v21 = vcombine.low %v7846_v14, %v7847_v36 }
 0xbc0   :  { %8783 = vmatprep.subr.bf16.mxu0 %v8684_v4  ;;  %v7720_v4 = vld [vmem:[%s11930_s19 + $0xd8] sm:$0x3] }
 0xbc1   :  { %v7848_v43 = vunpack.c.l.s8.bf16 %v7720_v4 }
 0xbc3   :  { %8784 = vmatpush3.bf16.msra.mxu0 %v8676_v8  ;;  %v8699_v8 = vcombine.low %v7864_v54, %v7865_v45  ;;  %v8691_v16 = vcombine.low %v7848_v43, %v7849_v24 }
 0xbc4   :  { %8791 = vmatprep.subr.bf16.mxu0 %v8693_v11  ;;  %v7722_v11 = vld [vmem:[%s11930_s19 + $0xdc] sm:$0x3] }
 0xbc5   :  { %v7850_v7 = vunpack.c.l.s8.bf16 %v7722_v11 }
 0xbc6   :  { %8367 = vmatmul.mubr.bf16.vlgmr.msra.gmra.mrb[52].mxu0 %v11592_v57  ;;  %v7732_v57 = vld [vmem:[%s11930_s19 + $0xf0] sm:$0x3] }
 0xbc7   :  { %8792 = vmatpush3.bf16.msra.mxu0 %v8685_v23  ;;  %8407 = vmatprep.mubr.bf16.mxu0 %v11600_v20  ;;  %v7733_v20 = vld [vmem:[%s11930_s19 + $0xf2] sm:$0x3]  ;;  %v7860_v50 = vunpack.c.l.s8.bf16 %v7732_v57  ;;  %v8692_v25 = vcombine.low %v7850_v7, %v7851_v10 }
 0xbc8   :  { %8793 = vmatprep.subr.bf16.mxu0 %v8694_v30  ;;  %v7861_v37 = vunpack.c.l.s8.bf16 %v7733_v20 }
 0xbca   :  { %v8697_v59 = vcombine.low %v7860_v50, %v7861_v37 }
 0xbcb   :  { %8794 = vmatpush3.bf16.msra.mxu0 %v8686_v58 }
 0xbcc   :  { %8795 = vmatprep.subr.bf16.mxu0 %v8695_v44 }
 0xbcf   :  { %8796 = vmatpush3.bf16.msra.mxu0 %v8687_v47 }
 0xbd0   :  { %8797 = vmatprep.subr.bf16.mxu0 %v8696_v35 }
 0xbd3   :  { %8798 = vmatpush3.bf16.msra.mxu0 %v8688_v17 }
 0xbd4   :  { %8799 = vmatprep.subr.bf16.mxu0 %v8697_v59 }
 0xbd7   :  { %8800 = vmatpush3.bf16.msra.mxu0 %v8689_v22 }
 0xbd8   :  { %8801 = vmatprep.subr.bf16.mxu0 %v8698_v3 }
 0xbdb   :  { %8802 = vmatpush3.bf16.msra.mxu0 %v8690_v21 }
 0xbdc   :  { %8803 = vmatprep.subr.bf16.mxu0 %v8699_v8 }
 0xbdf   :  { %8804 = vmatpush3.bf16.msra.mxu0 %v8691_v16 }
 0xbe0   :  { %8805 = vmatprep.subr.bf16.mxu0 %v8700_v0 }
 0xbe3   :  { %8806 = vmatpush3.bf16.msra.mxu0 %v8692_v25 }
 0xbe6   :  { %8408 = vmatmul.mubr.bf16.vlgmr.msra.gmra.mrb[56].mxu0 %v11602_v6 }
 0xbe7   :  { %9392 = shalt.err (!%p9389_p6)
}
 0xbe8   :  { %s9393_s10 = scalar_lea.hbm %s11933_s22, 256 }
 0xbe9   :  { %p9394_p7 = scmp.ne.s32.totalorder %s11933_s22, %s9393_s10  ;;  %p9397_p8 = scmp.lt.u32.totalorder %s9393_s10, %s11933_s22 }
 0xbeb   :  { %p9399_p9 = pnand %p9397_p8, %p9394_p7 }
 0xbed   :  { %9402 = shalt.err (!%p9399_p9)
}
 0xbee   :  { %s9518_s7 = smov 128   ;;  %s9519_s11 = smov 8  }
 0xbef   :  { %8455 = dma.vmem_to_hbm [thread:$0]  %s8450_s14, 256, %s11933_s22, [#allocation30], %s9518_s7, %s9518_s7, %s9519_s11  }
 0xbf0   :  { %s9520_s29 = smov [#allocation28]   ;;  %s9521_s16 = smov [#allocation31]  }
 0xbf1   :  { %s8437_s25 = sshll.u32 %s9520_s29, 4  ;;  %s8461_s15 = sshll.u32 %s9521_s16, 4  ;;  %s8438_s25 = int_to_ptr.vmem [resolvable:$true] %s8437_s25  ;;  %s8462_s15 = int_to_ptr.vmem [resolvable:$true] %s8461_s15 }
 0xbf2   :  { %s9403_s6 = scalar_lea.vmem %s8438_s25, 512  ;;  %p9408_p11 = scmp.lt.s32.totalorder %s8438_s25, %s8438_s25 }
 0xbf3   :  { %p9404_p10 = scmp.ne.s32.totalorder %s8438_s25, %s9403_s6  ;;  %p9409_p12 = scmp.lt.s32.totalorder %s9403_s6, %s9403_s6 }
 0xbf5   :  { %p9410_p13 = por %p9409_p12, %p9408_p11 }
 0xbf7   :  { %p9411_p0 = pnand %p9410_p13, %p9404_p10 }
 0xbf9   :  { %9414 = shalt.err (!%p9411_p0)
}
 0xbfa   :  { %s9415_s30 = scalar_lea.hbm %s11932_s21, 512 }
 0xbfb   :  { %p9416_p1 = scmp.ne.s32.totalorder %s11932_s21, %s9415_s30  ;;  %p9419_p2 = scmp.lt.u32.totalorder %s9415_s30, %s11932_s21 }
 0xbfd   :  { %p9421_p3 = pnand %p9419_p2, %p9416_p1 }
 0xbff   :  { %9424 = shalt.err (!%p9421_p3)
}
 0xc00   :  { %8443 = dma.vmem_to_hbm [thread:$0]  %s8438_s25, 512, %s11932_s21, [#allocation4], %s9509_s9, %s9509_s9, %s9510_s28  }
 0xc01   :  { %s9425_s14 = scalar_lea.vmem %s8462_s15, 512  ;;  %p9430_p5 = scmp.lt.s32.totalorder %s8462_s15, %s8462_s15 }
 0xc02   :  { %p9426_p4 = scmp.ne.s32.totalorder %s8462_s15, %s9425_s14  ;;  %p9431_p6 = scmp.lt.s32.totalorder %s9425_s14, %s9425_s14 }
 0xc04   :  { %p9432_p7 = por %p9431_p6, %p9430_p5 }
 0xc06   :  { %p9433_p8 = pnand %p9432_p7, %p9426_p4 }
 0xc08   :  { %9436 = shalt.err (!%p9433_p8)
}
 0xc09   :  { %s9437_s18 = scalar_lea.hbm %s11934_s23, 512 }
 0xc0a   :  { %p9438_p9 = scmp.ne.s32.totalorder %s11934_s23, %s9437_s18  ;;  %p9441_p10 = scmp.lt.u32.totalorder %s9437_s18, %s11934_s23 }
 0xc0c   :  { %p9443_p11 = pnand %p9441_p10, %p9438_p9 }
 0xc0e   :  { %9446 = shalt.err (!%p9443_p11)
}
 0xc0f   :  { %8467 = dma.vmem_to_hbm [thread:$0]  %s8462_s15, 512, %s11934_s23, [#allocation30], %s9509_s9, %s9509_s9, %s9510_s28   ;;  %v8701_v37 = vld [vmem:[#allocation26] ss:$0 sm:$0xff]  ;;  %v8702_v60 = vld [vmem:[#allocation26 + $0x1] ss:$0 sm:$0xff] }
 0xc10   :  { %s9522_s23 = smov [#allocation32]  }
 0xc11   :  { %s8473_s9 = sshll.u32 %s9522_s23, 4  ;;  %s8474_s9 = int_to_ptr.vmem [resolvable:$true] %s8473_s9 }
 0xc12   :  { %s9447_s28 = scalar_lea.vmem %s8474_s9, 256  ;;  %p9452_p13 = scmp.lt.s32.totalorder %s8474_s9, %s8474_s9 }
 0xc13   :  { %p9448_p12 = scmp.ne.s32.totalorder %s8474_s9, %s9447_s28  ;;  %p9453_p0 = scmp.lt.s32.totalorder %s9447_s28, %s9447_s28 }
 0xc15   :  { %p9454_p1 = por %p9453_p0, %p9452_p13 }
 0xc17   :  { %p9455_p2 = pnand %p9454_p1, %p9448_p12 }
 0xc59   :  { %v8741_v6 = vpop.f32.mrb[44].mxu0 }
 0xc5a   :  { %v8742_v23 = vpop.f32.mrb[45].mxu0 }
 0xc5b   :  { %v8743_v63 = vadd.f32 %v8742_v23, %v8741_v6  ;;  %v8744_v18 = vpop.f32.mrb[46].mxu0 }
 0xc5c   :  { %v8745_v30 = vpop.f32.mrb[47].mxu0 }
 0xc5d   :  { %v8746_v51 = vadd.f32 %v8745_v30, %v8744_v18 }
 0xc79   :  { %v8763_v28 = vpop.f32.mrb[48].mxu0 }
 0xc7a   :  { %v8764_v33 = vpop.f32.mrb[49].mxu0 }
 0xc7b   :  { %v8765_v29 = vadd.f32 %v8764_v33, %v8763_v28  ;;  %v8766_v62 = vpop.f32.mrb[50].mxu0 }
 0xc7c   :  { %v8767_v26 = vpop.f32.mrb[51].mxu0 }
 0xc7d   :  { %v8328_v58 = vadd.f32 %v8765_v29, %v8743_v63  ;;  %v8768_v53 = vadd.f32 %v8767_v26, %v8766_v62 }
 0xc7f   :  { %v8331_v41 = vadd.f32 %v8768_v53, %v8746_v51 }
 0xc99   :  { %v8785_v44 = vpop.f32.mrb[52].mxu0 }
 0xc9a   :  { %v8786_v31 = vpop.f32.mrb[53].mxu0 }
 0xc9b   :  { %v8787_v55 = vadd.f32 %v8786_v31, %v8785_v44  ;;  %v8788_v1 = vpop.f32.mrb[54].mxu0 }
 0xc9c   :  { %v8789_v48 = vpop.f32.mrb[55].mxu0 }
 0xc9d   :  { %v8369_v57 = vadd.f32 %v8787_v55, %v8328_v58  ;;  %v8790_v20 = vadd.f32 %v8789_v48, %v8788_v1 }
 0xc9f   :  { %v8372_v47 = vadd.f32 %v8790_v20, %v8331_v41 }
 0xcb9   :  { %v8807_v15 = vpop.f32.mrb[56].mxu0 }
 0xcba   :  { %v8808_v56 = vpop.f32.mrb[57].mxu0 }
 0xcbb   :  { %v8809_v35 = vadd.f32 %v8808_v56, %v8807_v15  ;;  %v8810_v50 = vpop.f32.mrb[58].mxu0 }
 0xcbc   :  { %v8811_v46 = vpop.f32.mrb[59].mxu0 }
 0xcbd   :  { %v8410_v32 = vadd.f32 %v8809_v35, %v8369_v57  ;;  %v8812_v49 = vadd.f32 %v8811_v46, %v8810_v50 }
 0xcbf   :  { %v8421_v17 = vmul.f32 %v8701_v37, %v8410_v32  ;;  %v8413_v5 = vadd.f32 %v8812_v49, %v8372_v47 }
 0xcc1   :  { %v8428_v27 = vadd.f32 %v8702_v60, %v8421_v17  ;;  %v8422_v59 = vmul.f32 %v8701_v37, %v8413_v5 }
 0xcc3   :  { %8430 = vst.msk [vmem:[#allocation32] sm:$0xff] %vm1412_vm1, %v8428_v27  ;;  %v8429_v9 = vadd.f32 %v8702_v60, %v8422_v59 }
 0xcc5   :  { %8431 = vst.msk [vmem:[#allocation32 + $0x8] sm:$0xff] %vm1412_vm1, %v8429_v9 }
 0xcc6   :  { %9458 = shalt.err (!%p9455_p2)
}
 0xcc7   :  { %s12081_s29 = sld [smem:[#allocation83_spill]] }
 0xccd   :  { %s9459_s25 = scalar_lea.hbm %s12081_s29, 256 }
 0xcce   :  { %p9460_p3 = scmp.ne.s32.totalorder %s12081_s29, %s9459_s25  ;;  %p9463_p4 = scmp.lt.u32.totalorder %s9459_s25, %s12081_s29 }
 0xcd0   :  { %p9465_p5 = pnand %p9463_p4, %p9460_p3 }
 0xcd2   :  { %9468 = shalt.err (!%p9465_p5)
}
 0xcd3   :  { %8479 = dma.vmem_to_hbm [thread:$0]  %s8474_s9, 256, %s12081_s29, [#allocation33], %s9518_s7, %s9518_s7, %s9519_s11  }
 0xcd4   :  { %9487 = dma.done.wait [#allocation4], 512  }
 0xcd5   :  { %9488 = vsyncadd [#allocation4], 4294966784 }
 0xcd6   :  { %9489 = dma.done.wait [#allocation30], 768  }
 0xcd7   :  { %9490 = vsyncadd [#allocation30], 4294966528 }
 0xcd8   :  { %9491 = dma.done.wait [#allocation33], 256  }
 0xcd9   :  { %9492 = vsyncadd [#allocation33], 4294967040 }
 0xcda   :  { %8492 = vsyncpa [#allocation3], 1 }
 0xcdb   :  { %8493 = vsyncpa [#allocation6], 1 }
 0xcdc   :  { %8494 = vsyncpa [#allocation9], 1 }
 0xcdd   :  { %8495 = vsyncpa [#allocation12], 1 }
 0xcde   :  { %8496 = vsyncpa [#allocation15], 1 }
 0xcdf   :  { %8497 = vsyncpa [#allocation18], 1 }
 0xce0   :  { %8498 = vsyncpa [#allocation21], 1 }
 0xce1   :  { %8499 = vsyncpa [#allocation24], 1 }
 0xce2   :  { %8500 = vsyncpa [#allocation27], 1 }
 0xce3   :  { %8501 = vsyncpa [#allocation4], 1 }
 0xce4   :  { %8502 = vsyncpa [#allocation30], 1 }
 0xce5   :  { %8503 = vsyncpa [#allocation33], 1 }

</bundles_post_ra>
